<compile_context>
chip_gen: v7x
topology: tpu7x:2x2x1
jax: 0.10.0
libtpu: 0.0.40
codegen_flags: <defaults>
</compile_context>

<pallas_src>
import jax
import jax.numpy as jnp
from jax import lax
from jax.experimental import pallas as pl
from jax.experimental.pallas import tpu as pltpu

SOFTMAX_SCALE = 10.0          # colanet ContextualAttention_Enhance default
_VMEM_LIMIT = 48 * 1024 * 1024   # explicit scoped-VMEM cap (headroom on v7x)


def _round_up(x, m):
    return ((x + m - 1) // m) * m


# --------------------------------------------------------------------------
# Fused RBS stage: grid = (B, R); one ResBlock (conv3x3 -> PReLU -> conv3x3
# -> +skip) per "arbitrary" grid step, running activation lives in VMEM.
# 3x3 conv = 9 shifted matmuls on the token layout (pltpu.roll + masks).
# --------------------------------------------------------------------------
_TAPS = [(dy, dx) for dy in (-1, 0, 1) for dx in (-1, 0, 1)]


def _conv_tap_masks(H, W):
    """(9, H*W, 1) f32 validity masks for the 3x3 taps (computed in XLA)."""
    tok = jnp.arange(H * W)
    hh, ww = tok // W, tok % W
    ms = []
    for dy, dx in _TAPS:
        ok = (hh + dy >= 0) & (hh + dy < H) & (ww + dx >= 0) & (ww + dx < W)
        ms.append(ok.astype(jnp.float32))
    return jnp.stack(ms, axis=0)[:, :, None]


def _make_rbs_kernel(H, W):
    N = H * W

    def kernel(x_ref, m_ref, w1_ref, b1_ref, a_ref, w2_ref, b2_ref,
               o_ref, cur_ref):
        r = pl.program_id(1)
        C = cur_ref.shape[-1]

        @pl.when(r == 0)
        def _init():
            cur_ref[...] = x_ref[...].astype(jnp.float32)

        def conv3x3(x_f32, w_ref, b_ref):
            # out[n] = bias + sum_t mask_t[n] * x[n + dy*W + dx] @ W_t
            acc = jnp.zeros((N, C), jnp.float32) + b_ref[...]
            for t, (dy, dx) in enumerate(_TAPS):
                s = dy * W + dx
                if s == 0:
                    xs = x_f32
                else:
                    xs = pltpu.roll(x_f32, shift=(-s) % N, axis=0) * m_ref[t]
                acc = acc + jnp.dot(xs.astype(jnp.bfloat16), w_ref[t],
                                    preferred_element_type=jnp.float32)
            return acc

        x = cur_ref[...]
        y = conv3x3(x, w1_ref, b1_ref)
        y = jnp.where(y >= 0.0, y, y * a_ref[...])     # PReLU, single alpha
        z = conv3x3(y, w2_ref, b2_ref)
        cur_ref[...] = x + z                           # res_scale = 1 skip

        @pl.when(r == pl.num_programs(1) - 1)
        def _finalize():
            o_ref[...] = cur_ref[...].astype(o_ref.dtype)

    return kernel


def rbs_stage(tokens, p, H, W):
    """Apply a whole stage of R ResBlocks in one pallas_call (tokens B,N,C)."""
    # TODO(synk): row-tile the stage with a 1-row halo for very large images
    # on v7x (whole-image blocks approach the 64 MiB VMEM at H=W>=128, C=64).
    B, N, C = tokens.shape
    R = p['w1'].shape[0]
    masks = _conv_tap_masks(H, W)
    return pl.pallas_call(
        _make_rbs_kernel(H, W),
        out_shape=jax.ShapeDtypeStruct((B, N, C), tokens.dtype),
        grid=(B, R),
        in_specs=[
            pl.BlockSpec((None, N, C), lambda b, r: (b, 0, 0)),
            pl.BlockSpec((9, N, 1), lambda b, r: (0, 0, 0)),
            pl.BlockSpec((None, 9, C, C), lambda b, r: (r, 0, 0, 0)),
            pl.BlockSpec((None, 1, C), lambda b, r: (r, 0, 0)),
            pl.BlockSpec((None, 1, 1), lambda b, r: (r, 0, 0)),
            pl.BlockSpec((None, 9, C, C), lambda b, r: (r, 0, 0, 0)),
            pl.BlockSpec((None, 1, C), lambda b, r: (r, 0, 0)),
        ],
        out_specs=pl.BlockSpec((None, N, C), lambda b, r: (b, 0, 0)),
        scratch_shapes=[pltpu.VMEM((N, C), jnp.float32)],
        compiler_params=pltpu.CompilerParams(
            dimension_semantics=("parallel", "arbitrary"),
            vmem_limit_bytes=_VMEM_LIMIT),
    )(tokens, masks, p['w1'], p['b1'], p['alpha'], p['w2'], p['b2'])


# --------------------------------------------------------------------------
# Non-local attention: flash-style, tiled over BOTH query and key axes.
#   grid = (B, q_tiles, k_tiles); per-q-tile running max / sum / acc scratch.
# --------------------------------------------------------------------------
def _make_nl_attn_kernel(n_valid, tk):
    def kernel(xq_ref, xkv_ref, wth_ref, bth_ref, wpg_ref, bpg_ref,
               wo_ref, bo_ref, o_ref, th_sc, m_sc, l_sc, acc_sc):
        kt = pl.program_id(2)
        i_pad = acc_sc.shape[-1]

        @pl.when(kt == 0)
        def _init():
            xq = xq_ref[...].astype(jnp.bfloat16)
            th = jnp.dot(xq, wth_ref[...],
                         preferred_element_type=jnp.float32) + bth_ref[...]
            th_sc[...] = (th * SOFTMAX_SCALE).astype(jnp.bfloat16)  # fold scale
            m_sc[...] = jnp.full_like(m_sc, -jnp.inf)
            l_sc[...] = jnp.zeros_like(l_sc)
            acc_sc[...] = jnp.zeros_like(acc_sc)

        # fused phi / g projection: one (Tk, C) x (C, 2*I) matmul per k step
        xkv = xkv_ref[...].astype(jnp.bfloat16)
        pg = jnp.dot(xkv, wpg_ref[...],
                     preferred_element_type=jnp.float32) + bpg_ref[...]
        phi = pg[:, :i_pad].astype(jnp.bfloat16)
        g = pg[:, i_pad:].astype(jnp.bfloat16)

        s = jnp.einsum('ni,ki->nk', th_sc[...], phi,
                       preferred_element_type=jnp.float32)          # (Tq, Tk)

        if n_valid % tk != 0:   # only possible padding lives in the last tile
            k_idx = kt * tk + lax.broadcasted_iota(jnp.int32, (1, tk), 1)
            s = jnp.where(k_idx < n_valid, s, -1e30)

        m_prev = m_sc[...]
        m_new = jnp.maximum(m_prev, jnp.max(s, axis=-1, keepdims=True))
        alpha = jnp.exp(m_prev - m_new)
        p = jnp.exp(s - m_new)
        l_sc[...] = alpha * l_sc[...] + jnp.sum(p, axis=-1, keepdims=True)
        acc_sc[...] = alpha * acc_sc[...] + jnp.dot(
            p.astype(jnp.bfloat16), g, preferred_element_type=jnp.float32)
        m_sc[...] = m_new

        @pl.when(kt == pl.num_programs(2) - 1)
        def _finalize():
            y = acc_sc[...] * pl.reciprocal(l_sc[...], approx=True)
            out = jnp.dot(y.astype(jnp.bfloat16), wo_ref[...],
                          preferred_element_type=jnp.float32) + bo_ref[...]
            o_ref[...] = (xq_ref[...] + out).astype(o_ref.dtype)     # residual

    return kernel


def nl_attention(tokens, p):
    B, N, C = tokens.shape
    i_pad = p['wth'].shape[1]

    # Tile selection: single-tile fast path for small N, otherwise fixed
    # 256/512 q/k tiles with N zero-padded to a tile multiple (keys masked).
    if N <= 512:
        tq = tk = n_pad = N
    else:
        tq, tk = 256, 512
        n_pad = _round_up(N, tk)

    tok_p = tokens if n_pad == N else jnp.pad(
        tokens, ((0, 0), (0, n_pad - N), (0, 0)))

    out = pl.pallas_call(
        _make_nl_attn_kernel(N, tk),
        out_shape=jax.ShapeDtypeStruct((B, n_pad, C), tokens.dtype),
        grid=(B, n_pad // tq, n_pad // tk),
        in_specs=[
            pl.BlockSpec((None, tq, C), lambda b, qi, kt: (b, qi, 0)),   # q
            pl.BlockSpec((None, tk, C), lambda b, qi, kt: (b, kt, 0)),   # k/v
            pl.BlockSpec((C, i_pad), lambda b, qi, kt: (0, 0)),
            pl.BlockSpec((1, i_pad), lambda b, qi, kt: (0, 0)),
            pl.BlockSpec((C, 2 * i_pad), lambda b, qi, kt: (0, 0)),
            pl.BlockSpec((1, 2 * i_pad), lambda b, qi, kt: (0, 0)),
            pl.BlockSpec((i_pad, C), lambda b, qi, kt: (0, 0)),
            pl.BlockSpec((1, C), lambda b, qi, kt: (0, 0)),
        ],
        out_specs=pl.BlockSpec((None, tq, C), lambda b, qi, kt: (b, qi, 0)),
        scratch_shapes=[
            pltpu.VMEM((tq, i_pad), jnp.bfloat16),   # theta (scaled, bf16)
            pltpu.VMEM((tq, 1), jnp.float32),        # running max
            pltpu.VMEM((tq, 1), jnp.float32),        # running sum
            pltpu.VMEM((tq, i_pad), jnp.float32),    # running accumulator
        ],
        compiler_params=pltpu.CompilerParams(
            dimension_semantics=("parallel", "parallel", "arbitrary"),
            vmem_limit_bytes=_VMEM_LIMIT),
    )(tok_p, tok_p,
      p['wth'], p['bth'], p['wpg'], p['bpg'], p['wo'], p['bo'])

    return out if n_pad == N else out[:, :N, :]


# --------------------------------------------------------------------------
# Module glue (only transposes / view-reshapes outside the kernels)
# --------------------------------------------------------------------------
def merge_block_apply(tokens, p):
    # TODO(synk): colanet's dnls windowed top-k search (ws=29, wt=0, k=100,
    # flows/inds, exact/rand_bwd) has no clean Pallas equivalent here; the
    # merge block is implemented as the full global non-local attention branch.
    return nl_attention(tokens, p)


def ces_forward_nchw(x_nchw, params):
    B, C, H, W = x_nchw.shape
    tokens = jnp.transpose(x_nchw, (0, 2, 3, 1)).reshape(B, H * W, C)
    out = merge_block_apply(tokens, params['c1'])
    out = rbs_stage(out, params['rbs1'], H, W)
    out = merge_block_apply(out, params['c2'])
    out = rbs_stage(out, params['rbs2'], H, W)
    out = merge_block_apply(out, params['c3'])
    return jnp.transpose(out.reshape(B, H, W, C), (0, 3, 1, 2))


# --------------------------------------------------------------------------
# Deterministic parameter initialization (synthetic; not a checkpoint).
# Attention projection weights are zero-padded to a lane-dense inter dim
# (multiple of 128) and stored pre-fused/pre-transposed in bf16; conv weights
# are (R, 9, Cin, Cout) bf16 (tap t = (dy+1)*3 + (dx+1)); biases/PReLU stay f32.
# --------------------------------------------------------------------------
def init_params(key, C, num=6):
    inter = max(1, C // 4)               # colanet ratio: in=64 -> inter=16
    i_pad = _round_up(inter, 128)        # lane-dense padded inter dim
    keys = iter(jax.random.split(key, 64))

    def merge_params():
        def proj(cin, cols, valid):
            w = jnp.zeros((cin, cols), jnp.float32)
            w = w.at[:, :valid].set(
                jax.random.normal(next(keys), (cin, valid), jnp.float32) * 0.1)
            return w
        wth = proj(C, i_pad, inter)
        wph = proj(C, i_pad, inter)
        wg = proj(C, i_pad, inter)
        wo = jnp.zeros((i_pad, C), jnp.float32)
        wo = wo.at[:inter].set(
            jax.random.normal(next(keys), (inter, C), jnp.float32) * 0.1)
        return dict(
            wth=wth.astype(jnp.bfloat16),
            bth=jnp.zeros((1, i_pad), jnp.float32),
            wpg=jnp.concatenate([wph, wg], axis=1).astype(jnp.bfloat16),
            bpg=jnp.zeros((1, 2 * i_pad), jnp.float32),
            wo=wo.astype(jnp.bfloat16),
            bo=jnp.zeros((1, C), jnp.float32),
        )

    def rbs_params(R):
        def conv_w():
            return (jax.random.normal(next(keys), (R, 9, C, C), jnp.float32)
                    * 0.05).astype(jnp.bfloat16)
        return dict(
            w1=conv_w(), b1=jnp.zeros((R, 1, C), jnp.float32),
            alpha=jnp.full((R, 1, 1), 0.25, jnp.float32),   # nn.PReLU default
            w2=conv_w(), b2=jnp.zeros((R, 1, C), jnp.float32),
        )

    R = num // 2
    return dict(c1=merge_params(), c2=merge_params(), c3=merge_params(),
                rbs1=rbs_params(R), rbs2=rbs_params(R))


if __name__ == "__main__":
    key = jax.random.PRNGKey(0)
    k_x, k_p = jax.random.split(key)

    B, C, H, W = 2, 8, 16, 16            # small NCHW input, as in PyTorch
    x = jax.random.normal(k_x, (B, C, H, W), jnp.float32)
    params = init_params(k_p, C, num=6)

    ces = jax.jit(ces_forward_nchw)
    out = jax.block_until_ready(ces(x, params))

    assert out.shape == (B, C, H, W), out.shape
    assert bool(jnp.isfinite(out).all())
    print("KERNEL_OK")
</pallas_src>

<mosaic_0001>
module attributes {stable_mosaic.version = 11 : i64} {
  func.func @kernel(%arg0: i32, %arg1: i32, %arg2: i32, %arg3: memref<1x256x8xf32, #tpu.memory_space<vmem>>, %arg4: memref<1x256x8xf32, #tpu.memory_space<vmem>>, %arg5: memref<8x128xbf16, #tpu.memory_space<vmem>>, %arg6: memref<1x128xf32, #tpu.memory_space<vmem>>, %arg7: memref<8x256xbf16, #tpu.memory_space<vmem>>, %arg8: memref<1x256xf32, #tpu.memory_space<vmem>>, %arg9: memref<128x8xbf16, #tpu.memory_space<vmem>>, %arg10: memref<1x8xf32, #tpu.memory_space<vmem>>, %arg11: memref<1x256x8xf32, #tpu.memory_space<vmem>>, %arg12: memref<256x128xbf16, #tpu.memory_space<vmem>>, %arg13: memref<256x1xf32, #tpu.memory_space<vmem>>, %arg14: memref<256x1xf32, #tpu.memory_space<vmem>>, %arg15: memref<256x128xf32, #tpu.memory_space<vmem>>) attributes {dimension_semantics = [#tpu.dimension_semantics<parallel>, #tpu.dimension_semantics<parallel>, #tpu.dimension_semantics<arbitrary>], iteration_bounds = array<i64: 2, 1, 1>, scalar_prefetch = 0 : i64, scratch_operands = 4 : i64, tpu.core_type = #tpu.core_type<tc>, window_params = [{transform_indices = @transform_0, window_bounds = array<i64: 1, 256, 8>}, {transform_indices = @transform_1, window_bounds = array<i64: 1, 256, 8>}, {pipeline_mode = #tpu.pipeline_mode<synchronous>, transform_indices = @transform_2, window_bounds = array<i64: 8, 128>}, {pipeline_mode = #tpu.pipeline_mode<synchronous>, transform_indices = @transform_3, window_bounds = array<i64: 1, 128>}, {pipeline_mode = #tpu.pipeline_mode<synchronous>, transform_indices = @transform_4, window_bounds = array<i64: 8, 256>}, {pipeline_mode = #tpu.pipeline_mode<synchronous>, transform_indices = @transform_5, window_bounds = array<i64: 1, 256>}, {pipeline_mode = #tpu.pipeline_mode<synchronous>, transform_indices = @transform_6, window_bounds = array<i64: 128, 8>}, {pipeline_mode = #tpu.pipeline_mode<synchronous>, transform_indices = @transform_7, window_bounds = array<i64: 1, 8>}, {transform_indices = @transform_8, window_bounds = array<i64: 1, 256, 8>}]} {
    %c0_i32 = arith.constant 0 : i32
    %0 = arith.cmpi eq, %arg2, %c0_i32 : i32
    %1 = arith.extui %0 : i1 to i32
    %c0_i32_0 = arith.constant 0 : i32
    %2 = arith.cmpi ne, %1, %c0_i32_0 : i32
    scf.if %2 {
      %c0_27 = arith.constant 0 : index
      %c0_28 = arith.constant 0 : index
      %c0_29 = arith.constant 0 : index
      %43 = vector.load %arg3[%c0_27, %c0_28, %c0_29] : memref<1x256x8xf32, #tpu.memory_space<vmem>>, vector<1x256x8xf32>
      %44 = vector.shape_cast %43 : vector<1x256x8xf32> to vector<256x8xf32>
      %45 = arith.truncf %44 : vector<256x8xf32> to vector<256x8xbf16>
      %c0_30 = arith.constant 0 : index
      %c0_31 = arith.constant 0 : index
      %46 = vector.load %arg5[%c0_30, %c0_31] : memref<8x128xbf16, #tpu.memory_space<vmem>>, vector<8x128xbf16>
      %cst_32 = arith.constant dense<0.000000e+00> : vector<256x128xf32>
      %47 = tpu.matmul %45, %46, %cst_32 {dimension_numbers = #tpu.dot_dimension_numbers<[1], [0], [0], [1], [0, 0, 1, 1], [], []>} : vector<256x8xbf16>, vector<8x128xbf16>, vector<256x128xf32> -> vector<256x128xf32>
      %c0_33 = arith.constant 0 : index
      %c0_34 = arith.constant 0 : index
      %48 = vector.load %arg6[%c0_33, %c0_34] : memref<1x128xf32, #tpu.memory_space<vmem>>, vector<1x128xf32>
      %49 = vector.broadcast %48 : vector<1x128xf32> to vector<256x128xf32>
      %50 = arith.addf %47, %49 : vector<256x128xf32>
      %cst_35 = arith.constant 1.000000e+01 : f32
      %51 = vector.broadcast %cst_35 : f32 to vector<256x128xf32>
      %52 = arith.mulf %50, %51 : vector<256x128xf32>
      %53 = arith.truncf %52 : vector<256x128xf32> to vector<256x128xbf16>
      %c0_36 = arith.constant 0 : index
      %c0_37 = arith.constant 0 : index
      %54 = vector.load %arg12[%c0_36, %c0_37] : memref<256x128xbf16, #tpu.memory_space<vmem>>, vector<256x128xbf16>
      tpu.vector_store %arg12[%c0_36, %c0_37], %53 {strides = array<i32>} : memref<256x128xbf16, #tpu.memory_space<vmem>>, vector<256x128xbf16>,
      %cst_38 = arith.constant 0xFF800000 : f32
      %55 = vector.broadcast %cst_38 : f32 to vector<256x1xf32>
      %c0_39 = arith.constant 0 : index
      %c0_40 = arith.constant 0 : index
      %56 = vector.load %arg13[%c0_39, %c0_40] : memref<256x1xf32, #tpu.memory_space<vmem>>, vector<256x1xf32>
      tpu.vector_store %arg13[%c0_39, %c0_40], %55 {strides = array<i32>} : memref<256x1xf32, #tpu.memory_space<vmem>>, vector<256x1xf32>,
      %cst_41 = arith.constant 0.000000e+00 : f32
      %57 = vector.broadcast %cst_41 : f32 to vector<256x1xf32>
      %c0_42 = arith.constant 0 : index
      %c0_43 = arith.constant 0 : index
      %58 = vector.load %arg14[%c0_42, %c0_43] : memref<256x1xf32, #tpu.memory_space<vmem>>, vector<256x1xf32>
      tpu.vector_store %arg14[%c0_42, %c0_43], %57 {strides = array<i32>} : memref<256x1xf32, #tpu.memory_space<vmem>>, vector<256x1xf32>,
      %cst_44 = arith.constant 0.000000e+00 : f32
      %59 = vector.broadcast %cst_44 : f32 to vector<256x128xf32>
      %c0_45 = arith.constant 0 : index
      %c0_46 = arith.constant 0 : index
      %60 = vector.load %arg15[%c0_45, %c0_46] : memref<256x128xf32, #tpu.memory_space<vmem>>, vector<256x128xf32>
      tpu.vector_store %arg15[%c0_45, %c0_46], %59 {strides = array<i32>} : memref<256x128xf32, #tpu.memory_space<vmem>>, vector<256x128xf32>,
    } else {
    }
    %c0 = arith.constant 0 : index
    %c0_1 = arith.constant 0 : index
    %c0_2 = arith.constant 0 : index
    %3 = vector.load %arg4[%c0, %c0_1, %c0_2] : memref<1x256x8xf32, #tpu.memory_space<vmem>>, vector<1x256x8xf32>
    %4 = vector.shape_cast %3 : vector<1x256x8xf32> to vector<256x8xf32>
    %5 = arith.truncf %4 : vector<256x8xf32> to vector<256x8xbf16>
    %c0_3 = arith.constant 0 : index
    %c0_4 = arith.constant 0 : index
    %6 = vector.load %arg7[%c0_3, %c0_4] : memref<8x256xbf16, #tpu.memory_space<vmem>>, vector<8x256xbf16>
    %cst = arith.constant dense<0.000000e+00> : vector<256x256xf32>
    %7 = tpu.matmul %5, %6, %cst {dimension_numbers = #tpu.dot_dimension_numbers<[1], [0], [0], [1], [0, 0, 1, 1], [], []>} : vector<256x8xbf16>, vector<8x256xbf16>, vector<256x256xf32> -> vector<256x256xf32>
    %c0_5 = arith.constant 0 : index
    %c0_6 = arith.constant 0 : index
    %8 = vector.load %arg8[%c0_5, %c0_6] : memref<1x256xf32, #tpu.memory_space<vmem>>, vector<1x256xf32>
    %9 = vector.broadcast %8 : vector<1x256xf32> to vector<256x256xf32>
    %10 = arith.addf %7, %9 : vector<256x256xf32>
    %11 = vector.extract_strided_slice %10 {offsets = [0, 0], sizes = [256, 128], strides = [1, 1]} : vector<256x256xf32> to vector<256x128xf32>
    %12 = arith.truncf %11 : vector<256x128xf32> to vector<256x128xbf16>
    %13 = vector.extract_strided_slice %10 {offsets = [0, 128], sizes = [256, 128], strides = [1, 1]} : vector<256x256xf32> to vector<256x128xf32>
    %14 = arith.truncf %13 : vector<256x128xf32> to vector<256x128xbf16>
    %c0_7 = arith.constant 0 : index
    %c0_8 = arith.constant 0 : index
    %15 = vector.load %arg12[%c0_7, %c0_8] : memref<256x128xbf16, #tpu.memory_space<vmem>>, vector<256x128xbf16>
    "tpu.trace_start"() <{level = 10 : i32, message = "ni,ki->nk"}> : () -> ()
    %cst_9 = arith.constant dense<0.000000e+00> : vector<256x256xf32>
    %16 = tpu.matmul %15, %12, %cst_9 {dimension_numbers = #tpu.dot_dimension_numbers<[1], [1], [0], [0], [0, 0, 1, 0], [], []>} : vector<256x128xbf16>, vector<256x128xbf16>, vector<256x256xf32> -> vector<256x256xf32>
    "tpu.trace_stop"() : () -> ()
    %c0_10 = arith.constant 0 : index
    %c0_11 = arith.constant 0 : index
    %17 = vector.load %arg13[%c0_10, %c0_11] : memref<256x1xf32, #tpu.memory_space<vmem>>, vector<256x1xf32>
    %cst_12 = arith.constant dense<0xFF800000> : vector<256xf32>
    %18 = vector.multi_reduction <maximumf>, %16, %cst_12 [1] : vector<256x256xf32> to vector<256xf32>
    %19 = vector.shape_cast %18 : vector<256xf32> to vector<256x1xf32>
    %20 = arith.maximumf %17, %19 : vector<256x1xf32>
    %21 = arith.subf %17, %20 : vector<256x1xf32>
    %22 = math.exp %21 : vector<256x1xf32>
    %23 = vector.broadcast %20 : vector<256x1xf32> to vector<256x256xf32>
    %24 = arith.subf %16, %23 : vector<256x256xf32>
    %25 = math.exp %24 : vector<256x256xf32>
    %c0_13 = arith.constant 0 : index
    %c0_14 = arith.constant 0 : index
    %26 = vector.load %arg14[%c0_13, %c0_14] : memref<256x1xf32, #tpu.memory_space<vmem>>, vector<256x1xf32>
    %27 = arith.mulf %22, %26 : vector<256x1xf32>
    %cst_15 = arith.constant dense<0.000000e+00> : vector<256xf32>
    %28 = vector.multi_reduction <add>, %25, %cst_15 [1] : vector<256x256xf32> to vector<256xf32>
    %29 = vector.shape_cast %28 : vector<256xf32> to vector<256x1xf32>
    %30 = arith.addf %27, %29 : vector<256x1xf32>
    %c0_16 = arith.constant 0 : index
    %c0_17 = arith.constant 0 : index
    %31 = vector.load %arg14[%c0_16, %c0_17] : memref<256x1xf32, #tpu.memory_space<vmem>>, vector<256x1xf32>
    tpu.vector_store %arg14[%c0_16, %c0_17], %30 {strides = array<i32>} : memref<256x1xf32, #tpu.memory_space<vmem>>, vector<256x1xf32>,
    %c0_18 = arith.constant 0 : index
    %c0_19 = arith.constant 0 : index
    %32 = vector.load %arg15[%c0_18, %c0_19] : memref<256x128xf32, #tpu.memory_space<vmem>>, vector<256x128xf32>
    %33 = vector.broadcast %22 : vector<256x1xf32> to vector<256x128xf32>
    %34 = arith.mulf %33, %32 : vector<256x128xf32>
    %35 = arith.truncf %25 : vector<256x256xf32> to vector<256x256xbf16>
    %cst_20 = arith.constant dense<0.000000e+00> : vector<256x128xf32>
    %36 = tpu.matmul %35, %14, %cst_20 {dimension_numbers = #tpu.dot_dimension_numbers<[1], [0], [0], [1], [0, 0, 1, 1], [], []>} : vector<256x256xbf16>, vector<256x128xbf16>, vector<256x128xf32> -> vector<256x128xf32>
    %37 = arith.addf %34, %36 : vector<256x128xf32>
    %c0_21 = arith.constant 0 : index
    %c0_22 = arith.constant 0 : index
    %38 = vector.load %arg15[%c0_21, %c0_22] : memref<256x128xf32, #tpu.memory_space<vmem>>, vector<256x128xf32>
    tpu.vector_store %arg15[%c0_21, %c0_22], %37 {strides = array<i32>} : memref<256x128xf32, #tpu.memory_space<vmem>>, vector<256x128xf32>,
    %c0_23 = arith.constant 0 : index
    %c0_24 = arith.constant 0 : index
    %39 = vector.load %arg13[%c0_23, %c0_24] : memref<256x1xf32, #tpu.memory_space<vmem>>, vector<256x1xf32>
    tpu.vector_store %arg13[%c0_23, %c0_24], %20 {strides = array<i32>} : memref<256x1xf32, #tpu.memory_space<vmem>>, vector<256x1xf32>,
    %c0_i32_25 = arith.constant 0 : i32
    %40 = arith.cmpi eq, %arg2, %c0_i32_25 : i32
    %41 = arith.extui %40 : i1 to i32
    %c0_i32_26 = arith.constant 0 : i32
    %42 = arith.cmpi ne, %41, %c0_i32_26 : i32
    scf.if %42 {
      %c0_27 = arith.constant 0 : index
      %c0_28 = arith.constant 0 : index
      %43 = vector.load %arg15[%c0_27, %c0_28] : memref<256x128xf32, #tpu.memory_space<vmem>>, vector<256x128xf32>
      %c0_29 = arith.constant 0 : index
      %c0_30 = arith.constant 0 : index
      %44 = vector.load %arg14[%c0_29, %c0_30] : memref<256x1xf32, #tpu.memory_space<vmem>>, vector<256x1xf32>
      %45 = tpu.reciprocal %44 {approx = true} : vector<256x1xf32> -> vector<256x1xf32>
      %46 = vector.broadcast %45 : vector<256x1xf32> to vector<256x128xf32>
      %47 = arith.mulf %43, %46 : vector<256x128xf32>
      %48 = arith.truncf %47 : vector<256x128xf32> to vector<256x128xbf16>
      %c0_31 = arith.constant 0 : index
      %c0_32 = arith.constant 0 : index
      %49 = vector.load %arg9[%c0_31, %c0_32] : memref<128x8xbf16, #tpu.memory_space<vmem>>, vector<128x8xbf16>
      %cst_33 = arith.constant dense<0.000000e+00> : vector<256x8xf32>
      %50 = tpu.matmul %48, %49, %cst_33 {dimension_numbers = #tpu.dot_dimension_numbers<[1], [0], [0], [1], [0, 0, 1, 1], [], []>} : vector<256x128xbf16>, vector<128x8xbf16>, vector<256x8xf32> -> vector<256x8xf32>
      %c0_34 = arith.constant 0 : index
      %c0_35 = arith.constant 0 : index
      %51 = vector.load %arg10[%c0_34, %c0_35] : memref<1x8xf32, #tpu.memory_space<vmem>>, vector<1x8xf32>
      %52 = vector.broadcast %51 : vector<1x8xf32> to vector<256x8xf32>
      %53 = arith.addf %50, %52 : vector<256x8xf32>
      %c0_36 = arith.constant 0 : index
      %c0_37 = arith.constant 0 : index
      %c0_38 = arith.constant 0 : index
      %54 = vector.load %arg3[%c0_36, %c0_37, %c0_38] : memref<1x256x8xf32, #tpu.memory_space<vmem>>, vector<1x256x8xf32>
      %55 = vector.shape_cast %54 : vector<1x256x8xf32> to vector<256x8xf32>
      %56 = arith.addf %55, %53 : vector<256x8xf32>
      %c0_39 = arith.constant 0 : index
      %c0_40 = arith.constant 0 : index
      %c0_41 = arith.constant 0 : index
      %57 = vector.load %arg11[%c0_39, %c0_40, %c0_41] : memref<1x256x8xf32, #tpu.memory_space<vmem>>, vector<1x256x8xf32>
      %58 = vector.shape_cast %57 : vector<1x256x8xf32> to vector<256x8xf32>
      %59 = vector.shape_cast %56 : vector<256x8xf32> to vector<1x256x8xf32>
      tpu.vector_store %arg11[%c0_39, %c0_40, %c0_41], %59 {strides = array<i32>} : memref<1x256x8xf32, #tpu.memory_space<vmem>>, vector<1x256x8xf32>,
    } else {
    }
    return
  }
  func.func @transform_0(%arg0: i32, %arg1: i32, %arg2: i32) -> (i32, i32, i32) {
    %c0_i32 = arith.constant 0 : i32
    %c0_i32_0 = arith.constant 0 : i32
    return %arg0, %arg1, %c0_i32 : i32, i32, i32
  }
  func.func @transform_1(%arg0: i32, %arg1: i32, %arg2: i32) -> (i32, i32, i32) {
    %c0_i32 = arith.constant 0 : i32
    %c0_i32_0 = arith.constant 0 : i32
    return %arg0, %arg2, %c0_i32 : i32, i32, i32
  }
  func.func @transform_2(%arg0: i32, %arg1: i32, %arg2: i32) -> (i32, i32) {
    %c0_i32 = arith.constant 0 : i32
    %c0_i32_0 = arith.constant 0 : i32
    %c0_i32_1 = arith.constant 0 : i32
    return %c0_i32, %c0_i32_0 : i32, i32
  }
  func.func @transform_3(%arg0: i32, %arg1: i32, %arg2: i32) -> (i32, i32) {
    %c0_i32 = arith.constant 0 : i32
    %c0_i32_0 = arith.constant 0 : i32
    %c0_i32_1 = arith.constant 0 : i32
    return %c0_i32, %c0_i32_0 : i32, i32
  }
  func.func @transform_4(%arg0: i32, %arg1: i32, %arg2: i32) -> (i32, i32) {
    %c0_i32 = arith.constant 0 : i32
    %c0_i32_0 = arith.constant 0 : i32
    %c0_i32_1 = arith.constant 0 : i32
    return %c0_i32, %c0_i32_0 : i32, i32
  }
  func.func @transform_5(%arg0: i32, %arg1: i32, %arg2: i32) -> (i32, i32) {
    %c0_i32 = arith.constant 0 : i32
    %c0_i32_0 = arith.constant 0 : i32
    %c0_i32_1 = arith.constant 0 : i32
    return %c0_i32, %c0_i32_0 : i32, i32
  }
  func.func @transform_6(%arg0: i32, %arg1: i32, %arg2: i32) -> (i32, i32) {
    %c0_i32 = arith.constant 0 : i32
    %c0_i32_0 = arith.constant 0 : i32
    %c0_i32_1 = arith.constant 0 : i32
    return %c0_i32, %c0_i32_0 : i32, i32
  }
  func.func @transform_7(%arg0: i32, %arg1: i32, %arg2: i32) -> (i32, i32) {
    %c0_i32 = arith.constant 0 : i32
    %c0_i32_0 = arith.constant 0 : i32
    %c0_i32_1 = arith.constant 0 : i32
    return %c0_i32, %c0_i32_0 : i32, i32
  }
  func.func @transform_8(%arg0: i32, %arg1: i32, %arg2: i32) -> (i32, i32, i32) {
    %c0_i32 = arith.constant 0 : i32
    %c0_i32_0 = arith.constant 0 : i32
    return %arg0, %arg1, %c0_i32 : i32, i32, i32
  }
}

module attributes {stable_mosaic.version = 11 : i64} {
  func.func @kernel(%arg0: i32, %arg1: i32, %arg2: memref<1x256x8xf32, #tpu.memory_space<vmem>>, %arg3: memref<9x256x1xf32, #tpu.memory_space<vmem>>, %arg4: memref<1x9x8x8xbf16, #tpu.memory_space<vmem>>, %arg5: memref<1x1x8xf32, #tpu.memory_space<vmem>>, %arg6: memref<1x1x1xf32, #tpu.memory_space<vmem>>, %arg7: memref<1x9x8x8xbf16, #tpu.memory_space<vmem>>, %arg8: memref<1x1x8xf32, #tpu.memory_space<vmem>>, %arg9: memref<1x256x8xf32, #tpu.memory_space<vmem>>, %arg10: memref<256x8xf32, #tpu.memory_space<vmem>>) attributes {dimension_semantics = [#tpu.dimension_semantics<parallel>, #tpu.dimension_semantics<arbitrary>], iteration_bounds = array<i64: 2, 3>, scalar_prefetch = 0 : i64, scratch_operands = 1 : i64, tpu.core_type = #tpu.core_type<tc>, window_params = [{transform_indices = @transform_0, window_bounds = array<i64: 1, 256, 8>}, {pipeline_mode = #tpu.pipeline_mode<synchronous>, transform_indices = @transform_1, window_bounds = array<i64: 9, 256, 1>}, {transform_indices = @transform_2, window_bounds = array<i64: 1, 9, 8, 8>}, {transform_indices = @transform_3, window_bounds = array<i64: 1, 1, 8>}, {transform_indices = @transform_4, window_bounds = array<i64: 1, 1, 1>}, {transform_indices = @transform_5, window_bounds = array<i64: 1, 9, 8, 8>}, {transform_indices = @transform_6, window_bounds = array<i64: 1, 1, 8>}, {transform_indices = @transform_7, window_bounds = array<i64: 1, 256, 8>}]} {
    %c0_i32 = arith.constant 0 : i32
    %0 = arith.cmpi eq, %arg1, %c0_i32 : i32
    %1 = arith.extui %0 : i1 to i32
    %c0_i32_0 = arith.constant 0 : i32
    %2 = arith.cmpi ne, %1, %c0_i32_0 : i32
    scf.if %2 {
      %c0_154 = arith.constant 0 : index
      %c0_155 = arith.constant 0 : index
      %c0_156 = arith.constant 0 : index
      %196 = vector.load %arg2[%c0_154, %c0_155, %c0_156] : memref<1x256x8xf32, #tpu.memory_space<vmem>>, vector<1x256x8xf32>
      %197 = vector.shape_cast %196 : vector<1x256x8xf32> to vector<256x8xf32>
      %c0_157 = arith.constant 0 : index
      %c0_158 = arith.constant 0 : index
      %198 = vector.load %arg10[%c0_157, %c0_158] : memref<256x8xf32, #tpu.memory_space<vmem>>, vector<256x8xf32>
      tpu.vector_store %arg10[%c0_157, %c0_158], %197 {strides = array<i32>} : memref<256x8xf32, #tpu.memory_space<vmem>>, vector<256x8xf32>,
    } else {
    }
    %c0 = arith.constant 0 : index
    %c0_1 = arith.constant 0 : index
    %3 = vector.load %arg10[%c0, %c0_1] : memref<256x8xf32, #tpu.memory_space<vmem>>, vector<256x8xf32>
    %cst = arith.constant 0.000000e+00 : f32
    %4 = vector.broadcast %cst : f32 to vector<256x8xf32>
    %c0_2 = arith.constant 0 : index
    %c0_3 = arith.constant 0 : index
    %c0_4 = arith.constant 0 : index
    %5 = vector.load %arg5[%c0_2, %c0_3, %c0_4] : memref<1x1x8xf32, #tpu.memory_space<vmem>>, vector<1x1x8xf32>
    %6 = vector.shape_cast %5 : vector<1x1x8xf32> to vector<1x8xf32>
    %7 = vector.broadcast %6 : vector<1x8xf32> to vector<256x8xf32>
    %8 = arith.addf %4, %7 : vector<256x8xf32>
    %c17_i32 = arith.constant 17 : i32
    %9 = tpu.dynamic_rotate %3 by %c17_i32 dim 0 : vector<256x8xf32>, i32 -> vector<256x8xf32>
    %c0_5 = arith.constant 0 : index
    %c0_6 = arith.constant 0 : index
    %c0_7 = arith.constant 0 : index
    %10 = vector.load %arg3[%c0_5, %c0_6, %c0_7] : memref<9x256x1xf32, #tpu.memory_space<vmem>>, vector<1x256x1xf32>
    %11 = vector.shape_cast %10 : vector<1x256x1xf32> to vector<256x1xf32>
    %12 = vector.broadcast %11 : vector<256x1xf32> to vector<256x8xf32>
    %13 = arith.mulf %9, %12 : vector<256x8xf32>
    %14 = arith.truncf %13 : vector<256x8xf32> to vector<256x8xbf16>
    %c0_8 = arith.constant 0 : index
    %c0_9 = arith.constant 0 : index
    %c0_10 = arith.constant 0 : index
    %c0_11 = arith.constant 0 : index
    %15 = vector.load %arg4[%c0_8, %c0_9, %c0_10, %c0_11] : memref<1x9x8x8xbf16, #tpu.memory_space<vmem>>, vector<1x1x8x8xbf16>
    %16 = vector.shape_cast %15 : vector<1x1x8x8xbf16> to vector<8x8xbf16>
    %cst_12 = arith.constant dense<0.000000e+00> : vector<256x8xf32>
    %17 = tpu.matmul %14, %16, %cst_12 {dimension_numbers = #tpu.dot_dimension_numbers<[1], [0], [0], [1], [0, 0, 1, 1], [], []>} : vector<256x8xbf16>, vector<8x8xbf16>, vector<256x8xf32> -> vector<256x8xf32>
    %18 = arith.addf %8, %17 : vector<256x8xf32>
    %c16_i32 = arith.constant 16 : i32
    %19 = tpu.dynamic_rotate %3 by %c16_i32 dim 0 : vector<256x8xf32>, i32 -> vector<256x8xf32>
    %c1 = arith.constant 1 : index
    %c0_13 = arith.constant 0 : index
    %c0_14 = arith.constant 0 : index
    %20 = vector.load %arg3[%c1, %c0_13, %c0_14] : memref<9x256x1xf32, #tpu.memory_space<vmem>>, vector<1x256x1xf32>
    %21 = vector.shape_cast %20 : vector<1x256x1xf32> to vector<256x1xf32>
    %22 = vector.broadcast %21 : vector<256x1xf32> to vector<256x8xf32>
    %23 = arith.mulf %19, %22 : vector<256x8xf32>
    %24 = arith.truncf %23 : vector<256x8xf32> to vector<256x8xbf16>
    %c0_15 = arith.constant 0 : index
    %c1_16 = arith.constant 1 : index
    %c0_17 = arith.constant 0 : index
    %c0_18 = arith.constant 0 : index
    %25 = vector.load %arg4[%c0_15, %c1_16, %c0_17, %c0_18] : memref<1x9x8x8xbf16, #tpu.memory_space<vmem>>, vector<1x1x8x8xbf16>
    %26 = vector.shape_cast %25 : vector<1x1x8x8xbf16> to vector<8x8xbf16>
    %cst_19 = arith.constant dense<0.000000e+00> : vector<256x8xf32>
    %27 = tpu.matmul %24, %26, %cst_19 {dimension_numbers = #tpu.dot_dimension_numbers<[1], [0], [0], [1], [0, 0, 1, 1], [], []>} : vector<256x8xbf16>, vector<8x8xbf16>, vector<256x8xf32> -> vector<256x8xf32>
    %28 = arith.addf %18, %27 : vector<256x8xf32>
    %c15_i32 = arith.constant 15 : i32
    %29 = tpu.dynamic_rotate %3 by %c15_i32 dim 0 : vector<256x8xf32>, i32 -> vector<256x8xf32>
    %c2 = arith.constant 2 : index
    %c0_20 = arith.constant 0 : index
    %c0_21 = arith.constant 0 : index
    %30 = vector.load %arg3[%c2, %c0_20, %c0_21] : memref<9x256x1xf32, #tpu.memory_space<vmem>>, vector<1x256x1xf32>
    %31 = vector.shape_cast %30 : vector<1x256x1xf32> to vector<256x1xf32>
    %32 = vector.broadcast %31 : vector<256x1xf32> to vector<256x8xf32>
    %33 = arith.mulf %29, %32 : vector<256x8xf32>
    %34 = arith.truncf %33 : vector<256x8xf32> to vector<256x8xbf16>
    %c0_22 = arith.constant 0 : index
    %c2_23 = arith.constant 2 : index
    %c0_24 = arith.constant 0 : index
    %c0_25 = arith.constant 0 : index
    %35 = vector.load %arg4[%c0_22, %c2_23, %c0_24, %c0_25] : memref<1x9x8x8xbf16, #tpu.memory_space<vmem>>, vector<1x1x8x8xbf16>
    %36 = vector.shape_cast %35 : vector<1x1x8x8xbf16> to vector<8x8xbf16>
    %cst_26 = arith.constant dense<0.000000e+00> : vector<256x8xf32>
    %37 = tpu.matmul %34, %36, %cst_26 {dimension_numbers = #tpu.dot_dimension_numbers<[1], [0], [0], [1], [0, 0, 1, 1], [], []>} : vector<256x8xbf16>, vector<8x8xbf16>, vector<256x8xf32> -> vector<256x8xf32>
    %38 = arith.addf %28, %37 : vector<256x8xf32>
    %c1_i32 = arith.constant 1 : i32
    %39 = tpu.dynamic_rotate %3 by %c1_i32 dim 0 : vector<256x8xf32>, i32 -> vector<256x8xf32>
    %c3 = arith.constant 3 : index
    %c0_27 = arith.constant 0 : index
    %c0_28 = arith.constant 0 : index
    %40 = vector.load %arg3[%c3, %c0_27, %c0_28] : memref<9x256x1xf32, #tpu.memory_space<vmem>>, vector<1x256x1xf32>
    %41 = vector.shape_cast %40 : vector<1x256x1xf32> to vector<256x1xf32>
    %42 = vector.broadcast %41 : vector<256x1xf32> to vector<256x8xf32>
    %43 = arith.mulf %39, %42 : vector<256x8xf32>
    %44 = arith.truncf %43 : vector<256x8xf32> to vector<256x8xbf16>
    %c0_29 = arith.constant 0 : index
    %c3_30 = arith.constant 3 : index
    %c0_31 = arith.constant 0 : index
    %c0_32 = arith.constant 0 : index
    %45 = vector.load %arg4[%c0_29, %c3_30, %c0_31, %c0_32] : memref<1x9x8x8xbf16, #tpu.memory_space<vmem>>, vector<1x1x8x8xbf16>
    %46 = vector.shape_cast %45 : vector<1x1x8x8xbf16> to vector<8x8xbf16>
    %cst_33 = arith.constant dense<0.000000e+00> : vector<256x8xf32>
    %47 = tpu.matmul %44, %46, %cst_33 {dimension_numbers = #tpu.dot_dimension_numbers<[1], [0], [0], [1], [0, 0, 1, 1], [], []>} : vector<256x8xbf16>, vector<8x8xbf16>, vector<256x8xf32> -> vector<256x8xf32>
    %48 = arith.addf %38, %47 : vector<256x8xf32>
    %49 = arith.truncf %3 : vector<256x8xf32> to vector<256x8xbf16>
    %c0_34 = arith.constant 0 : index
    %c4 = arith.constant 4 : index
    %c0_35 = arith.constant 0 : index
    %c0_36 = arith.constant 0 : index
    %50 = vector.load %arg4[%c0_34, %c4, %c0_35, %c0_36] : memref<1x9x8x8xbf16, #tpu.memory_space<vmem>>, vector<1x1x8x8xbf16>
    %51 = vector.shape_cast %50 : vector<1x1x8x8xbf16> to vector<8x8xbf16>
    %cst_37 = arith.constant dense<0.000000e+00> : vector<256x8xf32>
    %52 = tpu.matmul %49, %51, %cst_37 {dimension_numbers = #tpu.dot_dimension_numbers<[1], [0], [0], [1], [0, 0, 1, 1], [], []>} : vector<256x8xbf16>, vector<8x8xbf16>, vector<256x8xf32> -> vector<256x8xf32>
    %53 = arith.addf %48, %52 : vector<256x8xf32>
    %c255_i32 = arith.constant 255 : i32
    %54 = tpu.dynamic_rotate %3 by %c255_i32 dim 0 : vector<256x8xf32>, i32 -> vector<256x8xf32>
    %c5 = arith.constant 5 : index
    %c0_38 = arith.constant 0 : index
    %c0_39 = arith.constant 0 : index
    %55 = vector.load %arg3[%c5, %c0_38, %c0_39] : memref<9x256x1xf32, #tpu.memory_space<vmem>>, vector<1x256x1xf32>
    %56 = vector.shape_cast %55 : vector<1x256x1xf32> to vector<256x1xf32>
    %57 = vector.broadcast %56 : vector<256x1xf32> to vector<256x8xf32>
    %58 = arith.mulf %54, %57 : vector<256x8xf32>
    %59 = arith.truncf %58 : vector<256x8xf32> to vector<256x8xbf16>
    %c0_40 = arith.constant 0 : index
    %c5_41 = arith.constant 5 : index
    %c0_42 = arith.constant 0 : index
    %c0_43 = arith.constant 0 : index
    %60 = vector.load %arg4[%c0_40, %c5_41, %c0_42, %c0_43] : memref<1x9x8x8xbf16, #tpu.memory_space<vmem>>, vector<1x1x8x8xbf16>
    %61 = vector.shape_cast %60 : vector<1x1x8x8xbf16> to vector<8x8xbf16>
    %cst_44 = arith.constant dense<0.000000e+00> : vector<256x8xf32>
    %62 = tpu.matmul %59, %61, %cst_44 {dimension_numbers = #tpu.dot_dimension_numbers<[1], [0], [0], [1], [0, 0, 1, 1], [], []>} : vector<256x8xbf16>, vector<8x8xbf16>, vector<256x8xf32> -> vector<256x8xf32>
    %63 = arith.addf %53, %62 : vector<256x8xf32>
    %c241_i32 = arith.constant 241 : i32
    %64 = tpu.dynamic_rotate %3 by %c241_i32 dim 0 : vector<256x8xf32>, i32 -> vector<256x8xf32>
    %c6 = arith.constant 6 : index
    %c0_45 = arith.constant 0 : index
    %c0_46 = arith.constant 0 : index
    %65 = vector.load %arg3[%c6, %c0_45, %c0_46] : memref<9x256x1xf32, #tpu.memory_space<vmem>>, vector<1x256x1xf32>
    %66 = vector.shape_cast %65 : vector<1x256x1xf32> to vector<256x1xf32>
    %67 = vector.broadcast %66 : vector<256x1xf32> to vector<256x8xf32>
    %68 = arith.mulf %64, %67 : vector<256x8xf32>
    %69 = arith.truncf %68 : vector<256x8xf32> to vector<256x8xbf16>
    %c0_47 = arith.constant 0 : index
    %c6_48 = arith.constant 6 : index
    %c0_49 = arith.constant 0 : index
    %c0_50 = arith.constant 0 : index
    %70 = vector.load %arg4[%c0_47, %c6_48, %c0_49, %c0_50] : memref<1x9x8x8xbf16, #tpu.memory_space<vmem>>, vector<1x1x8x8xbf16>
    %71 = vector.shape_cast %70 : vector<1x1x8x8xbf16> to vector<8x8xbf16>
    %cst_51 = arith.constant dense<0.000000e+00> : vector<256x8xf32>
    %72 = tpu.matmul %69, %71, %cst_51 {dimension_numbers = #tpu.dot_dimension_numbers<[1], [0], [0], [1], [0, 0, 1, 1], [], []>} : vector<256x8xbf16>, vector<8x8xbf16>, vector<256x8xf32> -> vector<256x8xf32>
    %73 = arith.addf %63, %72 : vector<256x8xf32>
    %c240_i32 = arith.constant 240 : i32
    %74 = tpu.dynamic_rotate %3 by %c240_i32 dim 0 : vector<256x8xf32>, i32 -> vector<256x8xf32>
    %c7 = arith.constant 7 : index
    %c0_52 = arith.constant 0 : index
    %c0_53 = arith.constant 0 : index
    %75 = vector.load %arg3[%c7, %c0_52, %c0_53] : memref<9x256x1xf32, #tpu.memory_space<vmem>>, vector<1x256x1xf32>
    %76 = vector.shape_cast %75 : vector<1x256x1xf32> to vector<256x1xf32>
    %77 = vector.broadcast %76 : vector<256x1xf32> to vector<256x8xf32>
    %78 = arith.mulf %74, %77 : vector<256x8xf32>
    %79 = arith.truncf %78 : vector<256x8xf32> to vector<256x8xbf16>
    %c0_54 = arith.constant 0 : index
    %c7_55 = arith.constant 7 : index
    %c0_56 = arith.constant 0 : index
    %c0_57 = arith.constant 0 : index
    %80 = vector.load %arg4[%c0_54, %c7_55, %c0_56, %c0_57] : memref<1x9x8x8xbf16, #tpu.memory_space<vmem>>, vector<1x1x8x8xbf16>
    %81 = vector.shape_cast %80 : vector<1x1x8x8xbf16> to vector<8x8xbf16>
    %cst_58 = arith.constant dense<0.000000e+00> : vector<256x8xf32>
    %82 = tpu.matmul %79, %81, %cst_58 {dimension_numbers = #tpu.dot_dimension_numbers<[1], [0], [0], [1], [0, 0, 1, 1], [], []>} : vector<256x8xbf16>, vector<8x8xbf16>, vector<256x8xf32> -> vector<256x8xf32>
    %83 = arith.addf %73, %82 : vector<256x8xf32>
    %c239_i32 = arith.constant 239 : i32
    %84 = tpu.dynamic_rotate %3 by %c239_i32 dim 0 : vector<256x8xf32>, i32 -> vector<256x8xf32>
    %c8 = arith.constant 8 : index
    %c0_59 = arith.constant 0 : index
    %c0_60 = arith.constant 0 : index
    %85 = vector.load %arg3[%c8, %c0_59, %c0_60] : memref<9x256x1xf32, #tpu.memory_space<vmem>>, vector<1x256x1xf32>
    %86 = vector.shape_cast %85 : vector<1x256x1xf32> to vector<256x1xf32>
    %87 = vector.broadcast %86 : vector<256x1xf32> to vector<256x8xf32>
    %88 = arith.mulf %84, %87 : vector<256x8xf32>
    %89 = arith.truncf %88 : vector<256x8xf32> to vector<256x8xbf16>
    %c0_61 = arith.constant 0 : index
    %c8_62 = arith.constant 8 : index
    %c0_63 = arith.constant 0 : index
    %c0_64 = arith.constant 0 : index
    %90 = vector.load %arg4[%c0_61, %c8_62, %c0_63, %c0_64] : memref<1x9x8x8xbf16, #tpu.memory_space<vmem>>, vector<1x1x8x8xbf16>
    %91 = vector.shape_cast %90 : vector<1x1x8x8xbf16> to vector<8x8xbf16>
    %cst_65 = arith.constant dense<0.000000e+00> : vector<256x8xf32>
    %92 = tpu.matmul %89, %91, %cst_65 {dimension_numbers = #tpu.dot_dimension_numbers<[1], [0], [0], [1], [0, 0, 1, 1], [], []>} : vector<256x8xbf16>, vector<8x8xbf16>, vector<256x8xf32> -> vector<256x8xf32>
    %93 = arith.addf %83, %92 : vector<256x8xf32>
    %cst_66 = arith.constant 0.000000e+00 : f32
    %94 = vector.broadcast %cst_66 : f32 to vector<256x8xf32>
    %95 = arith.cmpf oge, %93, %94 : vector<256x8xf32>
    %c0_67 = arith.constant 0 : index
    %c0_68 = arith.constant 0 : index
    %c0_69 = arith.constant 0 : index
    %96 = vector.load %arg6[%c0_67, %c0_68, %c0_69] : memref<1x1x1xf32, #tpu.memory_space<vmem>>, vector<1x1x1xf32>
    %97 = vector.shape_cast %96 : vector<1x1x1xf32> to vector<1x1xf32>
    %98 = vector.broadcast %97 : vector<1x1xf32> to vector<256x8xf32>
    %99 = arith.mulf %93, %98 : vector<256x8xf32>
    %100 = arith.select %95, %93, %99 : vector<256x8xi1>, vector<256x8xf32>
    %cst_70 = arith.constant 0.000000e+00 : f32
    %101 = vector.broadcast %cst_70 : f32 to vector<256x8xf32>
    %c0_71 = arith.constant 0 : index
    %c0_72 = arith.constant 0 : index
    %c0_73 = arith.constant 0 : index
    %102 = vector.load %arg8[%c0_71, %c0_72, %c0_73] : memref<1x1x8xf32, #tpu.memory_space<vmem>>, vector<1x1x8xf32>
    %103 = vector.shape_cast %102 : vector<1x1x8xf32> to vector<1x8xf32>
    %104 = vector.broadcast %103 : vector<1x8xf32> to vector<256x8xf32>
    %105 = arith.addf %101, %104 : vector<256x8xf32>
    %c17_i32_74 = arith.constant 17 : i32
    %106 = tpu.dynamic_rotate %100 by %c17_i32_74 dim 0 : vector<256x8xf32>, i32 -> vector<256x8xf32>
    %c0_75 = arith.constant 0 : index
    %c0_76 = arith.constant 0 : index
    %c0_77 = arith.constant 0 : index
    %107 = vector.load %arg3[%c0_75, %c0_76, %c0_77] : memref<9x256x1xf32, #tpu.memory_space<vmem>>, vector<1x256x1xf32>
    %108 = vector.shape_cast %107 : vector<1x256x1xf32> to vector<256x1xf32>
    %109 = vector.broadcast %108 : vector<256x1xf32> to vector<256x8xf32>
    %110 = arith.mulf %106, %109 : vector<256x8xf32>
    %111 = arith.truncf %110 : vector<256x8xf32> to vector<256x8xbf16>
    %c0_78 = arith.constant 0 : index
    %c0_79 = arith.constant 0 : index
    %c0_80 = arith.constant 0 : index
    %c0_81 = arith.constant 0 : index
    %112 = vector.load %arg7[%c0_78, %c0_79, %c0_80, %c0_81] : memref<1x9x8x8xbf16, #tpu.memory_space<vmem>>, vector<1x1x8x8xbf16>
    %113 = vector.shape_cast %112 : vector<1x1x8x8xbf16> to vector<8x8xbf16>
    %cst_82 = arith.constant dense<0.000000e+00> : vector<256x8xf32>
    %114 = tpu.matmul %111, %113, %cst_82 {dimension_numbers = #tpu.dot_dimension_numbers<[1], [0], [0], [1], [0, 0, 1, 1], [], []>} : vector<256x8xbf16>, vector<8x8xbf16>, vector<256x8xf32> -> vector<256x8xf32>
    %115 = arith.addf %105, %114 : vector<256x8xf32>
    %c16_i32_83 = arith.constant 16 : i32
    %116 = tpu.dynamic_rotate %100 by %c16_i32_83 dim 0 : vector<256x8xf32>, i32 -> vector<256x8xf32>
    %c1_84 = arith.constant 1 : index
    %c0_85 = arith.constant 0 : index
    %c0_86 = arith.constant 0 : index
    %117 = vector.load %arg3[%c1_84, %c0_85, %c0_86] : memref<9x256x1xf32, #tpu.memory_space<vmem>>, vector<1x256x1xf32>
    %118 = vector.shape_cast %117 : vector<1x256x1xf32> to vector<256x1xf32>
    %119 = vector.broadcast %118 : vector<256x1xf32> to vector<256x8xf32>
    %120 = arith.mulf %116, %119 : vector<256x8xf32>
    %121 = arith.truncf %120 : vector<256x8xf32> to vector<256x8xbf16>
    %c0_87 = arith.constant 0 : index
    %c1_88 = arith.constant 1 : index
    %c0_89 = arith.constant 0 : index
    %c0_90 = arith.constant 0 : index
    %122 = vector.load %arg7[%c0_87, %c1_88, %c0_89, %c0_90] : memref<1x9x8x8xbf16, #tpu.memory_space<vmem>>, vector<1x1x8x8xbf16>
    %123 = vector.shape_cast %122 : vector<1x1x8x8xbf16> to vector<8x8xbf16>
    %cst_91 = arith.constant dense<0.000000e+00> : vector<256x8xf32>
    %124 = tpu.matmul %121, %123, %cst_91 {dimension_numbers = #tpu.dot_dimension_numbers<[1], [0], [0], [1], [0, 0, 1, 1], [], []>} : vector<256x8xbf16>, vector<8x8xbf16>, vector<256x8xf32> -> vector<256x8xf32>
    %125 = arith.addf %115, %124 : vector<256x8xf32>
    %c15_i32_92 = arith.constant 15 : i32
    %126 = tpu.dynamic_rotate %100 by %c15_i32_92 dim 0 : vector<256x8xf32>, i32 -> vector<256x8xf32>
    %c2_93 = arith.constant 2 : index
    %c0_94 = arith.constant 0 : index
    %c0_95 = arith.constant 0 : index
    %127 = vector.load %arg3[%c2_93, %c0_94, %c0_95] : memref<9x256x1xf32, #tpu.memory_space<vmem>>, vector<1x256x1xf32>
    %128 = vector.shape_cast %127 : vector<1x256x1xf32> to vector<256x1xf32>
    %129 = vector.broadcast %128 : vector<256x1xf32> to vector<256x8xf32>
    %130 = arith.mulf %126, %129 : vector<256x8xf32>
    %131 = arith.truncf %130 : vector<256x8xf32> to vector<256x8xbf16>
    %c0_96 = arith.constant 0 : index
    %c2_97 = arith.constant 2 : index
    %c0_98 = arith.constant 0 : index
    %c0_99 = arith.constant 0 : index
    %132 = vector.load %arg7[%c0_96, %c2_97, %c0_98, %c0_99] : memref<1x9x8x8xbf16, #tpu.memory_space<vmem>>, vector<1x1x8x8xbf16>
    %133 = vector.shape_cast %132 : vector<1x1x8x8xbf16> to vector<8x8xbf16>
    %cst_100 = arith.constant dense<0.000000e+00> : vector<256x8xf32>
    %134 = tpu.matmul %131, %133, %cst_100 {dimension_numbers = #tpu.dot_dimension_numbers<[1], [0], [0], [1], [0, 0, 1, 1], [], []>} : vector<256x8xbf16>, vector<8x8xbf16>, vector<256x8xf32> -> vector<256x8xf32>
    %135 = arith.addf %125, %134 : vector<256x8xf32>
    %c1_i32_101 = arith.constant 1 : i32
    %136 = tpu.dynamic_rotate %100 by %c1_i32_101 dim 0 : vector<256x8xf32>, i32 -> vector<256x8xf32>
    %c3_102 = arith.constant 3 : index
    %c0_103 = arith.constant 0 : index
    %c0_104 = arith.constant 0 : index
    %137 = vector.load %arg3[%c3_102, %c0_103, %c0_104] : memref<9x256x1xf32, #tpu.memory_space<vmem>>, vector<1x256x1xf32>
    %138 = vector.shape_cast %137 : vector<1x256x1xf32> to vector<256x1xf32>
    %139 = vector.broadcast %138 : vector<256x1xf32> to vector<256x8xf32>
    %140 = arith.mulf %136, %139 : vector<256x8xf32>
    %141 = arith.truncf %140 : vector<256x8xf32> to vector<256x8xbf16>
    %c0_105 = arith.constant 0 : index
    %c3_106 = arith.constant 3 : index
    %c0_107 = arith.constant 0 : index
    %c0_108 = arith.constant 0 : index
    %142 = vector.load %arg7[%c0_105, %c3_106, %c0_107, %c0_108] : memref<1x9x8x8xbf16, #tpu.memory_space<vmem>>, vector<1x1x8x8xbf16>
    %143 = vector.shape_cast %142 : vector<1x1x8x8xbf16> to vector<8x8xbf16>
    %cst_109 = arith.constant dense<0.000000e+00> : vector<256x8xf32>
    %144 = tpu.matmul %141, %143, %cst_109 {dimension_numbers = #tpu.dot_dimension_numbers<[1], [0], [0], [1], [0, 0, 1, 1], [], []>} : vector<256x8xbf16>, vector<8x8xbf16>, vector<256x8xf32> -> vector<256x8xf32>
    %145 = arith.addf %135, %144 : vector<256x8xf32>
    %146 = arith.truncf %100 : vector<256x8xf32> to vector<256x8xbf16>
    %c0_110 = arith.constant 0 : index
    %c4_111 = arith.constant 4 : index
    %c0_112 = arith.constant 0 : index
    %c0_113 = arith.constant 0 : index
    %147 = vector.load %arg7[%c0_110, %c4_111, %c0_112, %c0_113] : memref<1x9x8x8xbf16, #tpu.memory_space<vmem>>, vector<1x1x8x8xbf16>
    %148 = vector.shape_cast %147 : vector<1x1x8x8xbf16> to vector<8x8xbf16>
    %cst_114 = arith.constant dense<0.000000e+00> : vector<256x8xf32>
    %149 = tpu.matmul %146, %148, %cst_114 {dimension_numbers = #tpu.dot_dimension_numbers<[1], [0], [0], [1], [0, 0, 1, 1], [], []>} : vector<256x8xbf16>, vector<8x8xbf16>, vector<256x8xf32> -> vector<256x8xf32>
    %150 = arith.addf %145, %149 : vector<256x8xf32>
    %c255_i32_115 = arith.constant 255 : i32
    %151 = tpu.dynamic_rotate %100 by %c255_i32_115 dim 0 : vector<256x8xf32>, i32 -> vector<256x8xf32>
    %c5_116 = arith.constant 5 : index
    %c0_117 = arith.constant 0 : index
    %c0_118 = arith.constant 0 : index
    %152 = vector.load %arg3[%c5_116, %c0_117, %c0_118] : memref<9x256x1xf32, #tpu.memory_space<vmem>>, vector<1x256x1xf32>
    %153 = vector.shape_cast %152 : vector<1x256x1xf32> to vector<256x1xf32>
    %154 = vector.broadcast %153 : vector<256x1xf32> to vector<256x8xf32>
    %155 = arith.mulf %151, %154 : vector<256x8xf32>
    %156 = arith.truncf %155 : vector<256x8xf32> to vector<256x8xbf16>
    %c0_119 = arith.constant 0 : index
    %c5_120 = arith.constant 5 : index
    %c0_121 = arith.constant 0 : index
    %c0_122 = arith.constant 0 : index
    %157 = vector.load %arg7[%c0_119, %c5_120, %c0_121, %c0_122] : memref<1x9x8x8xbf16, #tpu.memory_space<vmem>>, vector<1x1x8x8xbf16>
    %158 = vector.shape_cast %157 : vector<1x1x8x8xbf16> to vector<8x8xbf16>
    %cst_123 = arith.constant dense<0.000000e+00> : vector<256x8xf32>
    %159 = tpu.matmul %156, %158, %cst_123 {dimension_numbers = #tpu.dot_dimension_numbers<[1], [0], [0], [1], [0, 0, 1, 1], [], []>} : vector<256x8xbf16>, vector<8x8xbf16>, vector<256x8xf32> -> vector<256x8xf32>
    %160 = arith.addf %150, %159 : vector<256x8xf32>
    %c241_i32_124 = arith.constant 241 : i32
    %161 = tpu.dynamic_rotate %100 by %c241_i32_124 dim 0 : vector<256x8xf32>, i32 -> vector<256x8xf32>
    %c6_125 = arith.constant 6 : index
    %c0_126 = arith.constant 0 : index
    %c0_127 = arith.constant 0 : index
    %162 = vector.load %arg3[%c6_125, %c0_126, %c0_127] : memref<9x256x1xf32, #tpu.memory_space<vmem>>, vector<1x256x1xf32>
    %163 = vector.shape_cast %162 : vector<1x256x1xf32> to vector<256x1xf32>
    %164 = vector.broadcast %163 : vector<256x1xf32> to vector<256x8xf32>
    %165 = arith.mulf %161, %164 : vector<256x8xf32>
    %166 = arith.truncf %165 : vector<256x8xf32> to vector<256x8xbf16>
    %c0_128 = arith.constant 0 : index
    %c6_129 = arith.constant 6 : index
    %c0_130 = arith.constant 0 : index
    %c0_131 = arith.constant 0 : index
    %167 = vector.load %arg7[%c0_128, %c6_129, %c0_130, %c0_131] : memref<1x9x8x8xbf16, #tpu.memory_space<vmem>>, vector<1x1x8x8xbf16>
    %168 = vector.shape_cast %167 : vector<1x1x8x8xbf16> to vector<8x8xbf16>
    %cst_132 = arith.constant dense<0.000000e+00> : vector<256x8xf32>
    %169 = tpu.matmul %166, %168, %cst_132 {dimension_numbers = #tpu.dot_dimension_numbers<[1], [0], [0], [1], [0, 0, 1, 1], [], []>} : vector<256x8xbf16>, vector<8x8xbf16>, vector<256x8xf32> -> vector<256x8xf32>
    %170 = arith.addf %160, %169 : vector<256x8xf32>
    %c240_i32_133 = arith.constant 240 : i32
    %171 = tpu.dynamic_rotate %100 by %c240_i32_133 dim 0 : vector<256x8xf32>, i32 -> vector<256x8xf32>
    %c7_134 = arith.constant 7 : index
    %c0_135 = arith.constant 0 : index
    %c0_136 = arith.constant 0 : index
    %172 = vector.load %arg3[%c7_134, %c0_135, %c0_136] : memref<9x256x1xf32, #tpu.memory_space<vmem>>, vector<1x256x1xf32>
    %173 = vector.shape_cast %172 : vector<1x256x1xf32> to vector<256x1xf32>
    %174 = vector.broadcast %173 : vector<256x1xf32> to vector<256x8xf32>
    %175 = arith.mulf %171, %174 : vector<256x8xf32>
    %176 = arith.truncf %175 : vector<256x8xf32> to vector<256x8xbf16>
    %c0_137 = arith.constant 0 : index
    %c7_138 = arith.constant 7 : index
    %c0_139 = arith.constant 0 : index
    %c0_140 = arith.constant 0 : index
    %177 = vector.load %arg7[%c0_137, %c7_138, %c0_139, %c0_140] : memref<1x9x8x8xbf16, #tpu.memory_space<vmem>>, vector<1x1x8x8xbf16>
    %178 = vector.shape_cast %177 : vector<1x1x8x8xbf16> to vector<8x8xbf16>
    %cst_141 = arith.constant dense<0.000000e+00> : vector<256x8xf32>
    %179 = tpu.matmul %176, %178, %cst_141 {dimension_numbers = #tpu.dot_dimension_numbers<[1], [0], [0], [1], [0, 0, 1, 1], [], []>} : vector<256x8xbf16>, vector<8x8xbf16>, vector<256x8xf32> -> vector<256x8xf32>
    %180 = arith.addf %170, %179 : vector<256x8xf32>
    %c239_i32_142 = arith.constant 239 : i32
    %181 = tpu.dynamic_rotate %100 by %c239_i32_142 dim 0 : vector<256x8xf32>, i32 -> vector<256x8xf32>
    %c8_143 = arith.constant 8 : index
    %c0_144 = arith.constant 0 : index
    %c0_145 = arith.constant 0 : index
    %182 = vector.load %arg3[%c8_143, %c0_144, %c0_145] : memref<9x256x1xf32, #tpu.memory_space<vmem>>, vector<1x256x1xf32>
    %183 = vector.shape_cast %182 : vector<1x256x1xf32> to vector<256x1xf32>
    %184 = vector.broadcast %183 : vector<256x1xf32> to vector<256x8xf32>
    %185 = arith.mulf %181, %184 : vector<256x8xf32>
    %186 = arith.truncf %185 : vector<256x8xf32> to vector<256x8xbf16>
    %c0_146 = arith.constant 0 : index
    %c8_147 = arith.constant 8 : index
    %c0_148 = arith.constant 0 : index
    %c0_149 = arith.constant 0 : index
    %187 = vector.load %arg7[%c0_146, %c8_147, %c0_148, %c0_149] : memref<1x9x8x8xbf16, #tpu.memory_space<vmem>>, vector<1x1x8x8xbf16>
    %188 = vector.shape_cast %187 : vector<1x1x8x8xbf16> to vector<8x8xbf16>
    %cst_150 = arith.constant dense<0.000000e+00> : vector<256x8xf32>
    %189 = tpu.matmul %186, %188, %cst_150 {dimension_numbers = #tpu.dot_dimension_numbers<[1], [0], [0], [1], [0, 0, 1, 1], [], []>} : vector<256x8xbf16>, vector<8x8xbf16>, vector<256x8xf32> -> vector<256x8xf32>
    %190 = arith.addf %180, %189 : vector<256x8xf32>
    %191 = arith.addf %3, %190 : vector<256x8xf32>
    %c0_151 = arith.constant 0 : index
    %c0_152 = arith.constant 0 : index
    %192 = vector.load %arg10[%c0_151, %c0_152] : memref<256x8xf32, #tpu.memory_space<vmem>>, vector<256x8xf32>
    tpu.vector_store %arg10[%c0_151, %c0_152], %191 {strides = array<i32>} : memref<256x8xf32, #tpu.memory_space<vmem>>, vector<256x8xf32>,
    %c2_i32 = arith.constant 2 : i32
    %193 = arith.cmpi eq, %arg1, %c2_i32 : i32
    %194 = arith.extui %193 : i1 to i32
    %c0_i32_153 = arith.constant 0 : i32
    %195 = arith.cmpi ne, %194, %c0_i32_153 : i32
    scf.if %195 {
      %c0_154 = arith.constant 0 : index
      %c0_155 = arith.constant 0 : index
      %196 = vector.load %arg10[%c0_154, %c0_155] : memref<256x8xf32, #tpu.memory_space<vmem>>, vector<256x8xf32>
      %c0_156 = arith.constant 0 : index
      %c0_157 = arith.constant 0 : index
      %c0_158 = arith.constant 0 : index
      %197 = vector.load %arg9[%c0_156, %c0_157, %c0_158] : memref<1x256x8xf32, #tpu.memory_space<vmem>>, vector<1x256x8xf32>
      %198 = vector.shape_cast %197 : vector<1x256x8xf32> to vector<256x8xf32>
      %199 = vector.shape_cast %196 : vector<256x8xf32> to vector<1x256x8xf32>
      tpu.vector_store %arg9[%c0_156, %c0_157, %c0_158], %199 {strides = array<i32>} : memref<1x256x8xf32, #tpu.memory_space<vmem>>, vector<1x256x8xf32>,
    } else {
    }
    return
  }
  func.func @transform_0(%arg0: i32, %arg1: i32) -> (i32, i32, i32) {
    %c0_i32 = arith.constant 0 : i32
    %c0_i32_0 = arith.constant 0 : i32
    %c0_i32_1 = arith.constant 0 : i32
    return %arg0, %c0_i32, %c0_i32_0 : i32, i32, i32
  }
  func.func @transform_1(%arg0: i32, %arg1: i32) -> (i32, i32, i32) {
    %c0_i32 = arith.constant 0 : i32
    %c0_i32_0 = arith.constant 0 : i32
    %c0_i32_1 = arith.constant 0 : i32
    %c0_i32_2 = arith.constant 0 : i32
    return %c0_i32, %c0_i32_0, %c0_i32_1 : i32, i32, i32
  }
  func.func @transform_2(%arg0: i32, %arg1: i32) -> (i32, i32, i32, i32) {
    %c0_i32 = arith.constant 0 : i32
    %c0_i32_0 = arith.constant 0 : i32
    %c0_i32_1 = arith.constant 0 : i32
    %c0_i32_2 = arith.constant 0 : i32
    return %arg1, %c0_i32, %c0_i32_0, %c0_i32_1 : i32, i32, i32, i32
  }
  func.func @transform_3(%arg0: i32, %arg1: i32) -> (i32, i32, i32) {
    %c0_i32 = arith.constant 0 : i32
    %c0_i32_0 = arith.constant 0 : i32
    %c0_i32_1 = arith.constant 0 : i32
    return %arg1, %c0_i32, %c0_i32_0 : i32, i32, i32
  }
  func.func @transform_4(%arg0: i32, %arg1: i32) -> (i32, i32, i32) {
    %c0_i32 = arith.constant 0 : i32
    %c0_i32_0 = arith.constant 0 : i32
    %c0_i32_1 = arith.constant 0 : i32
    return %arg1, %c0_i32, %c0_i32_0 : i32, i32, i32
  }
  func.func @transform_5(%arg0: i32, %arg1: i32) -> (i32, i32, i32, i32) {
    %c0_i32 = arith.constant 0 : i32
    %c0_i32_0 = arith.constant 0 : i32
    %c0_i32_1 = arith.constant 0 : i32
    %c0_i32_2 = arith.constant 0 : i32
    return %arg1, %c0_i32, %c0_i32_0, %c0_i32_1 : i32, i32, i32, i32
  }
  func.func @transform_6(%arg0: i32, %arg1: i32) -> (i32, i32, i32) {
    %c0_i32 = arith.constant 0 : i32
    %c0_i32_0 = arith.constant 0 : i32
    %c0_i32_1 = arith.constant 0 : i32
    return %arg1, %c0_i32, %c0_i32_0 : i32, i32, i32
  }
  func.func @transform_7(%arg0: i32, %arg1: i32) -> (i32, i32, i32) {
    %c0_i32 = arith.constant 0 : i32
    %c0_i32_0 = arith.constant 0 : i32
    %c0_i32_1 = arith.constant 0 : i32
    return %arg0, %c0_i32, %c0_i32_0 : i32, i32, i32
  }
}

</mosaic_0001>

<bundles_post_ra>
// kernel: ces_forward_nchw.5
= control target key start
LH: loop header
LB: loop body
LE: loop exit
PB: predicated region body
PF: predicated region fallthrough
CT: control target
= control target key end

     0   :  { %s4181_s27 = smov 0   ;;  %s4183_s28 = smov 0   ;;  %s5983_s0 = inlined_call_operand.vmem [shape: f32[2,256,8], index: 0, kind: input, shape index: {}, may-alias: {0,1}]   ;;  %s5984_s1 = inlined_call_operand.vmem [shape: f32[2,256,8], index: 1, kind: input, shape index: {}, may-alias: {0,1}]   ;;  %s5985_s2 = inlined_call_operand.vmem [shape: bf16[8,128], index: 2, kind: input, shape index: {}]   ;;  %s5986_s3 = inlined_call_operand.vmem [shape: f32[1,128], index: 3, kind: input, shape index: {}]   ;;  %s5987_s4 = inlined_call_operand.vmem [shape: bf16[8,256], index: 4, kind: input, shape index: {}]   ;;  %s5988_s5 = inlined_call_operand.vmem [shape: f32[1,256], index: 5, kind: input, shape index: {}]   ;;  %s5989_s6 = inlined_call_operand.vmem [shape: bf16[128,8], index: 6, kind: input, shape index: {}]   ;;  %s5990_s7 = inlined_call_operand.vmem [shape: f32[1,8], index: 7, kind: input, shape index: {}]   ;;  %s5991_s8 = inlined_call_operand.vmem [shape: f32[2,256,8], index: 8, kind: output, shape index: {}]  }
   0x1   :  { %s4185_s29 = smov 0  }
   0x2 LB: > { %s37_s30 = sadd.s32 1, %s4127_s28  ;;  %p3473_p0 = scmp.ge.s32.totalorder %s4131_s29, 1  ;;  %s4131_s29 = sphi %s4185_s29, %s18_s29   ;;  %s4127_s28 = sphi %s4183_s28, %s6308_s28   ;;  %s4123_s27 = sphi %s4181_s27, %s6307_s27  }
   0x3   : > { %p39_p1 = scmp.ge.s32.totalorder %s37_s30, 2  ;;  %p307_p2 = scmp.lt.s32.totalorder %s4131_s29, 3 }
   0x5   : > { %s6310_s30 = smov (%p39_p1, %s37_s30), 0  ;;  %p308_p3 = pnand %p3473_p0, %p307_p2 }
   0x7   : > { %311 = sbr.rel (%p308_p3) target bundleno = 1618 (0x652), region = 52 }
   0xe   : > { %vm498_vm0 = vcmask 1043456   ;;  %v872_v0 = vld [vmem:[%s5987_s4] sm:$0xff]  ;;  %p359_p4 = scmp.lt.s32.totalorder %s4123_s27, 1  ;;  %v4133_v3 = vmov 0   ;;  %vm449_vm1 = vcmask 64512   ;;  %vm727_vm2 = vcmask 7168  }
   0xf   : > { %v3498_v1 = vcombine.high %v872_v0, %v872_v0  ;;  %v3497_v2 = vcombine.low %v872_v0, %v872_v0  ;;  %978 = vmatprep.mubr.bf16.mxu1 %v4133_v3  ;;  %v441_v4 = vld [vmem:[%s5985_s2] sm:$0xf]  ;;  %3841 = vset.pattern.permute.xlu0 %v4133_v3 }
  0x10   : > { %s6312_s27 = smov (!%p359_p4, %s4123_s27), 1  ;;  %3813 = vmatprep.subr.msk.bf16.mxu0 %vm498_vm0, %v441_v4  ;;  %v500_v5 = vsel %vm498_vm0, %v441_v4, 0  ;;  %3842 = vset.pattern.permute.xlu1 %v4133_v3 }
  0x11   : > { %3499 = vmatprep.subr.msk.bf16.mxu1 %vm498_vm0, %v3498_v1  ;;  %v941_v6 = vsel %vm498_vm0, %v3497_v2, 0  ;;  %3732 = vmatpush3.bf16.msra.mxu0 %v500_v5  ;;  %s4208_s13 = sshll.u32 %s6312_s27, 8 }
  0x12   : > { %947 = vmatpush1.bf16.msra.mxu1 %v941_v6  ;;  %s4214_s16 = scalar_lea.vmem %s5984_s1, %s4208_s13  ;;  %s4226_s19 = scalar_lea.vmem %s5983_s0, %s4208_s13 }
  0x13   : > { %v824_v7 = vld [vmem:[%s4214_s16] sm:$0xff]  ;;  %v825_v8 = vld [vmem:[%s4214_s16 + $0x8] sm:$0xff]  ;;  %v826_v10 = vld [vmem:[%s4214_s16 + $0x10] sm:$0xff]  ;;  %s5847_s27 = scalar_lea.vmem %s5991_s8, %s4208_s13 }
  0x14   : > { %v856_v9 = vpack.c.bf16 %v825_v8, %v824_v7  ;;  %v827_v11 = vld [vmem:[%s4214_s16 + $0x18] sm:$0xff]  ;;  %v828_v13 = vld [vmem:[%s4214_s16 + $0x20] sm:$0xff]  ;;  %v394_v15 = vld [vmem:[%s4226_s19 + $0x8] sm:$0xff] }
  0x15   : > { %v857_v12 = vpack.c.bf16 %v827_v11, %v826_v10  ;;  %v393_v14 = vld [vmem:[%s4226_s19] sm:$0xff]  ;;  %v395_v16 = vld [vmem:[%s4226_s19 + $0x10] sm:$0xff]  ;;  %v396_v17 = vld [vmem:[%s4226_s19 + $0x18] sm:$0xff] }
  0x16   : > { %3500 = vmatmul.mubr.msk.bf16.vlgmr.msra.gmra.mrb[0].mxu1 %vm449_vm1, %v856_v9  ;;  %v829_v18 = vld [vmem:[%s4214_s16 + $0x28] sm:$0xff]  ;;  %v425_v19 = vpack.c.bf16 %v394_v15, %v393_v14  ;;  %v426_v20 = vpack.c.bf16 %v396_v17, %v395_v16  ;;  %v397_v21 = vld [vmem:[%s4226_s19 + $0x20] sm:$0xff]  ;;  %v399_v25 = vld [vmem:[%s4226_s19 + $0x30] sm:$0xff] }
  0x17   : > { %988 = vmatprep.mubr.bf16.mxu1 %v4133_v3  ;;  %v398_v22 = vld [vmem:[%s4226_s19 + $0x28] sm:$0xff]  ;;  %v858_v24 = vpack.c.bf16 %v829_v18, %v828_v13  ;;  %v400_v26 = vld [vmem:[%s4226_s19 + $0x38] sm:$0xff]  ;;  %v401_v27 = vld [vmem:[%s4226_s19 + $0x40] sm:$0xff] }
  0x18   : > { %v427_v23 = vpack.c.bf16 %v398_v22, %v397_v21  ;;  %3733 = vmatprep.mubr.msk.bf16.mxu0 %vm449_vm1, %v425_v19  ;;  %v402_v28 = vld [vmem:[%s4226_s19 + $0x48] sm:$0xff]  ;;  %v830_v29 = vld [vmem:[%s4214_s16 + $0x30] sm:$0xff]  ;;  %v831_v30 = vld [vmem:[%s4214_s16 + $0x38] sm:$0xff]  ;;  %v428_v31 = vpack.c.bf16 %v400_v26, %v399_v25 }
  0x19   : > { %3734 = vmatmul.mubr.msk.bf16.vlgmr.msra.gmra.mrb[0].mxu0 %vm449_vm1, %v426_v20  ;;  %v429_v32 = vpack.c.bf16 %v402_v28, %v401_v27  ;;  %v859_v33 = vpack.c.bf16 %v831_v30, %v830_v29  ;;  %v403_v34 = vld [vmem:[%s4226_s19 + $0x50] sm:$0xff]  ;;  %v404_v35 = vld [vmem:[%s4226_s19 + $0x58] sm:$0xff]  ;;  %v405_v36 = vld [vmem:[%s4226_s19 + $0x60] sm:$0xff] }
  0x1a   : > { %3737 = vmatprep.mubr.msk.bf16.mxu0 %vm449_vm1, %v427_v23  ;;  %v406_v37 = vld [vmem:[%s4226_s19 + $0x68] sm:$0xff]  ;;  %v430_v38 = vpack.c.bf16 %v404_v35, %v403_v34  ;;  %v832_v39 = vld [vmem:[%s4214_s16 + $0x40] sm:$0xff]  ;;  %v407_v43 = vld [vmem:[%s4226_s19 + $0x70] sm:$0xff] }
  0x1b   : > { %v833_v40 = vld [vmem:[%s4214_s16 + $0x48] sm:$0xff]  ;;  %v431_v41 = vpack.c.bf16 %v406_v37, %v405_v36  ;;  %v408_v44 = vld [vmem:[%s4226_s19 + $0x78] sm:$0xff]  ;;  %v409_v45 = vld [vmem:[%s4226_s19 + $0x80] sm:$0xff] }
  0x1c   : > { %v860_v42 = vpack.c.bf16 %v833_v40, %v832_v39  ;;  %v410_v46 = vld [vmem:[%s4226_s19 + $0x88] sm:$0xff]  ;;  %v432_v47 = vpack.c.bf16 %v408_v44, %v407_v43  ;;  %v834_v48 = vld [vmem:[%s4214_s16 + $0x50] sm:$0xff]  ;;  %v835_v49 = vld [vmem:[%s4214_s16 + $0x58] sm:$0xff]  ;;  %v875_v40 = vlaneseq }
  0x1d   : > { %v433_v50 = vpack.c.bf16 %v410_v46, %v409_v45  ;;  %v861_v51 = vpack.c.bf16 %v835_v49, %v834_v48  ;;  %v411_v52 = vld [vmem:[%s4226_s19 + $0x90] sm:$0xff]  ;;  %v412_v53 = vld [vmem:[%s4226_s19 + $0x98] sm:$0xff]  ;;  %v413_v54 = vld [vmem:[%s4226_s19 + $0xa0] sm:$0xff] }
  0x1e   : > { %3501 = vmatmul.mubr.msk.bf16.gmra.mrb[4].mxu1 %vm449_vm1, %v857_v12  ;;  %v414_v55 = vld [vmem:[%s4226_s19 + $0xa8] sm:$0xff]  ;;  %v434_v56 = vpack.c.bf16 %v412_v53, %v411_v52  ;;  %v836_v57 = vld [vmem:[%s4214_s16 + $0x60] sm:$0xff]  ;;  %v415_v61 = vld [vmem:[%s4226_s19 + $0xb0] sm:$0xff] }
  0x1f   : > { %998 = vmatprep.mubr.bf16.mxu1 %v4133_v3  ;;  %v837_v58 = vld [vmem:[%s4214_s16 + $0x68] sm:$0xff]  ;;  %v435_v59 = vpack.c.bf16 %v414_v55, %v413_v54  ;;  %v416_v62 = vld [vmem:[%s4226_s19 + $0xb8] sm:$0xff]  ;;  %v838_v0 = vld [vmem:[%s4214_s16 + $0x70] sm:$0xff] }
  0x20   : > { %v862_v60 = vpack.c.bf16 %v837_v58, %v836_v57  ;;  %v436_v63 = vpack.c.bf16 %v416_v62, %v415_v61  ;;  %v839_v1 = vld [vmem:[%s4214_s16 + $0x78] sm:$0xff]  ;;  %v840_v4 = vld [vmem:[%s4214_s16 + $0x80] sm:$0xff]  ;;  %v841_v5 = vld [vmem:[%s4214_s16 + $0x88] sm:$0xff] }
  0x21   : > { %3738 = vmatmul.mubr.msk.bf16.gmra.mrb[4].mxu0 %vm449_vm1, %v428_v31  ;;  %v863_v2 = vpack.c.bf16 %v839_v1, %v838_v0  ;;  %v864_v6 = vpack.c.bf16 %v841_v5, %v840_v4  ;;  %v842_v7 = vld [vmem:[%s4214_s16 + $0x90] sm:$0xff]  ;;  %v843_v8 = vld [vmem:[%s4214_s16 + $0x98] sm:$0xff]  ;;  %v844_v10 = vld [vmem:[%s4214_s16 + $0xa0] sm:$0xff] }
  0x22   : > { %3741 = vmatprep.mubr.msk.bf16.mxu0 %vm449_vm1, %v429_v32  ;;  %v865_v9 = vpack.c.bf16 %v843_v8, %v842_v7  ;;  %v845_v11 = vld [vmem:[%s4214_s16 + $0xa8] sm:$0xff]  ;;  %v846_v13 = vld [vmem:[%s4214_s16 + $0xb0] sm:$0xff]  ;;  %v847_v14 = vld [vmem:[%s4214_s16 + $0xb8] sm:$0xff] }
  0x23   : > { %v866_v12 = vpack.c.bf16 %v845_v11, %v844_v10  ;;  %v867_v15 = vpack.c.bf16 %v847_v14, %v846_v13  ;;  %v848_v16 = vld [vmem:[%s4214_s16 + $0xc0] sm:$0xff]  ;;  %v849_v17 = vld [vmem:[%s4214_s16 + $0xc8] sm:$0xff]  ;;  %v419_v22 = vld [vmem:[%s4226_s19 + $0xd0] sm:$0xff] }
  0x24   : > { %v417_v18 = vld [vmem:[%s4226_s19 + $0xc0] sm:$0xff]  ;;  %v418_v19 = vld [vmem:[%s4226_s19 + $0xc8] sm:$0xff]  ;;  %v868_v20 = vpack.c.bf16 %v849_v17, %v848_v16  ;;  %v420_v23 = vld [vmem:[%s4226_s19 + $0xd8] sm:$0xff] }
  0x25   : > { %v437_v21 = vpack.c.bf16 %v418_v19, %v417_v18  ;;  %v850_v25 = vld [vmem:[%s4214_s16 + $0xd0] sm:$0xff]  ;;  %v851_v26 = vld [vmem:[%s4214_s16 + $0xd8] sm:$0xff]  ;;  %v852_v28 = vld [vmem:[%s4214_s16 + $0xe0] sm:$0xff] }
  0x26   : > { %3502 = vmatmul.mubr.msk.bf16.gmra.mrb[8].mxu1 %vm449_vm1, %v858_v24  ;;  %v438_v24 = vpack.c.bf16 %v420_v23, %v419_v22  ;;  %v869_v27 = vpack.c.bf16 %v851_v26, %v850_v25  ;;  %v853_v29 = vld [vmem:[%s4214_s16 + $0xe8] sm:$0xff]  ;;  %v421_v30 = vld [vmem:[%s4226_s19 + $0xe0] sm:$0xff]  ;;  %v423_v34 = vld [vmem:[%s4226_s19 + $0xf0] sm:$0xff] }
  0x27   : > { %1008 = vmatprep.mubr.bf16.mxu1 %v4133_v3  ;;  %v422_v31 = vld [vmem:[%s4226_s19 + $0xe8] sm:$0xff]  ;;  %v870_v32 = vpack.c.bf16 %v853_v29, %v852_v28  ;;  %v424_v35 = vld [vmem:[%s4226_s19 + $0xf8] sm:$0xff]  ;;  %v854_v37 = vld [vmem:[%s4214_s16 + $0xf0] sm:$0xff] }
  0x28   : > { %v440_v36 = vpack.c.bf16 %v424_v35, %v423_v34  ;;  %v873_v43 = vld [vmem:[%s5988_s5] sm:$0x3] }
  0x29   : > { %3742 = vmatmul.mubr.msk.bf16.gmra.mrb[8].mxu0 %vm449_vm1, %v430_v38  ;;  %v855_v38 = vld [vmem:[%s4214_s16 + $0xf8] sm:$0xff] }
  0x2a   : > { %3745 = vmatprep.mubr.msk.bf16.mxu0 %vm449_vm1, %v431_v41  ;;  %v871_v39 = vpack.c.bf16 %v855_v38, %v854_v37  ;;  %v876_v41 = vshrl.u32 %v875_v40, 7 }
  0x2c   : > { %v881_v44 = vsub.s32 1, %v876_v41 }
  0x2e   : > { %3503 = vmatmul.mubr.msk.bf16.gmra.mrb[12].mxu1 %vm449_vm1, %v859_v33  ;;  %v439_v33 = vpack.c.bf16 %v422_v31, %v421_v30 }
  0x2f   : > { %1018 = vmatprep.mubr.bf16.mxu1 %v4133_v3 }
  0x31   : > { %3746 = vmatmul.mubr.msk.bf16.gmra.mrb[12].mxu0 %vm449_vm1, %v432_v47  ;;  %v4338_v47 = vrot.slane %v873_v43, %v881_v44 }
  0x32   : > { %3749 = vmatprep.mubr.msk.bf16.mxu0 %vm449_vm1, %v433_v50 }
  0x36   : > { %3504 = vmatmul.mubr.msk.bf16.gmra.mrb[16].mxu1 %vm449_vm1, %v860_v42  ;;  %v877_v42 = vsub.s32 0, %v876_v41 }
  0x37   : > { %1028 = vmatprep.mubr.bf16.mxu1 %v4133_v3 }
  0x38   : > { %v4336_v45 = vrot.slane %v873_v43, %v877_v42 }
  0x39   : > { %3750 = vmatmul.mubr.msk.bf16.gmra.mrb[16].mxu0 %vm449_vm1, %v434_v56 }
  0x3a   : > { %3753 = vmatprep.mubr.msk.bf16.mxu0 %vm449_vm1, %v435_v59  ;;  %v4359_v59 = vld [vmem:[%s5986_s3] ss:$0 sm:$0xff] }
  0x3e   : > { %3505 = vmatmul.mubr.msk.bf16.gmra.mrb[20].mxu1 %vm449_vm1, %v861_v51 }
  0x3f   : > { %1038 = vmatprep.mubr.bf16.mxu1 %v4133_v3 }
  0x41   : > { %3754 = vmatmul.mubr.msk.bf16.gmra.mrb[20].mxu0 %vm449_vm1, %v436_v63 }
  0x42   : > { %3757 = vmatprep.mubr.msk.bf16.mxu0 %vm449_vm1, %v437_v21 }
  0x46   : > { %3506 = vmatmul.mubr.msk.bf16.gmra.mrb[24].mxu1 %vm449_vm1, %v862_v60 }
  0x47   : > { %1048 = vmatprep.mubr.bf16.mxu1 %v4133_v3 }
  0x49   : > { %3758 = vmatmul.mubr.msk.bf16.gmra.mrb[24].mxu0 %vm449_vm1, %v438_v24 }
  0x4a   : > { %3761 = vmatprep.mubr.msk.bf16.mxu0 %vm449_vm1, %v439_v33 }
  0x4e   : > { %3507 = vmatmul.mubr.msk.bf16.gmra.mrb[28].mxu1 %vm449_vm1, %v863_v2 }
  0x4f   : > { %1058 = vmatprep.mubr.bf16.mxu1 %v4133_v3 }
  0x51   : > { %3762 = vmatmul.mubr.msk.bf16.gmra.mrb[28].mxu0 %vm449_vm1, %v440_v36 }
  0x56   : > { %3508 = vmatmul.mubr.msk.bf16.gmra.mrb[32].mxu1 %vm449_vm1, %v864_v6 }
  0x57   : > { %1068 = vmatprep.mubr.bf16.mxu1 %v4133_v3 }
  0x5e   : > { %3509 = vmatmul.mubr.msk.bf16.gmra.mrb[36].mxu1 %vm449_vm1, %v865_v9 }
  0x5f   : > { %1078 = vmatprep.mubr.bf16.mxu1 %v4133_v3 }
  0x66   : > { %3510 = vmatmul.mubr.msk.bf16.gmra.mrb[40].mxu1 %vm449_vm1, %v866_v12 }
  0x67   : > { %1088 = vmatprep.mubr.bf16.mxu1 %v4133_v3 }
  0x6e   : > { %3511 = vmatmul.mubr.msk.bf16.gmra.mrb[44].mxu1 %vm449_vm1, %v867_v15 }
  0x6f   : > { %1098 = vmatprep.mubr.bf16.mxu1 %v4133_v3 }
  0x76   : > { %3512 = vmatmul.mubr.msk.bf16.gmra.mrb[48].mxu1 %vm449_vm1, %v868_v20 }
  0x77   : > { %1108 = vmatprep.mubr.bf16.mxu1 %v4133_v3 }
  0x7e   : > { %3513 = vmatmul.mubr.msk.bf16.gmra.mrb[52].mxu1 %vm449_vm1, %v869_v27 }
  0x7f   : > { %1118 = vmatprep.mubr.bf16.mxu1 %v4133_v3 }
  0x86   : > { %3514 = vmatmul.mubr.msk.bf16.gmra.mrb[56].mxu1 %vm449_vm1, %v870_v32 }
  0x87   : > { %1128 = vmatprep.mubr.bf16.mxu1 %v4133_v3 }
  0x8e   : > { %3515 = vmatmul.mubr.msk.bf16.gmra.mrb[60].mxu1 %vm449_vm1, %v871_v39 }
  0xe9   : > { %v980_v46 = vpop.f32.mrb[0].mxu1 }
  0xea   : > { %v982_v48 = vpop.f32.mrb[1].mxu1  ;;  %v4341_v49 = vadd.f32 %v980_v46, %v4336_v45 }
  0xeb   : > { %v984_v3 = vpop.f32.mrb[2].mxu1  ;;  %v4347_v52 = vadd.f32 %v982_v48, %v4338_v47 }
  0xec   : > { %v4344_v50 = vadd.f32 %v984_v3, %v4336_v45  ;;  %v986_v51 = vpop.f32.mrb[3].mxu1  ;;  %v3735_v1 = vpop.f32.mrb[0].mxu0 }
  0xed   : > { %v4350_v53 = vadd.f32 %v986_v51, %v4338_v47  ;;  %v545_v4 = vadd.f32 %v3735_v1, %v4359_v59  ;;  %v536_v5 = vpop.f32.mrb[1].mxu0 }
  0xee   : > { %v1139_v54 = vpack.c.bf16 %v4344_v50, %v4341_v49  ;;  %v537_v7 = vadd.f32 %v4359_v59, %v536_v5  ;;  %v3736_v8 = vpop.f32.mrb[2].mxu0 }
  0xef   : > { %v1155_v55 = vpack.c.bf16 %v4350_v53, %v4347_v52  ;;  %v665_v9 = vmul.f32 10.0, %v545_v4  ;;  %v548_v10 = vadd.f32 %v3736_v8, %v4359_v59  ;;  %v539_v11 = vpop.f32.mrb[3].mxu0 }
  0xf0   : > { %v663_v13 = vmul.f32 10.0, %v537_v7  ;;  %v540_v14 = vadd.f32 %v4359_v59, %v539_v11 }
  0xf1   : > { %v990_v56 = vpop.f32.mrb[4].mxu1  ;;  %v666_v16 = vmul.f32 10.0, %v548_v10 }
  0xf2   : > { %v992_v57 = vpop.f32.mrb[5].mxu1  ;;  %v4362_v60 = vadd.f32 %v990_v56, %v4336_v45  ;;  %v664_v18 = vmul.f32 10.0, %v540_v14 }
  0xf3   : > { %v994_v58 = vpop.f32.mrb[6].mxu1  ;;  %v4368_v63 = vadd.f32 %v992_v57, %v4338_v47  ;;  %v4387_v22 = vpack.c.bf16 %v666_v16, %v665_v9 }
  0xf4   : > { %v4365_v61 = vadd.f32 %v994_v58, %v4336_v45  ;;  %v996_v62 = vpop.f32.mrb[7].mxu1  ;;  %v4395_v25 = vpack.c.bf16 %v664_v18, %v663_v13  ;;  %v3739_v26 = vpop.f32.mrb[4].mxu0 }
  0xf5   : > { %v4371_v0 = vadd.f32 %v996_v62, %v4338_v47  ;;  %v561_v28 = vadd.f32 %v3739_v26, %v4359_v59  ;;  %v552_v29 = vpop.f32.mrb[5].mxu0 }
  0xf6   : > { %v1140_v2 = vpack.c.bf16 %v4365_v61, %v4362_v60  ;;  %3563 = vmatprep.mubr.bf16.mxu0 %v4395_v25  ;;  %v553_v31 = vadd.f32 %v4359_v59, %v552_v29  ;;  %v3740_v32 = vpop.f32.mrb[6].mxu0 }
  0xf7   : > { %v1156_v6 = vpack.c.bf16 %v4371_v0, %v4368_v63  ;;  %v669_v33 = vmul.f32 10.0, %v561_v28  ;;  %v564_v34 = vadd.f32 %v3740_v32, %v4359_v59  ;;  %v555_v35 = vpop.f32.mrb[7].mxu0 }
  0xf8   : > { %v667_v37 = vmul.f32 10.0, %v553_v31  ;;  %v556_v38 = vadd.f32 %v4359_v59, %v555_v35 }
  0xf9   : > { %v1000_v12 = vpop.f32.mrb[8].mxu1  ;;  %v670_v40 = vmul.f32 10.0, %v564_v34 }
  0xfa   : > { %v1002_v15 = vpop.f32.mrb[9].mxu1  ;;  %v4382_v19 = vadd.f32 %v1000_v12, %v4336_v45  ;;  %v668_v42 = vmul.f32 10.0, %v556_v38 }
  0xfb   : > { %v1004_v17 = vpop.f32.mrb[10].mxu1  ;;  %v4390_v23 = vadd.f32 %v1002_v15, %v4338_v47  ;;  %v4412_v48 = vpack.c.bf16 %v670_v40, %v669_v33 }
  0xfc   : > { %v4385_v20 = vadd.f32 %v1004_v17, %v4336_v45  ;;  %v1006_v21 = vpop.f32.mrb[11].mxu1  ;;  %v4420_v56 = vpack.c.bf16 %v668_v42, %v667_v37  ;;  %v3743_v57 = vpop.f32.mrb[8].mxu0 }
  0xfd   : > { %v4393_v24 = vadd.f32 %v1006_v21, %v4338_v47  ;;  %v577_v62 = vadd.f32 %v3743_v57, %v4359_v59  ;;  %v568_v1 = vpop.f32.mrb[9].mxu0 }
  0xfe   : > { %v569_v5 = vadd.f32 %v4359_v59, %v568_v1  ;;  %v3744_v7 = vpop.f32.mrb[10].mxu0  ;;  %v6081_v61 = vpack.c.bf16 %v4385_v20, %v4382_v19 }
  0xff   : > { %v673_v8 = vmul.f32 10.0, %v577_v62  ;;  %v580_v9 = vadd.f32 %v3744_v7, %v4359_v59  ;;  %v571_v10 = vpop.f32.mrb[11].mxu0  ;;  %v6082_v0 = vpack.c.bf16 %v4393_v24, %v4390_v23 }
 0x100   : > { %v671_v12 = vmul.f32 10.0, %v569_v5  ;;  %v572_v13 = vadd.f32 %v4359_v59, %v571_v10 }
 0x101   : > { %v1010_v36 = vpop.f32.mrb[12].mxu1  ;;  %v674_v15 = vmul.f32 10.0, %v580_v9 }
 0x102   : > { %v1012_v39 = vpop.f32.mrb[13].mxu1  ;;  %v4407_v43 = vadd.f32 %v1010_v36, %v4336_v45  ;;  %v672_v17 = vmul.f32 10.0, %v572_v13 }
 0x103   : > { %v1014_v41 = vpop.f32.mrb[14].mxu1  ;;  %v4415_v3 = vadd.f32 %v1012_v39, %v4338_v47  ;;  %v4436_v28 = vpack.c.bf16 %v674_v15, %v673_v8 }
 0x104   : > { %v4410_v44 = vadd.f32 %v1014_v41, %v4336_v45  ;;  %v1016_v46 = vpop.f32.mrb[15].mxu1  ;;  %v4444_v32 = vpack.c.bf16 %v672_v17, %v671_v12  ;;  %v3747_v36 = vpop.f32.mrb[12].mxu0 }
 0x105   : > { %v4418_v51 = vadd.f32 %v1016_v46, %v4338_v47  ;;  %v593_v62 = vadd.f32 %v3747_v36, %v4359_v59  ;;  %v584_v5 = vpop.f32.mrb[13].mxu0 }
 0x106   : > { %v585_v8 = vadd.f32 %v4359_v59, %v584_v5  ;;  %v3748_v9 = vpop.f32.mrb[14].mxu0 }
 0x107   : > { %v596_v12 = vadd.f32 %v3748_v9, %v4359_v59  ;;  %v587_v13 = vpop.f32.mrb[15].mxu0 }
 0x108   : > { %v675_v15 = vmul.f32 10.0, %v585_v8 }
 0x109   : > { %v1020_v11 = vpop.f32.mrb[16].mxu1  ;;  %v678_v36 = vmul.f32 10.0, %v596_v12 }
 0x10a   : > { %v1022_v14 = vpop.f32.mrb[17].mxu1  ;;  %v4431_v18 = vadd.f32 %v1020_v11, %v4336_v45  ;;  %v677_v11 = vmul.f32 10.0, %v593_v62 }
 0x10b   : > { %v1024_v16 = vpop.f32.mrb[18].mxu1  ;;  %v4439_v29 = vadd.f32 %v1022_v14, %v4338_v47 }
 0x10c   : > { %v4434_v21 = vadd.f32 %v1024_v16, %v4336_v45  ;;  %v1026_v26 = vpop.f32.mrb[19].mxu1  ;;  %v588_v16 = vadd.f32 %v4359_v59, %v587_v13  ;;  %v4484_v5 = vpack.c.bf16 %v678_v36, %v677_v11  ;;  %v3751_v9 = vpop.f32.mrb[16].mxu0 }
 0x10d   : > { %v4442_v31 = vadd.f32 %v1026_v26, %v4338_v47  ;;  %v609_v12 = vadd.f32 %v3751_v9, %v4359_v59 }
 0x10f   : > { %v681_v57 = vmul.f32 10.0, %v609_v12 }
 0x111   : > { %v1030_v35 = vpop.f32.mrb[20].mxu1 }
 0x112   : > { %v1032_v37 = vpop.f32.mrb[21].mxu1  ;;  %v4451_v39 = vadd.f32 %v1030_v35, %v4336_v45 }
 0x113   : > { %v1034_v38 = vpop.f32.mrb[22].mxu1  ;;  %v4457_v42 = vadd.f32 %v1032_v37, %v4338_v47 }
 0x114   : > { %v4454_v40 = vadd.f32 %v1034_v38, %v4336_v45  ;;  %v1036_v41 = vpop.f32.mrb[23].mxu1 }
 0x115   : > { %v4460_v46 = vadd.f32 %v1036_v41, %v4338_v47  ;;  %v676_v41 = vmul.f32 10.0, %v588_v16 }
 0x117   : > { %v4488_v8 = vpack.c.bf16 %v676_v41, %v675_v15 }
 0x119   : > { %v1040_v7 = vpop.f32.mrb[24].mxu1 }
 0x11a   : > { %v1042_v10 = vpop.f32.mrb[25].mxu1  ;;  %v4471_v17 = vadd.f32 %v1040_v7, %v4336_v45 }
 0x11b   : > { %v1044_v14 = vpop.f32.mrb[26].mxu1  ;;  %v4477_v37 = vadd.f32 %v1042_v10, %v4338_v47  ;;  %v600_v10 = vpop.f32.mrb[17].mxu0 }
 0x11c   : > { %v4474_v26 = vadd.f32 %v1044_v14, %v4336_v45  ;;  %v1046_v35 = vpop.f32.mrb[27].mxu1  ;;  %v3752_v1 = vpop.f32.mrb[18].mxu0 }
 0x11d   : > { %v4480_v38 = vadd.f32 %v1046_v35, %v4338_v47  ;;  %v601_v35 = vadd.f32 %v4359_v59, %v600_v10  ;;  %v612_v62 = vadd.f32 %v3752_v1, %v4359_v59  ;;  %v603_v11 = vpop.f32.mrb[19].mxu0 }
 0x11e   : > { %v604_v9 = vadd.f32 %v4359_v59, %v603_v11 }
 0x11f   : > { %v679_v7 = vmul.f32 10.0, %v601_v35  ;;  %v682_v12 = vmul.f32 10.0, %v612_v62 }
 0x120   : > { %v680_v33 = vmul.f32 10.0, %v604_v9 }
 0x121   : > { %v1050_v13 = vpop.f32.mrb[28].mxu1 }
 0x122   : > { %v1052_v14 = vpop.f32.mrb[29].mxu1  ;;  %v4494_v36 = vadd.f32 %v1050_v13, %v4336_v45  ;;  %v4512_v4 = vpack.c.bf16 %v680_v33, %v679_v7  ;;  %v3755_v13 = vpop.f32.mrb[20].mxu0 }
 0x123   : > { %v1054_v16 = vpop.f32.mrb[30].mxu1  ;;  %v4501_v34 = vadd.f32 %v1052_v14, %v4338_v47  ;;  %v625_v33 = vadd.f32 %v3755_v13, %v4359_v59  ;;  %v616_v7 = vpop.f32.mrb[21].mxu0 }
 0x124   : > { %v4497_v15 = vadd.f32 %v1054_v16, %v4336_v45  ;;  %v1056_v41 = vpop.f32.mrb[31].mxu1  ;;  %v4510_v16 = vpack.c.bf16 %v682_v12, %v681_v57 }
 0x125   : > { %v4504_v10 = vadd.f32 %v1056_v41, %v4338_v47 }
 0x129   : > { %v1060_v35 = vpop.f32.mrb[32].mxu1 }
 0x12a   : > { %v1062_v11 = vpop.f32.mrb[33].mxu1  ;;  %v1061_v14 = vadd.f32 %v1060_v35, %v4336_v45  ;;  %v685_v35 = vmul.f32 10.0, %v625_v33 }
 0x12b   : > { %v1064_v58 = vpop.f32.mrb[34].mxu1  ;;  %v1063_v62 = vadd.f32 %v1062_v11, %v4338_v47 }
 0x12c   : > { %v1065_v41 = vadd.f32 %v1064_v58, %v4336_v45  ;;  %v1066_v30 = vpop.f32.mrb[35].mxu1  ;;  %v3756_v58 = vpop.f32.mrb[22].mxu0 }
 0x12d   : > { %v1067_v1 = vadd.f32 %v1066_v30, %v4338_v47  ;;  %v617_v30 = vadd.f32 %v4359_v59, %v616_v7  ;;  %v628_v11 = vadd.f32 %v3756_v58, %v4359_v59 }
 0x12e   : > { %v1147_v9 = vpack.c.bf16 %v1065_v41, %v1061_v14  ;;  %v619_v14 = vpop.f32.mrb[23].mxu0 }
 0x12f   : > { %v1163_v27 = vpack.c.bf16 %v1067_v1, %v1063_v62  ;;  %v620_v13 = vadd.f32 %v4359_v59, %v619_v14  ;;  %v686_v53 = vmul.f32 10.0, %v628_v11  ;;  %v3759_v19 = vpop.f32.mrb[24].mxu0 }
 0x130   : > { %3547 = vmatprep.subr.bf16.mxu0 %v1147_v9  ;;  %v641_v23 = vadd.f32 %v3759_v19, %v4359_v59  ;;  %v632_v24 = vpop.f32.mrb[25].mxu0 }
 0x131   : > { %v1070_v57 = vpop.f32.mrb[36].mxu1  ;;  %3548 = vmatpush3.bf16.xpose.msra.mxu0 %v1139_v54  ;;  %3595 = vmatprep.subr.bf16.mxu1 %v1163_v27  ;;  %v683_v27 = vmul.f32 10.0, %v617_v30  ;;  %v684_v62 = vmul.f32 10.0, %v620_v13  ;;  %v4532_v33 = vpack.c.bf16 %v686_v53, %v685_v35 }
 0x132   : > { %v1072_v12 = vpop.f32.mrb[37].mxu1  ;;  %3596 = vmatpush3.bf16.msra.mxu1 %v1155_v55  ;;  %v1071_v49 = vadd.f32 %v1070_v57, %v4336_v45 }
 0x133   : > { %v1074_v1 = vpop.f32.mrb[38].mxu1  ;;  %v1073_v41 = vadd.f32 %v1072_v12, %v4338_v47  ;;  %v4534_v7 = vpack.c.bf16 %v684_v62, %v683_v27 }
 0x134   : > { %v1075_v50 = vadd.f32 %v1074_v1, %v4336_v45  ;;  %v1076_v54 = vpop.f32.mrb[39].mxu1 }
 0x135   : > { %v1077_v52 = vadd.f32 %v1076_v54, %v4338_v47 }
 0x136   : > { %v1148_v55 = vpack.c.bf16 %v1075_v50, %v1071_v49 }
 0x137   : > { %v1164_v9 = vpack.c.bf16 %v1077_v52, %v1073_v41 }
 0x138   : > { %3549 = vmatprep.subr.bf16.mxu0 %v1148_v55  ;;  %v6083_v55 = vpack.c.bf16 %v4410_v44, %v4407_v43 }
 0x139   : > { %v1080_v57 = vpop.f32.mrb[40].mxu1  ;;  %3550 = vmatpush3.bf16.xpose.msra.mxu0 %v1140_v2  ;;  %3597 = vmatprep.subr.bf16.mxu1 %v1164_v9  ;;  %v6084_v9 = vpack.c.bf16 %v4418_v51, %v4415_v3 }
 0x13a   : > { %v1082_v30 = vpop.f32.mrb[41].mxu1  ;;  %3598 = vmatpush3.bf16.msra.mxu1 %v1156_v6  ;;  %v1081_v58 = vadd.f32 %v1080_v57, %v4336_v45  ;;  %v633_v57 = vadd.f32 %v4359_v59, %v632_v24 }
 0x13b   : > { %v1084_v12 = vpop.f32.mrb[42].mxu1  ;;  %v1083_v11 = vadd.f32 %v1082_v30, %v4338_v47  ;;  %v3760_v30 = vpop.f32.mrb[26].mxu0 }
 0x13c   : > { %v1085_v1 = vadd.f32 %v1084_v12, %v4336_v45  ;;  %v1086_v35 = vpop.f32.mrb[43].mxu1 }
 0x13d   : > { %v1087_v14 = vadd.f32 %v1086_v35, %v4338_v47  ;;  %v635_v35 = vpop.f32.mrb[27].mxu0 }
 0x13e   : > { %v1149_v49 = vpack.c.bf16 %v1085_v1, %v1081_v58  ;;  %v689_v58 = vmul.f32 10.0, %v641_v23  ;;  %v644_v1 = vadd.f32 %v3760_v30, %v4359_v59 }
 0x13f   : > { %v1165_v50 = vpack.c.bf16 %v1087_v14, %v1083_v11  ;;  %v687_v14 = vmul.f32 10.0, %v633_v57  ;;  %v6088_v57 = vpack.c.bf16 %v4460_v46, %v4457_v42 }
 0x140   : > { %3551 = vmatprep.subr.bf16.mxu0 %v1149_v49  ;;  %v636_v49 = vadd.f32 %v4359_v59, %v635_v35  ;;  %v690_v51 = vmul.f32 10.0, %v644_v1 }
 0x141   : > { %v1090_v60 = vpop.f32.mrb[44].mxu1  ;;  %3552 = vmatpush3.bf16.xpose.msra.mxu0 %v6081_v61  ;;  %3599 = vmatprep.subr.bf16.mxu1 %v1165_v50 }
 0x142   : > { %v1092_v63 = vpop.f32.mrb[45].mxu1  ;;  %3600 = vmatpush3.bf16.msra.mxu1 %v6082_v0  ;;  %v1091_v6 = vadd.f32 %v1090_v60, %v4336_v45  ;;  %v688_v61 = vmul.f32 10.0, %v636_v49  ;;  %v4570_v0 = vpack.c.bf16 %v690_v51, %v689_v58 }
 0x143   : > { %v1094_v2 = vpop.f32.mrb[46].mxu1  ;;  %v1093_v13 = vadd.f32 %v1092_v63, %v4338_v47 }
 0x144   : > { %v1095_v54 = vadd.f32 %v1094_v2, %v4336_v45  ;;  %v1096_v27 = vpop.f32.mrb[47].mxu1  ;;  %v4572_v2 = vpack.c.bf16 %v688_v61, %v687_v14 }
 0x145   : > { %v1097_v41 = vadd.f32 %v1096_v27, %v4338_v47 }
 0x146   : > { %v1150_v52 = vpack.c.bf16 %v1095_v54, %v1091_v6  ;;  %v6085_v54 = vpack.c.bf16 %v4434_v21, %v4431_v18  ;;  %v3763_v18 = vpop.f32.mrb[28].mxu0 }
 0x147   : > { %v1166_v53 = vpack.c.bf16 %v1097_v41, %v1093_v13  ;;  %v6086_v13 = vpack.c.bf16 %v4442_v31, %v4439_v29  ;;  %v657_v29 = vadd.f32 %v3763_v18, %v4359_v59  ;;  %v648_v31 = vpop.f32.mrb[29].mxu0 }
 0x148   : > { %3553 = vmatprep.subr.bf16.mxu0 %v1150_v52  ;;  %v649_v30 = vadd.f32 %v4359_v59, %v648_v31 }
 0x149   : > { %v1100_v20 = vpop.f32.mrb[48].mxu1  ;;  %3554 = vmatpush3.bf16.xpose.msra.mxu0 %v6083_v55  ;;  %3601 = vmatprep.subr.bf16.mxu1 %v1166_v53  ;;  %v693_v1 = vmul.f32 10.0, %v657_v29 }
 0x14a   : > { %v1102_v62 = vpop.f32.mrb[49].mxu1  ;;  %3602 = vmatpush3.bf16.msra.mxu1 %v6084_v9  ;;  %v1101_v43 = vadd.f32 %v1100_v20, %v4336_v45 }
 0x14b   : > { %v1104_v12 = vpop.f32.mrb[50].mxu1  ;;  %v1103_v50 = vadd.f32 %v1102_v62, %v4338_v47  ;;  %v6087_v62 = vpack.c.bf16 %v4454_v40, %v4451_v39 }
 0x14c   : > { %v1105_v44 = vadd.f32 %v1104_v12, %v4336_v45  ;;  %v1106_v11 = vpop.f32.mrb[51].mxu1  ;;  %v3764_v12 = vpop.f32.mrb[30].mxu0 }
 0x14d   : > { %v1107_v3 = vadd.f32 %v1106_v11, %v4338_v47  ;;  %v660_v35 = vadd.f32 %v3764_v12, %v4359_v59  ;;  %v691_v11 = vmul.f32 10.0, %v649_v30 }
 0x14e   : > { %v1151_v60 = vpack.c.bf16 %v1105_v44, %v1101_v43  ;;  %v651_v43 = vpop.f32.mrb[31].mxu0 }
 0x14f   : > { %v1167_v63 = vpack.c.bf16 %v1107_v3, %v1103_v50  ;;  %v652_v14 = vadd.f32 %v4359_v59, %v651_v43  ;;  %v694_v46 = vmul.f32 10.0, %v660_v35  ;;  %v6090_v59 = vpack.c.bf16 %v4480_v38, %v4477_v37 }
 0x150   : > { %3555 = vmatprep.subr.bf16.mxu0 %v1151_v60 }
 0x151   : > { %v1110_v6 = vpop.f32.mrb[52].mxu1  ;;  %3556 = vmatpush3.bf16.xpose.msra.mxu0 %v6085_v54  ;;  %3603 = vmatprep.subr.bf16.mxu1 %v1167_v63  ;;  %v692_v3 = vmul.f32 10.0, %v652_v14  ;;  %v710_v60 = vpack.c.bf16 %v694_v46, %v693_v1 }
 0x152   : > { %v1112_v27 = vpop.f32.mrb[53].mxu1  ;;  %3604 = vmatpush3.bf16.msra.mxu1 %v6086_v13  ;;  %v1111_v52 = vadd.f32 %v1110_v6, %v4336_v45  ;;  %v6089_v6 = vpack.c.bf16 %v4474_v26, %v4471_v17  ;;  %v6091_v17 = vpack.c.bf16 %v4497_v15, %v4494_v36  ;;  %v6092_v26 = vpack.c.bf16 %v4504_v10, %v4501_v34 }
 0x153   : > { %v1114_v41 = vpop.f32.mrb[54].mxu1  ;;  %v1113_v20 = vadd.f32 %v1112_v27, %v4338_v47  ;;  %v709_v61 = vpack.c.bf16 %v692_v3, %v691_v11 }
 0x154   : > { %v1115_v53 = vadd.f32 %v1114_v41, %v4336_v45  ;;  %v1116_v19 = vpop.f32.mrb[55].mxu1 }
 0x155   : > { %v1117_v55 = vadd.f32 %v1116_v19, %v4338_v47 }
 0x156   : > { %v1152_v23 = vpack.c.bf16 %v1115_v53, %v1111_v52 }
 0x157   : > { %v1168_v24 = vpack.c.bf16 %v1117_v55, %v1113_v20 }
 0x158   : > { %3557 = vmatprep.subr.bf16.mxu0 %v1152_v23 }
 0x159   : > { %v1120_v21 = vpop.f32.mrb[56].mxu1  ;;  %3558 = vmatpush3.bf16.xpose.msra.mxu0 %v6087_v62  ;;  %3605 = vmatprep.subr.bf16.mxu1 %v1168_v24 }
 0x15a   : > { %v1122_v9 = vpop.f32.mrb[57].mxu1  ;;  %3606 = vmatpush3.bf16.msra.mxu1 %v6088_v57  ;;  %v1121_v39 = vadd.f32 %v1120_v21, %v4336_v45  ;;  %v4135_v21 = vmov 0.0  }
 0x15b   : > { %v1124_v58 = vpop.f32.mrb[58].mxu1  ;;  %v1123_v49 = vadd.f32 %v1122_v9, %v4338_v47  ;;  %761 = vst.msk [vmem:[#allocation4 + $0x8] sm:$0xff] %vm727_vm2, %v4135_v21  ;;  %760 = vst.msk [vmem:[#allocation4] sm:$0xff] %vm727_vm2, %v4135_v21 }
 0x15c   : > { %v1125_v40 = vadd.f32 %v1124_v58, %v4336_v45  ;;  %v1126_v44 = vpop.f32.mrb[59].mxu1  ;;  %762 = vst.msk [vmem:[#allocation4 + $0x10] sm:$0xff] %vm727_vm2, %v4135_v21  ;;  %763 = vst.msk [vmem:[#allocation4 + $0x18] sm:$0xff] %vm727_vm2, %v4135_v21 }
 0x15d   : > { %v1127_v42 = vadd.f32 %v1126_v44, %v4338_v47  ;;  %764 = vst.msk [vmem:[#allocation4 + $0x20] sm:$0xff] %vm727_vm2, %v4135_v21  ;;  %765 = vst.msk [vmem:[#allocation4 + $0x28] sm:$0xff] %vm727_vm2, %v4135_v21 }
 0x15e   : > { %v1153_v50 = vpack.c.bf16 %v1125_v40, %v1121_v39  ;;  %766 = vst.msk [vmem:[#allocation4 + $0x30] sm:$0xff] %vm727_vm2, %v4135_v21  ;;  %767 = vst.msk [vmem:[#allocation4 + $0x38] sm:$0xff] %vm727_vm2, %v4135_v21 }
 0x15f   : > { %v1169_v51 = vpack.c.bf16 %v1127_v42, %v1123_v49  ;;  %768 = vst.msk [vmem:[#allocation4 + $0x40] sm:$0xff] %vm727_vm2, %v4135_v21  ;;  %769 = vst.msk [vmem:[#allocation4 + $0x48] sm:$0xff] %vm727_vm2, %v4135_v21 }
 0x160   : > { %3559 = vmatprep.subr.bf16.mxu0 %v1153_v50  ;;  %770 = vst.msk [vmem:[#allocation4 + $0x50] sm:$0xff] %vm727_vm2, %v4135_v21  ;;  %771 = vst.msk [vmem:[#allocation4 + $0x58] sm:$0xff] %vm727_vm2, %v4135_v21 }
 0x161   : > { %v1130_v63 = vpop.f32.mrb[60].mxu1  ;;  %3560 = vmatpush3.bf16.xpose.msra.mxu0 %v6089_v6  ;;  %3607 = vmatprep.subr.bf16.mxu1 %v1169_v51  ;;  %772 = vst.msk [vmem:[#allocation4 + $0x60] sm:$0xff] %vm727_vm2, %v4135_v21  ;;  %773 = vst.msk [vmem:[#allocation4 + $0x68] sm:$0xff] %vm727_vm2, %v4135_v21 }
 0x162   : > { %v1132_v54 = vpop.f32.mrb[61].mxu1  ;;  %3608 = vmatpush3.bf16.msra.mxu1 %v6090_v59  ;;  %v1131_v13 = vadd.f32 %v1130_v63, %v4336_v45  ;;  %774 = vst.msk [vmem:[#allocation4 + $0x70] sm:$0xff] %vm727_vm2, %v4135_v21  ;;  %775 = vst.msk [vmem:[#allocation4 + $0x78] sm:$0xff] %vm727_vm2, %v4135_v21 }
 0x163   : > { %v1134_v27 = vpop.f32.mrb[62].mxu1  ;;  %v1133_v53 = vadd.f32 %v1132_v54, %v4338_v47  ;;  %776 = vst.msk [vmem:[#allocation4 + $0x80] sm:$0xff] %vm727_vm2, %v4135_v21  ;;  %777 = vst.msk [vmem:[#allocation4 + $0x88] sm:$0xff] %vm727_vm2, %v4135_v21 }
 0x164   : > { %v1135_v41 = vadd.f32 %v1134_v27, %v4336_v45  ;;  %v1136_v52 = vpop.f32.mrb[63].mxu1  ;;  %v4134_v45 = vmov -inf   ;;  %778 = vst.msk [vmem:[#allocation4 + $0x90] sm:$0xff] %vm727_vm2, %v4135_v21  ;;  %779 = vst.msk [vmem:[#allocation4 + $0x98] sm:$0xff] %vm727_vm2, %v4135_v21 }
 0x165   : > { %v1137_v19 = vadd.f32 %v1136_v52, %v4338_v47  ;;  %728 = vst.msk [vmem:[#allocation3] sm:$0xff] %vm727_vm2, %v4134_v45  ;;  %729 = vst.msk [vmem:[#allocation3 + $0x8] sm:$0xff] %vm727_vm2, %v4134_v45 }
 0x166   : > { %v1154_v20 = vpack.c.bf16 %v1135_v41, %v1131_v13  ;;  %730 = vst.msk [vmem:[#allocation3 + $0x10] sm:$0xff] %vm727_vm2, %v4134_v45  ;;  %731 = vst.msk [vmem:[#allocation3 + $0x18] sm:$0xff] %vm727_vm2, %v4134_v45 }
 0x167   : > { %v1170_v55 = vpack.c.bf16 %v1137_v19, %v1133_v53  ;;  %732 = vst.msk [vmem:[#allocation3 + $0x20] sm:$0xff] %vm727_vm2, %v4134_v45  ;;  %733 = vst.msk [vmem:[#allocation3 + $0x28] sm:$0xff] %vm727_vm2, %v4134_v45 }
 0x168   : > { %3561 = vmatprep.subr.bf16.mxu0 %v1154_v20  ;;  %734 = vst.msk [vmem:[#allocation3 + $0x30] sm:$0xff] %vm727_vm2, %v4134_v45  ;;  %735 = vst.msk [vmem:[#allocation3 + $0x38] sm:$0xff] %vm727_vm2, %v4134_v45 }
 0x169   : > { %3562 = vmatpush3.bf16.xpose.msra.mxu0 %v6091_v17  ;;  %3609 = vmatprep.subr.bf16.mxu1 %v1170_v55  ;;  %736 = vst.msk [vmem:[#allocation3 + $0x40] sm:$0xff] %vm727_vm2, %v4134_v45  ;;  %737 = vst.msk [vmem:[#allocation3 + $0x48] sm:$0xff] %vm727_vm2, %v4134_v45 }
 0x16a   : > { %3610 = vmatpush3.bf16.msra.mxu1 %v6092_v26  ;;  %738 = vst.msk [vmem:[#allocation3 + $0x50] sm:$0xff] %vm727_vm2, %v4134_v45  ;;  %739 = vst.msk [vmem:[#allocation3 + $0x58] sm:$0xff] %vm727_vm2, %v4134_v45 }
 0x16b   : > { %740 = vst.msk [vmem:[#allocation3 + $0x60] sm:$0xff] %vm727_vm2, %v4134_v45  ;;  %741 = vst.msk [vmem:[#allocation3 + $0x68] sm:$0xff] %vm727_vm2, %v4134_v45 }
 0x16c   : > { %742 = vst.msk [vmem:[#allocation3 + $0x70] sm:$0xff] %vm727_vm2, %v4134_v45  ;;  %743 = vst.msk [vmem:[#allocation3 + $0x78] sm:$0xff] %vm727_vm2, %v4134_v45 }
 0x16d   : > { %744 = vst.msk [vmem:[#allocation3 + $0x80] sm:$0xff] %vm727_vm2, %v4134_v45  ;;  %745 = vst.msk [vmem:[#allocation3 + $0x88] sm:$0xff] %vm727_vm2, %v4134_v45 }
 0x16e   : > { %746 = vst.msk [vmem:[#allocation3 + $0x90] sm:$0xff] %vm727_vm2, %v4134_v45  ;;  %747 = vst.msk [vmem:[#allocation3 + $0x98] sm:$0xff] %vm727_vm2, %v4134_v45 }
 0x16f   : > { %748 = vst.msk [vmem:[#allocation3 + $0xa0] sm:$0xff] %vm727_vm2, %v4134_v45  ;;  %749 = vst.msk [vmem:[#allocation3 + $0xa8] sm:$0xff] %vm727_vm2, %v4134_v45 }
 0x170   : > { %3564 = vmatmul.mubr.bf16.vlgmr.msra.gmra.mrb[32].mxu0 %v4395_v25  ;;  %750 = vst.msk [vmem:[#allocation3 + $0xb0] sm:$0xff] %vm727_vm2, %v4134_v45  ;;  %751 = vst.msk [vmem:[#allocation3 + $0xb8] sm:$0xff] %vm727_vm2, %v4134_v45 }
 0x171   : > { %3565 = vmatprep.mubr.bf16.mxu0 %v4387_v22  ;;  %752 = vst.msk [vmem:[#allocation3 + $0xc0] sm:$0xff] %vm727_vm2, %v4134_v45  ;;  %753 = vst.msk [vmem:[#allocation3 + $0xc8] sm:$0xff] %vm727_vm2, %v4134_v45 }
 0x172   : > { %754 = vst.msk [vmem:[#allocation3 + $0xd0] sm:$0xff] %vm727_vm2, %v4134_v45  ;;  %755 = vst.msk [vmem:[#allocation3 + $0xd8] sm:$0xff] %vm727_vm2, %v4134_v45 }
 0x173   : > { %756 = vst.msk [vmem:[#allocation3 + $0xe0] sm:$0xff] %vm727_vm2, %v4134_v45  ;;  %757 = vst.msk [vmem:[#allocation3 + $0xe8] sm:$0xff] %vm727_vm2, %v4134_v45 }
 0x174   : > { %758 = vst.msk [vmem:[#allocation3 + $0xf0] sm:$0xff] %vm727_vm2, %v4134_v45  ;;  %759 = vst.msk [vmem:[#allocation3 + $0xf8] sm:$0xff] %vm727_vm2, %v4134_v45 }
 0x175   : > { %780 = vst.msk [vmem:[#allocation4 + $0xa0] sm:$0xff] %vm727_vm2, %v4135_v21  ;;  %781 = vst.msk [vmem:[#allocation4 + $0xa8] sm:$0xff] %vm727_vm2, %v4135_v21 }
 0x176   : > { %782 = vst.msk [vmem:[#allocation4 + $0xb0] sm:$0xff] %vm727_vm2, %v4135_v21  ;;  %783 = vst.msk [vmem:[#allocation4 + $0xb8] sm:$0xff] %vm727_vm2, %v4135_v21 }
 0x177   : > { %784 = vst.msk [vmem:[#allocation4 + $0xc0] sm:$0xff] %vm727_vm2, %v4135_v21  ;;  %785 = vst.msk [vmem:[#allocation4 + $0xc8] sm:$0xff] %vm727_vm2, %v4135_v21 }
 0x178   : > { %3566 = vmatmul.mubr.bf16.gmra.mrb[36].mxu0 %v4387_v22  ;;  %786 = vst.msk [vmem:[#allocation4 + $0xd0] sm:$0xff] %vm727_vm2, %v4135_v21  ;;  %787 = vst.msk [vmem:[#allocation4 + $0xd8] sm:$0xff] %vm727_vm2, %v4135_v21 }
 0x179   : > { %3567 = vmatprep.mubr.bf16.mxu0 %v4420_v56  ;;  %788 = vst.msk [vmem:[#allocation4 + $0xe0] sm:$0xff] %vm727_vm2, %v4135_v21  ;;  %789 = vst.msk [vmem:[#allocation4 + $0xe8] sm:$0xff] %vm727_vm2, %v4135_v21 }
 0x17a   : > { %790 = vst.msk [vmem:[#allocation4 + $0xf0] sm:$0xff] %vm727_vm2, %v4135_v21  ;;  %791 = vst.msk [vmem:[#allocation4 + $0xf8] sm:$0xff] %vm727_vm2, %v4135_v21 }
 0x180   : > { %3568 = vmatmul.mubr.bf16.gmra.mrb[40].mxu0 %v4420_v56 }
 0x181   : > { %3569 = vmatprep.mubr.bf16.mxu0 %v4412_v48 }
 0x188   : > { %3570 = vmatmul.mubr.bf16.gmra.mrb[44].mxu0 %v4412_v48 }
 0x189   : > { %3571 = vmatprep.mubr.bf16.mxu0 %v4444_v32 }
 0x190   : > { %3572 = vmatmul.mubr.bf16.gmra.mrb[48].mxu0 %v4444_v32 }
 0x191   : > { %3573 = vmatprep.mubr.bf16.mxu0 %v4436_v28 }
 0x198   : > { %3574 = vmatmul.mubr.bf16.gmra.mrb[52].mxu0 %v4436_v28 }
 0x199   : > { %3575 = vmatprep.mubr.bf16.mxu0 %v4488_v8 }
 0x1a0   : > { %3576 = vmatmul.mubr.bf16.gmra.mrb[56].mxu0 %v4488_v8 }
 0x1a1   : > { %3577 = vmatprep.mubr.bf16.mxu0 %v4484_v5 }
 0x1a8   : > { %3578 = vmatmul.mubr.bf16.gmra.mrb[60].mxu0 %v4484_v5 }
 0x1a9   : > { %3579 = vmatprep.mubr.bf16.mxu0 %v4512_v4 }
 0x1b0   : > { %3580 = vmatmul.mubr.bf16.gmra.mrb[64].mxu0 %v4512_v4 }
 0x1b1   : > { %3581 = vmatprep.mubr.bf16.mxu0 %v4510_v16 }
 0x1b8   : > { %3582 = vmatmul.mubr.bf16.gmra.mrb[68].mxu0 %v4510_v16 }
 0x1b9   : > { %3583 = vmatprep.mubr.bf16.mxu0 %v4534_v7 }
 0x1c0   : > { %3584 = vmatmul.mubr.bf16.gmra.mrb[72].mxu0 %v4534_v7 }
 0x1c1   : > { %3585 = vmatprep.mubr.bf16.mxu0 %v4532_v33 }
 0x1c8   : > { %3586 = vmatmul.mubr.bf16.gmra.mrb[76].mxu0 %v4532_v33 }
 0x1c9   : > { %3587 = vmatprep.mubr.bf16.mxu0 %v4572_v2 }
 0x1d0   : > { %3588 = vmatmul.mubr.bf16.gmra.mrb[80].mxu0 %v4572_v2 }
 0x1d1   : > { %3589 = vmatprep.mubr.bf16.mxu0 %v4570_v0 }
 0x1d8   : > { %3590 = vmatmul.mubr.bf16.gmra.mrb[84].mxu0 %v4570_v0 }
 0x1d9   : > { %3591 = vmatprep.mubr.bf16.mxu0 %v709_v61 }
 0x1e0   : > { %3592 = vmatmul.mubr.bf16.gmra.mrb[88].mxu0 %v709_v61 }
 0x1e1   : > { %3593 = vmatprep.mubr.bf16.mxu0 %v710_v60 }
 0x1e8   : > { %3594 = vmatmul.mubr.bf16.gmra.mrb[92].mxu0 %v710_v60 }
 0x243   : > { %v4673_v47 = vpop.f32.mrb[32].mxu0 }
 0x244   : > { %v4675_v22 = vpop.f32.mrb[33].mxu0 }
 0x245   : > { %v4677_v25 = vpop.f32.mrb[34].mxu0  ;;  %v1412_v48 = vmax.f32 %v4673_v47, %v4675_v22 }
 0x246   : > { %v4681_v56 = vpop.f32.mrb[35].mxu0 }
 0x247   : > { %1413 = vmax.xlane.f32.xlu0 %v1412_v48  ;;  %v1415_v4 = vmax.f32 %v4677_v25, %v4681_v56 }
 0x24b   : > { %1416 = vmax.xlane.f32.xlu0 %v1415_v4  ;;  %v4685_v28 = vpop.f32.mrb[36].mxu0 }
 0x24c   : > { %v4687_v32 = vpop.f32.mrb[37].mxu0 }
 0x24d   : > { %v4689_v34 = vpop.f32.mrb[38].mxu0  ;;  %v1418_v37 = vmax.f32 %v4685_v28, %v4687_v32 }
 0x24e   : > { %v4693_v38 = vpop.f32.mrb[39].mxu0 }
 0x24f   : > { %1419 = vmax.xlane.f32.xlu1 %v1418_v37  ;;  %v1421_v5 = vmax.f32 %v4689_v34, %v4693_v38 }
 0x253   : > { %1422 = vmax.xlane.f32.xlu1 %v1421_v5  ;;  %v4697_v8 = vpop.f32.mrb[40].mxu0 }
 0x254   : > { %v4699_v36 = vpop.f32.mrb[41].mxu0 }
 0x255   : > { %v4701_v15 = vpop.f32.mrb[42].mxu0  ;;  %v1424_v10 = vmax.f32 %v4697_v8, %v4699_v36 }
 0x256   : > { %v4705_v16 = vpop.f32.mrb[43].mxu0 }
 0x257   : > { %1425 = vmax.xlane.f32.xlu0 %v1424_v10  ;;  %v1427_v33 = vmax.f32 %v4701_v15, %v4705_v16 }
 0x259   : > { %1428 = vmax.xlane.f32.xlu1 %v1427_v33 }
 0x25b   : > { %v4709_v7 = vpop.f32.mrb[44].mxu0 }
 0x25c   : > { %v4711_v0 = vpop.f32.mrb[45].mxu0 }
 0x25d   : > { %v4713_v2 = vpop.f32.mrb[46].mxu0  ;;  %v1430_v23 = vmax.f32 %v4709_v7, %v4711_v0 }
 0x25e   : > { %v4717_v24 = vpop.f32.mrb[47].mxu0 }
 0x25f   : > { %1431 = vmax.xlane.f32.xlu0 %v1430_v23  ;;  %v1433_v18 = vmax.f32 %v4713_v2, %v4717_v24 }
 0x261   : > { %1434 = vmax.xlane.f32.xlu1 %v1433_v18 }
 0x263   : > { %v4753_v62 = vpop.f32.mrb[48].mxu0 }
 0x264   : > { %v4755_v29 = vpop.f32.mrb[49].mxu0 }
 0x265   : > { %v4757_v31 = vpop.f32.mrb[50].mxu0  ;;  %v1436_v9 = vmax.f32 %v4753_v62, %v4755_v29 }
 0x266   : > { %v4761_v57 = vpop.f32.mrb[51].mxu0 }
 0x267   : > { %1437 = vmax.xlane.f32.xlu0 %v1436_v9  ;;  %v1439_v30 = vmax.f32 %v4757_v31, %v4761_v57 }
 0x269   : > { %1440 = vmax.xlane.f32.xlu1 %v1439_v30 }
 0x26b   : > { %v4765_v12 = vpop.f32.mrb[52].mxu0 }
 0x26c   : > { %v4767_v58 = vpop.f32.mrb[53].mxu0 }
 0x26d   : > { %v4769_v1 = vpop.f32.mrb[54].mxu0  ;;  %v1442_v35 = vmax.f32 %v4765_v12, %v4767_v58 }
 0x26e   : > { %v4773_v43 = vpop.f32.mrb[55].mxu0 }
 0x26f   : > { %1443 = vmax.xlane.f32.xlu0 %v1442_v35  ;;  %v1445_v39 = vmax.f32 %v4769_v1, %v4773_v43 }
 0x271   : > { %1446 = vmax.xlane.f32.xlu1 %v1445_v39 }
 0x273   : > { %v4777_v40 = vpop.f32.mrb[56].mxu0 }
 0x274   : > { %6093 = vst [vmem:[#allocation6_spill] sm:$0xff] %v4777_v40  ;;  %v4779_v44 = vpop.f32.mrb[57].mxu0 }
 0x275   : > { %6094 = vst [vmem:[#allocation7_spill] sm:$0xff] %v4779_v44  ;;  %v4781_v11 = vpop.f32.mrb[58].mxu0  ;;  %v1448_v14 = vmax.f32 %v4777_v40, %v4779_v44 }
 0x276   : > { %6095 = vst [vmem:[#allocation8_spill] sm:$0xff] %v4781_v11  ;;  %v4785_v49 = vpop.f32.mrb[59].mxu0 }
 0x277   : > { %6096 = vst [vmem:[#allocation9_spill] sm:$0xff] %v4785_v49  ;;  %1449 = vmax.xlane.f32.xlu0 %v1448_v14  ;;  %v1451_v42 = vmax.f32 %v4781_v11, %v4785_v49  ;;  %v5035_v49 = vld [vmem:[#allocation3 + $0x70] sm:$0xff]  ;;  %v5037_v11 = vld [vmem:[#allocation3 + $0x78] sm:$0xff] }
 0x278   : > { %6139 = vst [vmem:[#allocation52_spill] sm:$0xff] %v5035_v49  ;;  %6140 = vst [vmem:[#allocation53_spill] sm:$0xff] %v5037_v11 }
 0x279   : > { %1452 = vmax.xlane.f32.xlu1 %v1451_v42 }
 0x27b   : > { %v4789_v46 = vpop.f32.mrb[60].mxu0 }
 0x27c   : > { %6097 = vst [vmem:[#allocation10_spill] sm:$0xff] %v4789_v46  ;;  %v4791_v50 = vpop.f32.mrb[61].mxu0 }
 0x27d   : > { %6098 = vst [vmem:[#allocation11_spill] sm:$0xff] %v4791_v50  ;;  %v4793_v3 = vpop.f32.mrb[62].mxu0  ;;  %v1454_v51 = vmax.f32 %v4789_v46, %v4791_v50 }
 0x27e   : > { %6099 = vst [vmem:[#allocation12_spill] sm:$0xff] %v4793_v3  ;;  %v4797_v60 = vpop.f32.mrb[63].mxu0 }
 0x27f   : > { %6100 = vst [vmem:[#allocation13_spill] sm:$0xff] %v4797_v60  ;;  %1455 = vmax.xlane.f32.xlu0 %v1454_v51  ;;  %v1457_v61 = vmax.f32 %v4793_v3, %v4797_v60  ;;  %v5019_v60 = vld [vmem:[#allocation3 + $0x68] sm:$0xff] }
 0x280   : > { %6138 = vst [vmem:[#allocation51_spill] sm:$0xff] %v5019_v60 }
 0x281   : > { %1458 = vmax.xlane.f32.xlu1 %v1457_v61 }
 0x283   : > { %v4801_v63 = vpop.f32.mrb[64].mxu0 }
 0x284   : > { %6101 = vst [vmem:[#allocation14_spill] sm:$0xff] %v4801_v63  ;;  %v4803_v6 = vpop.f32.mrb[65].mxu0 }
 0x285   : > { %6102 = vst [vmem:[#allocation15_spill] sm:$0xff] %v4803_v6  ;;  %v4805_v54 = vpop.f32.mrb[66].mxu0  ;;  %v1460_v59 = vmax.f32 %v4801_v63, %v4803_v6 }
 0x286   : > { %6103 = vst [vmem:[#allocation16_spill] sm:$0xff] %v4805_v54  ;;  %v4809_v27 = vpop.f32.mrb[67].mxu0 }
 0x287   : > { %6104 = vst [vmem:[#allocation17_spill] sm:$0xff] %v4809_v27  ;;  %1461 = vmax.xlane.f32.xlu0 %v1460_v59  ;;  %v1463_v13 = vmax.f32 %v4805_v54, %v4809_v27  ;;  %v4999_v27 = vld [vmem:[#allocation3 + $0x58] sm:$0xff] }
 0x288   : > { %6134 = vst [vmem:[#allocation47_spill] sm:$0xff] %v4999_v27 }
 0x289   : > { %1464 = vmax.xlane.f32.xlu1 %v1463_v13 }
 0x28b   : > { %v4813_v41 = vpop.f32.mrb[68].mxu0 }
 0x28c   : > { %6105 = vst [vmem:[#allocation18_spill] sm:$0xff] %v4813_v41  ;;  %v4815_v52 = vpop.f32.mrb[69].mxu0 }
 0x28d   : > { %6106 = vst [vmem:[#allocation19_spill] sm:$0xff] %v4815_v52  ;;  %v4817_v53 = vpop.f32.mrb[70].mxu0  ;;  %v1466_v19 = vmax.f32 %v4813_v41, %v4815_v52  ;;  %v4979_v52 = vld [vmem:[#allocation3 + $0x48] sm:$0xff] }
 0x28e   : > { %6107 = vst [vmem:[#allocation20_spill] sm:$0xff] %v4817_v53  ;;  %v4821_v20 = vpop.f32.mrb[71].mxu0 }
 0x28f   : > { %6108 = vst [vmem:[#allocation21_spill] sm:$0xff] %v4821_v20  ;;  %1467 = vmax.xlane.f32.xlu0 %v1466_v19  ;;  %v1469_v55 = vmax.f32 %v4817_v53, %v4821_v20 }
 0x291   : > { %1470 = vmax.xlane.f32.xlu1 %v1469_v55 }
 0x293   : > { %v4825_v17 = vpop.f32.mrb[72].mxu0 }
 0x294   : > { %6109 = vst [vmem:[#allocation22_spill] sm:$0xff] %v4825_v17  ;;  %v4827_v26 = vpop.f32.mrb[73].mxu0 }
 0x295   : > { %6110 = vst [vmem:[#allocation23_spill] sm:$0xff] %v4827_v26  ;;  %v4829_v45 = vpop.f32.mrb[74].mxu0  ;;  %v1472_v48 = vmax.f32 %v4825_v17, %v4827_v26  ;;  %v4932_v17 = vld [vmem:[#allocation3 + $0x20] sm:$0xff] }
 0x296   : > { %6111 = vst [vmem:[#allocation24_spill] sm:$0xff] %v4829_v45  ;;  %v4833_v4 = vpop.f32.mrb[75].mxu0 }
 0x297   : > { %6112 = vst [vmem:[#allocation25_spill] sm:$0xff] %v4833_v4  ;;  %1473 = vmax.xlane.f32.xlu1 %v1472_v48  ;;  %v1475_v37 = vmax.f32 %v4829_v45, %v4833_v4 }
 0x299   : > { %1476 = vmax.xlane.f32.xlu0 %v1475_v37 }
 0x29b   : > { %v4837_v5 = vpop.f32.mrb[76].mxu0 }
 0x29c   : > { %6113 = vst [vmem:[#allocation26_spill] sm:$0xff] %v4837_v5  ;;  %v4839_v10 = vpop.f32.mrb[77].mxu0 }
 0x29d   : > { %6114 = vst [vmem:[#allocation27_spill] sm:$0xff] %v4839_v10  ;;  %v4841_v33 = vpop.f32.mrb[78].mxu0  ;;  %v1478_v23 = vmax.f32 %v4837_v5, %v4839_v10 }
 0x29e   : > { %6115 = vst [vmem:[#allocation28_spill] sm:$0xff] %v4841_v33  ;;  %v4845_v18 = vpop.f32.mrb[79].mxu0 }
 0x29f   : > { %6116 = vst [vmem:[#allocation29_spill] sm:$0xff] %v4845_v18  ;;  %1479 = vmax.xlane.f32.xlu1 %v1478_v23  ;;  %v1481_v21 = vmax.f32 %v4841_v33, %v4845_v18 }
 0x2a1   : > { %1482 = vmax.xlane.f32.xlu0 %v1481_v21 }
 0x2a3   : > { %v4849_v9 = vpop.f32.mrb[80].mxu0 }
 0x2a4   : > { %6117 = vst [vmem:[#allocation30_spill] sm:$0xff] %v4849_v9  ;;  %v4851_v30 = vpop.f32.mrb[81].mxu0 }
 0x2a5   : > { %6118 = vst [vmem:[#allocation31_spill] sm:$0xff] %v4851_v30  ;;  %v4853_v35 = vpop.f32.mrb[82].mxu0  ;;  %v1484_v39 = vmax.f32 %v4849_v9, %v4851_v30 }
 0x2a6   : > { %6119 = vst [vmem:[#allocation32_spill] sm:$0xff] %v4853_v35  ;;  %v4857_v14 = vpop.f32.mrb[83].mxu0 }
 0x2a7   : > { %6120 = vst [vmem:[#allocation33_spill] sm:$0xff] %v4857_v14  ;;  %1485 = vmax.xlane.f32.xlu0 %v1484_v39  ;;  %v1487_v42 = vmax.f32 %v4853_v35, %v4857_v14 }
 0x2a9   : > { %1488 = vmax.xlane.f32.xlu1 %v1487_v42 }
 0x2ab   : > { %v4861_v51 = vpop.f32.mrb[84].mxu0 }
 0x2ac   : > { %6121 = vst [vmem:[#allocation34_spill] sm:$0xff] %v4861_v51  ;;  %v4863_v61 = vpop.f32.mrb[85].mxu0 }
 0x2ad   : > { %6122 = vst [vmem:[#allocation35_spill] sm:$0xff] %v4863_v61  ;;  %v4865_v59 = vpop.f32.mrb[86].mxu0  ;;  %v1490_v13 = vmax.f32 %v4861_v51, %v4863_v61 }
 0x2ae   : > { %6123 = vst [vmem:[#allocation36_spill] sm:$0xff] %v4865_v59  ;;  %v4869_v19 = vpop.f32.mrb[87].mxu0 }
 0x2af   : > { %6124 = vst [vmem:[#allocation37_spill] sm:$0xff] %v4869_v19  ;;  %1491 = vmax.xlane.f32.xlu1 %v1490_v13  ;;  %v1493_v55 = vmax.f32 %v4865_v59, %v4869_v19  ;;  %v4939_v19 = vld [vmem:[#allocation3 + $0x28] sm:$0xff] }
 0x2b1   : > { %1494 = vmax.xlane.f32.xlu0 %v1493_v55 }
 0x2b3   : > { %v4873_v48 = vpop.f32.mrb[88].mxu0 }
 0x2b4   : > { %6125 = vst [vmem:[#allocation38_spill] sm:$0xff] %v4873_v48  ;;  %v4875_v37 = vpop.f32.mrb[89].mxu0 }
 0x2b5   : > { %6126 = vst [vmem:[#allocation39_spill] sm:$0xff] %v4875_v37  ;;  %v4877_v23 = vpop.f32.mrb[90].mxu0  ;;  %v1496_v21 = vmax.f32 %v4873_v48, %v4875_v37  ;;  %v4897_v48 = vld [vmem:[#allocation3] sm:$0xff]  ;;  %v4912_v37 = vld [vmem:[#allocation3 + $0x10] sm:$0xff] }
 0x2b6   : > { %6127 = vst [vmem:[#allocation40_spill] sm:$0xff] %v4877_v23  ;;  %v4881_v39 = vpop.f32.mrb[91].mxu0 }
 0x2b7   : > { %6128 = vst [vmem:[#allocation41_spill] sm:$0xff] %v4881_v39  ;;  %v1499_v42 = vmax.f32 %v4877_v23, %v4881_v39  ;;  %1497 = vmax.xlane.f32.xlu0 %v1496_v21  ;;  %v4922_v23 = vld [vmem:[#allocation3 + $0x18] sm:$0xff] }
 0x2b9   : > { %1500 = vmax.xlane.f32.xlu1 %v1499_v42  ;;  %v4902_v42 = vld [vmem:[#allocation3 + $0x8] sm:$0xff] }
 0x2bb   : > { %v4885_v13 = vpop.f32.mrb[92].mxu0 }
 0x2bc   : > { %6129 = vst [vmem:[#allocation42_spill] sm:$0xff] %v4885_v13  ;;  %v4887_v61 = vpop.f32.mrb[93].mxu0 }
 0x2bd   : > { %6130 = vst [vmem:[#allocation43_spill] sm:$0xff] %v4887_v61  ;;  %v4889_v55 = vpop.f32.mrb[94].mxu0 }
 0x2be   : > { %6131 = vst [vmem:[#allocation44_spill] sm:$0xff] %v4889_v55  ;;  %v4893_v30 = vpop.f32.mrb[95].mxu0 }
 0x2bf   : > { %6132 = vst [vmem:[#allocation45_spill] sm:$0xff] %v4893_v30 }
 0x2d4   : > { %v1414_v9 = vpop.xlane.xlu0 %1413 }
 0x2d5   : > { %v4900_v21 = vmax.f32 %v4897_v48, %v1414_v9 }
 0x2d7   : > { %2694 = vst.msk [vmem:[#allocation3] sm:$0xff] %vm727_vm2, %v4900_v21  ;;  %1638 = vperm.xlu0 %3841, %v4900_v21  }
 0x2d8   : > { %v1417_v51 = vpop.xlane.xlu0 %1416 }
 0x2d9   : > { %v4910_v5 = vmax.f32 %v4902_v42, %v1417_v51 }
 0x2db   : > { %2695 = vst.msk [vmem:[#allocation3 + $0x8] sm:$0xff] %vm727_vm2, %v4910_v5  ;;  %1643 = vperm.xlu1 %3842, %v4910_v5  }
 0x2dc   : > { %v1420_v10 = vpop.xlane.xlu1 %1419 }
 0x2dd   : > { %v4920_v39 = vmax.f32 %v4912_v37, %v1420_v10 }
 0x2df   : > { %2696 = vst.msk [vmem:[#allocation3 + $0x10] sm:$0xff] %vm727_vm2, %v4920_v39  ;;  %1648 = vperm.xlu1 %3842, %v4920_v39  }
 0x2e0   : > { %v1423_v9 = vpop.xlane.xlu1 %1422 }
 0x2e1   : > { %v4930_v26 = vmax.f32 %v4922_v23, %v1423_v9  ;;  %v4959_v9 = vld [vmem:[#allocation3 + $0x38] sm:$0xff] }
 0x2e3   : > { %2697 = vst.msk [vmem:[#allocation3 + $0x18] sm:$0xff] %vm727_vm2, %v4930_v26  ;;  %1653 = vperm.xlu1 %3842, %v4930_v26  }
 0x2e4   : > { %v1426_v51 = vpop.xlane.xlu0 %1425 }
 0x2e5   : > { %v4942_v59 = vmax.f32 %v4932_v17, %v1426_v51  ;;  %v4956_v51 = vld [vmem:[#allocation3 + $0x30] sm:$0xff] }
 0x2e6   : > { %v1429_v20 = vpop.xlane.xlu1 %1428 }
 0x2e7   : > { %2698 = vst.msk [vmem:[#allocation3 + $0x20] sm:$0xff] %vm727_vm2, %v4942_v59  ;;  %v4949_v10 = vmax.f32 %v4939_v19, %v1429_v20  ;;  %1658 = vperm.xlu0 %3841, %v4942_v59  }
 0x2e9   : > { %2699 = vst.msk [vmem:[#allocation3 + $0x28] sm:$0xff] %vm727_vm2, %v4949_v10 }
 0x2eb   : > { %1663 = vperm.xlu0 %3841, %v4949_v10  }
 0x2ec   : > { %v1432_v14 = vpop.xlane.xlu0 %1431 }
 0x2ed   : > { %v4962_v35 = vmax.f32 %v4956_v51, %v1432_v14  ;;  %v4976_v14 = vld [vmem:[#allocation3 + $0x40] sm:$0xff] }
 0x2ee   : > { %v1435_v20 = vpop.xlane.xlu1 %1434 }
 0x2ef   : > { %2700 = vst.msk [vmem:[#allocation3 + $0x30] sm:$0xff] %vm727_vm2, %v4962_v35  ;;  %v4969_v53 = vmax.f32 %v4959_v9, %v1435_v20  ;;  %1668 = vperm.xlu1 %3842, %v4962_v35  }
 0x2f1   : > { %2701 = vst.msk [vmem:[#allocation3 + $0x38] sm:$0xff] %vm727_vm2, %v4969_v53 }
 0x2f3   : > { %1673 = vperm.xlu1 %3842, %v4969_v53  }
 0x2f4   : > { %v1438_v18 = vpop.xlane.xlu0 %1437 }
 0x2f5   : > { %v4982_v33 = vmax.f32 %v4976_v14, %v1438_v18  ;;  %v4996_v18 = vld [vmem:[#allocation3 + $0x50] sm:$0xff] }
 0x2f6   : > { %v1441_v20 = vpop.xlane.xlu1 %1440  ;;  %6133 = vst [vmem:[#allocation46_spill] sm:$0xff] %v4996_v18 }
 0x2f7   : > { %2702 = vst.msk [vmem:[#allocation3 + $0x40] sm:$0xff] %vm727_vm2, %v4982_v33  ;;  %v4989_v41 = vmax.f32 %v4979_v52, %v1441_v20  ;;  %1678 = vperm.xlu0 %3841, %v4982_v33  }
 0x2f9   : > { %2703 = vst.msk [vmem:[#allocation3 + $0x48] sm:$0xff] %vm727_vm2, %v4989_v41 }
 0x2fb   : > { %1683 = vperm.xlu0 %3841, %v4989_v41  }
 0x2fc   : > { %v1444_v4 = vpop.xlane.xlu0 %1443 }
 0x2fd   : > { %v5002_v45 = vmax.f32 %v4996_v18, %v1444_v4  ;;  %v5016_v4 = vld [vmem:[#allocation3 + $0x60] sm:$0xff] }
 0x2fe   : > { %v1447_v20 = vpop.xlane.xlu1 %1446  ;;  %6137 = vst [vmem:[#allocation50_spill] sm:$0xff] %v5016_v4 }
 0x2ff   : > { %6135 = vst [vmem:[#allocation48_spill] sm:$0xff] %v5002_v45  ;;  %2704 = vst.msk [vmem:[#allocation3 + $0x50] sm:$0xff] %vm727_vm2, %v5002_v45  ;;  %v5009_v54 = vmax.f32 %v4999_v27, %v1447_v20  ;;  %1688 = vperm.xlu1 %3842, %v5002_v45  }
 0x301   : > { %6136 = vst [vmem:[#allocation49_spill] sm:$0xff] %v5009_v54  ;;  %2705 = vst.msk [vmem:[#allocation3 + $0x58] sm:$0xff] %vm727_vm2, %v5009_v54 }
 0x303   : > { %1693 = vperm.xlu1 %3842, %v5009_v54  }
 0x304   : > { %v1450_v6 = vpop.xlane.xlu0 %1449 }
 0x305   : > { %v5022_v63 = vmax.f32 %v5016_v4, %v1450_v6  ;;  %v5055_v4 = vld [vmem:[#allocation3 + $0x88] sm:$0xff] }
 0x306   : > { %v1453_v20 = vpop.xlane.xlu1 %1452  ;;  %6143 = vst [vmem:[#allocation56_spill] sm:$0xff] %v5055_v4 }
 0x307   : > { %2706 = vst.msk [vmem:[#allocation3 + $0x60] sm:$0xff] %vm727_vm2, %v5022_v63  ;;  %v5029_v3 = vmax.f32 %v5019_v60, %v1453_v20  ;;  %v5053_v60 = vld [vmem:[#allocation3 + $0x80] sm:$0xff] }
 0x308   : > { %6142 = vst [vmem:[#allocation55_spill] sm:$0xff] %v5053_v60 }
 0x309   : > { %2707 = vst.msk [vmem:[#allocation3 + $0x68] sm:$0xff] %vm727_vm2, %v5029_v3 }
 0x30c   : > { %v1456_v6 = vpop.xlane.xlu0 %1455 }
 0x30d   : > { %v5040_v44 = vmax.f32 %v5035_v49, %v1456_v6  ;;  %v5076_v49 = vld [vmem:[#allocation3 + $0x98] sm:$0xff] }
 0x30e   : > { %v1459_v50 = vpop.xlane.xlu1 %1458  ;;  %6147 = vst [vmem:[#allocation59_spill] sm:$0xff] %v5076_v49 }
 0x30f   : > { %6141 = vst [vmem:[#allocation54_spill] sm:$0xff] %v5040_v44  ;;  %2708 = vst.msk [vmem:[#allocation3 + $0x70] sm:$0xff] %vm727_vm2, %v5040_v44  ;;  %v5047_v20 = vmax.f32 %v5037_v11, %v1459_v50  ;;  %v5074_v11 = vld [vmem:[#allocation3 + $0x90] sm:$0xff] }
 0x310   : > { %6146 = vst [vmem:[#allocation58_spill] sm:$0xff] %v5074_v11 }
 0x311   : > { %2709 = vst.msk [vmem:[#allocation3 + $0x78] sm:$0xff] %vm727_vm2, %v5047_v20 }
 0x314   : > { %v1462_v6 = vpop.xlane.xlu0 %1461 }
 0x315   : > { %v5058_v54 = vmax.f32 %v5053_v60, %v1462_v6  ;;  %v6145_v6 = vmax.f32 %v4889_v55, %v4893_v30  ;;  %v5092_v30 = vld [vmem:[#allocation3 + $0xa0] sm:$0xff]  ;;  %v5094_v55 = vld [vmem:[#allocation3 + $0xa8] sm:$0xff] }
 0x316   : > { %v1465_v40 = vpop.xlane.xlu1 %1464  ;;  %6148 = vst [vmem:[#allocation60_spill] sm:$0xff] %v5092_v30  ;;  %6149 = vst [vmem:[#allocation61_spill] sm:$0xff] %v5094_v55 }
 0x317   : > { %6144 = vst [vmem:[#allocation57_spill] sm:$0xff] %v5058_v54  ;;  %2710 = vst.msk [vmem:[#allocation3 + $0x80] sm:$0xff] %vm727_vm2, %v5058_v54  ;;  %v5065_v50 = vmax.f32 %v5055_v4, %v1465_v40 }
 0x319   : > { %2711 = vst.msk [vmem:[#allocation3 + $0x88] sm:$0xff] %vm727_vm2, %v5065_v50 }
 0x31a   : > { %1506 = vmax.xlane.f32.xlu0 %v6145_v6 }
 0x31c   : > { %v1468_v27 = vpop.xlane.xlu0 %1467 }
 0x31d   : > { %v5079_v60 = vmax.f32 %v5074_v11, %v1468_v27  ;;  %v6150_v11 = vmax.f32 %v4885_v13, %v4887_v61  ;;  %v5115_v61 = vld [vmem:[#allocation3 + $0xb8] sm:$0xff]  ;;  %v5135_v13 = vld [vmem:[#allocation3 + $0xc8] sm:$0xff] }
 0x31e   : > { %v1471_v40 = vpop.xlane.xlu1 %1470  ;;  %6153 = vst [vmem:[#allocation64_spill] sm:$0xff] %v5115_v61  ;;  %6157 = vst [vmem:[#allocation68_spill] sm:$0xff] %v5135_v13 }
 0x31f   : > { %2712 = vst.msk [vmem:[#allocation3 + $0x90] sm:$0xff] %vm727_vm2, %v5079_v60  ;;  %v5086_v46 = vmax.f32 %v5076_v49, %v1471_v40 }
 0x321   : > { %2713 = vst.msk [vmem:[#allocation3 + $0x98] sm:$0xff] %vm727_vm2, %v5086_v46 }
 0x324   : > { %v1474_v27 = vpop.xlane.xlu1 %1473 }
 0x325   : > { %v5097_v4 = vmax.f32 %v5092_v30, %v1474_v27  ;;  %v5113_v27 = vld [vmem:[#allocation3 + $0xb0] sm:$0xff] }
 0x326   : > { %v1477_v45 = vpop.xlane.xlu0 %1476  ;;  %6152 = vst [vmem:[#allocation63_spill] sm:$0xff] %v5113_v27 }
 0x327   : > { %1503 = vmax.xlane.f32.xlu1 %v6150_v11  ;;  %2714 = vst.msk [vmem:[#allocation3 + $0xa0] sm:$0xff] %vm727_vm2, %v5097_v4  ;;  %v5107_v6 = vmax.f32 %v5094_v55, %v1477_v45 }
 0x329   : > { %6151 = vst [vmem:[#allocation62_spill] sm:$0xff] %v5107_v6  ;;  %2715 = vst.msk [vmem:[#allocation3 + $0xa8] sm:$0xff] %vm727_vm2, %v5107_v6 }
 0x32c   : > { %v1480_v18 = vpop.xlane.xlu1 %1479 }
 0x32d   : > { %v5118_v11 = vmax.f32 %v5113_v27, %v1480_v18  ;;  %v5132_v18 = vld [vmem:[#allocation3 + $0xc0] sm:$0xff] }
 0x32e   : > { %v1483_v40 = vpop.xlane.xlu0 %1482  ;;  %6156 = vst [vmem:[#allocation67_spill] sm:$0xff] %v5132_v18 }
 0x32f   : > { %6154 = vst [vmem:[#allocation65_spill] sm:$0xff] %v5118_v11  ;;  %2716 = vst.msk [vmem:[#allocation3 + $0xb0] sm:$0xff] %vm727_vm2, %v5118_v11  ;;  %v5125_v45 = vmax.f32 %v5115_v61, %v1483_v40 }
 0x330   : > { %1698 = vperm.xlu0 %3841, %v5022_v63  }
 0x331   : > { %6155 = vst [vmem:[#allocation66_spill] sm:$0xff] %v5125_v45  ;;  %2717 = vst.msk [vmem:[#allocation3 + $0xb8] sm:$0xff] %vm727_vm2, %v5125_v45 }
 0x334   : > { %1703 = vperm.xlu0 %3841, %v5029_v3   ;;  %v1486_v55 = vpop.xlane.xlu0 %1485 }
 0x335   : > { %v5138_v27 = vmax.f32 %v5132_v18, %v1486_v55  ;;  %v5153_v55 = vld [vmem:[#allocation3 + $0xd0] sm:$0xff]  ;;  %v5157_v18 = vld [vmem:[#allocation3 + $0xd8] sm:$0xff] }
 0x336   : > { %v1489_v40 = vpop.xlane.xlu1 %1488  ;;  %6160 = vst [vmem:[#allocation71_spill] sm:$0xff] %v5153_v55  ;;  %6161 = vst [vmem:[#allocation72_spill] sm:$0xff] %v5157_v18 }
 0x337   : > { %6158 = vst [vmem:[#allocation69_spill] sm:$0xff] %v5138_v27  ;;  %2718 = vst.msk [vmem:[#allocation3 + $0xc0] sm:$0xff] %vm727_vm2, %v5138_v27  ;;  %v5145_v49 = vmax.f32 %v5135_v13, %v1489_v40 }
 0x338   : > { %1718 = vperm.xlu1 %3842, %v5058_v54   ;;  %1708 = vperm.xlu0 %3841, %v5040_v44   ;;  %v5179_v44 = vld [vmem:[#allocation3 + $0xe8] sm:$0xff] }
 0x339   : > { %6159 = vst [vmem:[#allocation70_spill] sm:$0xff] %v5145_v49  ;;  %2719 = vst.msk [vmem:[#allocation3 + $0xc8] sm:$0xff] %vm727_vm2, %v5145_v49 }
 0x33a   : > { %6164 = vst [vmem:[#allocation75_spill] sm:$0xff] %v5179_v44 }
 0x33c   : > { %1743 = vperm.xlu1 %3842, %v5107_v6   ;;  %1713 = vperm.xlu0 %3841, %v5047_v20   ;;  %v1492_v30 = vpop.xlane.xlu1 %1491 }
 0x33d   : > { %v5160_v40 = vmax.f32 %v5153_v55, %v1492_v30  ;;  %v5175_v30 = vld [vmem:[#allocation3 + $0xe0] sm:$0xff] }
 0x33e   : > { %v1495_v54 = vpop.xlane.xlu0 %1494  ;;  %6163 = vst [vmem:[#allocation74_spill] sm:$0xff] %v5175_v30 }
 0x33f   : > { %2720 = vst.msk [vmem:[#allocation3 + $0xd0] sm:$0xff] %vm727_vm2, %v5160_v40  ;;  %v5167_v61 = vmax.f32 %v5157_v18, %v1495_v54 }
 0x340   : > { %1753 = vperm.xlu1 %3842, %v5125_v45   ;;  %1723 = vperm.xlu0 %3841, %v5065_v50  }
 0x341   : > { %6162 = vst [vmem:[#allocation73_spill] sm:$0xff] %v5167_v61  ;;  %2721 = vst.msk [vmem:[#allocation3 + $0xd8] sm:$0xff] %vm727_vm2, %v5167_v61 }
 0x344   : > { %1763 = vperm.xlu1 %3842, %v5145_v49   ;;  %1728 = vperm.xlu0 %3841, %v5079_v60   ;;  %v1498_v54 = vpop.xlane.xlu0 %1497 }
 0x345   : > { %v5182_v55 = vmax.f32 %v5175_v30, %v1498_v54 }
 0x346   : > { %v1501_v45 = vpop.xlane.xlu1 %1500 }
 0x347   : > { %v5185_v6 = vmax.f32 %v5179_v44, %v1501_v45  ;;  %2722 = vst.msk [vmem:[#allocation3 + $0xe0] sm:$0xff] %vm727_vm2, %v5182_v55 }
 0x348   : > { %1773 = vperm.xlu1 %3842, %v5167_v61   ;;  %1733 = vperm.xlu0 %3841, %v5086_v46  }
 0x349   : > { %6165 = vst [vmem:[#allocation76_spill] sm:$0xff] %v5185_v6  ;;  %2723 = vst.msk [vmem:[#allocation3 + $0xe8] sm:$0xff] %vm727_vm2, %v5185_v6 }
 0x34c   : > { %1783 = vperm.xlu1 %3842, %v5185_v6   ;;  %1738 = vperm.xlu0 %3841, %v5097_v4  }
 0x350   : > { %1748 = vperm.xlu0 %3841, %v5118_v11  }
 0x354   : > { %1758 = vperm.xlu0 %3841, %v5138_v27  }
 0x356   : > { %v1639_v45 = vpop.permute.xlu0 %1638 }
 0x357   : > { %v1796_v54 = vsub.f32 %v4673_v47, %v1639_v45  ;;  %v1797_v13 = vsub.f32 %v4675_v22, %v1639_v45 }
 0x358   : > { %1768 = vperm.xlu0 %3841, %v5160_v40  }
 0x359   : > { %v1860_v30 = vmul.f32 1.442695, %v1796_v54  ;;  %v1862_v18 = vmul.f32 1.442695, %v1797_v13 }
 0x35a   : > { %v1644_v44 = vpop.permute.xlu1 %1643 }
 0x35b   : > { %3853 = vpow2.f32 %v1860_v30  ;;  %v1798_v61 = vsub.f32 %v4677_v25, %v1644_v44  ;;  %v1799_v6 = vsub.f32 %v4681_v56, %v1644_v44 }
 0x35c   : > { %3855 = vpow2.f32 %v1862_v18  ;;  %1778 = vperm.xlu0 %3841, %v5182_v55  }
 0x35d   : > { %v1864_v49 = vmul.f32 1.442695, %v1798_v61  ;;  %v1866_v27 = vmul.f32 1.442695, %v1799_v6 }
 0x35e   : > { %v1649_v11 = vpop.permute.xlu1 %1648 }
 0x35f   : > { %3857 = vpow2.f32 %v1864_v49  ;;  %v1800_v47 = vsub.f32 %v4685_v28, %v1649_v11  ;;  %v1801_v22 = vsub.f32 %v4687_v32, %v1649_v11 }
 0x360   : > { %3859 = vpow2.f32 %v1866_v27 }
 0x361   : > { %v1868_v45 = vmul.f32 1.442695, %v1800_v47  ;;  %v1870_v13 = vmul.f32 1.442695, %v1801_v22 }
 0x362   : > { %v1654_v54 = vpop.permute.xlu1 %1653 }
 0x363   : > { %3861 = vpow2.f32 %v1868_v45  ;;  %v1802_v25 = vsub.f32 %v4689_v34, %v1654_v54  ;;  %v1803_v56 = vsub.f32 %v4693_v38, %v1654_v54 }
 0x364   : > { %3863 = vpow2.f32 %v1870_v13 }
 0x365   : > { %v3854_v44 = vpop.eup %3853  ;;  %v1872_v18 = vmul.f32 1.442695, %v1802_v25  ;;  %v1874_v61 = vmul.f32 1.442695, %v1803_v56 }
 0x366   : > { %v3856_v6 = vpop.eup %3855  ;;  %v1659_v30 = vpop.permute.xlu0 %1658 }
 0x367   : > { %3865 = vpow2.f32 %v1872_v18  ;;  %v1804_v28 = vsub.f32 %v4697_v8, %v1659_v30  ;;  %v1805_v32 = vsub.f32 %v4699_v36, %v1659_v30  ;;  %v5213_v49 = vadd.f32 %v3856_v6, %v3854_v44 }
 0x368   : > { %3867 = vpow2.f32 %v1874_v61 }
 0x369   : > { %v3858_v27 = vpop.eup %3857  ;;  %v1876_v11 = vmul.f32 1.442695, %v1804_v28  ;;  %v1878_v47 = vmul.f32 1.442695, %v1805_v32 }
 0x36a   : > { %v3860_v34 = vpop.eup %3859  ;;  %v1664_v22 = vpop.permute.xlu0 %1663  ;;  %v2437_v38 = vpack.c.bf16 %v3858_v27, %v3854_v44 }
 0x36b   : > { %3869 = vpow2.f32 %v1876_v11  ;;  %v1806_v45 = vsub.f32 %v4701_v15, %v1664_v22  ;;  %v1807_v13 = vsub.f32 %v4705_v16, %v1664_v22  ;;  %v2438_v54 = vpack.c.bf16 %v3860_v34, %v3856_v6 }
 0x36c   : > { %3871 = vpow2.f32 %v1878_v47  ;;  %v5217_v25 = vadd.f32 %v3860_v34, %v3858_v27 }
 0x36d   : > { %v3862_v8 = vpop.eup %3861  ;;  %v1880_v36 = vmul.f32 1.442695, %v1806_v45  ;;  %v1882_v56 = vmul.f32 1.442695, %v1807_v13  ;;  %2501 = vmatprep.mubr.bf16.mxu1 %v2438_v54 }
 0x36e   : > { %v3864_v18 = vpop.eup %3863  ;;  %2502 = vmatmul.mubr.bf16.vlgmr.msra.gmra.mrb[64].mxu1 %v2437_v38  ;;  %v1669_v61 = vpop.permute.xlu1 %1668 }
 0x36f   : > { %3873 = vpow2.f32 %v1880_v36  ;;  %v1808_v30 = vsub.f32 %v4709_v7, %v1669_v61  ;;  %v1809_v44 = vsub.f32 %v4711_v0, %v1669_v61  ;;  %v5221_v28 = vadd.f32 %v3864_v18, %v3862_v8 }
 0x370   : > { %3875 = vpow2.f32 %v1882_v56 }
 0x371   : > { %v3866_v15 = vpop.eup %3865  ;;  %v1884_v16 = vmul.f32 1.442695, %v1808_v30  ;;  %v1886_v6 = vmul.f32 1.442695, %v1809_v44 }
 0x372   : > { %v3868_v32 = vpop.eup %3867  ;;  %v1674_v27 = vpop.permute.xlu1 %1673  ;;  %v2439_v11 = vpack.c.bf16 %v3866_v15, %v3862_v8 }
 0x373   : > { %3877 = vpow2.f32 %v1884_v16  ;;  %v1810_v47 = vsub.f32 %v4713_v2, %v1674_v27  ;;  %v1811_v34 = vsub.f32 %v4717_v24, %v1674_v27  ;;  %v2440_v22 = vpack.c.bf16 %v3868_v32, %v3864_v18 }
 0x374   : > { %3879 = vpow2.f32 %v1886_v6  ;;  %v5225_v38 = vadd.f32 %v3868_v32, %v3866_v15 }
 0x375   : > { %v3870_v7 = vpop.eup %3869  ;;  %v1888_v0 = vmul.f32 1.442695, %v1810_v47  ;;  %v1890_v45 = vmul.f32 1.442695, %v1811_v34  ;;  %2509 = vmatprep.mubr.bf16.mxu1 %v2440_v22 }
 0x376   : > { %v3872_v13 = vpop.eup %3871  ;;  %2510 = vmatmul.mubr.bf16.gmra.mrb[68].mxu1 %v2439_v11  ;;  %v1679_v54 = vpop.permute.xlu0 %1678 }
 0x377   : > { %3881 = vpow2.f32 %v1888_v0  ;;  %v1812_v36 = vsub.f32 %v4753_v62, %v1679_v54  ;;  %v1813_v8 = vsub.f32 %v4755_v29, %v1679_v54  ;;  %v5229_v56 = vadd.f32 %v3872_v13, %v3870_v7 }
 0x378   : > { %3883 = vpow2.f32 %v1890_v45 }
 0x379   : > { %v3874_v2 = vpop.eup %3873  ;;  %v1892_v24 = vmul.f32 1.442695, %v1812_v36  ;;  %v1894_v18 = vmul.f32 1.442695, %v1813_v8 }
 0x37a   : > { %v3876_v61 = vpop.eup %3875  ;;  %v1684_v30 = vpop.permute.xlu0 %1683  ;;  %v2441_v44 = vpack.c.bf16 %v3874_v2, %v3870_v7 }
 0x37b   : > { %3885 = vpow2.f32 %v1892_v24  ;;  %v1814_v15 = vsub.f32 %v4757_v31, %v1684_v30  ;;  %v1815_v16 = vsub.f32 %v4761_v57, %v1684_v30  ;;  %v2442_v6 = vpack.c.bf16 %v3876_v61, %v3872_v13 }
 0x37c   : > { %3887 = vpow2.f32 %v1894_v18  ;;  %v5233_v32 = vadd.f32 %v3876_v61, %v3874_v2 }
 0x37d   : > { %v3878_v62 = vpop.eup %3877  ;;  %v1896_v29 = vmul.f32 1.442695, %v1814_v15  ;;  %v1898_v27 = vmul.f32 1.442695, %v1815_v16  ;;  %2517 = vmatprep.mubr.bf16.mxu1 %v2442_v6 }
 0x37e   : > { %v3880_v11 = vpop.eup %3879  ;;  %2518 = vmatmul.mubr.bf16.gmra.mrb[72].mxu1 %v2441_v44  ;;  %v1689_v47 = vpop.permute.xlu1 %1688 }
 0x37f   : > { %3889 = vpow2.f32 %v1896_v29  ;;  %v1816_v34 = vsub.f32 %v4765_v12, %v1689_v47  ;;  %v1817_v22 = vsub.f32 %v4767_v58, %v1689_v47  ;;  %v5237_v7 = vadd.f32 %v3880_v11, %v3878_v62 }
 0x380   : > { %3891 = vpow2.f32 %v1898_v27 }
 0x381   : > { %v3882_v31 = vpop.eup %3881  ;;  %v1900_v57 = vmul.f32 1.442695, %v1816_v34  ;;  %v1902_v0 = vmul.f32 1.442695, %v1817_v22 }
 0x382   : > { %v3884_v45 = vpop.eup %3883  ;;  %v1694_v13 = vpop.permute.xlu1 %1693  ;;  %v2443_v54 = vpack.c.bf16 %v3882_v31, %v3878_v62 }
 0x383   : > { %3893 = vpow2.f32 %v1900_v57  ;;  %v1818_v36 = vsub.f32 %v4769_v1, %v1694_v13  ;;  %v1819_v8 = vsub.f32 %v4773_v43, %v1694_v13  ;;  %v2444_v2 = vpack.c.bf16 %v3884_v45, %v3880_v11 }
 0x384   : > { %3895 = vpow2.f32 %v1902_v0  ;;  %v5241_v24 = vadd.f32 %v3884_v45, %v3882_v31  ;;  %v6166_v31 = vsub.f32 %v4897_v48, %v4900_v21  ;;  %v6167_v0 = vsub.f32 %v4902_v42, %v4910_v5  ;;  %v5281_v42 = vld [vmem:[#allocation3 + $0xf8] sm:$0xff] }
 0x385   : > { %v3886_v12 = vpop.eup %3885  ;;  %v1904_v58 = vmul.f32 1.442695, %v1818_v36  ;;  %v1906_v18 = vmul.f32 1.442695, %v1819_v8  ;;  %2525 = vmatprep.mubr.bf16.mxu1 %v2444_v2  ;;  %v6168_v13 = vsub.f32 %v4912_v37, %v4920_v39  ;;  %v6169_v36 = vsub.f32 %v4922_v23, %v4930_v26 }
 0x386   : > { %v3888_v61 = vpop.eup %3887  ;;  %2526 = vmatmul.mubr.bf16.gmra.mrb[76].mxu1 %v2443_v54  ;;  %v1572_v57 = vmul.f32 1.442695, %v6166_v31  ;;  %v1574_v45 = vmul.f32 1.442695, %v6167_v0  ;;  %v6170_v2 = vsub.f32 %v4932_v17, %v4942_v59  ;;  %v6171_v48 = vsub.f32 %v4939_v19, %v4949_v10  ;;  %v6177_v10 = vld [vmem:[#allocation48_spill] sm:$0xff] }
 0x387   : > { %3897 = vpow2.f32 %v1904_v58  ;;  %v5243_v30 = vadd.f32 %v3888_v61, %v3886_v12  ;;  %v1576_v54 = vmul.f32 1.442695, %v6168_v13  ;;  %v1578_v8 = vmul.f32 1.442695, %v6169_v36  ;;  %v6193_v13 = vld [vmem:[#allocation57_spill] sm:$0xff] }
 0x388   : > { %3899 = vpow2.f32 %v1906_v18  ;;  %v1582_v21 = vmul.f32 1.442695, %v6171_v48  ;;  %v6172_v5 = vsub.f32 %v4956_v51, %v4962_v35  ;;  %v6173_v26 = vsub.f32 %v4959_v9, %v4969_v53  ;;  %v6176_v35 = vld [vmem:[#allocation46_spill] sm:$0xff]  ;;  %v6179_v53 = vld [vmem:[#allocation47_spill] sm:$0xff]  ;;  %v6180_v9 = vld [vmem:[#allocation49_spill] sm:$0xff] }
 0x389   : > { %v3890_v44 = vpop.eup %3889  ;;  %3901 = vpow2.f32 %v1572_v57  ;;  %v6174_v17 = vsub.f32 %v4976_v14, %v4982_v33  ;;  %v6175_v19 = vsub.f32 %v4979_v52, %v4989_v41  ;;  %v6178_v51 = vsub.f32 %v6176_v35, %v6177_v10  ;;  %v6182_v33 = vld [vmem:[#allocation50_spill] sm:$0xff]  ;;  %v6184_v52 = vld [vmem:[#allocation51_spill] sm:$0xff] }
 0x38a   : > { %v3892_v15 = vpop.eup %3891  ;;  %v2445_v16 = vpack.c.bf16 %v3890_v44, %v3886_v12  ;;  %v1580_v12 = vmul.f32 1.442695, %v6170_v2  ;;  %3903 = vpow2.f32 %v1574_v45  ;;  %v1584_v37 = vmul.f32 1.442695, %v6172_v5  ;;  %v6192_v45 = vld [vmem:[#allocation55_spill] sm:$0xff]  ;;  %v6196_v2 = vld [vmem:[#allocation56_spill] sm:$0xff] }
 0x38b   : > { %v2446_v1 = vpack.c.bf16 %v3892_v15, %v3888_v61  ;;  %v5245_v6 = vadd.f32 %v3892_v15, %v3890_v44  ;;  %3905 = vpow2.f32 %v1576_v54  ;;  %v1586_v23 = vmul.f32 1.442695, %v6173_v26  ;;  %v6199_v5 = vld [vmem:[#allocation58_spill] sm:$0xff]  ;;  %v6206_v10 = vld [vmem:[#allocation7_spill] sm:$0xff] }
 0x38c   : > { %3907 = vpow2.f32 %v1578_v8  ;;  %v1588_v59 = vmul.f32 1.442695, %v6174_v17  ;;  %v1590_v39 = vmul.f32 1.442695, %v6175_v19  ;;  %v1592_v58 = vmul.f32 1.442695, %v6178_v51 }
 0x38d   : > { %v3894_v43 = vpop.eup %3893  ;;  %2533 = vmatprep.mubr.bf16.mxu1 %v2446_v1  ;;  %3909 = vpow2.f32 %v1580_v12  ;;  %v6181_v18 = vsub.f32 %v6179_v53, %v6180_v9  ;;  %v6183_v14 = vsub.f32 %v6182_v33, %v5022_v63  ;;  %v6194_v54 = vsub.f32 %v6192_v45, %v6193_v13  ;;  %v6220_v13 = vld [vmem:[#allocation63_spill] sm:$0xff] }
 0x38e   : > { %v3896_v62 = vpop.eup %3895  ;;  %2534 = vmatmul.mubr.bf16.gmra.mrb[80].mxu1 %v2445_v16  ;;  %3911 = vpow2.f32 %v1582_v21  ;;  %v6185_v16 = vsub.f32 %v6184_v52, %v5029_v3  ;;  %v6189_v3 = vld [vmem:[#allocation53_spill] sm:$0xff]  ;;  %v6197_v12 = vsub.f32 %v6196_v2, %v5065_v50  ;;  %v6205_v50 = vld [vmem:[#allocation6_spill] sm:$0xff] }
 0x38f   : > { %v5247_v29 = vadd.f32 %v3896_v62, %v3894_v43  ;;  %3913 = vpow2.f32 %v1584_v37  ;;  %v1594_v61 = vmul.f32 1.442695, %v6181_v18  ;;  %v1596_v15 = vmul.f32 1.442695, %v6183_v14  ;;  %v6212_v14 = vld [vmem:[#allocation61_spill] sm:$0xff] }
 0x390   : > { %3915 = vpow2.f32 %v1586_v23  ;;  %v1598_v1 = vmul.f32 1.442695, %v6185_v16  ;;  %v6190_v31 = vsub.f32 %v6189_v3, %v5047_v20  ;;  %v1604_v36 = vmul.f32 1.442695, %v6194_v54  ;;  %v6202_v23 = vld [vmem:[#allocation59_spill] sm:$0xff]  ;;  %v6221_v54 = vld [vmem:[#allocation65_spill] sm:$0xff] }
 0x391   : > { %v3898_v27 = vpop.eup %3897  ;;  %3917 = vpow2.f32 %v1588_v59  ;;  %v1606_v48 = vmul.f32 1.442695, %v6197_v12  ;;  %v6200_v20 = vsub.f32 %v6199_v5, %v5079_v60  ;;  %v6203_v17 = vsub.f32 %v6202_v23, %v5086_v46  ;;  %v6208_v60 = vld [vmem:[#allocation60_spill] sm:$0xff] }
 0x392   : > { %v3900_v11 = vpop.eup %3899  ;;  %v2447_v47 = vpack.c.bf16 %v3898_v27, %v3894_v43  ;;  %3919 = vpow2.f32 %v1590_v39  ;;  %v1602_v57 = vmul.f32 1.442695, %v6190_v31  ;;  %v6209_v53 = vsub.f32 %v6208_v60, %v5097_v4  ;;  %v6216_v4 = vld [vmem:[#allocation8_spill] sm:$0xff] }
 0x393   : > { %v2448_v34 = vpack.c.bf16 %v3900_v11, %v3896_v62  ;;  %v5249_v22 = vadd.f32 %v3900_v11, %v3898_v27  ;;  %v5298_v43 = vpop.eup %3901  ;;  %3921 = vpow2.f32 %v1592_v58  ;;  %v6186_v62 = vld [vmem:[#allocation52_spill] sm:$0xff]  ;;  %v6187_v27 = vld [vmem:[#allocation54_spill] sm:$0xff]  ;;  %v1608_v37 = vmul.f32 1.442695, %v6200_v20 }
 0x394   : > { %v6188_v11 = vsub.f32 %v6186_v62, %v6187_v27  ;;  %v5308_v63 = vpop.eup %3903  ;;  %3923 = vpow2.f32 %v1594_v61  ;;  %v1610_v59 = vmul.f32 1.442695, %v6203_v17  ;;  %v1612_v9 = vmul.f32 1.442695, %v6209_v53  ;;  %v6224_v20 = vld [vmem:[#allocation64_spill] sm:$0xff] }
 0x395   : > { %2541 = vmatprep.mubr.bf16.mxu1 %v2448_v34  ;;  %v5313_v0 = vpop.eup %3905  ;;  %3925 = vpow2.f32 %v1596_v15  ;;  %v6213_v15 = vld [vmem:[#allocation62_spill] sm:$0xff] }
 0x396   : > { %2542 = vmatmul.mubr.bf16.gmra.mrb[84].mxu1 %v2447_v47  ;;  %v1600_v47 = vmul.f32 1.442695, %v6188_v11  ;;  %6191 = vst [vmem:[#allocation46_spill] sm:$0xff] %v5313_v0  ;;  %v5318_v8 = vpop.eup %3907  ;;  %3927 = vpow2.f32 %v1598_v1  ;;  %v6214_v52 = vsub.f32 %v6212_v14, %v6213_v15  ;;  %v6217_v11 = vld [vmem:[#allocation9_spill] sm:$0xff]  ;;  %v6232_v14 = vld [vmem:[#allocation15_spill] sm:$0xff] }
 0x397   : > { %6195 = vst [vmem:[#allocation48_spill] sm:$0xff] %v5318_v8  ;;  %v5323_v21 = vpop.eup %3909 }
 0x398   : > { %6198 = vst [vmem:[#allocation47_spill] sm:$0xff] %v5323_v21  ;;  %3929 = vpow2.f32 %v1600_v47  ;;  %v5329_v26 = vpop.eup %3911  ;;  %v1614_v16 = vmul.f32 1.442695, %v6214_v52 }
 0x399   : > { %6201 = vst [vmem:[#allocation49_spill] sm:$0xff] %v5329_v26  ;;  %3931 = vpow2.f32 %v1602_v57  ;;  %v5334_v39 = vpop.eup %3913 }
 0x39a   : > { %6204 = vst [vmem:[#allocation50_spill] sm:$0xff] %v5334_v39  ;;  %3933 = vpow2.f32 %v1604_v36  ;;  %v5338_v58 = vpop.eup %3915  ;;  %v6222_v36 = vsub.f32 %v6220_v13, %v6221_v54  ;;  %v6235_v13 = vld [vmem:[#allocation12_spill] sm:$0xff] }
 0x39b   : > { %6207 = vst [vmem:[#allocation51_spill] sm:$0xff] %v5338_v58  ;;  %3935 = vpow2.f32 %v1606_v48  ;;  %v5343_v18 = vpop.eup %3917 }
 0x39c   : > { %6210 = vst [vmem:[#allocation52_spill] sm:$0xff] %v5343_v18  ;;  %3937 = vpow2.f32 %v1608_v37  ;;  %v5348_v33 = vpop.eup %3919  ;;  %v1616_v2 = vmul.f32 1.442695, %v6222_v36  ;;  %v6225_v37 = vld [vmem:[#allocation66_spill] sm:$0xff]  ;;  %v6236_v36 = vld [vmem:[#allocation13_spill] sm:$0xff] }
 0x39d   : > { %6211 = vst [vmem:[#allocation54_spill] sm:$0xff] %v5348_v33  ;;  %3939 = vpow2.f32 %v1610_v59  ;;  %v5353_v62 = vpop.eup %3921  ;;  %v6226_v23 = vsub.f32 %v6224_v20, %v6225_v37  ;;  %v6238_v20 = vld [vmem:[#allocation24_spill] sm:$0xff] }
 0x39e   : > { %6215 = vst [vmem:[#allocation53_spill] sm:$0xff] %v5353_v62  ;;  %v5357_v31 = vpop.eup %3923  ;;  %v6247_v59 = vld [vmem:[#allocation32_spill] sm:$0xff] }
 0x39f   : > { %6218 = vst [vmem:[#allocation55_spill] sm:$0xff] %v5357_v31  ;;  %v5362_v45 = vpop.eup %3925  ;;  %v1618_v17 = vmul.f32 1.442695, %v6226_v23  ;;  %v6239_v23 = vld [vmem:[#allocation25_spill] sm:$0xff] }
 0x3a0   : > { %6219 = vst [vmem:[#allocation57_spill] sm:$0xff] %v5362_v45  ;;  %v5368_v5 = vpop.eup %3927 }
 0x3a1   : > { %6223 = vst [vmem:[#allocation56_spill] sm:$0xff] %v5368_v5 }
 0x3a7   : > { %v1507_v44 = vpop.xlane.xlu0 %1506 }
 0x3a8   : > { %v5293_v41 = vmax.f32 %v5281_v42, %v1507_v44  ;;  %v5346_v44 = vld [vmem:[#allocation3 + $0xf0] sm:$0xff] }
 0x3aa   : > { %2725 = vst.msk [vmem:[#allocation3 + $0xf8] sm:$0xff] %vm727_vm2, %v5293_v41  ;;  %1793 = vperm.xlu1 %3842, %v5293_v41  }
 0x3ae   : > { %2247 = vperm.xlu1 %3842, %v5298_v43  }
 0x3af   : > { %v1699_v19 = vpop.permute.xlu0 %1698 }
 0x3b0   : > { %v1820_v35 = vsub.f32 %v6205_v50, %v1699_v19  ;;  %v1821_v51 = vsub.f32 %v6206_v10, %v1699_v19  ;;  %v5378_v50 = vpop.eup %3929 }
 0x3b1   : > { %6227 = vst [vmem:[#allocation58_spill] sm:$0xff] %v5378_v50 }
 0x3b2   : > { %v1908_v46 = vmul.f32 1.442695, %v1820_v35  ;;  %v1910_v61 = vmul.f32 1.442695, %v1821_v51  ;;  %2257 = vperm.xlu1 %3842, %v5313_v0   ;;  %v6228_v35 = vld [vmem:[#allocation10_spill] sm:$0xff]  ;;  %v6229_v51 = vld [vmem:[#allocation11_spill] sm:$0xff] }
 0x3b3   : > { %v1704_v1 = vpop.permute.xlu0 %1703 }
 0x3b4   : > { %3941 = vpow2.f32 %v1908_v46  ;;  %v1822_v27 = vsub.f32 %v6216_v4, %v1704_v1  ;;  %v1823_v47 = vsub.f32 %v6217_v11, %v1704_v1  ;;  %v1504_v3 = vpop.xlane.xlu1 %1503  ;;  %v6231_v46 = vld [vmem:[#allocation14_spill] sm:$0xff] }
 0x3b5   : > { %3943 = vpow2.f32 %v1910_v61  ;;  %v5360_v57 = vmax.f32 %v5346_v44, %v1504_v3 }
 0x3b6   : > { %3945 = vpow2.f32 %v1612_v9  ;;  %v1912_v12 = vmul.f32 1.442695, %v1822_v27  ;;  %v1914_v48 = vmul.f32 1.442695, %v1823_v47  ;;  %2262 = vperm.xlu1 %3842, %v5318_v8   ;;  %v5382_v9 = vpop.eup %3931 }
 0x3b7   : > { %3947 = vpow2.f32 %v1614_v16  ;;  %2724 = vst.msk [vmem:[#allocation3 + $0xf0] sm:$0xff] %vm727_vm2, %v5360_v57  ;;  %1788 = vperm.xlu0 %3841, %v5360_v57   ;;  %v1709_v19 = vpop.permute.xlu0 %1708  ;;  %6230 = vst [vmem:[#allocation59_spill] sm:$0xff] %v5382_v9  ;;  %v5386_v52 = vpop.eup %3933 }
 0x3b8   : > { %3949 = vpow2.f32 %v1912_v12  ;;  %v1824_v10 = vsub.f32 %v6228_v35, %v1709_v19  ;;  %v1825_v60 = vsub.f32 %v6229_v51, %v1709_v19  ;;  %v1719_v53 = vpop.permute.xlu1 %1718  ;;  %6233 = vst [vmem:[#allocation6_spill] sm:$0xff] %v5386_v52  ;;  %v5389_v4 = vpop.eup %3935 }
 0x3b9   : > { %3951 = vpow2.f32 %v1914_v48  ;;  %v1828_v61 = vsub.f32 %v6231_v46, %v1719_v53  ;;  %v1829_v15 = vsub.f32 %v6232_v14, %v1719_v53  ;;  %6234 = vst [vmem:[#allocation7_spill] sm:$0xff] %v5389_v4  ;;  %v5392_v3 = vpop.eup %3937  ;;  %v6240_v14 = vld [vmem:[#allocation16_spill] sm:$0xff] }
 0x3ba   : > { %3953 = vpow2.f32 %v1616_v2  ;;  %v1916_v16 = vmul.f32 1.442695, %v1824_v10  ;;  %v1918_v1 = vmul.f32 1.442695, %v1825_v60  ;;  %2272 = vperm.xlu1 %3842, %v5329_v26   ;;  %v5396_v48 = vpop.eup %3939 }
 0x3bb   : > { %3955 = vpow2.f32 %v1618_v17  ;;  %v1924_v27 = vmul.f32 1.442695, %v1828_v61  ;;  %v1926_v11 = vmul.f32 1.442695, %v1829_v15  ;;  %2252 = vperm.xlu0 %3841, %v5308_v63   ;;  %v1714_v47 = vpop.permute.xlu0 %1713  ;;  %6237 = vst [vmem:[#allocation60_spill] sm:$0xff] %v5396_v48 }
 0x3bc   : > { %3957 = vpow2.f32 %v1916_v16  ;;  %v1826_v54 = vsub.f32 %v6235_v13, %v1714_v47  ;;  %v1827_v12 = vsub.f32 %v6236_v36, %v1714_v47  ;;  %v1744_v2 = vpop.permute.xlu1 %1743  ;;  %v6241_v16 = vld [vmem:[#allocation17_spill] sm:$0xff] }
 0x3bd   : > { %3959 = vpow2.f32 %v1918_v1  ;;  %v1838_v37 = vsub.f32 %v6238_v20, %v1744_v2  ;;  %v1839_v17 = vsub.f32 %v6239_v23, %v1744_v2  ;;  %v6244_v36 = vld [vmem:[#allocation29_spill] sm:$0xff] }
 0x3be   : > { %v3942_v19 = vpop.eup %3941  ;;  %3961 = vpow2.f32 %v1924_v27  ;;  %v1920_v35 = vmul.f32 1.442695, %v1826_v54  ;;  %v1922_v10 = vmul.f32 1.442695, %v1827_v12  ;;  %2282 = vperm.xlu1 %3842, %v5338_v58   ;;  %v6243_v54 = vld [vmem:[#allocation28_spill] sm:$0xff] }
 0x3bf   : > { %v3944_v51 = vpop.eup %3943  ;;  %3963 = vpow2.f32 %v1926_v11  ;;  %v1944_v60 = vmul.f32 1.442695, %v1838_v37  ;;  %v1946_v53 = vmul.f32 1.442695, %v1839_v17  ;;  %2267 = vperm.xlu0 %3841, %v5323_v21   ;;  %v1724_v46 = vpop.permute.xlu0 %1723 }
 0x3c0   : > { %v5402_v61 = vpop.eup %3945  ;;  %3965 = vpow2.f32 %v1920_v35  ;;  %v1830_v15 = vsub.f32 %v6240_v14, %v1724_v46  ;;  %v1831_v1 = vsub.f32 %v6241_v16, %v1724_v46  ;;  %v1754_v47 = vpop.permute.xlu1 %1753  ;;  %v5406_v27 = vadd.f32 %v3944_v51, %v3942_v19 }
 0x3c1   : > { %v5408_v13 = vpop.eup %3947  ;;  %3967 = vpow2.f32 %v1922_v10  ;;  %v1842_v11 = vsub.f32 %v6243_v54, %v1754_v47  ;;  %v1843_v12 = vsub.f32 %v6244_v36, %v1754_v47  ;;  %v6245_v10 = vld [vmem:[#allocation18_spill] sm:$0xff]  ;;  %v6246_v47 = vld [vmem:[#allocation19_spill] sm:$0xff] }
 0x3c2   : > { %6242 = vst [vmem:[#allocation61_spill] sm:$0xff] %v5408_v13  ;;  %v3950_v2 = vpop.eup %3949  ;;  %3969 = vpow2.f32 %v1944_v60  ;;  %v1928_v20 = vmul.f32 1.442695, %v1830_v15  ;;  %v1930_v37 = vmul.f32 1.442695, %v1831_v1  ;;  %2292 = vperm.xlu1 %3842, %v5348_v33  }
 0x3c3   : > { %v3952_v23 = vpop.eup %3951  ;;  %3971 = vpow2.f32 %v1946_v53  ;;  %v1952_v17 = vmul.f32 1.442695, %v1842_v11  ;;  %v1954_v35 = vmul.f32 1.442695, %v1843_v12  ;;  %2277 = vperm.xlu0 %3841, %v5334_v39   ;;  %v1729_v46 = vpop.permute.xlu0 %1728  ;;  %v2449_v14 = vpack.c.bf16 %v3950_v2, %v3942_v19  ;;  %v6248_v11 = vld [vmem:[#allocation33_spill] sm:$0xff] }
 0x3c4   : > { %v5414_v16 = vpop.eup %3953  ;;  %3973 = vpow2.f32 %v1928_v20  ;;  %v1832_v54 = vsub.f32 %v6245_v10, %v1729_v46  ;;  %v1833_v36 = vsub.f32 %v6246_v47, %v1729_v46  ;;  %v1764_v60 = vpop.permute.xlu1 %1763  ;;  %v2450_v15 = vpack.c.bf16 %v3952_v23, %v3944_v51  ;;  %v6250_v10 = vld [vmem:[#allocation21_spill] sm:$0xff] }
 0x3c5   : > { %v5418_v1 = vpop.eup %3955  ;;  %3975 = vpow2.f32 %v1930_v37  ;;  %v1846_v53 = vsub.f32 %v6247_v59, %v1764_v60  ;;  %v1847_v12 = vsub.f32 %v6248_v11, %v1764_v60  ;;  %v5422_v34 = vadd.f32 %v3952_v23, %v3950_v2  ;;  %v6249_v2 = vld [vmem:[#allocation20_spill] sm:$0xff] }
 0x3c6   : > { %v3958_v33 = vpop.eup %3957  ;;  %3977 = vpow2.f32 %v1952_v17  ;;  %v1932_v19 = vmul.f32 1.442695, %v1832_v54  ;;  %v1934_v58 = vmul.f32 1.442695, %v1833_v36  ;;  %2549 = vmatprep.mubr.bf16.mxu1 %v2450_v15  ;;  %2302 = vperm.xlu1 %3842, %v5357_v31   ;;  %v6251_v60 = vld [vmem:[#allocation36_spill] sm:$0xff]  ;;  %v6252_v15 = vld [vmem:[#allocation37_spill] sm:$0xff] }
 0x3c7   : > { %v3960_v20 = vpop.eup %3959  ;;  %3979 = vpow2.f32 %v1954_v35  ;;  %v1960_v46 = vmul.f32 1.442695, %v1846_v53  ;;  %v1962_v51 = vmul.f32 1.442695, %v1847_v12  ;;  %2550 = vmatmul.mubr.bf16.gmra.mrb[88].mxu1 %v2449_v14  ;;  %2287 = vperm.xlu0 %3841, %v5343_v18   ;;  %v1734_v37 = vpop.permute.xlu0 %1733  ;;  %v6255_v18 = vld [vmem:[#allocation40_spill] sm:$0xff] }
 0x3c8   : > { %v5426_v59 = vpop.eup %3961  ;;  %3981 = vpow2.f32 %v1932_v19  ;;  %v1834_v23 = vsub.f32 %v6249_v2, %v1734_v37  ;;  %v1835_v17 = vsub.f32 %v6250_v10, %v1734_v37  ;;  %v1774_v54 = vpop.permute.xlu1 %1773  ;;  %v5430_v47 = vadd.f32 %v3960_v20, %v3958_v33 }
 0x3c9   : > { %v3964_v36 = vpop.eup %3963  ;;  %3983 = vpow2.f32 %v1934_v58  ;;  %v1850_v35 = vsub.f32 %v6251_v60, %v1774_v54  ;;  %v1851_v53 = vsub.f32 %v6252_v15, %v1774_v54  ;;  %v6253_v54 = vld [vmem:[#allocation22_spill] sm:$0xff] }
 0x3ca   : > { %v3966_v14 = vpop.eup %3965  ;;  %3985 = vpow2.f32 %v1960_v46  ;;  %v1936_v11 = vmul.f32 1.442695, %v1834_v23  ;;  %v1938_v12 = vmul.f32 1.442695, %v1835_v17  ;;  %2312 = vperm.xlu1 %3842, %v5368_v5   ;;  %v5436_v19 = vadd.f32 %v3964_v36, %v5426_v59  ;;  %v6254_v23 = vld [vmem:[#allocation23_spill] sm:$0xff] }
 0x3cb   : > { %v3968_v2 = vpop.eup %3967  ;;  %3987 = vpow2.f32 %v1962_v51  ;;  %v1968_v37 = vmul.f32 1.442695, %v1850_v35  ;;  %v1970_v10 = vmul.f32 1.442695, %v1851_v53  ;;  %2297 = vperm.xlu0 %3841, %v5353_v62   ;;  %v1739_v58 = vpop.permute.xlu0 %1738  ;;  %v2451_v31 = vpack.c.bf16 %v3966_v14, %v3958_v33  ;;  %v6256_v35 = vld [vmem:[#allocation41_spill] sm:$0xff] }
 0x3cc   : > { %v5439_v60 = vpop.eup %3969  ;;  %3989 = vpow2.f32 %v1936_v11  ;;  %v1836_v46 = vsub.f32 %v6253_v54, %v1739_v58  ;;  %v1837_v17 = vsub.f32 %v6254_v23, %v1739_v58  ;;  %v1784_v15 = vpop.permute.xlu1 %1783  ;;  %v2452_v5 = vpack.c.bf16 %v3968_v2, %v3960_v20  ;;  %v6258_v54 = vld [vmem:[#allocation27_spill] sm:$0xff] }
 0x3cd   : > { %v5443_v26 = vpop.eup %3971  ;;  %3991 = vpow2.f32 %v1938_v12  ;;  %v1854_v51 = vsub.f32 %v6255_v18, %v1784_v15  ;;  %v1855_v53 = vsub.f32 %v6256_v35, %v1784_v15  ;;  %v5447_v8 = vadd.f32 %v3968_v2, %v3966_v14  ;;  %v6259_v15 = vld [vmem:[#allocation67_spill] sm:$0xff] }
 0x3ce   : > { %v3974_v62 = vpop.eup %3973  ;;  %3993 = vpow2.f32 %v1968_v37  ;;  %v1940_v33 = vmul.f32 1.442695, %v1836_v46  ;;  %v1942_v39 = vmul.f32 1.442695, %v1837_v17  ;;  %2557 = vmatprep.mubr.bf16.mxu1 %v2452_v5  ;;  %2322 = vperm.xlu1 %3842, %v5382_v9   ;;  %v5452_v11 = vadd.f32 %v5443_v26, %v5439_v60  ;;  %v6257_v5 = vld [vmem:[#allocation26_spill] sm:$0xff] }
 0x3cf   : > { %v3976_v20 = vpop.eup %3975  ;;  %3995 = vpow2.f32 %v1970_v10  ;;  %v1976_v12 = vmul.f32 1.442695, %v1854_v51  ;;  %v1978_v58 = vmul.f32 1.442695, %v1855_v53  ;;  %2558 = vmatmul.mubr.bf16.gmra.mrb[92].mxu1 %v2451_v31  ;;  %2307 = vperm.xlu0 %3841, %v5362_v45   ;;  %v1749_v18 = vpop.permute.xlu0 %1748  ;;  %v2453_v14 = vpack.c.bf16 %v3974_v62, %v5426_v59  ;;  %v6260_v10 = vld [vmem:[#allocation69_spill] sm:$0xff] }
 0x3d0   : > { %v5456_v2 = vpop.eup %3977  ;;  %3997 = vpow2.f32 %v1940_v33  ;;  %v1840_v37 = vsub.f32 %v6257_v5, %v1749_v18  ;;  %v1841_v46 = vsub.f32 %v6258_v54, %v1749_v18  ;;  %v2454_v23 = vpack.c.bf16 %v3976_v20, %v3964_v36  ;;  %v6262_v18 = vld [vmem:[#allocation68_spill] sm:$0xff]  ;;  %v6263_v5 = vld [vmem:[#allocation70_spill] sm:$0xff] }
 0x3d1   : > { %v5460_v17 = vpop.eup %3979  ;;  %v6261_v51 = vsub.f32 %v6259_v15, %v6260_v10  ;;  %3999 = vpow2.f32 %v1942_v39  ;;  %v5465_v31 = vadd.f32 %v3976_v20, %v3974_v62  ;;  %v6264_v54 = vsub.f32 %v6262_v18, %v6263_v5  ;;  %v6265_v20 = vld [vmem:[#allocation30_spill] sm:$0xff] }
 0x3d2   : > { %v5467_v53 = vpop.eup %3981  ;;  %4001 = vpow2.f32 %v1976_v12  ;;  %v1948_v59 = vmul.f32 1.442695, %v1840_v37  ;;  %v1950_v9 = vmul.f32 1.442695, %v1841_v46  ;;  %2565 = vmatprep.mubr.bf16.mxu1 %v2454_v23  ;;  %2332 = vperm.xlu1 %3842, %v5389_v4   ;;  %v5472_v36 = vadd.f32 %v5460_v17, %v5456_v2  ;;  %v6266_v37 = vld [vmem:[#allocation31_spill] sm:$0xff] }
 0x3d3   : > { %v1620_v35 = vmul.f32 1.442695, %v6261_v51  ;;  %v3984_v33 = vpop.eup %3983  ;;  %v1622_v15 = vmul.f32 1.442695, %v6264_v54  ;;  %4003 = vpow2.f32 %v1978_v58  ;;  %2317 = vperm.xlu0 %3841, %v5378_v50   ;;  %v1759_v39 = vpop.permute.xlu0 %1758  ;;  %v6267_v54 = vld [vmem:[#allocation72_spill] sm:$0xff]  ;;  %v6271_v4 = vld [vmem:[#allocation35_spill] sm:$0xff] }
 0x3d4   : > { %v5478_v62 = vpop.eup %3985  ;;  %4005 = vpow2.f32 %v1948_v59  ;;  %v1844_v12 = vsub.f32 %v6265_v20, %v1759_v39  ;;  %v1845_v46 = vsub.f32 %v6266_v37, %v1759_v39  ;;  %v5483_v23 = vadd.f32 %v3984_v33, %v5467_v53  ;;  %v6268_v39 = vld [vmem:[#allocation73_spill] sm:$0xff] }
 0x3d5   : > { %v5485_v10 = vpop.eup %3987  ;;  %4007 = vpow2.f32 %v1950_v9  ;;  %v6269_v20 = vsub.f32 %v6267_v54, %v6268_v39 }
 0x3d6   : > { %v3990_v51 = vpop.eup %3989  ;;  %4009 = vpow2.f32 %v1620_v35  ;;  %v1956_v18 = vmul.f32 1.442695, %v1844_v12  ;;  %v1958_v58 = vmul.f32 1.442695, %v1845_v46  ;;  %2342 = vperm.xlu1 %3842, %v5396_v48   ;;  %v5490_v5 = vadd.f32 %v5485_v10, %v5478_v62  ;;  %v6270_v46 = vld [vmem:[#allocation34_spill] sm:$0xff] }
 0x3d7   : > { %v3992_v59 = vpop.eup %3991  ;;  %4011 = vpow2.f32 %v1622_v15  ;;  %v1626_v37 = vmul.f32 1.442695, %v6269_v20  ;;  %2566 = vmatmul.mubr.bf16.gmra.mrb[96].mxu1 %v2453_v14  ;;  %2327 = vperm.xlu0 %3841, %v5386_v52   ;;  %v1769_v9 = vpop.permute.xlu0 %1768  ;;  %v2455_v35 = vpack.c.bf16 %v3990_v51, %v5467_v53  ;;  %v6272_v14 = vld [vmem:[#allocation71_spill] sm:$0xff] }
 0x3d8   : > { %v5497_v12 = vpop.eup %3993  ;;  %4013 = vpow2.f32 %v1956_v18  ;;  %v1848_v48 = vsub.f32 %v6270_v46, %v1769_v9  ;;  %v1849_v50 = vsub.f32 %v6271_v4, %v1769_v9  ;;  %v2456_v45 = vpack.c.bf16 %v3992_v59, %v3984_v33  ;;  %v6274_v33 = vld [vmem:[#allocation75_spill] sm:$0xff] }
 0x3d9   : > { %v5501_v0 = vpop.eup %3995  ;;  %4015 = vpow2.f32 %v1958_v58  ;;  %v5503_v15 = vadd.f32 %v3992_v59, %v3990_v51  ;;  %v6273_v39 = vsub.f32 %v6272_v14, %v5160_v40  ;;  %v6275_v58 = vld [vmem:[#allocation76_spill] sm:$0xff]  ;;  %v6278_v46 = vld [vmem:[#allocation39_spill] sm:$0xff] }
 0x3da   : > { %v3998_v54 = vpop.eup %3997  ;;  %v1964_v52 = vmul.f32 1.442695, %v1848_v48  ;;  %v1966_v53 = vmul.f32 1.442695, %v1849_v50  ;;  %2573 = vmatprep.mubr.bf16.mxu1 %v2456_v45  ;;  %2352 = vperm.xlu1 %3842, %v5408_v13   ;;  %v5511_v18 = vadd.f32 %v5501_v0, %v5497_v12  ;;  %4017 = vpow2.f32 %v1626_v37  ;;  %v6277_v45 = vld [vmem:[#allocation38_spill] sm:$0xff] }
 0x3db   : > { %v1624_v20 = vmul.f32 1.442695, %v6273_v39  ;;  %v4000_v4 = vpop.eup %3999  ;;  %v6276_v51 = vsub.f32 %v6274_v33, %v6275_v58  ;;  %2337 = vperm.xlu0 %3841, %v5392_v3   ;;  %v1779_v9 = vpop.permute.xlu0 %1778  ;;  %v2457_v40 = vpack.c.bf16 %v5439_v60, %v3998_v54 }
 0x3dc   : > { %v4002_v48 = vpop.eup %4001  ;;  %4019 = vpow2.f32 %v1964_v52  ;;  %v1852_v50 = vsub.f32 %v6277_v45, %v1779_v9  ;;  %v1853_v14 = vsub.f32 %v6278_v46, %v1779_v9  ;;  %v2458_v39 = vpack.c.bf16 %v5443_v26, %v4000_v4 }
 0x3dd   : > { %v1630_v59 = vmul.f32 1.442695, %v6276_v51  ;;  %v4004_v13 = vpop.eup %4003  ;;  %4021 = vpow2.f32 %v1966_v53  ;;  %v5521_v37 = vadd.f32 %v4000_v4, %v3998_v54  ;;  %v6279_v53 = vld [vmem:[#allocation74_spill] sm:$0xff] }
 0x3de   : > { %v4006_v21 = vpop.eup %4005  ;;  %4023 = vpow2.f32 %v1624_v20  ;;  %v1972_v33 = vmul.f32 1.442695, %v1852_v50  ;;  %v1974_v58 = vmul.f32 1.442695, %v1853_v14  ;;  %2362 = vperm.xlu1 %3842, %v5418_v1   ;;  %v5524_v51 = vadd.f32 %v4004_v13, %v4002_v48 }
 0x3df   : > { %v4008_v60 = vpop.eup %4007  ;;  %4025 = vpow2.f32 %v1630_v59  ;;  %2574 = vmatmul.mubr.bf16.gmra.mrb[100].mxu1 %v2455_v35  ;;  %2347 = vperm.xlu0 %3841, %v5402_v61   ;;  %v2459_v52 = vpack.c.bf16 %v5456_v2, %v4006_v21  ;;  %v6280_v54 = vsub.f32 %v6279_v53, %v5182_v55 }
 0x3e0   : > { %v5528_v26 = vpop.eup %4009  ;;  %4027 = vpow2.f32 %v1972_v33  ;;  %2581 = vmatprep.mubr.bf16.mxu1 %v2458_v39  ;;  %v2460_v20 = vpack.c.bf16 %v5460_v17, %v4008_v60  ;;  %v5534_v9 = vadd.f32 %v4008_v60, %v4006_v21 }
 0x3e1   : > { %v1628_v4 = vmul.f32 1.442695, %v6280_v54  ;;  %v5536_v45 = vpop.eup %4011  ;;  %4029 = vpow2.f32 %v1974_v58 }
 0x3e2   : > { %v4014_v35 = vpop.eup %4013  ;;  %2372 = vperm.xlu1 %3842, %v5536_v45  }
 0x3e3   : > { %v4016_v59 = vpop.eup %4015  ;;  %2357 = vperm.xlu0 %3841, %v5414_v16   ;;  %v2461_v2 = vpack.c.bf16 %v5478_v62, %v4014_v35  ;;  %4031 = vpow2.f32 %v1628_v4 }
 0x3e4   : > { %v2462_v55 = vpack.c.bf16 %v5485_v10, %v4016_v59  ;;  %v5542_v50 = vadd.f32 %v4016_v59, %v4014_v35  ;;  %v5544_v46 = vpop.eup %4017 }
 0x3e6   : > { %v4020_v21 = vpop.eup %4019  ;;  %2382 = vperm.xlu1 %3842, %v5544_v46  }
 0x3e7   : > { %v4022_v17 = vpop.eup %4021  ;;  %2582 = vmatmul.mubr.bf16.gmra.mrb[104].mxu1 %v2457_v40  ;;  %2367 = vperm.xlu0 %3841, %v5528_v26   ;;  %v2463_v14 = vpack.c.bf16 %v5497_v12, %v4020_v21 }
 0x3e8   : > { %v5549_v39 = vpop.eup %4023  ;;  %2589 = vmatprep.mubr.bf16.mxu1 %v2460_v20  ;;  %v2464_v62 = vpack.c.bf16 %v5501_v0, %v4022_v17  ;;  %v2130_v33 = vadd.f32 %v4022_v17, %v4020_v21 }
 0x3e9   : > { %v5552_v10 = vpop.eup %4025 }
 0x3ea   : > { %v4028_v58 = vpop.eup %4027  ;;  %2392 = vperm.xlu1 %3842, %v5552_v10  }
 0x3eb   : > { %v4030_v60 = vpop.eup %4029  ;;  %2377 = vperm.xlu0 %3841, %v5549_v39   ;;  %v2465_v53 = vpack.c.bf16 %v4002_v48, %v4028_v58 }
 0x3ec   : > { %v2466_v40 = vpack.c.bf16 %v4004_v13, %v4030_v60  ;;  %v2136_v54 = vadd.f32 %v4030_v60, %v4028_v58 }
 0x3ed   : > { %v5556_v4 = vpop.eup %4031 }
 0x3ef   : > { %2590 = vmatmul.mubr.bf16.gmra.mrb[108].mxu1 %v2459_v52  ;;  %2387 = vperm.xlu0 %3841, %v5556_v4  }
 0x3f0   : > { %2597 = vmatprep.mubr.bf16.mxu1 %v2462_v55 }
 0x3f7   : > { %2598 = vmatmul.mubr.bf16.gmra.mrb[112].mxu1 %v2461_v2 }
 0x3f8   : > { %2605 = vmatprep.mubr.bf16.mxu1 %v2464_v62 }
 0x3ff   : > { %2606 = vmatmul.mubr.bf16.gmra.mrb[116].mxu1 %v2463_v14 }
 0x400   : > { %2613 = vmatprep.mubr.bf16.mxu1 %v2466_v40 }
 0x407   : > { %2614 = vmatmul.mubr.bf16.gmra.mrb[120].mxu1 %v2465_v53 }
 0x40e   : > { %2053 = vadd.xlane.f32.xlu0 %v5213_v49  ;;  %2056 = vadd.xlane.f32.xlu1 %v5217_v25  ;;  %v6281_v25 = vld [vmem:[#allocation44_spill] sm:$0xff] }
 0x412   : > { %2059 = vadd.xlane.f32.xlu0 %v5221_v28  ;;  %2065 = vadd.xlane.f32.xlu1 %v5229_v56 }
 0x416   : > { %2062 = vadd.xlane.f32.xlu0 %v5225_v38  ;;  %2071 = vadd.xlane.f32.xlu1 %v5237_v7  ;;  %v6282_v38 = vld [vmem:[#allocation45_spill] sm:$0xff] }
 0x41a   : > { %2068 = vadd.xlane.f32.xlu0 %v5233_v32  ;;  %2077 = vadd.xlane.f32.xlu1 %v5243_v30  ;;  %v6283_v30 = vld [vmem:[#allocation42_spill] sm:$0xff] }
 0x41e   : > { %2074 = vadd.xlane.f32.xlu0 %v5241_v24  ;;  %2083 = vadd.xlane.f32.xlu1 %v5247_v29  ;;  %v6284_v29 = vld [vmem:[#allocation43_spill] sm:$0xff] }
 0x422   : > { %2080 = vadd.xlane.f32.xlu0 %v5245_v6  ;;  %2089 = vadd.xlane.f32.xlu1 %v5406_v27 }
 0x426   : > { %2086 = vadd.xlane.f32.xlu0 %v5249_v22  ;;  %2095 = vadd.xlane.f32.xlu1 %v5430_v47 }
 0x429   : > { %v1794_v49 = vpop.permute.xlu1 %1793 }
 0x42a   : > { %v1858_v28 = vsub.f32 %v6281_v25, %v1794_v49  ;;  %v1859_v56 = vsub.f32 %v6282_v38, %v1794_v49  ;;  %2092 = vadd.xlane.f32.xlu0 %v5422_v34  ;;  %2101 = vadd.xlane.f32.xlu1 %v5436_v19 }
 0x42c   : > { %v1984_v32 = vmul.f32 1.442695, %v1858_v28  ;;  %v1986_v7 = vmul.f32 1.442695, %v1859_v56 }
 0x42d   : > { %v2248_v47 = vpop.permute.xlu1 %2247 }
 0x42e   : > { %4033 = vpow2.f32 %v1984_v32  ;;  %2098 = vadd.xlane.f32.xlu0 %v5447_v8  ;;  %2107 = vadd.xlane.f32.xlu1 %v5483_v23  ;;  %v2405_v12 = vmul.f32 0.0, %v2248_v47 }
 0x42f   : > { %4035 = vpow2.f32 %v1986_v7 }
 0x432   : > { %2104 = vadd.xlane.f32.xlu0 %v5465_v31  ;;  %2113 = vadd.xlane.f32.xlu1 %v5521_v37 }
 0x436   : > { %2110 = vadd.xlane.f32.xlu0 %v5503_v15  ;;  %2119 = vadd.xlane.f32.xlu1 %v5534_v9  ;;  %v1789_v24 = vpop.permute.xlu0 %1788  ;;  %v2258_v15 = vpop.permute.xlu1 %2257 }
 0x437   : > { %v1856_v6 = vsub.f32 %v6283_v30, %v1789_v24  ;;  %v1857_v22 = vsub.f32 %v6284_v29, %v1789_v24  ;;  %v6286_v24 = vsub.f32 %v5346_v44, %v5360_v57 }
 0x438   : > { %v4034_v34 = vpop.eup %4033 }
 0x439   : > { %v4036_v0 = vpop.eup %4035  ;;  %v1980_v27 = vmul.f32 1.442695, %v1856_v6  ;;  %v1982_v8 = vmul.f32 1.442695, %v1857_v22  ;;  %v1632_v30 = vmul.f32 1.442695, %v6286_v24 }
 0x43a   : > { %2116 = vadd.xlane.f32.xlu0 %v5452_v11  ;;  %2125 = vadd.xlane.f32.xlu1 %v5542_v50  ;;  %v2145_v13 = vadd.f32 %v4036_v0, %v4034_v34  ;;  %v2253_v31 = vpop.permute.xlu0 %2252  ;;  %v2263_v21 = vpop.permute.xlu1 %2262 }
 0x43b   : > { %4037 = vpow2.f32 %v1980_v27  ;;  %v2406_v20 = vmul.f32 0.0, %v2253_v31  ;;  %v2408_v40 = vmul.f32 0.0, %v2263_v21  ;;  %v3846_v27 = vld [vmem:[%s5989_s6 + $0x8] sm:$0xff]  }
 0x43c   : > { %4039 = vpow2.f32 %v1982_v8 }
 0x43e   : > { %2122 = vadd.xlane.f32.xlu0 %v5472_v36  ;;  %2131 = vadd.xlane.f32.xlu1 %v2130_v33  ;;  %v2407_v33 = vmul.f32 0.0, %v2258_v15  ;;  %v2273_v25 = vpop.permute.xlu1 %2272 }
 0x43f   : > { %v2410_v6 = vmul.f32 0.0, %v2273_v25  ;;  %v3848_v25 = vld [vmem:[%s5989_s6 + $0x18] sm:$0xff]  }
 0x441   : > { %v3611_v19 = vpop.f32.mrb[64].mxu1 }
 0x442   : > { %v3612_v23 = vpop.f32.mrb[65].mxu1  ;;  %2128 = vadd.xlane.f32.xlu0 %v5490_v5  ;;  %2137 = vadd.xlane.f32.xlu1 %v2136_v54  ;;  %v3845_v5 = vld [vmem:[%s5989_s6] sm:$0xff]   ;;  %v2283_v29 = vpop.permute.xlu1 %2282 }
 0x443   : > { %v3613_v48 = vadd.f32 %v3612_v23, %v3611_v19  ;;  %v3614_v37 = vpop.f32.mrb[66].mxu1  ;;  %3765 = vmatprep.subr.bf16.mxu0 %v3845_v5 }
 0x444   : > { %v3615_v11 = vpop.f32.mrb[67].mxu1  ;;  %3766 = vmatpush3.bf16.msra.mxu0 %v3845_v5 }
 0x445   : > { %v4038_v52 = vpop.eup %4037  ;;  %v3616_v9 = vadd.f32 %v3615_v11, %v3614_v37  ;;  %v5589_v35 = vadd.f32 %v3613_v48, %v2405_v12  ;;  %3767 = vmatprep.subr.bf16.mxu0 %v3846_v27  ;;  %v2412_v48 = vmul.f32 0.0, %v2283_v29  ;;  %v3849_v29 = vld [vmem:[%s5989_s6 + $0x20] sm:$0xff]  }
 0x446   : > { %v4040_v59 = vpop.eup %4039  ;;  %2134 = vadd.xlane.f32.xlu0 %v5511_v18  ;;  %v2467_v36 = vpack.c.bf16 %v4034_v34, %v4038_v52  ;;  %v6285_v18 = vsub.f32 %v5281_v42, %v5293_v41  ;;  %v2293_v44 = vpop.permute.xlu1 %2292 }
 0x447   : > { %v2468_v2 = vpack.c.bf16 %v4036_v0, %v4040_v59  ;;  %v2142_v55 = vadd.f32 %v4040_v59, %v4038_v52  ;;  %v5595_v50 = vadd.f32 %v3616_v9, %v2406_v20 }
 0x448   : > { %v1634_v62 = vmul.f32 1.442695, %v6285_v18  ;;  %3768 = vmatpush3.bf16.msra.mxu0 %v3846_v27 }
 0x449   : > { %v3617_v17 = vpop.f32.mrb[68].mxu1  ;;  %2621 = vmatprep.mubr.bf16.mxu1 %v2468_v2  ;;  %2143 = vadd.xlane.f32.xlu1 %v2142_v55 }
 0x44a   : > { %v3618_v14 = vpop.f32.mrb[69].mxu1  ;;  %2622 = vmatmul.mubr.bf16.gmra.mrb[124].mxu1 %v2467_v36  ;;  %2140 = vadd.xlane.f32.xlu0 %v5524_v51  ;;  %4041 = vpow2.f32 %v1634_v62  ;;  %v2268_v51 = vpop.permute.xlu0 %2267 }
 0x44b   : > { %v3619_v58 = vadd.f32 %v3618_v14, %v3617_v17  ;;  %v3620_v60 = vpop.f32.mrb[70].mxu1  ;;  %v2409_v42 = vmul.f32 0.0, %v2268_v51  ;;  %4043 = vpow2.f32 %v1632_v30  ;;  %v2303_v20 = vpop.permute.xlu1 %2302  ;;  %v2414_v14 = vmul.f32 0.0, %v2293_v44 }
 0x44c   : > { %v3621_v53 = vpop.f32.mrb[71].mxu1 }
 0x44d   : > { %v3622_v54 = vadd.f32 %v3621_v53, %v3620_v60  ;;  %v5601_v49 = vadd.f32 %v3619_v58, %v2407_v33  ;;  %v3847_v58 = vld [vmem:[%s5989_s6 + $0x10] sm:$0xff]  }
 0x44e   : > { %2146 = vadd.xlane.f32.xlu0 %v2145_v13  ;;  %v2278_v0 = vpop.permute.xlu0 %2277  ;;  %3769 = vmatprep.subr.bf16.mxu0 %v3847_v58 }
 0x44f   : > { %v5603_v28 = vadd.f32 %v3622_v54, %v2408_v40  ;;  %v2411_v57 = vmul.f32 0.0, %v2278_v0  ;;  %v2313_v33 = vpop.permute.xlu1 %2312  ;;  %3770 = vmatpush3.bf16.msra.mxu0 %v3847_v58 }
 0x450   : > { %3771 = vmatprep.subr.bf16.mxu0 %v3848_v25 }
 0x451   : > { %v3623_v38 = vpop.f32.mrb[72].mxu1 }
 0x452   : > { %v3624_v56 = vpop.f32.mrb[73].mxu1  ;;  %v2288_v12 = vpop.permute.xlu0 %2287 }
 0x453   : > { %v3625_v41 = vadd.f32 %v3624_v56, %v3623_v38  ;;  %v3626_v32 = vpop.f32.mrb[74].mxu1  ;;  %v2413_v55 = vmul.f32 0.0, %v2288_v12  ;;  %3772 = vmatpush3.bf16.msra.mxu0 %v3848_v25 }
 0x454   : > { %v3627_v7 = vpop.f32.mrb[75].mxu1  ;;  %v5615_v13 = vpop.eup %4041  ;;  %3773 = vmatprep.subr.bf16.mxu0 %v3849_v29 }
 0x455   : > { %v3628_v22 = vadd.f32 %v3627_v7, %v3626_v32  ;;  %v5608_v34 = vadd.f32 %v3625_v41, %v2409_v42  ;;  %v5622_v2 = vpop.eup %4043  ;;  %v2416_v41 = vmul.f32 0.0, %v2303_v20  ;;  %v5635_v32 = vpop.permute.xlu1 %2322 }
 0x456   : > { %v2298_v59 = vpop.permute.xlu0 %2297 }
 0x457   : > { %v5613_v8 = vadd.f32 %v3628_v22, %v2410_v6  ;;  %v2415_v51 = vmul.f32 0.0, %v2298_v59  ;;  %v3850_v22 = vld [vmem:[%s5989_s6 + $0x28] sm:$0xff]   ;;  %3774 = vmatpush3.bf16.msra.mxu0 %v3849_v29 }
 0x458   : > { %3775 = vmatprep.subr.bf16.mxu0 %v3850_v22  ;;  %v6287_v29 = vld [vmem:[#allocation47_spill] sm:$0xff] }
 0x459   : > { %v3629_v47 = vpop.f32.mrb[76].mxu1  ;;  %v5649_v0 = vpop.permute.xlu1 %2332 }
 0x45a   : > { %v3630_v19 = vpop.f32.mrb[77].mxu1  ;;  %2402 = vperm.xlu1 %3842, %v5615_v13   ;;  %v2308_v53 = vpop.permute.xlu0 %2307 }
 0x45b   : > { %v3631_v31 = vadd.f32 %v3630_v19, %v3629_v47  ;;  %v3632_v23 = vpop.f32.mrb[78].mxu1  ;;  %3776 = vmatpush3.bf16.msra.mxu0 %v3850_v22  ;;  %v2417_v58 = vmul.f32 0.0, %v2308_v53 }
 0x45c   : > { %v3633_v15 = vpop.f32.mrb[79].mxu1 }
 0x45d   : > { %v3634_v37 = vadd.f32 %v3633_v15, %v3632_v23  ;;  %v5618_v11 = vadd.f32 %v3631_v31, %v2411_v57  ;;  %v5653_v47 = vpop.permute.xlu1 %2342 }
 0x45e   : > { %v5639_v30 = vpop.permute.xlu0 %2317 }
 0x45f   : > { %v5620_v52 = vadd.f32 %v3634_v37, %v2412_v48 }
 0x461   : > { %v3635_v9 = vpop.f32.mrb[80].mxu1  ;;  %v5657_v44 = vpop.permute.xlu1 %2352 }
 0x462   : > { %v3636_v36 = vpop.f32.mrb[81].mxu1  ;;  %v5651_v27 = vpop.permute.xlu0 %2327 }
 0x463   : > { %v3637_v5 = vadd.f32 %v3636_v36, %v3635_v9  ;;  %v3638_v21 = vpop.f32.mrb[82].mxu1  ;;  %v1989_v9 = vld [vmem:[#allocation4 + $0x8] sm:$0xff]  ;;  %v1988_v36 = vld [vmem:[#allocation4] sm:$0xff] }
 0x464   : > { %v3639_v17 = vpop.f32.mrb[83].mxu1  ;;  %2397 = vperm.xlu0 %3841, %v5622_v2  }
 0x465   : > { %v3640_v18 = vadd.f32 %v3639_v17, %v3638_v21  ;;  %v5625_v62 = vadd.f32 %v3637_v5, %v2413_v55  ;;  %v5661_v31 = vpop.permute.xlu1 %2362  ;;  %v2021_v5 = vmul.f32 %v5308_v63, %v1989_v9  ;;  %v6288_v9 = vld [vmem:[#allocation46_spill] sm:$0xff] }
 0x466   : > { %v5655_v19 = vpop.permute.xlu0 %2337 }
 0x467   : > { %v5630_v60 = vadd.f32 %v3640_v18, %v2414_v14  ;;  %v2020_v14 = vmul.f32 %v5298_v43, %v1988_v36  ;;  %v1992_v18 = vld [vmem:[#allocation4 + $0x20] sm:$0xff]  ;;  %v1994_v36 = vld [vmem:[#allocation4 + $0x30] sm:$0xff] }
 0x468   : > { %v2024_v22 = vmul.f32 %v6287_v29, %v1992_v18  ;;  %v3852_v18 = vld [vmem:[%s5989_s6 + $0x38] sm:$0xff]  }
 0x469   : > { %v3641_v40 = vpop.f32.mrb[84].mxu1  ;;  %v5665_v12 = vpop.permute.xlu1 %2372 }
 0x46a   : > { %v3642_v54 = vpop.f32.mrb[85].mxu1  ;;  %v5659_v57 = vpop.permute.xlu0 %2347 }
 0x46b   : > { %v3643_v38 = vadd.f32 %v3642_v54, %v3641_v40  ;;  %v3644_v56 = vpop.f32.mrb[86].mxu1 }
 0x46c   : > { %v3645_v42 = vpop.f32.mrb[87].mxu1 }
 0x46d   : > { %v3646_v7 = vadd.f32 %v3645_v42, %v3644_v56  ;;  %v5637_v24 = vadd.f32 %v3643_v38, %v2415_v51  ;;  %v5669_v48 = vpop.permute.xlu1 %2382  ;;  %v1990_v38 = vld [vmem:[#allocation4 + $0x10] sm:$0xff] }
 0x46e   : > { %v5663_v23 = vpop.permute.xlu0 %2357  ;;  %v2022_v53 = vmul.f32 %v6288_v9, %v1990_v38  ;;  %v1993_v9 = vld [vmem:[#allocation4 + $0x28] sm:$0xff] }
 0x46f   : > { %v5641_v6 = vadd.f32 %v3646_v7, %v2416_v41  ;;  %v2418_v41 = vmul.f32 0.0, %v2313_v33  ;;  %v1991_v33 = vld [vmem:[#allocation4 + $0x18] sm:$0xff] }
 0x471   : > { %v5673_v20 = vpop.permute.xlu1 %2392 }
 0x472   : > { %v5667_v15 = vpop.permute.xlu0 %2367 }
 0x476   : > { %v5671_v37 = vpop.permute.xlu0 %2377 }
 0x47a   : > { %v5675_v59 = vpop.permute.xlu0 %2387 }
 0x49a   : > { %v3647_v55 = vpop.f32.mrb[88].mxu1 }
 0x49b   : > { %v3648_v21 = vpop.f32.mrb[89].mxu1  ;;  %v2057_v17 = vpop.xlane.xlu1 %2056 }
 0x49c   : > { %v3649_v40 = vadd.f32 %v3648_v21, %v3647_v55  ;;  %v2149_v54 = vadd.f32 %v2057_v17, %v2021_v5  ;;  %v3650_v25 = vpop.f32.mrb[90].mxu1  ;;  %v2054_v51 = vpop.xlane.xlu0 %2053  ;;  %v3851_v55 = vld [vmem:[%s5989_s6 + $0x30] sm:$0xff]  }
 0x49d   : > { %v2148_v56 = vadd.f32 %v2054_v51, %v2020_v14  ;;  %v3651_v42 = vpop.f32.mrb[91].mxu1  ;;  %3777 = vmatprep.subr.bf16.mxu0 %v3851_v55 }
 0x49e   : > { %2182 = vst.msk [vmem:[#allocation4 + $0x8] sm:$0xff] %vm727_vm2, %v2149_v54  ;;  %v3652_v7 = vadd.f32 %v3651_v42, %v3650_v25  ;;  %v5681_v63 = vadd.f32 %v3649_v40, %v2417_v58  ;;  %v6289_v40 = vld [vmem:[#allocation50_spill] sm:$0xff]  ;;  %3778 = vmatpush3.bf16.msra.mxu0 %v3851_v55  ;;  %v2420_v55 = vmul.f32 0.0, %v5635_v32 }
 0x49f   : > { %2181 = vst.msk [vmem:[#allocation4] sm:$0xff] %vm727_vm2, %v2148_v56  ;;  %v2066_v43 = vpop.xlane.xlu1 %2065  ;;  %v2026_v54 = vmul.f32 %v6289_v40, %v1994_v36  ;;  %v1996_v25 = vld [vmem:[#allocation4 + $0x40] sm:$0xff]  ;;  %v6290_v56 = vld [vmem:[#allocation48_spill] sm:$0xff]  ;;  %3779 = vmatprep.subr.bf16.mxu0 %v3852_v18 }
 0x4a0   : > { %v2152_v5 = vadd.f32 %v2066_v43, %v2024_v22  ;;  %v2060_v21 = vpop.xlane.xlu0 %2059  ;;  %v5688_v17 = vadd.f32 %v3652_v7, %v2418_v41  ;;  %v2023_v42 = vmul.f32 %v6290_v56, %v1991_v33  ;;  %v2419_v41 = vmul.f32 0.0, %v5639_v30  ;;  %v6291_v36 = vld [vmem:[#allocation52_spill] sm:$0xff] }
 0x4a1   : > { %v2150_v14 = vadd.f32 %v2060_v21, %v2022_v53  ;;  %v2028_v40 = vmul.f32 %v6291_v36, %v1996_v25  ;;  %v1995_v25 = vld [vmem:[#allocation4 + $0x38] sm:$0xff] }
 0x4a2   : > { %2185 = vst.msk [vmem:[#allocation4 + $0x20] sm:$0xff] %vm727_vm2, %v2152_v5  ;;  %v3653_v58 = vpop.f32.mrb[92].mxu1  ;;  %3780 = vmatpush3.bf16.msra.mxu0 %v3852_v18  ;;  %v6294_v18 = vld [vmem:[#allocation53_spill] sm:$0xff] }
 0x4a3   : > { %2183 = vst.msk [vmem:[#allocation4 + $0x10] sm:$0xff] %vm727_vm2, %v2150_v14  ;;  %v3654_v51 = vpop.f32.mrb[93].mxu1  ;;  %v2072_v38 = vpop.xlane.xlu1 %2071 }
 0x4a4   : > { %v3655_v7 = vadd.f32 %v3654_v51, %v3653_v58  ;;  %v2154_v29 = vadd.f32 %v2072_v38, %v2026_v54  ;;  %v3656_v22 = vpop.f32.mrb[94].mxu1  ;;  %v2063_v43 = vpop.xlane.xlu0 %2062  ;;  %v6292_v58 = vld [vmem:[#allocation49_spill] sm:$0xff]  ;;  %v1998_v51 = vld [vmem:[#allocation4 + $0x50] sm:$0xff] }
 0x4a5   : > { %v2762_v53 = vld [vmem:[#allocation4 + $0x8] sm:$0xff]  ;;  %v2151_v5 = vadd.f32 %v2063_v43, %v2023_v42  ;;  %v3657_v21 = vpop.f32.mrb[95].mxu1  ;;  %v2025_v54 = vmul.f32 %v6292_v58, %v1993_v9 }
 0x4a6   : > { %4045 = vrcp.f32 %v2762_v53  ;;  %v2761_v14 = vld [vmem:[#allocation4] sm:$0xff]  ;;  %2187 = vst.msk [vmem:[#allocation4 + $0x30] sm:$0xff] %vm727_vm2, %v2154_v29  ;;  %v3658_v33 = vadd.f32 %v3657_v21, %v3656_v22  ;;  %v5701_v56 = vadd.f32 %v3655_v7, %v2419_v41  ;;  %v2030_v41 = vmul.f32 %v6294_v18, %v1998_v51  ;;  %v6295_v21 = vld [vmem:[#allocation51_spill] sm:$0xff] }
 0x4a7   : > { %4047 = vrcp.f32 %v2761_v14  ;;  %2184 = vst.msk [vmem:[#allocation4 + $0x18] sm:$0xff] %vm727_vm2, %v2151_v5  ;;  %v2078_v30 = vpop.xlane.xlu1 %2077  ;;  %v2000_v7 = vld [vmem:[#allocation4 + $0x60] sm:$0xff]  ;;  %v2027_v36 = vmul.f32 %v6295_v21, %v1995_v25  ;;  %v1997_v58 = vld [vmem:[#allocation4 + $0x48] sm:$0xff]  ;;  %v2422_v18 = vmul.f32 0.0, %v5649_v0 }
 0x4a8   : > { %v2156_v38 = vadd.f32 %v2078_v30, %v2028_v40  ;;  %v2069_v42 = vpop.xlane.xlu0 %2068  ;;  %v5705_v43 = vadd.f32 %v3658_v33, %v2420_v55  ;;  %v2421_v40 = vmul.f32 0.0, %v5651_v27 }
 0x4a9   : > { %v2153_v32 = vadd.f32 %v2069_v42, %v2025_v54  ;;  %v2765_v22 = vld [vmem:[#allocation4 + $0x20] sm:$0xff]  ;;  %v6296_v42 = vld [vmem:[#allocation57_spill] sm:$0xff] }
 0x4aa   : > { %6293 = vst [vmem:[#allocation62_spill] sm:$0xff] %v5705_v43  ;;  %v2763_v53 = vld [vmem:[#allocation4 + $0x10] sm:$0xff]  ;;  %2189 = vst.msk [vmem:[#allocation4 + $0x40] sm:$0xff] %vm727_vm2, %v2156_v38  ;;  %v3659_v29 = vpop.f32.mrb[96].mxu1  ;;  %v2032_v51 = vmul.f32 %v6296_v42, %v2000_v7 }
 0x4ab   : > { %4049 = vrcp.f32 %v2763_v53  ;;  %2186 = vst.msk [vmem:[#allocation4 + $0x28] sm:$0xff] %vm727_vm2, %v2153_v32  ;;  %v3660_v5 = vpop.f32.mrb[97].mxu1  ;;  %v2084_v9 = vpop.xlane.xlu1 %2083 }
 0x4ac   : > { %v3661_v55 = vadd.f32 %v3660_v5, %v3659_v29  ;;  %v2158_v14 = vadd.f32 %v2084_v9, %v2030_v41  ;;  %v3662_v33 = vpop.f32.mrb[98].mxu1  ;;  %v2075_v30 = vpop.xlane.xlu0 %2074  ;;  %4051 = vrcp.f32 %v2765_v22  ;;  %v6297_v29 = vld [vmem:[#allocation54_spill] sm:$0xff]  ;;  %v2002_v5 = vld [vmem:[#allocation4 + $0x70] sm:$0xff] }
 0x4ad   : > { %v2155_v54 = vadd.f32 %v2075_v30, %v2027_v36  ;;  %v3663_v38 = vpop.f32.mrb[99].mxu1  ;;  %v2767_v25 = vld [vmem:[#allocation4 + $0x30] sm:$0xff]  ;;  %v2029_v41 = vmul.f32 %v6297_v29, %v1997_v58  ;;  %v1999_v36 = vld [vmem:[#allocation4 + $0x58] sm:$0xff] }
 0x4ae   : > { %v2764_v53 = vld [vmem:[#allocation4 + $0x18] sm:$0xff]  ;;  %2191 = vst.msk [vmem:[#allocation4 + $0x50] sm:$0xff] %vm727_vm2, %v2158_v14  ;;  %v3664_v32 = vadd.f32 %v3663_v38, %v3662_v33  ;;  %v5715_v43 = vadd.f32 %v3661_v55, %v2421_v40  ;;  %v6298_v14 = vld [vmem:[#allocation58_spill] sm:$0xff] }
 0x4af   : > { %4053 = vrcp.f32 %v2764_v53  ;;  %2188 = vst.msk [vmem:[#allocation4 + $0x38] sm:$0xff] %vm727_vm2, %v2155_v54  ;;  %v2090_v27 = vpop.xlane.xlu1 %2089  ;;  %v2034_v33 = vmul.f32 %v6298_v14, %v2002_v5  ;;  %v2004_v54 = vld [vmem:[#allocation4 + $0x80] sm:$0xff]  ;;  %v2423_v53 = vmul.f32 0.0, %v5655_v19 }
 0x4b0   : > { %v4046_v9 = vpop.eup %4045  ;;  %v2160_v21 = vadd.f32 %v2090_v27, %v2032_v51  ;;  %v2081_v7 = vpop.xlane.xlu0 %2080  ;;  %v5719_v0 = vadd.f32 %v3664_v32, %v2422_v18  ;;  %4055 = vrcp.f32 %v2767_v25  ;;  %v6299_v51 = vld [vmem:[#allocation55_spill] sm:$0xff]  ;;  %v6300_v5 = vld [vmem:[#allocation6_spill] sm:$0xff] }
 0x4b1   : > { %v4048_v22 = vpop.eup %4047  ;;  %v2157_v30 = vadd.f32 %v2081_v7, %v2029_v41  ;;  %2832 = vperm.xlu1 %3842, %v4046_v9   ;;  %v2769_v58 = vld [vmem:[#allocation4 + $0x40] sm:$0xff]  ;;  %v2031_v18 = vmul.f32 %v6299_v51, %v1999_v36  ;;  %v2001_v41 = vld [vmem:[#allocation4 + $0x68] sm:$0xff] }
 0x4b2   : > { %v2766_v40 = vld [vmem:[#allocation4 + $0x28] sm:$0xff]  ;;  %2193 = vst.msk [vmem:[#allocation4 + $0x60] sm:$0xff] %vm727_vm2, %v2160_v21  ;;  %v3665_v55 = vpop.f32.mrb[100].mxu1  ;;  %2827 = vperm.xlu0 %3841, %v4048_v22   ;;  %v2036_v22 = vmul.f32 %v6300_v5, %v2004_v54 }
 0x4b3   : > { %4057 = vrcp.f32 %v2766_v40  ;;  %2190 = vst.msk [vmem:[#allocation4 + $0x48] sm:$0xff] %vm727_vm2, %v2157_v30  ;;  %v3666_v38 = vpop.f32.mrb[101].mxu1  ;;  %v2096_v42 = vpop.xlane.xlu1 %2095  ;;  %v2424_v40 = vmul.f32 0.0, %v5653_v47  ;;  %v2003_v47 = vld [vmem:[#allocation4 + $0x78] sm:$0xff]  ;;  %v6302_v5 = vld [vmem:[#allocation59_spill] sm:$0xff] }
 0x4b4   : > { %v3667_v32 = vadd.f32 %v3666_v38, %v3665_v55  ;;  %v2162_v25 = vadd.f32 %v2096_v42, %v2034_v33  ;;  %v3668_v27 = vpop.f32.mrb[102].mxu1  ;;  %v2087_v29 = vpop.xlane.xlu0 %2086  ;;  %4059 = vrcp.f32 %v2769_v58  ;;  %v6301_v33 = vld [vmem:[#allocation56_spill] sm:$0xff] }
 0x4b5   : > { %v4050_v9 = vpop.eup %4049  ;;  %v2159_v21 = vadd.f32 %v2087_v29, %v2031_v18  ;;  %v3669_v7 = vpop.f32.mrb[103].mxu1  ;;  %v2771_v19 = vld [vmem:[#allocation4 + $0x50] sm:$0xff]  ;;  %v2033_v38 = vmul.f32 %v6301_v33, %v2001_v41 }
 0x4b6   : > { %v2768_v30 = vld [vmem:[#allocation4 + $0x38] sm:$0xff]  ;;  %2195 = vst.msk [vmem:[#allocation4 + $0x70] sm:$0xff] %vm727_vm2, %v2162_v25  ;;  %v3670_v14 = vadd.f32 %v3669_v7, %v3668_v27  ;;  %2837 = vperm.xlu0 %3841, %v4050_v9   ;;  %v5729_v36 = vadd.f32 %v3667_v32, %v2423_v53  ;;  %v2006_v42 = vld [vmem:[#allocation4 + $0x90] sm:$0xff]  ;;  %v4052_v51 = vpop.eup %4051  ;;  %v2008_v9 = vld [vmem:[#allocation4 + $0xa0] sm:$0xff] }
 0x4b7   : > { %4061 = vrcp.f32 %v2768_v30  ;;  %2192 = vst.msk [vmem:[#allocation4 + $0x58] sm:$0xff] %vm727_vm2, %v2159_v21  ;;  %v2102_v55 = vpop.xlane.xlu1 %2101  ;;  %v2038_v32 = vmul.f32 %v5392_v3, %v2006_v42  ;;  %v2425_v30 = vmul.f32 0.0, %v5659_v57  ;;  %v2040_v42 = vmul.f32 %v5402_v61, %v2008_v9 }
 0x4b8   : > { %v2164_v54 = vadd.f32 %v2102_v55, %v2036_v22  ;;  %v2093_v18 = vpop.xlane.xlu0 %2092  ;;  %v5733_v58 = vadd.f32 %v3670_v14, %v2424_v40  ;;  %4063 = vrcp.f32 %v2771_v19  ;;  %v2035_v22 = vmul.f32 %v6302_v5, %v2003_v47 }
 0x4b9   : > { %v4054_v29 = vpop.eup %4053  ;;  %v2161_v25 = vadd.f32 %v2093_v18, %v2033_v38  ;;  %v2773_v41 = vld [vmem:[#allocation4 + $0x60] sm:$0xff]  ;;  %v2005_v38 = vld [vmem:[#allocation4 + $0x88] sm:$0xff]  ;;  %v2426_v18 = vmul.f32 0.0, %v5657_v44 }
 0x4ba   : > { %v2770_v27 = vld [vmem:[#allocation4 + $0x48] sm:$0xff]  ;;  %2197 = vst.msk [vmem:[#allocation4 + $0x80] sm:$0xff] %vm727_vm2, %v2164_v54  ;;  %v3671_v53 = vpop.f32.mrb[104].mxu1  ;;  %2847 = vperm.xlu0 %3841, %v4052_v51   ;;  %2842 = vperm.xlu1 %3842, %v4054_v29   ;;  %v4056_v40 = vpop.eup %4055 }
 0x4bb   : > { %4065 = vrcp.f32 %v2770_v27  ;;  %2194 = vst.msk [vmem:[#allocation4 + $0x68] sm:$0xff] %vm727_vm2, %v2161_v25  ;;  %v3672_v21 = vpop.f32.mrb[105].mxu1  ;;  %v2108_v7 = vpop.xlane.xlu1 %2107 }
 0x4bc   : > { %v3673_v14 = vadd.f32 %v3672_v21, %v3671_v53  ;;  %v2166_v19 = vadd.f32 %v2108_v7, %v2038_v32  ;;  %v3674_v55 = vpop.f32.mrb[106].mxu1  ;;  %v2099_v33 = vpop.xlane.xlu0 %2098  ;;  %4067 = vrcp.f32 %v2773_v41  ;;  %v6303_v53 = vld [vmem:[#allocation7_spill] sm:$0xff]  ;;  %v2010_v21 = vld [vmem:[#allocation4 + $0xb0] sm:$0xff]  ;;  %v2007_v41 = vld [vmem:[#allocation4 + $0x98] sm:$0xff] }
 0x4bd   : > { %v4058_v51 = vpop.eup %4057  ;;  %v2163_v54 = vadd.f32 %v2099_v33, %v2035_v22  ;;  %v3675_v3 = vpop.f32.mrb[107].mxu1  ;;  %v2775_v25 = vld [vmem:[#allocation4 + $0x70] sm:$0xff]  ;;  %v2037_v32 = vmul.f32 %v6303_v53, %v2005_v38 }
 0x4be   : > { %v2772_v29 = vld [vmem:[#allocation4 + $0x58] sm:$0xff]  ;;  %2199 = vst.msk [vmem:[#allocation4 + $0x90] sm:$0xff] %vm727_vm2, %v2166_v19  ;;  %v3676_v47 = vadd.f32 %v3675_v3, %v3674_v55  ;;  %2857 = vperm.xlu0 %3841, %v4056_v40   ;;  %2852 = vperm.xlu1 %3842, %v4058_v51   ;;  %v5743_v57 = vadd.f32 %v3673_v14, %v2425_v30  ;;  %v4060_v61 = vpop.eup %4059  ;;  %v2012_v19 = vld [vmem:[#allocation4 + $0xc0] sm:$0xff]  ;;  %v6304_v51 = vld [vmem:[#allocation60_spill] sm:$0xff] }
 0x4bf   : > { %4069 = vrcp.f32 %v2772_v29  ;;  %2196 = vst.msk [vmem:[#allocation4 + $0x78] sm:$0xff] %vm727_vm2, %v2163_v54  ;;  %v2114_v27 = vpop.xlane.xlu1 %2113  ;;  %v2042_v14 = vmul.f32 %v5414_v16, %v2010_v21  ;;  %v2039_v54 = vmul.f32 %v6304_v51, %v2007_v41  ;;  %v2044_v21 = vmul.f32 %v5528_v26, %v2012_v19  ;;  %v2011_v19 = vld [vmem:[#allocation4 + $0xb8] sm:$0xff] }
 0x4c0   : > { %v2168_v9 = vadd.f32 %v2114_v27, %v2040_v42  ;;  %v2105_v44 = vpop.xlane.xlu0 %2104  ;;  %v5747_v7 = vadd.f32 %v3676_v47, %v2426_v18  ;;  %4071 = vrcp.f32 %v2775_v25  ;;  %v2427_v42 = vmul.f32 0.0, %v5663_v23  ;;  %v2009_v27 = vld [vmem:[#allocation4 + $0xa8] sm:$0xff] }
 0x4c1   : > { %v4062_v5 = vpop.eup %4061  ;;  %v2165_v22 = vadd.f32 %v2105_v44, %v2037_v32  ;;  %v2777_v55 = vld [vmem:[#allocation4 + $0x80] sm:$0xff] }
 0x4c2   : > { %v2774_v40 = vld [vmem:[#allocation4 + $0x68] sm:$0xff]  ;;  %2201 = vst.msk [vmem:[#allocation4 + $0xa0] sm:$0xff] %vm727_vm2, %v2168_v9  ;;  %v3677_v30 = vpop.f32.mrb[108].mxu1  ;;  %2867 = vperm.xlu0 %3841, %v4060_v61   ;;  %2862 = vperm.xlu1 %3842, %v4062_v5   ;;  %v4064_v3 = vpop.eup %4063  ;;  %v2428_v61 = vmul.f32 0.0, %v5661_v31 }
 0x4c3   : > { %4073 = vrcp.f32 %v2774_v40  ;;  %2198 = vst.msk [vmem:[#allocation4 + $0x88] sm:$0xff] %vm727_vm2, %v2165_v22  ;;  %v3678_v33 = vpop.f32.mrb[109].mxu1  ;;  %v2120_v38 = vpop.xlane.xlu1 %2119  ;;  %v6305_v22 = vld [vmem:[#allocation61_spill] sm:$0xff] }
 0x4c4   : > { %v3679_v18 = vadd.f32 %v3678_v33, %v3677_v30  ;;  %v3680_v29 = vpop.f32.mrb[110].mxu1  ;;  %v2170_v47 = vadd.f32 %v2120_v38, %v2042_v14  ;;  %v2111_v25 = vpop.xlane.xlu0 %2110  ;;  %4075 = vrcp.f32 %v2777_v55  ;;  %v2041_v40 = vmul.f32 %v6305_v22, %v2009_v27  ;;  %v2014_v30 = vld [vmem:[#allocation4 + $0xd0] sm:$0xff] }
 0x4c5   : > { %v4066_v53 = vpop.eup %4065  ;;  %v2167_v32 = vadd.f32 %v2111_v25, %v2039_v54  ;;  %v3681_v16 = vpop.f32.mrb[111].mxu1  ;;  %v2779_v41 = vld [vmem:[#allocation4 + $0x90] sm:$0xff]  ;;  %v2043_v25 = vmul.f32 %v5418_v1, %v2011_v19  ;;  %v2430_v22 = vmul.f32 0.0, %v5665_v12  ;;  %v2015_v12 = vld [vmem:[#allocation4 + $0xd8] sm:$0xff] }
 0x4c6   : > { %v2776_v9 = vld [vmem:[#allocation4 + $0x78] sm:$0xff]  ;;  %2203 = vst.msk [vmem:[#allocation4 + $0xb0] sm:$0xff] %vm727_vm2, %v2170_v47  ;;  %v3682_v44 = vadd.f32 %v3681_v16, %v3680_v29  ;;  %2877 = vperm.xlu0 %3841, %v4064_v3   ;;  %2872 = vperm.xlu1 %3842, %v4066_v53   ;;  %v5757_v23 = vadd.f32 %v3679_v18, %v2427_v42  ;;  %v4068_v26 = vpop.eup %4067  ;;  %v2016_v42 = vld [vmem:[#allocation4 + $0xe0] sm:$0xff]  ;;  %v2429_v53 = vmul.f32 0.0, %v5667_v15 }
 0x4c7   : > { %4077 = vrcp.f32 %v2776_v9  ;;  %2200 = vst.msk [vmem:[#allocation4 + $0x98] sm:$0xff] %vm727_vm2, %v2167_v32  ;;  %v2126_v5 = vpop.xlane.xlu1 %2125  ;;  %v2046_v3 = vmul.f32 %v5549_v39, %v2014_v30  ;;  %v2013_v9 = vld [vmem:[#allocation4 + $0xc8] sm:$0xff] }
 0x4c8   : > { %v2172_v14 = vadd.f32 %v2126_v5, %v2044_v21  ;;  %v2117_v31 = vpop.xlane.xlu0 %2116  ;;  %v5761_v55 = vadd.f32 %v3682_v44, %v2428_v61  ;;  %4079 = vrcp.f32 %v2779_v41  ;;  %v2048_v5 = vmul.f32 %v5556_v4, %v2016_v42  ;;  %v2018_v42 = vld [vmem:[#allocation4 + $0xf0] sm:$0xff] }
 0x4c9   : > { %v4070_v33 = vpop.eup %4069  ;;  %v2169_v38 = vadd.f32 %v2117_v31, %v2041_v40  ;;  %v2781_v18 = vld [vmem:[#allocation4 + $0xa0] sm:$0xff] }
 0x4ca   : > { %v2778_v51 = vld [vmem:[#allocation4 + $0x88] sm:$0xff]  ;;  %2205 = vst.msk [vmem:[#allocation4 + $0xc0] sm:$0xff] %vm727_vm2, %v2172_v14  ;;  %v3683_v54 = vpop.f32.mrb[112].mxu1  ;;  %2887 = vperm.xlu0 %3841, %v4068_v26   ;;  %2882 = vperm.xlu1 %3842, %v4070_v33   ;;  %v4072_v27 = vpop.eup %4071  ;;  %v2045_v14 = vmul.f32 %v5536_v45, %v2013_v9 }
 0x4cb   : > { %4081 = vrcp.f32 %v2778_v51  ;;  %2202 = vst.msk [vmem:[#allocation4 + $0xa8] sm:$0xff] %vm727_vm2, %v2169_v38  ;;  %v3684_v29 = vpop.f32.mrb[113].mxu1  ;;  %v2132_v47 = vpop.xlane.xlu1 %2131 }
 0x4cc   : > { %v3685_v32 = vadd.f32 %v3684_v29, %v3683_v54  ;;  %v3686_v16 = vpop.f32.mrb[114].mxu1  ;;  %v2174_v21 = vadd.f32 %v2132_v47, %v2046_v3  ;;  %v2123_v61 = vpop.xlane.xlu0 %2122  ;;  %4083 = vrcp.f32 %v2781_v18  ;;  %v2047_v29 = vmul.f32 %v5544_v46, %v2015_v12 }
 0x4cd   : > { %v4074_v44 = vpop.eup %4073  ;;  %v2171_v41 = vadd.f32 %v2123_v61, %v2043_v25  ;;  %v3687_v39 = vpop.f32.mrb[115].mxu1  ;;  %v2783_v30 = vld [vmem:[#allocation4 + $0xb0] sm:$0xff]  ;;  %v2431_v25 = vmul.f32 0.0, %v5671_v37 }
 0x4ce   : > { %v2780_v40 = vld [vmem:[#allocation4 + $0x98] sm:$0xff]  ;;  %2207 = vst.msk [vmem:[#allocation4 + $0xd0] sm:$0xff] %vm727_vm2, %v2174_v21  ;;  %v3688_v1 = vadd.f32 %v3687_v39, %v3686_v16  ;;  %2897 = vperm.xlu0 %3841, %v4072_v27   ;;  %2892 = vperm.xlu1 %3842, %v4074_v44   ;;  %v5771_v15 = vadd.f32 %v3685_v32, %v2429_v53  ;;  %v4076_v31 = vpop.eup %4075  ;;  %v2017_v16 = vld [vmem:[#allocation4 + $0xe8] sm:$0xff] }
 0x4cf   : > { %4085 = vrcp.f32 %v2780_v40  ;;  %2204 = vst.msk [vmem:[#allocation4 + $0xb8] sm:$0xff] %vm727_vm2, %v2171_v41  ;;  %v2138_v26 = vpop.xlane.xlu1 %2137  ;;  %v2050_v44 = vmul.f32 %v5622_v2, %v2018_v42  ;;  %v2432_v41 = vmul.f32 0.0, %v5669_v48  ;;  %v2019_v2 = vld [vmem:[#allocation4 + $0xf8] sm:$0xff] }
 0x4d0   : > { %v2176_v4 = vadd.f32 %v2138_v26, %v2048_v5  ;;  %v2129_v19 = vpop.xlane.xlu0 %2128  ;;  %v5775_v33 = vadd.f32 %v3688_v1, %v2430_v22  ;;  %4087 = vrcp.f32 %v2783_v30  ;;  %v2049_v1 = vmul.f32 %v5552_v10, %v2017_v16 }
 0x4d1   : > { %v4078_v38 = vpop.eup %4077  ;;  %v2173_v51 = vadd.f32 %v2129_v19, %v2045_v14  ;;  %v2785_v18 = vld [vmem:[#allocation4 + $0xc0] sm:$0xff]  ;;  %v2051_v10 = vmul.f32 %v5615_v13, %v2019_v2 }
 0x4d2   : > { %v2782_v54 = vld [vmem:[#allocation4 + $0xa8] sm:$0xff]  ;;  %2209 = vst.msk [vmem:[#allocation4 + $0xe0] sm:$0xff] %vm727_vm2, %v2176_v4  ;;  %v3689_v3 = vpop.f32.mrb[116].mxu1  ;;  %2907 = vperm.xlu0 %3841, %v4076_v31   ;;  %2902 = vperm.xlu1 %3842, %v4078_v38   ;;  %v4080_v47 = vpop.eup %4079 }
 0x4d3   : > { %4089 = vrcp.f32 %v2782_v54  ;;  %2206 = vst.msk [vmem:[#allocation4 + $0xc8] sm:$0xff] %vm727_vm2, %v2173_v51  ;;  %v3690_v45 = vpop.f32.mrb[117].mxu1  ;;  %v2433_v54 = vmul.f32 0.0, %v5675_v59 }
 0x4d4   : > { %v3691_v27 = vadd.f32 %v3690_v45, %v3689_v3  ;;  %v3692_v53 = vpop.f32.mrb[118].mxu1  ;;  %v2135_v32 = vpop.xlane.xlu0 %2134  ;;  %4091 = vrcp.f32 %v2785_v18 }
 0x4d5   : > { %v4082_v21 = vpop.eup %4081  ;;  %v2175_v61 = vadd.f32 %v2135_v32, %v2047_v29  ;;  %v3693_v9 = vpop.f32.mrb[119].mxu1  ;;  %v2787_v37 = vld [vmem:[#allocation4 + $0xd0] sm:$0xff] }
 0x4d6   : > { %v2784_v39 = vld [vmem:[#allocation4 + $0xb8] sm:$0xff]  ;;  %v3694_v5 = vadd.f32 %v3693_v9, %v3692_v53  ;;  %v2144_v22 = vpop.xlane.xlu1 %2143  ;;  %2917 = vperm.xlu0 %3841, %v4080_v47   ;;  %2912 = vperm.xlu1 %3842, %v4082_v21   ;;  %v5783_v46 = vadd.f32 %v3691_v27, %v2431_v25  ;;  %v4084_v30 = vpop.eup %4083  ;;  %v2434_v25 = vmul.f32 0.0, %v5673_v20 }
 0x4d7   : > { %4093 = vrcp.f32 %v2784_v39  ;;  %2208 = vst.msk [vmem:[#allocation4 + $0xd8] sm:$0xff] %vm727_vm2, %v2175_v61  ;;  %v2178_v40 = vadd.f32 %v2144_v22, %v2050_v44 }
 0x4d8   : > { %v2141_v26 = vpop.xlane.xlu0 %2140  ;;  %v5787_v14 = vadd.f32 %v3694_v5, %v2432_v41  ;;  %4095 = vrcp.f32 %v2787_v37 }
 0x4d9   : > { %v4086_v48 = vpop.eup %4085  ;;  %2211 = vst.msk [vmem:[#allocation4 + $0xf0] sm:$0xff] %vm727_vm2, %v2178_v40  ;;  %v2177_v31 = vadd.f32 %v2141_v26, %v2049_v1  ;;  %v2789_v12 = vld [vmem:[#allocation4 + $0xe0] sm:$0xff] }
 0x4da   : > { %v2786_v4 = vld [vmem:[#allocation4 + $0xc8] sm:$0xff]  ;;  %v3695_v19 = vpop.f32.mrb[120].mxu1  ;;  %2927 = vperm.xlu0 %3841, %v4084_v30   ;;  %2922 = vperm.xlu1 %3842, %v4086_v48   ;;  %v4088_v51 = vpop.eup %4087 }
 0x4db   : > { %4097 = vrcp.f32 %v2786_v4  ;;  %2210 = vst.msk [vmem:[#allocation4 + $0xe8] sm:$0xff] %vm727_vm2, %v2177_v31  ;;  %v3696_v38 = vpop.f32.mrb[121].mxu1  ;;  %v2403_v30 = vpop.permute.xlu1 %2402 }
 0x4dc   : > { %v3697_v3 = vadd.f32 %v3696_v38, %v3695_v19  ;;  %v3698_v42 = vpop.f32.mrb[122].mxu1  ;;  %v2147_v18 = vpop.xlane.xlu0 %2146  ;;  %4099 = vrcp.f32 %v2789_v12  ;;  %v2436_v19 = vmul.f32 0.0, %v2403_v30 }
 0x4dd   : > { %v4090_v45 = vpop.eup %4089  ;;  %v2179_v29 = vadd.f32 %v2147_v18, %v2051_v10  ;;  %v3699_v47 = vpop.f32.mrb[123].mxu1 }
 0x4de   : > { %v2788_v27 = vld [vmem:[#allocation4 + $0xd8] sm:$0xff]  ;;  %v3700_v53 = vadd.f32 %v3699_v47, %v3698_v42  ;;  %2937 = vperm.xlu0 %3841, %v4088_v51   ;;  %2932 = vperm.xlu1 %3842, %v4090_v45   ;;  %v5794_v32 = vadd.f32 %v3697_v3, %v2433_v54  ;;  %v4092_v13 = vpop.eup %4091 }
 0x4df   : > { %4101 = vrcp.f32 %v2788_v27  ;;  %2212 = vst.msk [vmem:[#allocation4 + $0xf8] sm:$0xff] %vm727_vm2, %v2179_v29 }
 0x4e0   : > { %v2791_v59 = vld [vmem:[#allocation4 + $0xf0] sm:$0xff]  ;;  %v5797_v16 = vadd.f32 %v3700_v53, %v2434_v25 }
 0x4e1   : > { %v4094_v21 = vpop.eup %4093  ;;  %4103 = vrcp.f32 %v2791_v59 }
 0x4e2   : > { %v2790_v61 = vld [vmem:[#allocation4 + $0xe8] sm:$0xff]  ;;  %2947 = vperm.xlu0 %3841, %v4092_v13   ;;  %2942 = vperm.xlu1 %3842, %v4094_v21   ;;  %v4096_v20 = vpop.eup %4095 }
 0x4e3   : > { %4105 = vrcp.f32 %v2790_v61  ;;  %v2398_v40 = vpop.permute.xlu0 %2397 }
 0x4e4   : > { %v2435_v2 = vmul.f32 0.0, %v2398_v40 }
 0x4e5   : > { %v4098_v9 = vpop.eup %4097 }
 0x4e6   : > { %v2792_v44 = vld [vmem:[#allocation4 + $0xf8] sm:$0xff]  ;;  %2957 = vperm.xlu0 %3841, %v4096_v20   ;;  %2952 = vperm.xlu1 %3842, %v4098_v9   ;;  %v4100_v41 = vpop.eup %4099 }
 0x4e7   : > { %4107 = vrcp.f32 %v2792_v44 }
 0x4e9   : > { %v4102_v39 = vpop.eup %4101 }
 0x4ea   : > { %2967 = vperm.xlu0 %3841, %v4100_v41   ;;  %2962 = vperm.xlu1 %3842, %v4102_v39  }
 0x4eb   : > { %v4104_v5 = vpop.eup %4103 }
 0x4ed   : > { %v4106_v22 = vpop.eup %4105 }
 0x4ee   : > { %2977 = vperm.xlu0 %3841, %v4104_v5   ;;  %2972 = vperm.xlu1 %3842, %v4106_v22  }
 0x4f1   : > { %v4108_v37 = vpop.eup %4107 }
 0x4f2   : > { %2982 = vperm.xlu1 %3842, %v4108_v37  }
 0x51d   : > { %v3701_v1 = vpop.f32.mrb[124].mxu1 }
 0x51e   : > { %v3702_v26 = vpop.f32.mrb[125].mxu1 }
 0x51f   : > { %v3703_v48 = vadd.f32 %v3702_v26, %v3701_v1  ;;  %v3704_v31 = vpop.f32.mrb[126].mxu1 }
 0x520   : > { %v3705_v4 = vpop.f32.mrb[127].mxu1 }
 0x521   : > { %v3706_v12 = vadd.f32 %v3705_v4, %v3704_v31  ;;  %v5799_v38 = vadd.f32 %v3703_v48, %v2435_v2  ;;  %v6306_v31 = vld [vmem:[#allocation62_spill] sm:$0xff] }
 0x523   : > { %v5801_v10 = vadd.f32 %v3706_v12, %v2436_v19 }
 0x530   : > { %v2833_v51 = vpop.permute.xlu1 %2832 }
 0x531   : > { %v2986_v54 = vmul.f32 %v2833_v51, %v5595_v50  ;;  %v2828_v3 = vpop.permute.xlu0 %2827 }
 0x532   : > { %v2985_v42 = vmul.f32 %v2828_v3, %v5589_v35 }
 0x534   : > { %v3017_v18 = vpack.c.bf16 %v2986_v54, %v2985_v42 }
 0x535   : > { %v2838_v45 = vpop.permute.xlu0 %2837 }
 0x536   : > { %3781 = vmatprep.mubr.bf16.mxu0 %v3017_v18  ;;  %v2987_v25 = vmul.f32 %v2838_v45, %v5601_v49 }
 0x539   : > { %v2843_v29 = vpop.permute.xlu1 %2842  ;;  %v2848_v47 = vpop.permute.xlu0 %2847 }
 0x53a   : > { %v2988_v27 = vmul.f32 %v2843_v29, %v5603_v28  ;;  %v2989_v21 = vmul.f32 %v2848_v47, %v5608_v34 }
 0x53c   : > { %v3018_v53 = vpack.c.bf16 %v2988_v27, %v2987_v25 }
 0x53d   : > { %v2853_v13 = vpop.permute.xlu1 %2852  ;;  %v2858_v59 = vpop.permute.xlu0 %2857 }
 0x53e   : > { %v2990_v61 = vmul.f32 %v2853_v13, %v5613_v8  ;;  %3782 = vmatmul.mubr.bf16.vlgmr.msra.gmra.mrb[96].mxu0 %v3018_v53  ;;  %v2991_v9 = vmul.f32 %v2858_v59, %v5618_v11 }
 0x540   : > { %v3019_v50 = vpack.c.bf16 %v2990_v61, %v2989_v21 }
 0x541   : > { %v2863_v20 = vpop.permute.xlu1 %2862  ;;  %v2868_v35 = vpop.permute.xlu0 %2867 }
 0x542   : > { %v2992_v44 = vmul.f32 %v2863_v20, %v5620_v52  ;;  %3785 = vmatprep.mubr.bf16.mxu0 %v3019_v50  ;;  %v2993_v28 = vmul.f32 %v2868_v35, %v5625_v62 }
 0x544   : > { %v3020_v41 = vpack.c.bf16 %v2992_v44, %v2991_v9 }
 0x545   : > { %v2873_v49 = vpop.permute.xlu1 %2872  ;;  %v2878_v39 = vpop.permute.xlu0 %2877 }
 0x546   : > { %v2994_v5 = vmul.f32 %v2873_v49, %v5630_v60  ;;  %3786 = vmatmul.mubr.bf16.gmra.mrb[100].mxu0 %v3020_v41  ;;  %v2995_v37 = vmul.f32 %v2878_v39, %v5637_v24  ;;  %v3267_v49 = vld [vmem:[%s4226_s19 + $0x10] sm:$0xff] }
 0x548   : > { %v3021_v34 = vpack.c.bf16 %v2994_v5, %v2993_v28  ;;  %v3265_v5 = vld [vmem:[%s4226_s19] sm:$0xff] }
 0x549   : > { %v2883_v22 = vpop.permute.xlu1 %2882  ;;  %v2888_v8 = vpop.permute.xlu0 %2887 }
 0x54a   : > { %v2996_v40 = vmul.f32 %v2883_v22, %v5641_v6  ;;  %3789 = vmatprep.mubr.bf16.mxu0 %v3021_v34  ;;  %v2997_v30 = vmul.f32 %v2888_v8, %v5681_v63  ;;  %v3268_v34 = vld [vmem:[%s4226_s19 + $0x18] sm:$0xff] }
 0x54c   : > { %v3022_v11 = vpack.c.bf16 %v2996_v40, %v2995_v37  ;;  %v3266_v40 = vld [vmem:[%s4226_s19 + $0x8] sm:$0xff] }
 0x54d   : > { %v2893_v1 = vpop.permute.xlu1 %2892  ;;  %v2898_v52 = vpop.permute.xlu0 %2897 }
 0x54e   : > { %v2998_v26 = vmul.f32 %v2893_v1, %v5688_v17  ;;  %3790 = vmatmul.mubr.bf16.gmra.mrb[104].mxu0 %v3022_v11  ;;  %v2999_v48 = vmul.f32 %v2898_v52, %v5701_v56 }
 0x550   : > { %v3023_v62 = vpack.c.bf16 %v2998_v26, %v2997_v30 }
 0x551   : > { %v2903_v2 = vpop.permute.xlu1 %2902  ;;  %v2908_v60 = vpop.permute.xlu0 %2907 }
 0x552   : > { %v3000_v4 = vmul.f32 %v2903_v2, %v6306_v31  ;;  %3793 = vmatprep.mubr.bf16.mxu0 %v3023_v62  ;;  %v3001_v12 = vmul.f32 %v2908_v60, %v5715_v43  ;;  %v3271_v62 = vld [vmem:[%s4226_s19 + $0x30] sm:$0xff] }
 0x554   : > { %v3024_v24 = vpack.c.bf16 %v3000_v4, %v2999_v48  ;;  %v3269_v48 = vld [vmem:[%s4226_s19 + $0x20] sm:$0xff] }
 0x555   : > { %v2913_v19 = vpop.permute.xlu1 %2912  ;;  %v2918_v6 = vpop.permute.xlu0 %2917 }
 0x556   : > { %v3002_v51 = vmul.f32 %v2913_v19, %v5719_v0  ;;  %3794 = vmatmul.mubr.bf16.gmra.mrb[108].mxu0 %v3024_v24  ;;  %v3003_v3 = vmul.f32 %v2918_v6, %v5729_v36  ;;  %v3272_v24 = vld [vmem:[%s4226_s19 + $0x38] sm:$0xff] }
 0x558   : > { %v3025_v63 = vpack.c.bf16 %v3002_v51, %v3001_v12  ;;  %v3270_v51 = vld [vmem:[%s4226_s19 + $0x28] sm:$0xff] }
 0x559   : > { %v2923_v54 = vpop.permute.xlu1 %2922  ;;  %v2928_v17 = vpop.permute.xlu0 %2927 }
 0x55a   : > { %v3004_v42 = vmul.f32 %v2923_v54, %v5733_v58  ;;  %3797 = vmatprep.mubr.bf16.mxu0 %v3025_v63  ;;  %v3005_v29 = vmul.f32 %v2928_v17, %v5743_v57 }
 0x55c   : > { %v3026_v56 = vpack.c.bf16 %v3004_v42, %v3003_v3 }
 0x55d   : > { %v2933_v18 = vpop.permute.xlu1 %2932  ;;  %v2938_v45 = vpop.permute.xlu0 %2937 }
 0x55e   : > { %v3006_v47 = vmul.f32 %v2933_v18, %v5747_v7  ;;  %3798 = vmatmul.mubr.bf16.gmra.mrb[112].mxu0 %v3026_v56  ;;  %v3007_v27 = vmul.f32 %v2938_v45, %v5757_v23  ;;  %v3275_v56 = vld [vmem:[%s4226_s19 + $0x50] sm:$0xff] }
 0x560   : > { %v3027_v43 = vpack.c.bf16 %v3006_v47, %v3005_v29  ;;  %v3273_v29 = vld [vmem:[%s4226_s19 + $0x40] sm:$0xff] }
 0x561   : > { %v2943_v25 = vpop.permute.xlu1 %2942  ;;  %v2948_v0 = vpop.permute.xlu0 %2947 }
 0x562   : > { %v3008_v53 = vmul.f32 %v2943_v25, %v5761_v55  ;;  %3801 = vmatprep.mubr.bf16.mxu0 %v3027_v43  ;;  %v3009_v59 = vmul.f32 %v2948_v0, %v5771_v15  ;;  %v3276_v25 = vld [vmem:[%s4226_s19 + $0x58] sm:$0xff] }
 0x564   : > { %v3028_v36 = vpack.c.bf16 %v3008_v53, %v3007_v27 }
 0x565   : > { %v2953_v13 = vpop.permute.xlu1 %2952  ;;  %v2958_v58 = vpop.permute.xlu0 %2957 }
 0x566   : > { %v3010_v21 = vmul.f32 %v2953_v13, %v5775_v33  ;;  %3802 = vmatmul.mubr.bf16.gmra.mrb[116].mxu0 %v3028_v36  ;;  %v3011_v50 = vmul.f32 %v2958_v58, %v5783_v46  ;;  %v3274_v36 = vld [vmem:[%s4226_s19 + $0x48] sm:$0xff] }
 0x568   : > { %v3029_v57 = vpack.c.bf16 %v3010_v21, %v3009_v59 }
 0x569   : > { %v2963_v61 = vpop.permute.xlu1 %2962  ;;  %v2968_v7 = vpop.permute.xlu0 %2967 }
 0x56a   : > { %v3012_v20 = vmul.f32 %v2963_v61, %v5787_v14  ;;  %3805 = vmatprep.mubr.bf16.mxu0 %v3029_v57  ;;  %v3013_v35 = vmul.f32 %v2968_v7, %v5794_v32  ;;  %v5838_v32 = vld [vmem:[%s5990_s7] ss:$0 sm:$0xff]  ;;  %v3279_v61 = vld [vmem:[%s4226_s19 + $0x70] sm:$0xff] }
 0x56c   : > { %v3030_v23 = vpack.c.bf16 %v3012_v20, %v3011_v50  ;;  %v3277_v20 = vld [vmem:[%s4226_s19 + $0x60] sm:$0xff] }
 0x56d   : > { %v2973_v55 = vpop.permute.xlu1 %2972  ;;  %v2978_v15 = vpop.permute.xlu0 %2977 }
 0x56e   : > { %v3014_v9 = vmul.f32 %v2973_v55, %v5797_v16  ;;  %3806 = vmatmul.mubr.bf16.gmra.mrb[120].mxu0 %v3030_v23  ;;  %v3015_v41 = vmul.f32 %v2978_v15, %v5799_v38 }
 0x570   : > { %v3031_v33 = vpack.c.bf16 %v3014_v9, %v3013_v35  ;;  %v3280_v35 = vld [vmem:[%s4226_s19 + $0x78] sm:$0xff] }
 0x571   : > { %v2983_v44 = vpop.permute.xlu1 %2982 }
 0x572   : > { %v3016_v46 = vmul.f32 %v2983_v44, %v5801_v10  ;;  %3809 = vmatprep.mubr.bf16.mxu0 %v3031_v33  ;;  %v3278_v44 = vld [vmem:[%s4226_s19 + $0x68] sm:$0xff] }
 0x574   : > { %v3032_v14 = vpack.c.bf16 %v3016_v46, %v3015_v41 }
 0x576   : > { %3810 = vmatmul.mubr.bf16.gmra.mrb[124].mxu0 %v3032_v14 }
 0x611   : > { %v3783_v16 = vpop.f32.mrb[96].mxu0 }
 0x612   : > { %v3147_v39 = vadd.f32 %v3783_v16, %v5838_v32  ;;  %v3138_v28 = vpop.f32.mrb[97].mxu0 }
 0x613   : > { %v3139_v38 = vadd.f32 %v5838_v32, %v3138_v28  ;;  %v3784_v10 = vpop.f32.mrb[98].mxu0 }
 0x614   : > { %v3299_v22 = vadd.f32 %v3267_v49, %v3147_v39  ;;  %v3150_v8 = vadd.f32 %v3784_v10, %v5838_v32  ;;  %v3141_v37 = vpop.f32.mrb[99].mxu0  ;;  %v3283_v39 = vld [vmem:[%s4226_s19 + $0x90] sm:$0xff] }
 0x615   : > { %v3297_v11 = vadd.f32 %v3265_v5, %v3139_v38  ;;  %v3142_v1 = vadd.f32 %v5838_v32, %v3141_v37  ;;  %v3281_v38 = vld [vmem:[%s4226_s19 + $0x80] sm:$0xff] }
 0x616   : > { %3331 = vst.msk [vmem:[%s5847_s27 + $0x10] sm:$0xff] %vm449_vm1, %v3299_v22  ;;  %v3300_v52 = vadd.f32 %v3268_v34, %v3150_v8  ;;  %v3284_v22 = vld [vmem:[%s4226_s19 + $0x98] sm:$0xff] }
 0x617   : > { %3329 = vst.msk [vmem:[%s5847_s27] sm:$0xff] %vm449_vm1, %v3297_v11  ;;  %v3298_v30 = vadd.f32 %v3266_v40, %v3142_v1  ;;  %v3282_v11 = vld [vmem:[%s4226_s19 + $0x88] sm:$0xff] }
 0x618   : > { %3332 = vst.msk [vmem:[%s5847_s27 + $0x18] sm:$0xff] %vm449_vm1, %v3300_v52 }
 0x619   : > { %3330 = vst.msk [vmem:[%s5847_s27 + $0x8] sm:$0xff] %vm449_vm1, %v3298_v30  ;;  %v3787_v26 = vpop.f32.mrb[100].mxu0 }
 0x61a   : > { %v3163_v2 = vadd.f32 %v3787_v26, %v5838_v32  ;;  %v3154_v60 = vpop.f32.mrb[101].mxu0 }
 0x61b   : > { %v3155_v31 = vadd.f32 %v5838_v32, %v3154_v60  ;;  %v3788_v4 = vpop.f32.mrb[102].mxu0 }
 0x61c   : > { %v3303_v19 = vadd.f32 %v3271_v62, %v3163_v2  ;;  %v3166_v6 = vadd.f32 %v3788_v4, %v5838_v32  ;;  %v3157_v12 = vpop.f32.mrb[103].mxu0  ;;  %v3287_v2 = vld [vmem:[%s4226_s19 + $0xb0] sm:$0xff] }
 0x61d   : > { %v3301_v63 = vadd.f32 %v3269_v48, %v3155_v31  ;;  %v3158_v54 = vadd.f32 %v5838_v32, %v3157_v12  ;;  %v3285_v31 = vld [vmem:[%s4226_s19 + $0xa0] sm:$0xff] }
 0x61e   : > { %3335 = vst.msk [vmem:[%s5847_s27 + $0x30] sm:$0xff] %vm449_vm1, %v3303_v19  ;;  %v3304_v17 = vadd.f32 %v3272_v24, %v3166_v6  ;;  %v3288_v19 = vld [vmem:[%s4226_s19 + $0xb8] sm:$0xff] }
 0x61f   : > { %3333 = vst.msk [vmem:[%s5847_s27 + $0x20] sm:$0xff] %vm449_vm1, %v3301_v63  ;;  %v3302_v3 = vadd.f32 %v3270_v51, %v3158_v54  ;;  %v3286_v63 = vld [vmem:[%s4226_s19 + $0xa8] sm:$0xff] }
 0x620   : > { %3336 = vst.msk [vmem:[%s5847_s27 + $0x38] sm:$0xff] %vm449_vm1, %v3304_v17 }
 0x621   : > { %3334 = vst.msk [vmem:[%s5847_s27 + $0x28] sm:$0xff] %vm449_vm1, %v3302_v3  ;;  %v3791_v42 = vpop.f32.mrb[104].mxu0 }
 0x622   : > { %v3179_v18 = vadd.f32 %v3791_v42, %v5838_v32  ;;  %v3170_v45 = vpop.f32.mrb[105].mxu0 }
 0x623   : > { %v3171_v47 = vadd.f32 %v5838_v32, %v3170_v45  ;;  %v3792_v43 = vpop.f32.mrb[106].mxu0 }
 0x624   : > { %v3307_v0 = vadd.f32 %v3275_v56, %v3179_v18  ;;  %v3182_v27 = vadd.f32 %v3792_v43, %v5838_v32  ;;  %v3173_v53 = vpop.f32.mrb[107].mxu0  ;;  %v3291_v18 = vld [vmem:[%s4226_s19 + $0xd0] sm:$0xff] }
 0x625   : > { %v3305_v13 = vadd.f32 %v3273_v29, %v3171_v47  ;;  %v3174_v58 = vadd.f32 %v5838_v32, %v3173_v53  ;;  %v3289_v47 = vld [vmem:[%s4226_s19 + $0xc0] sm:$0xff] }
 0x626   : > { %3339 = vst.msk [vmem:[%s5847_s27 + $0x50] sm:$0xff] %vm449_vm1, %v3307_v0  ;;  %v3308_v59 = vadd.f32 %v3276_v25, %v3182_v27  ;;  %v3292_v0 = vld [vmem:[%s4226_s19 + $0xd8] sm:$0xff] }
 0x627   : > { %3337 = vst.msk [vmem:[%s5847_s27 + $0x40] sm:$0xff] %vm449_vm1, %v3305_v13  ;;  %v3306_v21 = vadd.f32 %v3274_v36, %v3174_v58  ;;  %v3290_v13 = vld [vmem:[%s4226_s19 + $0xc8] sm:$0xff] }
 0x628   : > { %3340 = vst.msk [vmem:[%s5847_s27 + $0x58] sm:$0xff] %vm449_vm1, %v3308_v59 }
 0x629   : > { %3338 = vst.msk [vmem:[%s5847_s27 + $0x48] sm:$0xff] %vm449_vm1, %v3306_v21  ;;  %v3795_v57 = vpop.f32.mrb[108].mxu0 }
 0x62a   : > { %v3195_v7 = vadd.f32 %v3795_v57, %v5838_v32  ;;  %v3186_v50 = vpop.f32.mrb[109].mxu0 }
 0x62b   : > { %v3187_v23 = vadd.f32 %v5838_v32, %v3186_v50  ;;  %v3796_v55 = vpop.f32.mrb[110].mxu0 }
 0x62c   : > { %v3311_v9 = vadd.f32 %v3279_v61, %v3195_v7  ;;  %v3198_v15 = vadd.f32 %v3796_v55, %v5838_v32  ;;  %v3189_v33 = vpop.f32.mrb[111].mxu0  ;;  %v3295_v7 = vld [vmem:[%s4226_s19 + $0xf0] sm:$0xff] }
 0x62d   : > { %v3309_v41 = vadd.f32 %v3277_v20, %v3187_v23  ;;  %v3190_v46 = vadd.f32 %v5838_v32, %v3189_v33  ;;  %v3293_v23 = vld [vmem:[%s4226_s19 + $0xe0] sm:$0xff] }
 0x62e   : > { %3343 = vst.msk [vmem:[%s5847_s27 + $0x70] sm:$0xff] %vm449_vm1, %v3311_v9  ;;  %v3312_v14 = vadd.f32 %v3280_v35, %v3198_v15  ;;  %v3296_v9 = vld [vmem:[%s4226_s19 + $0xf8] sm:$0xff] }
 0x62f   : > { %3341 = vst.msk [vmem:[%s5847_s27 + $0x60] sm:$0xff] %vm449_vm1, %v3309_v41  ;;  %v3310_v16 = vadd.f32 %v3278_v44, %v3190_v46  ;;  %v3294_v41 = vld [vmem:[%s4226_s19 + $0xe8] sm:$0xff] }
 0x630   : > { %3344 = vst.msk [vmem:[%s5847_s27 + $0x78] sm:$0xff] %vm449_vm1, %v3312_v14 }
 0x631   : > { %3342 = vst.msk [vmem:[%s5847_s27 + $0x68] sm:$0xff] %vm449_vm1, %v3310_v16  ;;  %v3799_v49 = vpop.f32.mrb[112].mxu0 }
 0x632   : > { %v3211_v28 = vadd.f32 %v3799_v49, %v5838_v32  ;;  %v3202_v5 = vpop.f32.mrb[113].mxu0 }
 0x633   : > { %v3203_v10 = vadd.f32 %v5838_v32, %v3202_v5  ;;  %v3800_v34 = vpop.f32.mrb[114].mxu0 }
 0x634   : > { %v3315_v8 = vadd.f32 %v3283_v39, %v3211_v28  ;;  %v3214_v37 = vadd.f32 %v3800_v34, %v5838_v32  ;;  %v3205_v40 = vpop.f32.mrb[115].mxu0 }
 0x635   : > { %v3313_v1 = vadd.f32 %v3281_v38, %v3203_v10  ;;  %v3206_v52 = vadd.f32 %v5838_v32, %v3205_v40 }
 0x636   : > { %3347 = vst.msk [vmem:[%s5847_s27 + $0x90] sm:$0xff] %vm449_vm1, %v3315_v8  ;;  %v3316_v30 = vadd.f32 %v3284_v22, %v3214_v37 }
 0x637   : > { %3345 = vst.msk [vmem:[%s5847_s27 + $0x80] sm:$0xff] %vm449_vm1, %v3313_v1  ;;  %v3314_v26 = vadd.f32 %v3282_v11, %v3206_v52 }
 0x638   : > { %3348 = vst.msk [vmem:[%s5847_s27 + $0x98] sm:$0xff] %vm449_vm1, %v3316_v30 }
 0x639   : > { %3346 = vst.msk [vmem:[%s5847_s27 + $0x88] sm:$0xff] %vm449_vm1, %v3314_v26  ;;  %v3803_v62 = vpop.f32.mrb[116].mxu0 }
 0x63a   : > { %v3227_v60 = vadd.f32 %v3803_v62, %v5838_v32  ;;  %v3218_v48 = vpop.f32.mrb[117].mxu0 }
 0x63b   : > { %v3219_v4 = vadd.f32 %v5838_v32, %v3218_v48  ;;  %v3804_v24 = vpop.f32.mrb[118].mxu0 }
 0x63c   : > { %v3319_v6 = vadd.f32 %v3287_v2, %v3227_v60  ;;  %v3230_v12 = vadd.f32 %v3804_v24, %v5838_v32  ;;  %v3221_v51 = vpop.f32.mrb[119].mxu0 }
 0x63d   : > { %v3317_v54 = vadd.f32 %v3285_v31, %v3219_v4  ;;  %v3222_v17 = vadd.f32 %v5838_v32, %v3221_v51 }
 0x63e   : > { %3351 = vst.msk [vmem:[%s5847_s27 + $0xb0] sm:$0xff] %vm449_vm1, %v3319_v6  ;;  %v3320_v3 = vadd.f32 %v3288_v19, %v3230_v12 }
 0x63f   : > { %3349 = vst.msk [vmem:[%s5847_s27 + $0xa0] sm:$0xff] %vm449_vm1, %v3317_v54  ;;  %v3318_v42 = vadd.f32 %v3286_v63, %v3222_v17 }
 0x640   : > { %3352 = vst.msk [vmem:[%s5847_s27 + $0xb8] sm:$0xff] %vm449_vm1, %v3320_v3 }
 0x641   : > { %3350 = vst.msk [vmem:[%s5847_s27 + $0xa8] sm:$0xff] %vm449_vm1, %v3318_v42  ;;  %v3807_v56 = vpop.f32.mrb[120].mxu0 }
 0x642   : > { %v3243_v45 = vadd.f32 %v3807_v56, %v5838_v32  ;;  %v3234_v29 = vpop.f32.mrb[121].mxu0 }
 0x643   : > { %v3235_v43 = vadd.f32 %v5838_v32, %v3234_v29  ;;  %v3808_v25 = vpop.f32.mrb[122].mxu0 }
 0x644   : > { %v3323_v27 = vadd.f32 %v3291_v18, %v3243_v45  ;;  %v3246_v53 = vadd.f32 %v3808_v25, %v5838_v32  ;;  %v3237_v36 = vpop.f32.mrb[123].mxu0 }
 0x645   : > { %v3321_v58 = vadd.f32 %v3289_v47, %v3235_v43  ;;  %v3238_v59 = vadd.f32 %v5838_v32, %v3237_v36 }
 0x646   : > { %3355 = vst.msk [vmem:[%s5847_s27 + $0xd0] sm:$0xff] %vm449_vm1, %v3323_v27  ;;  %v3324_v21 = vadd.f32 %v3292_v0, %v3246_v53 }
 0x647   : > { %3353 = vst.msk [vmem:[%s5847_s27 + $0xc0] sm:$0xff] %vm449_vm1, %v3321_v58  ;;  %v3322_v57 = vadd.f32 %v3290_v13, %v3238_v59 }
 0x648   : > { %3356 = vst.msk [vmem:[%s5847_s27 + $0xd8] sm:$0xff] %vm449_vm1, %v3324_v21 }
 0x649   : > { %3354 = vst.msk [vmem:[%s5847_s27 + $0xc8] sm:$0xff] %vm449_vm1, %v3322_v57  ;;  %v3811_v61 = vpop.f32.mrb[124].mxu0 }
 0x64a   : > { %v3259_v50 = vadd.f32 %v3811_v61, %v5838_v32  ;;  %v3250_v20 = vpop.f32.mrb[125].mxu0 }
 0x64b   : > { %v3251_v55 = vadd.f32 %v5838_v32, %v3250_v20  ;;  %v3812_v35 = vpop.f32.mrb[126].mxu0 }
 0x64c   : > { %v3327_v15 = vadd.f32 %v3295_v7, %v3259_v50  ;;  %v3262_v33 = vadd.f32 %v3812_v35, %v5838_v32  ;;  %v3253_v44 = vpop.f32.mrb[127].mxu0 }
 0x64d   : > { %v3325_v46 = vadd.f32 %v3293_v23, %v3251_v55  ;;  %v3254_v14 = vadd.f32 %v5838_v32, %v3253_v44 }
 0x64e   : > { %3359 = vst.msk [vmem:[%s5847_s27 + $0xf0] sm:$0xff] %vm449_vm1, %v3327_v15  ;;  %v3328_v16 = vadd.f32 %v3296_v9, %v3262_v33 }
 0x64f   : > { %3357 = vst.msk [vmem:[%s5847_s27 + $0xe0] sm:$0xff] %vm449_vm1, %v3325_v46  ;;  %v3326_v49 = vadd.f32 %v3294_v41, %v3254_v14 }
 0x650   : > { %3360 = vst.msk [vmem:[%s5847_s27 + $0xf8] sm:$0xff] %vm449_vm1, %v3328_v16 }
 0x651   : > { %3358 = vst.msk [vmem:[%s5847_s27 + $0xe8] sm:$0xff] %vm449_vm1, %v3326_v49 }
 0x652 PF: > { %s18_s29 = sadd.s32 1, %s4131_s29   ;;  %s6307_s27 = smov %s4127_s28 }
 0x653   : > { %p15_p5 = scmp.ge.s32.totalorder %s18_s29, 4   ;;  %s6308_s28 = smov %s6310_s30 }
 0x655   :  { %17 = sbr.rel (!%p15_p5) target bundleno = 2 (0x2), region = 93 }

// kernel: ces_forward_nchw.6
= control target key start
LH: loop header
LB: loop body
LE: loop exit
PB: predicated region body
PF: predicated region fallthrough
CT: control target
= control target key end

     0   :  { %s10127_s24 = smov 0   ;;  %s10129_s25 = smov 0   ;;  %s14525_s0 = inlined_call_operand.vmem [shape: f32[2,256,8], index: 0, kind: input, shape index: {}]   ;;  %s14526_s1 = inlined_call_operand.vmem [shape: f32[9,256,1], index: 1, kind: input, shape index: {}]   ;;  %s14527_s2 = inlined_call_operand.vmem [shape: bf16[3,9,8,8], index: 2, kind: input, shape index: {}]   ;;  %s14528_s3 = inlined_call_operand.vmem [shape: f32[3,1,8], index: 3, kind: input, shape index: {}]   ;;  %s14529_s4 = inlined_call_operand.vmem [shape: f32[3,1,1], index: 4, kind: input, shape index: {}]   ;;  %s14530_s5 = inlined_call_operand.vmem [shape: bf16[3,9,8,8], index: 5, kind: input, shape index: {}]   ;;  %s14531_s6 = inlined_call_operand.vmem [shape: f32[3,1,8], index: 6, kind: input, shape index: {}]   ;;  %s14532_s7 = inlined_call_operand.vmem [shape: f32[2,256,8], index: 7, kind: output, shape index: {}]  }
   0x1   :  { %15055 = sst [smem:[#allocation282_spill]] %s14525_s0  ;;  %s10131_s26 = smov 0  }
   0x2   :  { %s10133_s27 = smov 0   ;;  %s10135_s28 = smov 0  }
   0x3 LB: > { %s26_s29 = sadd.s32 1, %s10076_s26  ;;  %s29_s30 = sadd.s32 1, %s10080_s27  ;;  %s10084_s28 = sphi %s10135_s28, %s17_s28   ;;  %s10080_s27 = sphi %s10133_s27, %s16075_s27   ;;  %s10076_s26 = sphi %s10131_s26, %s16074_s26   ;;  %s10072_s25 = sphi %s10129_s25, %s16073_s25   ;;  %s10068_s24 = sphi %s10127_s24, %s16072_s24  }
   0x4   : > { %p27_p0 = scmp.ge.s32.totalorder %s26_s29, 3  ;;  %p7881_p1 = scmp.ge.s32.totalorder %s10084_s28, 1 }
   0x5   : > { %p293_p2 = scmp.lt.s32.totalorder %s10084_s28, 7 }
   0x6   : > { %s16077_s29 = smov (%p27_p0, %s26_s29), 0  ;;  %s16079_s30 = smov (!%p27_p0, %s29_s30), %s10080_s27 }
   0x7   : > { %p294_p3 = pnand %p7881_p1, %p293_p2  ;;  %p31_p4 = scmp.ge.s32.totalorder %s16079_s30, 2 }
   0x9   : > { %s16081_s30 = smov (%p31_p4, %s16079_s30), 0  ;;  %297 = sbr.rel (%p294_p3) target bundleno = 1777 (0x6f1), region = 48 }
   0xa   : > { %15056 = sst [smem:[#allocation3_spill]] %s16081_s30 }
  0x10   : > { %p344_p5 = scmp.lt.s32.totalorder %s10072_s25, 1  ;;  %p349_p6 = scmp.lt.s32.totalorder %s10068_s24, 2 }
  0x11   : > { %s15057_s0 = sld [smem:[#allocation282_spill]]  ;;  %p7888_p7 = scmp.ne.s32.totalorder %s10068_s24, 0 }
  0x12   : > { %s16083_s25 = smov (!%p344_p5, %s10072_s25), 1  ;;  %vm410_vm0 = vcmask (!%p7888_p7), 64512  }
  0x13   : > { %s10161_s8 = scalar_select %p349_p6, %s10068_s24, 2 }
  0x14   : > { %s8423_s9 = sshll.u32 %s16083_s25, 8  ;;  %377 = sbr.rel (%p7888_p7) target bundleno = 41 (0x29), region = 52 }
  0x15   : > { %s9937_s13 = smul.u32 36, %s10161_s8  ;;  %s359_s19 = scalar_lea.vmem %s14529_s4, %s10161_s8 }
  0x16   : > { %s367_s30 = scalar_lea.vmem %s14531_s6, %s10161_s8  ;;  %s10194_s16 = scalar_lea.vmem %s14532_s7, %s8423_s9 }
  0x17   : > { %s10166_s12 = scalar_lea.vmem %s15057_s0, %s8423_s9  ;;  %s10180_s22 = scalar_lea.vmem %s14527_s2, %s9937_s13 }
  0x18   : > { %s10185_s10 = scalar_lea.vmem %s14530_s5, %s9937_s13  ;;  %v378_v0 = vld [vmem:[%s10166_s12] sm:$0xff] (!%p7888_p7)  ;;  %v379_v1 = vld [vmem:[%s10166_s12 + $0x8] sm:$0xff] (!%p7888_p7)  ;;  %v380_v2 = vld [vmem:[%s10166_s12 + $0x10] sm:$0xff] (!%p7888_p7) }
  0x19   : > { %411 = vst.msk [vmem:[#allocation2] sm:$0xff] (!%p7888_p7), %vm410_vm0, %v378_v0  ;;  %412 = vst.msk [vmem:[#allocation2 + $0x8] sm:$0xff] (!%p7888_p7), %vm410_vm0, %v379_v1  ;;  %v381_v3 = vld [vmem:[%s10166_s12 + $0x18] sm:$0xff] (!%p7888_p7)  ;;  %v382_v4 = vld [vmem:[%s10166_s12 + $0x20] sm:$0xff] (!%p7888_p7) }
  0x1a   : > { %413 = vst.msk [vmem:[#allocation2 + $0x10] sm:$0xff] (!%p7888_p7), %vm410_vm0, %v380_v2  ;;  %v383_v5 = vld [vmem:[%s10166_s12 + $0x28] sm:$0xff] (!%p7888_p7)  ;;  %414 = vst.msk [vmem:[#allocation2 + $0x18] sm:$0xff] (!%p7888_p7), %vm410_vm0, %v381_v3  ;;  %v384_v6 = vld [vmem:[%s10166_s12 + $0x30] sm:$0xff] (!%p7888_p7) }
  0x1b   : > { %415 = vst.msk [vmem:[#allocation2 + $0x20] sm:$0xff] %vm410_vm0, %v382_v4  ;;  %416 = vst.msk [vmem:[#allocation2 + $0x28] sm:$0xff] %vm410_vm0, %v383_v5  ;;  %v385_v7 = vld [vmem:[%s10166_s12 + $0x38] sm:$0xff]  ;;  %v386_v8 = vld [vmem:[%s10166_s12 + $0x40] sm:$0xff] }
  0x1c   : > { %417 = vst.msk [vmem:[#allocation2 + $0x30] sm:$0xff] %vm410_vm0, %v384_v6  ;;  %418 = vst.msk [vmem:[#allocation2 + $0x38] sm:$0xff] %vm410_vm0, %v385_v7  ;;  %v387_v9 = vld [vmem:[%s10166_s12 + $0x48] sm:$0xff]  ;;  %v388_v10 = vld [vmem:[%s10166_s12 + $0x50] sm:$0xff] }
  0x1d   : > { %419 = vst.msk [vmem:[#allocation2 + $0x40] sm:$0xff] %vm410_vm0, %v386_v8  ;;  %v389_v11 = vld [vmem:[%s10166_s12 + $0x58] sm:$0xff]  ;;  %420 = vst.msk [vmem:[#allocation2 + $0x48] sm:$0xff] %vm410_vm0, %v387_v9  ;;  %v390_v12 = vld [vmem:[%s10166_s12 + $0x60] sm:$0xff] }
  0x1e   : > { %421 = vst.msk [vmem:[#allocation2 + $0x50] sm:$0xff] %vm410_vm0, %v388_v10  ;;  %422 = vst.msk [vmem:[#allocation2 + $0x58] sm:$0xff] %vm410_vm0, %v389_v11  ;;  %v391_v13 = vld [vmem:[%s10166_s12 + $0x68] sm:$0xff]  ;;  %v392_v14 = vld [vmem:[%s10166_s12 + $0x70] sm:$0xff] }
  0x1f   : > { %423 = vst.msk [vmem:[#allocation2 + $0x60] sm:$0xff] %vm410_vm0, %v390_v12  ;;  %424 = vst.msk [vmem:[#allocation2 + $0x68] sm:$0xff] %vm410_vm0, %v391_v13  ;;  %v393_v15 = vld [vmem:[%s10166_s12 + $0x78] sm:$0xff]  ;;  %v394_v16 = vld [vmem:[%s10166_s12 + $0x80] sm:$0xff] }
  0x20   : > { %425 = vst.msk [vmem:[#allocation2 + $0x70] sm:$0xff] %vm410_vm0, %v392_v14  ;;  %v395_v17 = vld [vmem:[%s10166_s12 + $0x88] sm:$0xff]  ;;  %426 = vst.msk [vmem:[#allocation2 + $0x78] sm:$0xff] %vm410_vm0, %v393_v15  ;;  %v396_v18 = vld [vmem:[%s10166_s12 + $0x90] sm:$0xff] }
  0x21   : > { %427 = vst.msk [vmem:[#allocation2 + $0x80] sm:$0xff] %vm410_vm0, %v394_v16  ;;  %428 = vst.msk [vmem:[#allocation2 + $0x88] sm:$0xff] %vm410_vm0, %v395_v17  ;;  %v397_v19 = vld [vmem:[%s10166_s12 + $0x98] sm:$0xff]  ;;  %v398_v20 = vld [vmem:[%s10166_s12 + $0xa0] sm:$0xff] }
  0x22   : > { %429 = vst.msk [vmem:[#allocation2 + $0x90] sm:$0xff] %vm410_vm0, %v396_v18  ;;  %430 = vst.msk [vmem:[#allocation2 + $0x98] sm:$0xff] %vm410_vm0, %v397_v19  ;;  %v399_v21 = vld [vmem:[%s10166_s12 + $0xa8] sm:$0xff]  ;;  %v400_v22 = vld [vmem:[%s10166_s12 + $0xb0] sm:$0xff] }
  0x23   : > { %431 = vst.msk [vmem:[#allocation2 + $0xa0] sm:$0xff] %vm410_vm0, %v398_v20  ;;  %v401_v23 = vld [vmem:[%s10166_s12 + $0xb8] sm:$0xff]  ;;  %432 = vst.msk [vmem:[#allocation2 + $0xa8] sm:$0xff] %vm410_vm0, %v399_v21  ;;  %v402_v24 = vld [vmem:[%s10166_s12 + $0xc0] sm:$0xff] }
  0x24   : > { %433 = vst.msk [vmem:[#allocation2 + $0xb0] sm:$0xff] %vm410_vm0, %v400_v22  ;;  %434 = vst.msk [vmem:[#allocation2 + $0xb8] sm:$0xff] %vm410_vm0, %v401_v23  ;;  %v403_v25 = vld [vmem:[%s10166_s12 + $0xc8] sm:$0xff]  ;;  %v404_v26 = vld [vmem:[%s10166_s12 + $0xd0] sm:$0xff] }
  0x25   : > { %435 = vst.msk [vmem:[#allocation2 + $0xc0] sm:$0xff] %vm410_vm0, %v402_v24  ;;  %436 = vst.msk [vmem:[#allocation2 + $0xc8] sm:$0xff] %vm410_vm0, %v403_v25  ;;  %v405_v27 = vld [vmem:[%s10166_s12 + $0xd8] sm:$0xff]  ;;  %v406_v28 = vld [vmem:[%s10166_s12 + $0xe0] sm:$0xff] }
  0x26   : > { %437 = vst.msk [vmem:[#allocation2 + $0xd0] sm:$0xff] %vm410_vm0, %v404_v26  ;;  %v407_v29 = vld [vmem:[%s10166_s12 + $0xe8] sm:$0xff]  ;;  %438 = vst.msk [vmem:[#allocation2 + $0xd8] sm:$0xff] %vm410_vm0, %v405_v27  ;;  %v408_v30 = vld [vmem:[%s10166_s12 + $0xf0] sm:$0xff] }
  0x27   : > { %439 = vst.msk [vmem:[#allocation2 + $0xe0] sm:$0xff] %vm410_vm0, %v406_v28  ;;  %440 = vst.msk [vmem:[#allocation2 + $0xe8] sm:$0xff] %vm410_vm0, %v407_v29  ;;  %v409_v31 = vld [vmem:[%s10166_s12 + $0xf8] sm:$0xff] }
  0x28   : > { %441 = vst.msk [vmem:[#allocation2 + $0xf0] sm:$0xff] %vm410_vm0, %v408_v30  ;;  %442 = vst.msk [vmem:[#allocation2 + $0xf8] sm:$0xff] %vm410_vm0, %v409_v31 }
  0x29 PF: > { %v552_v32 = vld [vmem:[%s14526_s1 + $0x10] sm:$0xff]  ;;  %v550_v33 = vld [vmem:[%s14526_s1] sm:$0xff]  ;;  %v10086_v34 = vmov 0   ;;  %v553_v35 = vld [vmem:[%s14526_s1 + $0x18] sm:$0xff]  ;;  %vm840_vm1 = vcmask 1043456   ;;  %vm791_vm3 = vcmask 64512   ;;  %s15496_s21 = scalar_lea.vmem %s14528_s3, %s10161_s8 }
  0x2a   : > { %9980 = vset.pattern.permute.xlu1 %v10086_v34  ;;  %9979 = vset.pattern.permute.xlu0 %v10086_v34  ;;  %v551_v36 = vld [vmem:[%s14526_s1 + $0x8] sm:$0xff]  ;;  %v554_v38 = vld [vmem:[%s14526_s1 + $0x20] sm:$0xff]  ;;  %v557_v39 = vld [vmem:[%s14526_s1 + $0x38] sm:$0xff]  ;;  %v515_v34 = vlaneseq  ;;  %p8420_p8 = scmp.ne.s32.totalorder %s10068_s24, 2 }
  0x2b   : > { %594 = vperm.xlu1 %9980, %v552_v32   ;;  %584 = vperm.xlu0 %9979, %v550_v33   ;;  %v555_v37 = vld [vmem:[%s14526_s1 + $0x28] sm:$0xff]  ;;  %v556_v40 = vld [vmem:[%s14526_s1 + $0x30] sm:$0xff]  ;;  %v558_v42 = vld [vmem:[%s14526_s1 + $0x40] sm:$0xff] }
  0x2c   : > { %v559_v41 = vld [vmem:[%s14526_s1 + $0x48] sm:$0xff]  ;;  %v561_v43 = vld [vmem:[%s14526_s1 + $0x58] sm:$0xff]  ;;  %v560_v44 = vld [vmem:[%s14526_s1 + $0x50] sm:$0xff] }
  0x2d   : > { %v563_v45 = vld [vmem:[%s14526_s1 + $0x68] sm:$0xff]  ;;  %v562_v46 = vld [vmem:[%s14526_s1 + $0x60] sm:$0xff]  ;;  %v565_v50 = vld [vmem:[%s14526_s1 + $0x78] sm:$0xff] }
  0x2e   : > { %v790_v47 = vld [vmem:[%s10180_s22] sm:$0xf]  ;;  %v10307_v49 = vld [vmem:[%s10180_s22 + $0x4] sm:$0xf]  ;;  %v564_v51 = vld [vmem:[%s14526_s1 + $0x70] sm:$0xff] }
  0x2f   : > { %599 = vperm.xlu1 %9980, %v553_v35   ;;  %589 = vperm.xlu0 %9979, %v551_v36   ;;  %v842_v48 = vsel %vm840_vm1, %v790_v47, 0  ;;  %v567_v52 = vld [vmem:[%s14526_s1 + $0x88] sm:$0xff]  ;;  %v566_v53 = vld [vmem:[%s14526_s1 + $0x80] sm:$0xff]  ;;  %v569_v54 = vld [vmem:[%s14526_s1 + $0x98] sm:$0xff] }
  0x30   : > { %9919 = vmatprep.subr.msk.bf16.mxu0 %vm840_vm1, %v790_v47  ;;  %v568_v55 = vld [vmem:[%s14526_s1 + $0x90] sm:$0xff]  ;;  %v571_v56 = vld [vmem:[%s14526_s1 + $0xa8] sm:$0xff]  ;;  %v570_v57 = vld [vmem:[%s14526_s1 + $0xa0] sm:$0xff] }
  0x31   : > { %8732 = vmatpush3.bf16.msra.mxu0 %v842_v48  ;;  %v573_v58 = vld [vmem:[%s14526_s1 + $0xb8] sm:$0xff]  ;;  %v572_v59 = vld [vmem:[%s14526_s1 + $0xb0] sm:$0xff]  ;;  %v575_v60 = vld [vmem:[%s14526_s1 + $0xc8] sm:$0xff] }
  0x32   : > { %9920 = vmatprep.subr.msk.bf16.mxu0 %vm840_vm1, %v10307_v49  ;;  %v574_v61 = vld [vmem:[%s14526_s1 + $0xc0] sm:$0xff]  ;;  %v577_v62 = vld [vmem:[%s14526_s1 + $0xd8] sm:$0xff]  ;;  %v576_v63 = vld [vmem:[%s14526_s1 + $0xd0] sm:$0xff] }
  0x33   : > { %609 = vperm.xlu1 %9980, %v555_v37   ;;  %604 = vperm.xlu0 %9979, %v554_v38   ;;  %v579_v0 = vld [vmem:[%s14526_s1 + $0xe8] sm:$0xff]  ;;  %v578_v1 = vld [vmem:[%s14526_s1 + $0xe0] sm:$0xff]  ;;  %v581_v2 = vld [vmem:[%s14526_s1 + $0xf8] sm:$0xff] }
  0x34   : > { %v580_v3 = vld [vmem:[%s14526_s1 + $0xf0] sm:$0xff]  ;;  %v7907_v4 = vld [vmem:[%s14526_s1 + $0x108] sm:$0xff]  ;;  %v7906_v5 = vld [vmem:[%s14526_s1 + $0x100] sm:$0xff] }
  0x35   : > { %v7909_v6 = vld [vmem:[%s14526_s1 + $0x118] sm:$0xff]  ;;  %v7908_v7 = vld [vmem:[%s14526_s1 + $0x110] sm:$0xff]  ;;  %v7911_v8 = vld [vmem:[%s14526_s1 + $0x128] sm:$0xff] }
  0x36   : > { %v7910_v9 = vld [vmem:[%s14526_s1 + $0x120] sm:$0xff]  ;;  %v7913_v10 = vld [vmem:[%s14526_s1 + $0x138] sm:$0xff]  ;;  %v7912_v11 = vld [vmem:[%s14526_s1 + $0x130] sm:$0xff] }
  0x37   : > { %619 = vperm.xlu1 %9980, %v557_v39   ;;  %614 = vperm.xlu0 %9979, %v556_v40   ;;  %v7915_v12 = vld [vmem:[%s14526_s1 + $0x148] sm:$0xff]  ;;  %v7914_v13 = vld [vmem:[%s14526_s1 + $0x140] sm:$0xff]  ;;  %v7917_v14 = vld [vmem:[%s14526_s1 + $0x158] sm:$0xff]  ;;  %v10465_v39 = vshrl.u32 %v515_v34, 7 }
  0x38   : > { %v7916_v15 = vld [vmem:[%s14526_s1 + $0x150] sm:$0xff]  ;;  %v7919_v16 = vld [vmem:[%s14526_s1 + $0x168] sm:$0xff]  ;;  %v7918_v17 = vld [vmem:[%s14526_s1 + $0x160] sm:$0xff] }
  0x39   : > { %v7921_v18 = vld [vmem:[%s14526_s1 + $0x178] sm:$0xff]  ;;  %v7920_v19 = vld [vmem:[%s14526_s1 + $0x170] sm:$0xff]  ;;  %v7923_v20 = vld [vmem:[%s14526_s1 + $0x188] sm:$0xff]  ;;  %15058 = vst [vmem:[#allocation4_spill] sm:$0xff] %v10465_v39  ;;  %vm517_vm2 = vcmp.lt.s32.totalorder %v10465_v39, 1  ;;  %vm1556_vm4 = vcmp.lt.s32.totalorder %v10465_v39, 7 }
  0x3a   : > { %v7922_v21 = vld [vmem:[%s14526_s1 + $0x180] sm:$0xff]  ;;  %v7925_v22 = vld [vmem:[%s14526_s1 + $0x198] sm:$0xff]  ;;  %v7924_v23 = vld [vmem:[%s14526_s1 + $0x190] sm:$0xff] }
  0x3b   : > { %629 = vperm.xlu1 %9980, %v559_v41   ;;  %624 = vperm.xlu0 %9979, %v558_v42   ;;  %v7927_v24 = vld [vmem:[%s14526_s1 + $0x1a8] sm:$0xff]  ;;  %v7926_v25 = vld [vmem:[%s14526_s1 + $0x1a0] sm:$0xff]  ;;  %v7929_v26 = vld [vmem:[%s14526_s1 + $0x1b8] sm:$0xff] }
  0x3c   : > { %v7928_v27 = vld [vmem:[%s14526_s1 + $0x1b0] sm:$0xff]  ;;  %v7931_v28 = vld [vmem:[%s14526_s1 + $0x1c8] sm:$0xff]  ;;  %v7930_v29 = vld [vmem:[%s14526_s1 + $0x1c0] sm:$0xff] }
  0x3d   : > { %v7933_v30 = vld [vmem:[%s14526_s1 + $0x1d8] sm:$0xff]  ;;  %v7932_v31 = vld [vmem:[%s14526_s1 + $0x1d0] sm:$0xff]  ;;  %v7935_v32 = vld [vmem:[%s14526_s1 + $0x1e8] sm:$0xff] }
  0x3e   : > { %v7934_v33 = vld [vmem:[%s14526_s1 + $0x1e0] sm:$0xff]  ;;  %v7937_v35 = vld [vmem:[%s14526_s1 + $0x1f8] sm:$0xff]  ;;  %v7936_v36 = vld [vmem:[%s14526_s1 + $0x1f0] sm:$0xff] }
  0x3f   : > { %639 = vperm.xlu1 %9980, %v561_v43   ;;  %634 = vperm.xlu0 %9979, %v560_v44   ;;  %v10461_v37 = vld [vmem:[#allocation2] sm:$0xff]  ;;  %v10463_v38 = vld [vmem:[#allocation2 + $0xf8] sm:$0xff]  ;;  %v10467_v40 = vld [vmem:[#allocation2 + $0x8] sm:$0xff] }
  0x40   : > { %v10469_v41 = vld [vmem:[#allocation2 + $0xe8] sm:$0xff]  ;;  %v10471_v42 = vld [vmem:[#allocation2 + $0xf0] sm:$0xff]  ;;  %v483_v43 = vrot.slane %v10461_v37, 7  ;;  %v514_v44 = vrot.slane %v10463_v38, 7  ;;  %v7955_v47 = vld [vmem:[%s14526_s1 + $0x200] sm:$0xff] }
  0x41   : > { %v14533_v48 = vrot.slane %v10469_v41, 7 }
  0x43   : > { %649 = vperm.xlu1 %9980, %v563_v45   ;;  %644 = vperm.xlu0 %9979, %v562_v46   ;;  %v484_v45 = vrot.slane %v10467_v40, 7  ;;  %v7956_v46 = vld [vmem:[%s14526_s1 + $0x208] sm:$0xff] }
  0x47   : > { %659 = vperm.xlu1 %9980, %v565_v50   ;;  %654 = vperm.xlu0 %9979, %v564_v51   ;;  %v513_v50 = vrot.slane %v10471_v42, 7  ;;  %v10485_v51 = vld [vmem:[#allocation2 + $0x10] sm:$0xff] }
  0x4b   : > { %669 = vperm.xlu1 %9980, %v567_v52   ;;  %664 = vperm.xlu0 %9979, %v566_v53   ;;  %v10487_v52 = vld [vmem:[#allocation2 + $0x18] sm:$0xff] }
  0x4f   : > { %679 = vperm.xlu1 %9980, %v569_v54   ;;  %674 = vperm.xlu0 %9979, %v568_v55   ;;  %v10495_v55 = vsel %vm517_vm2, %v514_v44, %v483_v43 }
  0x50   : > { %15061 = vst [vmem:[#allocation7_spill] sm:$0xff] %v10495_v55 }
  0x53   : > { %689 = vperm.xlu1 %9980, %v571_v56   ;;  %684 = vperm.xlu0 %9979, %v570_v57   ;;  %v10499_v56 = vsel %vm517_vm2, %v483_v43, %v484_v45  ;;  %v7958_v57 = vld [vmem:[%s14526_s1 + $0x218] sm:$0xff]  ;;  %v7964_v43 = vld [vmem:[%s14526_s1 + $0x248] sm:$0xff] }
  0x54   : > { %15062 = vst [vmem:[#allocation8_spill] sm:$0xff] %v10499_v56 }
  0x57   : > { %699 = vperm.xlu1 %9980, %v573_v58   ;;  %694 = vperm.xlu0 %9979, %v572_v59   ;;  %v7957_v58 = vld [vmem:[%s14526_s1 + $0x210] sm:$0xff]  ;;  %v485_v59 = vrot.slane %v10485_v51, 7 }
  0x5b   : > { %709 = vperm.xlu1 %9980, %v575_v60   ;;  %704 = vperm.xlu0 %9979, %v574_v61   ;;  %v486_v60 = vrot.slane %v10487_v52, 7  ;;  %v10511_v61 = vsel %vm517_vm2, %v513_v50, %v514_v44  ;;  %v7963_v44 = vld [vmem:[%s14526_s1 + $0x240] sm:$0xff] }
  0x5c   : > { %15063 = vst [vmem:[#allocation9_spill] sm:$0xff] %v10511_v61 }
  0x5f   : > { %719 = vperm.xlu1 %9980, %v577_v62   ;;  %714 = vperm.xlu0 %9979, %v576_v63   ;;  %v10517_v62 = vsel %vm517_vm2, %v14533_v48, %v513_v50  ;;  %v10519_v63 = vld [vmem:[#allocation2 + $0x20] sm:$0xff]  ;;  %v10617_v50 = vld [vmem:[#allocation2 + $0x50] sm:$0xff]  ;;  %v10706_v48 = vld [vmem:[#allocation2 + $0x88] sm:$0xff] }
  0x60   : > { %15064 = vst [vmem:[#allocation10_spill] sm:$0xff] %v10517_v62 }
  0x63   : > { %729 = vperm.xlu1 %9980, %v579_v0   ;;  %724 = vperm.xlu0 %9979, %v578_v1   ;;  %v10521_v0 = vld [vmem:[#allocation2 + $0x28] sm:$0xff] }
  0x67   : > { %739 = vperm.xlu1 %9980, %v581_v2   ;;  %734 = vperm.xlu0 %9979, %v580_v3  }
  0x6b   : > { %1077 = vperm.xlu1 %9980, %v7907_v4   ;;  %1072 = vperm.xlu0 %9979, %v7906_v5  }
  0x6f   : > { %1087 = vperm.xlu1 %9980, %v7909_v6   ;;  %1082 = vperm.xlu0 %9979, %v7908_v7   ;;  %v10537_v7 = vsel %vm517_vm2, %v485_v59, %v486_v60 }
  0x70   : > { %15067 = vst [vmem:[#allocation13_spill] sm:$0xff] %v10537_v7 }
  0x73   : > { %1097 = vperm.xlu1 %9980, %v7911_v8   ;;  %1092 = vperm.xlu0 %9979, %v7910_v9   ;;  %v10541_v8 = vsel %vm517_vm2, %v484_v45, %v485_v59  ;;  %v7960_v9 = vld [vmem:[%s14526_s1 + $0x228] sm:$0xff] }
  0x74   : > { %15068 = vst [vmem:[#allocation14_spill] sm:$0xff] %v10541_v8 }
  0x77   : > { %1107 = vperm.xlu1 %9980, %v7913_v10   ;;  %1102 = vperm.xlu0 %9979, %v7912_v11   ;;  %v7959_v10 = vld [vmem:[%s14526_s1 + $0x220] sm:$0xff]  ;;  %v487_v11 = vrot.slane %v10519_v63, 7 }
  0x7b   : > { %1117 = vperm.xlu1 %9980, %v7915_v12   ;;  %1112 = vperm.xlu0 %9979, %v7914_v13   ;;  %v488_v12 = vrot.slane %v10521_v0, 7 }
  0x7f   : > { %1127 = vperm.xlu1 %9980, %v7917_v14   ;;  %1122 = vperm.xlu0 %9979, %v7916_v15   ;;  %v10551_v15 = vld [vmem:[#allocation2 + $0x30] sm:$0xff] }
  0x83   : > { %1137 = vperm.xlu1 %9980, %v7919_v16   ;;  %1132 = vperm.xlu0 %9979, %v7918_v17   ;;  %v10553_v16 = vld [vmem:[#allocation2 + $0x38] sm:$0xff] }
  0x87   : > { %1147 = vperm.xlu1 %9980, %v7921_v18   ;;  %1142 = vperm.xlu0 %9979, %v7920_v19  }
  0x8b   : > { %1157 = vperm.xlu1 %9980, %v7923_v20   ;;  %1152 = vperm.xlu0 %9979, %v7922_v21   ;;  %v1329_v21 = vsel %vm840_vm1, %v10307_v49, 0  ;;  %v489_v49 = vrot.slane %v10551_v15, 7 }
  0x8f   : > { %1167 = vperm.xlu1 %9980, %v7925_v22   ;;  %1162 = vperm.xlu0 %9979, %v7924_v23   ;;  %v10568_v22 = vsel %vm517_vm2, %v487_v11, %v488_v12  ;;  %v10572_v23 = vsel %vm517_vm2, %v486_v60, %v487_v11 }
  0x90   : > { %15071 = vst [vmem:[#allocation17_spill] sm:$0xff] %v10568_v22  ;;  %15072 = vst [vmem:[#allocation18_spill] sm:$0xff] %v10572_v23 }
  0x93   : > { %1177 = vperm.xlu1 %9980, %v7927_v24   ;;  %1172 = vperm.xlu0 %9979, %v7926_v25   ;;  %v7962_v24 = vld [vmem:[%s14526_s1 + $0x238] sm:$0xff]  ;;  %v7961_v25 = vld [vmem:[%s14526_s1 + $0x230] sm:$0xff] }
  0x97   : > { %1187 = vperm.xlu1 %9980, %v7929_v26   ;;  %1182 = vperm.xlu0 %9979, %v7928_v27   ;;  %v490_v26 = vrot.slane %v10553_v16, 7 }
  0x9b   : > { %1197 = vperm.xlu1 %9980, %v7931_v28   ;;  %1192 = vperm.xlu0 %9979, %v7930_v29   ;;  %v10583_v28 = vld [vmem:[#allocation2 + $0x40] sm:$0xff]  ;;  %v10585_v29 = vld [vmem:[#allocation2 + $0x48] sm:$0xff] }
  0x9c   : > { %v491_v45 = vrot.slane %v10583_v28, 7 }
  0x9f   : > { %1207 = vperm.xlu1 %9980, %v7933_v30   ;;  %1202 = vperm.xlu0 %9979, %v7932_v31   ;;  %v10588_v30 = vld [vmem:[%s10180_s22 + $0x8] sm:$0xf] }
  0xa3   : > { %1217 = vperm.xlu1 %9980, %v7935_v32   ;;  %1212 = vperm.xlu0 %9979, %v7934_v33  }
  0xa7   : > { %1227 = vperm.xlu1 %9980, %v7937_v35   ;;  %1222 = vperm.xlu0 %9979, %v7936_v36   ;;  %v10601_v35 = vsel %vm517_vm2, %v489_v49, %v490_v26  ;;  %v10605_v36 = vsel %vm517_vm2, %v488_v12, %v489_v49 }
  0xa8   : > { %15075 = vst [vmem:[#allocation21_spill] sm:$0xff] %v10601_v35  ;;  %15076 = vst [vmem:[#allocation22_spill] sm:$0xff] %v10605_v36 }
  0xaa   : > { %v10489_v53 = vpop.permute.xlu1 %594  ;;  %v10491_v54 = vpop.permute.xlu0 %584 }
  0xab   : > { %15059 = vst [vmem:[#allocation5_spill] sm:$0xff] %v10489_v53  ;;  %15060 = vst [vmem:[#allocation6_spill] sm:$0xff] %v10491_v54  ;;  %1629 = vperm.xlu1 %9980, %v7956_v46   ;;  %1624 = vperm.xlu0 %9979, %v7955_v47   ;;  %v744_v1 = vmul.f32 %v10489_v53, %v10495_v55  ;;  %v742_v5 = vmul.f32 %v10491_v54, %v10517_v62  ;;  %v492_v46 = vrot.slane %v10585_v29, 7  ;;  %v10820_v62 = vld [vmem:[#allocation2 + $0xc0] sm:$0xff] }
  0xae   : > { %v10525_v2 = vpop.permute.xlu1 %599  ;;  %v10527_v3 = vpop.permute.xlu0 %589 }
  0xaf   : > { %15065 = vst [vmem:[#allocation11_spill] sm:$0xff] %v10525_v2  ;;  %15066 = vst [vmem:[#allocation12_spill] sm:$0xff] %v10527_v3  ;;  %v745_v4 = vmul.f32 %v10525_v2, %v10499_v56  ;;  %1639 = vperm.xlu1 %9980, %v7958_v57   ;;  %1634 = vperm.xlu0 %9979, %v7957_v58   ;;  %v743_v6 = vmul.f32 %v10527_v3, %v10511_v61  ;;  %v10619_v57 = vld [vmem:[#allocation2 + $0x58] sm:$0xff]  ;;  %v10822_v61 = vld [vmem:[#allocation2 + $0xc8] sm:$0xff] }
  0xb0   : > { %v494_v11 = vrot.slane %v10619_v57, 7 }
  0xb1   : > { %v775_v13 = vpack.c.bf16 %v745_v4, %v744_v1  ;;  %v774_v14 = vpack.c.bf16 %v743_v6, %v742_v5  ;;  %v10631_v4 = vsel %vm517_vm2, %v491_v45, %v492_v46  ;;  %v10635_v5 = vsel %vm517_vm2, %v490_v26, %v491_v45  ;;  %v7966_v6 = vld [vmem:[%s14526_s1 + $0x258] sm:$0xff]  ;;  %v7968_v26 = vld [vmem:[%s14526_s1 + $0x268] sm:$0xff] }
  0xb2   : > { %v10555_v17 = vpop.permute.xlu1 %609  ;;  %v10557_v18 = vpop.permute.xlu0 %604  ;;  %15079 = vst [vmem:[#allocation25_spill] sm:$0xff] %v10631_v4  ;;  %15080 = vst [vmem:[#allocation26_spill] sm:$0xff] %v10635_v5  ;;  %v10677_v45 = vld [vmem:[#allocation2 + $0x78] sm:$0xff] }
  0xb3   : > { %15069 = vst [vmem:[#allocation15_spill] sm:$0xff] %v10555_v17  ;;  %15070 = vst [vmem:[#allocation16_spill] sm:$0xff] %v10557_v18  ;;  %v747_v19 = vmul.f32 %v10555_v17, %v10537_v7  ;;  %v746_v20 = vmul.f32 %v10557_v18, %v10541_v8  ;;  %1649 = vperm.xlu1 %9980, %v7960_v9   ;;  %1644 = vperm.xlu0 %9979, %v7959_v10   ;;  %v7965_v9 = vld [vmem:[%s14526_s1 + $0x250] sm:$0xff]  ;;  %v493_v10 = vrot.slane %v10617_v50, 7  ;;  %v10793_v17 = vld [vmem:[#allocation2 + $0xb8] sm:$0xff] }
  0xb4   : > { %8733 = vmatprep.mubr.msk.bf16.mxu0 %vm791_vm3, %v774_v14  ;;  %v10648_v14 = vld [vmem:[#allocation2 + $0x68] sm:$0xff] }
  0xb5   : > { %v776_v27 = vpack.c.bf16 %v747_v19, %v746_v20  ;;  %8734 = vmatmul.mubr.msk.bf16.vlgmr.msra.gmra.mrb[0].mxu0 %vm791_vm3, %v775_v13  ;;  %v10646_v13 = vld [vmem:[#allocation2 + $0x60] sm:$0xff]  ;;  %v10665_v49 = vsel %vm517_vm2, %v492_v46, %v493_v10 }
  0xb6   : > { %8766 = vmatpush3.bf16.msra.mxu0 %v1329_v21  ;;  %v10590_v31 = vpop.permute.xlu1 %619  ;;  %v10592_v32 = vpop.permute.xlu0 %614  ;;  %15084 = vst [vmem:[#allocation30_spill] sm:$0xff] %v10665_v49 }
  0xb7   : > { %15073 = vst [vmem:[#allocation19_spill] sm:$0xff] %v10590_v31  ;;  %15074 = vst [vmem:[#allocation20_spill] sm:$0xff] %v10592_v32  ;;  %v749_v33 = vmul.f32 %v10590_v31, %v10568_v22  ;;  %v748_v34 = vmul.f32 %v10592_v32, %v10572_v23  ;;  %1659 = vperm.xlu1 %9980, %v7962_v24   ;;  %1654 = vperm.xlu0 %9979, %v7961_v25   ;;  %v10762_v31 = vld [vmem:[#allocation2 + $0xa0] sm:$0xff]  ;;  %v10764_v32 = vld [vmem:[#allocation2 + $0xa8] sm:$0xff] }
  0xb8   : > { %8737 = vmatprep.mubr.msk.bf16.mxu0 %vm791_vm3, %v776_v27  ;;  %9921 = vmatprep.subr.msk.bf16.mxu0 %vm840_vm1, %v10588_v30  ;;  %v10661_v25 = vsel %vm517_vm2, %v493_v10, %v494_v11  ;;  %v7967_v27 = vld [vmem:[%s14526_s1 + $0x260] sm:$0xff]  ;;  %v7970_v10 = vld [vmem:[%s14526_s1 + $0x278] sm:$0xff] }
  0xb9   : > { %v777_v47 = vpack.c.bf16 %v749_v33, %v748_v34  ;;  %15083 = vst [vmem:[#allocation29_spill] sm:$0xff] %v10661_v25  ;;  %v495_v33 = vrot.slane %v10646_v13, 7  ;;  %v496_v34 = vrot.slane %v10648_v14, 7 }
  0xba   : > { %v10621_v58 = vpop.permute.xlu1 %629  ;;  %v10623_v59 = vpop.permute.xlu0 %624 }
  0xbb   : > { %15077 = vst [vmem:[#allocation23_spill] sm:$0xff] %v10621_v58  ;;  %15078 = vst [vmem:[#allocation24_spill] sm:$0xff] %v10623_v59  ;;  %v751_v60 = vmul.f32 %v10621_v58, %v10601_v35  ;;  %v750_v1 = vmul.f32 %v10623_v59, %v10605_v36  ;;  %1669 = vperm.xlu1 %9980, %v7964_v43   ;;  %1664 = vperm.xlu0 %9979, %v7963_v44   ;;  %v10675_v44 = vld [vmem:[#allocation2 + $0x70] sm:$0xff] }
  0xbd   : > { %v778_v12 = vpack.c.bf16 %v751_v60, %v750_v1  ;;  %8738 = vmatmul.mubr.msk.bf16.gmra.mrb[4].mxu0 %vm791_vm3, %v777_v47 }
  0xbe   : > { %v10650_v19 = vpop.permute.xlu1 %639  ;;  %v10652_v20 = vpop.permute.xlu0 %634 }
  0xbf   : > { %15081 = vst [vmem:[#allocation27_spill] sm:$0xff] %v10650_v19  ;;  %15082 = vst [vmem:[#allocation28_spill] sm:$0xff] %v10652_v20  ;;  %v753_v21 = vmul.f32 %v10650_v19, %v10631_v4  ;;  %v752_v24 = vmul.f32 %v10652_v20, %v10635_v5  ;;  %1679 = vperm.xlu1 %9980, %v7966_v6   ;;  %1674 = vperm.xlu0 %9979, %v7965_v9  }
  0xc0   : > { %8741 = vmatprep.mubr.msk.bf16.mxu0 %vm791_vm3, %v778_v12  ;;  %v10689_v6 = vsel %vm517_vm2, %v495_v33, %v496_v34  ;;  %v10693_v9 = vsel %vm517_vm2, %v494_v11, %v495_v33  ;;  %v7969_v12 = vld [vmem:[%s14526_s1 + $0x270] sm:$0xff] }
  0xc1   : > { %v779_v43 = vpack.c.bf16 %v753_v21, %v752_v24  ;;  %15087 = vst [vmem:[#allocation33_spill] sm:$0xff] %v10689_v6  ;;  %15088 = vst [vmem:[#allocation34_spill] sm:$0xff] %v10693_v9  ;;  %v497_v21 = vrot.slane %v10675_v44, 7  ;;  %v498_v24 = vrot.slane %v10677_v45, 7 }
  0xc2   : > { %v10679_v47 = vpop.permute.xlu1 %649  ;;  %v10681_v46 = vpop.permute.xlu0 %644 }
  0xc3   : > { %15085 = vst [vmem:[#allocation31_spill] sm:$0xff] %v10679_v47  ;;  %15086 = vst [vmem:[#allocation32_spill] sm:$0xff] %v10681_v46  ;;  %v755_v60 = vmul.f32 %v10679_v47, %v10661_v25  ;;  %v754_v1 = vmul.f32 %v10681_v46, %v10665_v49  ;;  %1689 = vperm.xlu1 %9980, %v7968_v26   ;;  %1684 = vperm.xlu0 %9979, %v7967_v27   ;;  %v10704_v27 = vld [vmem:[#allocation2 + $0x80] sm:$0xff]  ;;  %v10735_v46 = vld [vmem:[#allocation2 + $0x98] sm:$0xff] }
  0xc5   : > { %v780_v26 = vpack.c.bf16 %v755_v60, %v754_v1  ;;  %8742 = vmatmul.mubr.msk.bf16.gmra.mrb[8].mxu0 %vm791_vm3, %v779_v43  ;;  %v10719_v43 = vsel %vm517_vm2, %v497_v21, %v498_v24  ;;  %v10723_v60 = vsel %vm517_vm2, %v496_v34, %v497_v21  ;;  %v7972_v1 = vld [vmem:[%s14526_s1 + $0x288] sm:$0xff] }
  0xc6   : > { %v10708_v11 = vpop.permute.xlu1 %659  ;;  %v10710_v33 = vpop.permute.xlu0 %654  ;;  %15091 = vst [vmem:[#allocation37_spill] sm:$0xff] %v10719_v43  ;;  %15092 = vst [vmem:[#allocation38_spill] sm:$0xff] %v10723_v60 }
  0xc7   : > { %15089 = vst [vmem:[#allocation35_spill] sm:$0xff] %v10708_v11  ;;  %15090 = vst [vmem:[#allocation36_spill] sm:$0xff] %v10710_v33  ;;  %v757_v20 = vmul.f32 %v10708_v11, %v10689_v6  ;;  %v756_v47 = vmul.f32 %v10710_v33, %v10693_v9  ;;  %1699 = vperm.xlu1 %9980, %v7970_v10   ;;  %1694 = vperm.xlu0 %9979, %v7969_v12   ;;  %v7971_v33 = vld [vmem:[%s14526_s1 + $0x280] sm:$0xff]  ;;  %v499_v10 = vrot.slane %v10704_v27, 7  ;;  %v10733_v11 = vld [vmem:[#allocation2 + $0x90] sm:$0xff] }
  0xc8   : > { %8745 = vmatprep.mubr.msk.bf16.mxu0 %vm791_vm3, %v780_v26  ;;  %v500_v12 = vrot.slane %v10706_v48, 7 }
  0xc9   : > { %v781_v26 = vpack.c.bf16 %v757_v20, %v756_v47  ;;  %v10751_v20 = vsel %vm517_vm2, %v498_v24, %v499_v10  ;;  %v7974_v47 = vld [vmem:[%s14526_s1 + $0x298] sm:$0xff] }
  0xca   : > { %v10737_v19 = vpop.permute.xlu1 %669  ;;  %v10739_v34 = vpop.permute.xlu0 %664  ;;  %v10747_v59 = vsel %vm517_vm2, %v499_v10, %v500_v12  ;;  %15096 = vst [vmem:[#allocation42_spill] sm:$0xff] %v10751_v20 }
  0xcb   : > { %15093 = vst [vmem:[#allocation39_spill] sm:$0xff] %v10737_v19  ;;  %15094 = vst [vmem:[#allocation40_spill] sm:$0xff] %v10739_v34  ;;  %v759_v21 = vmul.f32 %v10737_v19, %v10719_v43  ;;  %v758_v58 = vmul.f32 %v10739_v34, %v10723_v60  ;;  %1709 = vperm.xlu1 %9980, %v7972_v1   ;;  %1704 = vperm.xlu0 %9979, %v7971_v33   ;;  %v7973_v19 = vld [vmem:[%s14526_s1 + $0x290] sm:$0xff]  ;;  %v501_v34 = vrot.slane %v10733_v11, 7 }
  0xcc   : > { %15095 = vst [vmem:[#allocation41_spill] sm:$0xff] %v10747_v59  ;;  %v502_v33 = vrot.slane %v10735_v46, 7 }
  0xcd   : > { %v782_v1 = vpack.c.bf16 %v759_v21, %v758_v58  ;;  %8746 = vmatmul.mubr.msk.bf16.gmra.mrb[12].mxu0 %vm791_vm3, %v781_v26  ;;  %v10781_v26 = vsel %vm517_vm2, %v500_v12, %v501_v34  ;;  %v7976_v21 = vld [vmem:[%s14526_s1 + $0x2a8] sm:$0xff] }
  0xce   : > { %v10766_v24 = vpop.permute.xlu1 %679  ;;  %v10768_v10 = vpop.permute.xlu0 %674  ;;  %v10777_v58 = vsel %vm517_vm2, %v501_v34, %v502_v33  ;;  %15100 = vst [vmem:[#allocation46_spill] sm:$0xff] %v10781_v26 }
  0xcf   : > { %15097 = vst [vmem:[#allocation43_spill] sm:$0xff] %v10766_v24  ;;  %15098 = vst [vmem:[#allocation44_spill] sm:$0xff] %v10768_v10  ;;  %v761_v53 = vmul.f32 %v10766_v24, %v10747_v59  ;;  %v760_v54 = vmul.f32 %v10768_v10, %v10751_v20  ;;  %1719 = vperm.xlu1 %9980, %v7974_v47   ;;  %1714 = vperm.xlu0 %9979, %v7973_v19   ;;  %v7975_v10 = vld [vmem:[%s14526_s1 + $0x2a0] sm:$0xff]  ;;  %v503_v19 = vrot.slane %v10762_v31, 7  ;;  %v10791_v24 = vld [vmem:[#allocation2 + $0xb0] sm:$0xff] }
  0xd0   : > { %8749 = vmatprep.mubr.msk.bf16.mxu0 %vm791_vm3, %v782_v1  ;;  %15099 = vst [vmem:[#allocation45_spill] sm:$0xff] %v10777_v58  ;;  %v504_v47 = vrot.slane %v10764_v32, 7 }
  0xd1   : > { %v783_v1 = vpack.c.bf16 %v761_v53, %v760_v54  ;;  %v10809_v53 = vsel %vm517_vm2, %v502_v33, %v503_v19  ;;  %v7978_v54 = vld [vmem:[%s14526_s1 + $0x2b8] sm:$0xff] }
  0xd2   : > { %v10795_v3 = vpop.permute.xlu1 %689  ;;  %v10797_v12 = vpop.permute.xlu0 %684  ;;  %v10805_v2 = vsel %vm517_vm2, %v503_v19, %v504_v47  ;;  %15104 = vst [vmem:[#allocation50_spill] sm:$0xff] %v10809_v53 }
  0xd3   : > { %15101 = vst [vmem:[#allocation47_spill] sm:$0xff] %v10795_v3  ;;  %15102 = vst [vmem:[#allocation48_spill] sm:$0xff] %v10797_v12  ;;  %v763_v34 = vmul.f32 %v10795_v3, %v10777_v58  ;;  %v762_v18 = vmul.f32 %v10797_v12, %v10781_v26  ;;  %1729 = vperm.xlu1 %9980, %v7976_v21   ;;  %1724 = vperm.xlu0 %9979, %v7975_v10   ;;  %v7977_v3 = vld [vmem:[%s14526_s1 + $0x2b0] sm:$0xff]  ;;  %v505_v12 = vrot.slane %v10791_v24, 7 }
  0xd4   : > { %15103 = vst [vmem:[#allocation49_spill] sm:$0xff] %v10805_v2  ;;  %v506_v10 = vrot.slane %v10793_v17, 7 }
  0xd5   : > { %v784_v21 = vpack.c.bf16 %v763_v34, %v762_v18  ;;  %8750 = vmatmul.mubr.msk.bf16.gmra.mrb[16].mxu0 %vm791_vm3, %v783_v1  ;;  %v10839_v1 = vsel %vm517_vm2, %v504_v47, %v505_v12  ;;  %v7980_v34 = vld [vmem:[%s14526_s1 + $0x2c8] sm:$0xff] }
  0xd6   : > { %v10824_v33 = vpop.permute.xlu1 %699  ;;  %v10826_v19 = vpop.permute.xlu0 %694  ;;  %v10835_v18 = vsel %vm517_vm2, %v505_v12, %v506_v10  ;;  %15108 = vst [vmem:[#allocation54_spill] sm:$0xff] %v10839_v1 }
  0xd7   : > { %15105 = vst [vmem:[#allocation51_spill] sm:$0xff] %v10824_v33  ;;  %15106 = vst [vmem:[#allocation52_spill] sm:$0xff] %v10826_v19  ;;  %v765_v26 = vmul.f32 %v10824_v33, %v10805_v2  ;;  %v764_v58 = vmul.f32 %v10826_v19, %v10809_v53  ;;  %1739 = vperm.xlu1 %9980, %v7978_v54   ;;  %1734 = vperm.xlu0 %9979, %v7977_v3   ;;  %v7979_v19 = vld [vmem:[%s14526_s1 + $0x2c0] sm:$0xff]  ;;  %v507_v3 = vrot.slane %v10820_v62, 7  ;;  %v10849_v33 = vld [vmem:[#allocation2 + $0xd0] sm:$0xff] }
  0xd8   : > { %8753 = vmatprep.mubr.msk.bf16.mxu0 %vm791_vm3, %v784_v21  ;;  %15107 = vst [vmem:[#allocation53_spill] sm:$0xff] %v10835_v18  ;;  %v508_v54 = vrot.slane %v10822_v61, 7  ;;  %v10851_v53 = vld [vmem:[#allocation2 + $0xd8] sm:$0xff] }
  0xd9   : > { %v785_v21 = vpack.c.bf16 %v765_v26, %v764_v58  ;;  %v10867_v58 = vsel %vm517_vm2, %v506_v10, %v507_v3  ;;  %v7982_v26 = vld [vmem:[%s14526_s1 + $0x2d8] sm:$0xff] }
  0xda   : > { %v10853_v2 = vpop.permute.xlu1 %709  ;;  %v10855_v47 = vpop.permute.xlu0 %704  ;;  %v10863_v59 = vsel %vm517_vm2, %v507_v3, %v508_v54  ;;  %15112 = vst [vmem:[#allocation58_spill] sm:$0xff] %v10867_v58 }
  0xdb   : > { %15109 = vst [vmem:[#allocation55_spill] sm:$0xff] %v10853_v2  ;;  %15110 = vst [vmem:[#allocation56_spill] sm:$0xff] %v10855_v47  ;;  %v767_v12 = vmul.f32 %v10853_v2, %v10835_v18  ;;  %v766_v20 = vmul.f32 %v10855_v47, %v10839_v1  ;;  %1749 = vperm.xlu1 %9980, %v7980_v34   ;;  %1744 = vperm.xlu0 %9979, %v7979_v19   ;;  %v7981_v2 = vld [vmem:[%s14526_s1 + $0x2d0] sm:$0xff]  ;;  %v509_v47 = vrot.slane %v10849_v33, 7  ;;  %v10878_v1 = vld [vmem:[#allocation2 + $0xe0] sm:$0xff] }
  0xdc   : > { %15111 = vst [vmem:[#allocation57_spill] sm:$0xff] %v10863_v59  ;;  %v510_v19 = vrot.slane %v10851_v53, 7 }
  0xdd   : > { %v786_v34 = vpack.c.bf16 %v767_v12, %v766_v20  ;;  %8754 = vmatmul.mubr.msk.bf16.gmra.mrb[20].mxu0 %vm791_vm3, %v785_v21  ;;  %v10895_v21 = vsel %vm517_vm2, %v508_v54, %v509_v47  ;;  %v7984_v12 = vld [vmem:[%s14526_s1 + $0x2e8] sm:$0xff] }
  0xde   : > { %v10880_v18 = vpop.permute.xlu1 %719  ;;  %v10882_v10 = vpop.permute.xlu0 %714  ;;  %v10891_v20 = vsel %vm517_vm2, %v509_v47, %v510_v19  ;;  %15116 = vst [vmem:[#allocation62_spill] sm:$0xff] %v10895_v21  ;;  %v15119_v47 = vrot.slane %v10469_v41, 7 }
  0xdf   : > { %15113 = vst [vmem:[#allocation59_spill] sm:$0xff] %v10880_v18  ;;  %15114 = vst [vmem:[#allocation60_spill] sm:$0xff] %v10882_v10  ;;  %v769_v3 = vmul.f32 %v10880_v18, %v10863_v59  ;;  %v768_v60 = vmul.f32 %v10882_v10, %v10867_v58  ;;  %1759 = vperm.xlu1 %9980, %v7982_v26   ;;  %1754 = vperm.xlu0 %9979, %v7981_v2   ;;  %v7983_v10 = vld [vmem:[%s14526_s1 + $0x2e0] sm:$0xff]  ;;  %v511_v2 = vrot.slane %v10878_v1, 7 }
  0xe0   : > { %8757 = vmatprep.mubr.msk.bf16.mxu0 %vm791_vm3, %v786_v34  ;;  %15115 = vst [vmem:[#allocation61_spill] sm:$0xff] %v10891_v20 }
  0xe1   : > { %v787_v26 = vpack.c.bf16 %v769_v3, %v768_v60  ;;  %v10916_v59 = vsel %vm517_vm2, %v511_v2, %v15119_v47  ;;  %v10920_v60 = vsel %vm517_vm2, %v510_v19, %v511_v2  ;;  %v7986_v3 = vld [vmem:[%s14526_s1 + $0x2f8] sm:$0xff]  ;;  %v8004_v2 = vld [vmem:[%s14526_s1 + $0x300] sm:$0xff] }
  0xe2   : > { %v10904_v34 = vpop.permute.xlu1 %729  ;;  %v10906_v18 = vpop.permute.xlu0 %724  ;;  %15120 = vst [vmem:[#allocation65_spill] sm:$0xff] %v10916_v59  ;;  %15121 = vst [vmem:[#allocation66_spill] sm:$0xff] %v10920_v60 }
  0xe3   : > { %15117 = vst [vmem:[#allocation63_spill] sm:$0xff] %v10904_v34  ;;  %15118 = vst [vmem:[#allocation64_spill] sm:$0xff] %v10906_v18  ;;  %v771_v58 = vmul.f32 %v10904_v34, %v10891_v20  ;;  %v770_v54 = vmul.f32 %v10906_v18, %v10895_v21  ;;  %1769 = vperm.xlu1 %9980, %v7984_v12   ;;  %1764 = vperm.xlu0 %9979, %v7983_v10   ;;  %v7985_v34 = vld [vmem:[%s14526_s1 + $0x2f0] sm:$0xff] }
  0xe5   : > { %v788_v12 = vpack.c.bf16 %v771_v58, %v770_v54  ;;  %8758 = vmatmul.mubr.msk.bf16.gmra.mrb[24].mxu0 %vm791_vm3, %v787_v26  ;;  %v8005_v58 = vld [vmem:[%s14526_s1 + $0x308] sm:$0xff] }
  0xe6   : > { %v10929_v10 = vpop.permute.xlu1 %739  ;;  %v10931_v18 = vpop.permute.xlu0 %734 }
  0xe7   : > { %15122 = vst [vmem:[#allocation67_spill] sm:$0xff] %v10929_v10  ;;  %15123 = vst [vmem:[#allocation68_spill] sm:$0xff] %v10931_v18  ;;  %v773_v47 = vmul.f32 %v10929_v10, %v10916_v59  ;;  %v772_v19 = vmul.f32 %v10931_v18, %v10920_v60  ;;  %1779 = vperm.xlu1 %9980, %v7986_v3   ;;  %1774 = vperm.xlu0 %9979, %v7985_v34   ;;  %v8007_v3 = vld [vmem:[%s14526_s1 + $0x318] sm:$0xff] }
  0xe8   : > { %8761 = vmatprep.mubr.msk.bf16.mxu0 %vm791_vm3, %v788_v12  ;;  %v8006_v12 = vld [vmem:[%s14526_s1 + $0x310] sm:$0xff] }
  0xe9   : > { %v789_v26 = vpack.c.bf16 %v773_v47, %v772_v19 }
  0xea   : > { %v10944_v54 = vpop.permute.xlu1 %1077  ;;  %v10946_v21 = vpop.permute.xlu0 %1072 }
  0xeb   : > { %15124 = vst [vmem:[#allocation69_spill] sm:$0xff] %v10944_v54  ;;  %15125 = vst [vmem:[#allocation70_spill] sm:$0xff] %v10946_v21  ;;  %v1231_v18 = vmul.f32 %v10944_v54, %v10463_v38  ;;  %v1230_v34 = vmul.f32 %v10946_v21, %v10471_v42  ;;  %2116 = vperm.xlu1 %9980, %v8005_v58   ;;  %2111 = vperm.xlu0 %9979, %v8004_v2   ;;  %v8008_v2 = vld [vmem:[%s14526_s1 + $0x320] sm:$0xff] }
  0xed   : > { %v1262_v47 = vpack.c.bf16 %v1231_v18, %v1230_v34  ;;  %8762 = vmatmul.mubr.msk.bf16.gmra.mrb[28].mxu0 %vm791_vm3, %v789_v26  ;;  %v8009_v18 = vld [vmem:[%s14526_s1 + $0x328] sm:$0xff] }
  0xee   : > { %v10959_v19 = vpop.permute.xlu1 %1087  ;;  %v10961_v10 = vpop.permute.xlu0 %1082 }
  0xef   : > { %15126 = vst [vmem:[#allocation71_spill] sm:$0xff] %v10959_v19  ;;  %15127 = vst [vmem:[#allocation72_spill] sm:$0xff] %v10961_v10  ;;  %v1233_v21 = vmul.f32 %v10959_v19, %v10467_v40  ;;  %v1232_v58 = vmul.f32 %v10961_v10, %v10461_v37  ;;  %2126 = vperm.xlu1 %9980, %v8007_v3   ;;  %2121 = vperm.xlu0 %9979, %v8006_v12   ;;  %v8011_v10 = vld [vmem:[%s14526_s1 + $0x338] sm:$0xff] }
  0xf0   : > { %8767 = vmatprep.mubr.msk.bf16.mxu0 %vm791_vm3, %v1262_v47  ;;  %v1881_v47 = vsel %vm840_vm1, %v10588_v30, 0 }
  0xf1   : > { %v1263_v26 = vpack.c.bf16 %v1233_v21, %v1232_v58  ;;  %v8010_v21 = vld [vmem:[%s14526_s1 + $0x330] sm:$0xff] }
  0xf2   : > { %v10974_v34 = vpop.permute.xlu1 %1097  ;;  %v10976_v19 = vpop.permute.xlu0 %1092 }
  0xf3   : > { %15128 = vst [vmem:[#allocation73_spill] sm:$0xff] %v10974_v34  ;;  %15129 = vst [vmem:[#allocation74_spill] sm:$0xff] %v10976_v19  ;;  %v1235_v3 = vmul.f32 %v10974_v34, %v10487_v52  ;;  %v1234_v12 = vmul.f32 %v10976_v19, %v10485_v51  ;;  %2136 = vperm.xlu1 %9980, %v8009_v18   ;;  %2131 = vperm.xlu0 %9979, %v8008_v2   ;;  %v10992_v34 = vld [vmem:[%s10180_s22 + $0xc] sm:$0xf] }
  0xf5   : > { %v1264_v58 = vpack.c.bf16 %v1235_v3, %v1234_v12  ;;  %8768 = vmatmul.mubr.msk.bf16.vlgmr.msra.gmra.mrb[0].mxu0 %vm791_vm3, %v1263_v26  ;;  %v8013_v26 = vld [vmem:[%s14526_s1 + $0x348] sm:$0xff]  ;;  %v8012_v3 = vld [vmem:[%s14526_s1 + $0x340] sm:$0xff] }
  0xf6   : > { %8800 = vmatpush3.bf16.msra.mxu0 %v1881_v47  ;;  %v10994_v19 = vpop.permute.xlu1 %1107  ;;  %v10996_v18 = vpop.permute.xlu0 %1102 }
  0xf7   : > { %15130 = vst [vmem:[#allocation75_spill] sm:$0xff] %v10994_v19  ;;  %15131 = vst [vmem:[#allocation76_spill] sm:$0xff] %v10996_v18  ;;  %v1237_v30 = vmul.f32 %v10994_v19, %v10521_v0  ;;  %v1236_v2 = vmul.f32 %v10996_v18, %v10519_v63  ;;  %2146 = vperm.xlu1 %9980, %v8011_v10   ;;  %2141 = vperm.xlu0 %9979, %v8010_v21  }
  0xf8   : > { %8771 = vmatprep.mubr.msk.bf16.mxu0 %vm791_vm3, %v1264_v58  ;;  %9922 = vmatprep.subr.msk.bf16.mxu0 %vm840_vm1, %v10992_v34  ;;  %v8015_v58 = vld [vmem:[%s14526_s1 + $0x358] sm:$0xff] }
  0xf9   : > { %v1265_v12 = vpack.c.bf16 %v1237_v30, %v1236_v2  ;;  %v8014_v30 = vld [vmem:[%s14526_s1 + $0x350] sm:$0xff] }
  0xfa   : > { %v11011_v47 = vpop.permute.xlu1 %1117  ;;  %v11013_v19 = vpop.permute.xlu0 %1112 }
  0xfb   : > { %15132 = vst [vmem:[#allocation77_spill] sm:$0xff] %v11011_v47  ;;  %15133 = vst [vmem:[#allocation78_spill] sm:$0xff] %v11013_v19  ;;  %v1239_v10 = vmul.f32 %v11011_v47, %v10553_v16  ;;  %v1238_v21 = vmul.f32 %v11013_v19, %v10551_v15  ;;  %2156 = vperm.xlu1 %9980, %v8013_v26   ;;  %2151 = vperm.xlu0 %9979, %v8012_v3   ;;  %v8017_v3 = vld [vmem:[%s14526_s1 + $0x368] sm:$0xff] }
  0xfd   : > { %v1266_v2 = vpack.c.bf16 %v1239_v10, %v1238_v21  ;;  %8772 = vmatmul.mubr.msk.bf16.gmra.mrb[4].mxu0 %vm791_vm3, %v1265_v12  ;;  %v8016_v12 = vld [vmem:[%s14526_s1 + $0x360] sm:$0xff] }
  0xfe   : > { %v11026_v18 = vpop.permute.xlu1 %1127  ;;  %v11028_v54 = vpop.permute.xlu0 %1122 }
  0xff   : > { %15134 = vst [vmem:[#allocation79_spill] sm:$0xff] %v11026_v18  ;;  %15135 = vst [vmem:[#allocation80_spill] sm:$0xff] %v11028_v54  ;;  %v1241_v19 = vmul.f32 %v11026_v18, %v10585_v29  ;;  %v1240_v26 = vmul.f32 %v11028_v54, %v10583_v28  ;;  %2166 = vperm.xlu1 %9980, %v8015_v58   ;;  %2161 = vperm.xlu0 %9979, %v8014_v30   ;;  %v8019_v30 = vld [vmem:[%s14526_s1 + $0x378] sm:$0xff] }
 0x100   : > { %8775 = vmatprep.mubr.msk.bf16.mxu0 %vm791_vm3, %v1266_v2 }
 0x101   : > { %v1267_v10 = vpack.c.bf16 %v1241_v19, %v1240_v26  ;;  %v8018_v19 = vld [vmem:[%s14526_s1 + $0x370] sm:$0xff] }
 0x102   : > { %v11041_v21 = vpop.permute.xlu1 %1137  ;;  %v11043_v47 = vpop.permute.xlu0 %1132 }
 0x103   : > { %15136 = vst [vmem:[#allocation81_spill] sm:$0xff] %v11041_v21  ;;  %15137 = vst [vmem:[#allocation82_spill] sm:$0xff] %v11043_v47  ;;  %v1243_v54 = vmul.f32 %v11041_v21, %v10619_v57  ;;  %v1242_v58 = vmul.f32 %v11043_v47, %v10617_v50  ;;  %2176 = vperm.xlu1 %9980, %v8017_v3   ;;  %2171 = vperm.xlu0 %9979, %v8016_v12   ;;  %v8020_v12 = vld [vmem:[%s14526_s1 + $0x380] sm:$0xff] }
 0x105   : > { %v1268_v2 = vpack.c.bf16 %v1243_v54, %v1242_v58  ;;  %8776 = vmatmul.mubr.msk.bf16.gmra.mrb[8].mxu0 %vm791_vm3, %v1267_v10  ;;  %v8021_v54 = vld [vmem:[%s14526_s1 + $0x388] sm:$0xff] }
 0x106   : > { %v11056_v26 = vpop.permute.xlu1 %1147  ;;  %v11058_v18 = vpop.permute.xlu0 %1142 }
 0x107   : > { %15138 = vst [vmem:[#allocation83_spill] sm:$0xff] %v11056_v26  ;;  %15139 = vst [vmem:[#allocation84_spill] sm:$0xff] %v11058_v18  ;;  %v1245_v47 = vmul.f32 %v11056_v26, %v10648_v14  ;;  %v1244_v3 = vmul.f32 %v11058_v18, %v10646_v13  ;;  %2186 = vperm.xlu1 %9980, %v8019_v30   ;;  %2181 = vperm.xlu0 %9979, %v8018_v19   ;;  %v8023_v19 = vld [vmem:[%s14526_s1 + $0x398] sm:$0xff] }
 0x108   : > { %8779 = vmatprep.mubr.msk.bf16.mxu0 %vm791_vm3, %v1268_v2 }
 0x109   : > { %v1269_v10 = vpack.c.bf16 %v1245_v47, %v1244_v3  ;;  %v8022_v47 = vld [vmem:[%s14526_s1 + $0x390] sm:$0xff] }
 0x10a   : > { %v11071_v58 = vpop.permute.xlu1 %1157  ;;  %v11073_v21 = vpop.permute.xlu0 %1152 }
 0x10b   : > { %15140 = vst [vmem:[#allocation85_spill] sm:$0xff] %v11071_v58  ;;  %15141 = vst [vmem:[#allocation86_spill] sm:$0xff] %v11073_v21  ;;  %v1247_v18 = vmul.f32 %v11071_v58, %v10677_v45  ;;  %v1246_v30 = vmul.f32 %v11073_v21, %v10675_v44  ;;  %2196 = vperm.xlu1 %9980, %v8021_v54   ;;  %2191 = vperm.xlu0 %9979, %v8020_v12   ;;  %v8024_v12 = vld [vmem:[%s14526_s1 + $0x3a0] sm:$0xff] }
 0x10d   : > { %v1270_v2 = vpack.c.bf16 %v1247_v18, %v1246_v30  ;;  %8780 = vmatmul.mubr.msk.bf16.gmra.mrb[12].mxu0 %vm791_vm3, %v1269_v10  ;;  %v8025_v18 = vld [vmem:[%s14526_s1 + $0x3a8] sm:$0xff] }
 0x10e   : > { %v11086_v3 = vpop.permute.xlu1 %1167  ;;  %v11088_v26 = vpop.permute.xlu0 %1162 }
 0x10f   : > { %15142 = vst [vmem:[#allocation87_spill] sm:$0xff] %v11086_v3  ;;  %15143 = vst [vmem:[#allocation88_spill] sm:$0xff] %v11088_v26  ;;  %v1249_v21 = vmul.f32 %v11086_v3, %v10706_v48  ;;  %v1248_v54 = vmul.f32 %v11088_v26, %v10704_v27  ;;  %2206 = vperm.xlu1 %9980, %v8023_v19   ;;  %2201 = vperm.xlu0 %9979, %v8022_v47   ;;  %v8027_v47 = vld [vmem:[%s14526_s1 + $0x3b8] sm:$0xff] }
 0x110   : > { %8783 = vmatprep.mubr.msk.bf16.mxu0 %vm791_vm3, %v1270_v2 }
 0x111   : > { %v1271_v10 = vpack.c.bf16 %v1249_v21, %v1248_v54  ;;  %v8026_v21 = vld [vmem:[%s14526_s1 + $0x3b0] sm:$0xff] }
 0x112   : > { %v11101_v30 = vpop.permute.xlu1 %1177  ;;  %v11103_v58 = vpop.permute.xlu0 %1172 }
 0x113   : > { %15144 = vst [vmem:[#allocation89_spill] sm:$0xff] %v11101_v30  ;;  %15145 = vst [vmem:[#allocation90_spill] sm:$0xff] %v11103_v58  ;;  %v1251_v26 = vmul.f32 %v11101_v30, %v10735_v46  ;;  %v1250_v19 = vmul.f32 %v11103_v58, %v10733_v11  ;;  %2216 = vperm.xlu1 %9980, %v8025_v18   ;;  %2211 = vperm.xlu0 %9979, %v8024_v12   ;;  %v8028_v12 = vld [vmem:[%s14526_s1 + $0x3c0] sm:$0xff] }
 0x115   : > { %v1272_v2 = vpack.c.bf16 %v1251_v26, %v1250_v19  ;;  %8784 = vmatmul.mubr.msk.bf16.gmra.mrb[16].mxu0 %vm791_vm3, %v1271_v10  ;;  %v8029_v26 = vld [vmem:[%s14526_s1 + $0x3c8] sm:$0xff] }
 0x116   : > { %v11116_v54 = vpop.permute.xlu1 %1187  ;;  %v11118_v3 = vpop.permute.xlu0 %1182 }
 0x117   : > { %15146 = vst [vmem:[#allocation91_spill] sm:$0xff] %v11116_v54  ;;  %15147 = vst [vmem:[#allocation92_spill] sm:$0xff] %v11118_v3  ;;  %v1253_v58 = vmul.f32 %v11116_v54, %v10764_v32  ;;  %v1252_v18 = vmul.f32 %v11118_v3, %v10762_v31  ;;  %2226 = vperm.xlu1 %9980, %v8027_v47   ;;  %2221 = vperm.xlu0 %9979, %v8026_v21   ;;  %v8031_v21 = vld [vmem:[%s14526_s1 + $0x3d8] sm:$0xff] }
 0x118   : > { %8787 = vmatprep.mubr.msk.bf16.mxu0 %vm791_vm3, %v1272_v2 }
 0x119   : > { %v1273_v10 = vpack.c.bf16 %v1253_v58, %v1252_v18  ;;  %v8030_v58 = vld [vmem:[%s14526_s1 + $0x3d0] sm:$0xff] }
 0x11a   : > { %v11131_v19 = vpop.permute.xlu1 %1197  ;;  %v11133_v30 = vpop.permute.xlu0 %1192 }
 0x11b   : > { %15148 = vst [vmem:[#allocation93_spill] sm:$0xff] %v11131_v19  ;;  %15149 = vst [vmem:[#allocation94_spill] sm:$0xff] %v11133_v30  ;;  %v1255_v3 = vmul.f32 %v11131_v19, %v10793_v17  ;;  %v1254_v47 = vmul.f32 %v11133_v30, %v10791_v24  ;;  %2236 = vperm.xlu1 %9980, %v8029_v26   ;;  %2231 = vperm.xlu0 %9979, %v8028_v12   ;;  %v8032_v12 = vld [vmem:[%s14526_s1 + $0x3e0] sm:$0xff] }
 0x11d   : > { %v1274_v2 = vpack.c.bf16 %v1255_v3, %v1254_v47  ;;  %8788 = vmatmul.mubr.msk.bf16.gmra.mrb[20].mxu0 %vm791_vm3, %v1273_v10  ;;  %v8033_v3 = vld [vmem:[%s14526_s1 + $0x3e8] sm:$0xff] }
 0x11e   : > { %v11146_v18 = vpop.permute.xlu1 %1207  ;;  %v11148_v54 = vpop.permute.xlu0 %1202 }
 0x11f   : > { %15150 = vst [vmem:[#allocation95_spill] sm:$0xff] %v11146_v18  ;;  %15151 = vst [vmem:[#allocation96_spill] sm:$0xff] %v11148_v54  ;;  %v1257_v30 = vmul.f32 %v11146_v18, %v10822_v61  ;;  %v1256_v26 = vmul.f32 %v11148_v54, %v10820_v62  ;;  %2246 = vperm.xlu1 %9980, %v8031_v21   ;;  %2241 = vperm.xlu0 %9979, %v8030_v58   ;;  %v8035_v58 = vld [vmem:[%s14526_s1 + $0x3f8] sm:$0xff]  ;;  %v14626_v18 = vrot.slane %v10471_v42, 1 }
 0x120   : > { %8791 = vmatprep.mubr.msk.bf16.mxu0 %vm791_vm3, %v1274_v2  ;;  %v1524_v2 = vrot.slane %v10461_v37, 1 }
 0x121   : > { %v1275_v10 = vpack.c.bf16 %v1257_v30, %v1256_v26  ;;  %v8034_v30 = vld [vmem:[%s14526_s1 + $0x3f0] sm:$0xff]  ;;  %v1555_v26 = vrot.slane %v10463_v38, 1 }
 0x122   : > { %v11161_v47 = vpop.permute.xlu1 %1217  ;;  %v11163_v19 = vpop.permute.xlu0 %1212 }
 0x123   : > { %15152 = vst [vmem:[#allocation97_spill] sm:$0xff] %v11161_v47  ;;  %15153 = vst [vmem:[#allocation98_spill] sm:$0xff] %v11163_v19  ;;  %v1259_v54 = vmul.f32 %v11161_v47, %v10851_v53  ;;  %v1258_v21 = vmul.f32 %v11163_v19, %v10849_v33  ;;  %2256 = vperm.xlu1 %9980, %v8033_v3   ;;  %2251 = vperm.xlu0 %9979, %v8032_v12  }
 0x124   : > { %v11191_v37 = vsel %vm1556_vm4, %v1555_v26, %v1524_v2  ;;  %v11197_v38 = vsel %vm1556_vm4, %v14626_v18, %v1555_v26 }
 0x125   : > { %v1276_v47 = vpack.c.bf16 %v1259_v54, %v1258_v21  ;;  %8792 = vmatmul.mubr.msk.bf16.gmra.mrb[24].mxu0 %vm791_vm3, %v1275_v10  ;;  %15156 = vst [vmem:[#allocation101_spill] sm:$0xff] %v11191_v37  ;;  %15157 = vst [vmem:[#allocation102_spill] sm:$0xff] %v11197_v38  ;;  %v8070_v54 = vld [vmem:[%s14526_s1 + $0x500] sm:$0xff]  ;;  %v1525_v10 = vrot.slane %v10467_v40, 1 }
 0x126   : > { %v11180_v3 = vpop.permute.xlu1 %1227  ;;  %v11182_v12 = vpop.permute.xlu0 %1222 }
 0x127   : > { %15154 = vst [vmem:[#allocation99_spill] sm:$0xff] %v11180_v3  ;;  %15155 = vst [vmem:[#allocation100_spill] sm:$0xff] %v11182_v12  ;;  %v1261_v19 = vmul.f32 %v11180_v3, %v10469_v41  ;;  %v1260_v60 = vmul.f32 %v11182_v12, %v10878_v1  ;;  %2266 = vperm.xlu1 %9980, %v8035_v58   ;;  %2261 = vperm.xlu0 %9979, %v8034_v30   ;;  %v8071_v41 = vld [vmem:[%s14526_s1 + $0x508] sm:$0xff] }
 0x128   : > { %8795 = vmatprep.mubr.msk.bf16.mxu0 %vm791_vm3, %v1276_v47  ;;  %v1526_v47 = vrot.slane %v10485_v51, 1  ;;  %v11221_v40 = vsel %vm1556_vm4, %v1524_v2, %v1525_v10  ;;  %v8073_v51 = vld [vmem:[%s14526_s1 + $0x518] sm:$0xff] }
 0x129   : > { %v1277_v21 = vpack.c.bf16 %v1261_v19, %v1260_v60  ;;  %15161 = vst [vmem:[#allocation106_spill] sm:$0xff] %v11221_v40  ;;  %v8072_v60 = vld [vmem:[%s14526_s1 + $0x510] sm:$0xff]  ;;  %v1527_v19 = vrot.slane %v10487_v52, 1 }
 0x12a   : > { %v11207_v58 = vpop.permute.xlu1 %1629  ;;  %v11209_v30 = vpop.permute.xlu0 %1624  ;;  %v11217_v12 = vsel %vm1556_vm4, %v1525_v10, %v1526_v47 }
 0x12b   : > { %15158 = vst [vmem:[#allocation103_spill] sm:$0xff] %v11207_v58  ;;  %15159 = vst [vmem:[#allocation104_spill] sm:$0xff] %v11209_v30  ;;  %v1783_v26 = vmul.f32 %v11207_v58, %v11191_v37  ;;  %v1782_v18 = vmul.f32 %v11209_v30, %v11197_v38  ;;  %2865 = vperm.xlu1 %9980, %v8071_v41   ;;  %2860 = vperm.xlu0 %9979, %v8070_v54   ;;  %v1528_v41 = vrot.slane %v10519_v63, 1  ;;  %v8191_v38 = vld [vmem:[%s14526_s1 + $0x7b8] sm:$0xff] }
 0x12c   : > { %15160 = vst [vmem:[#allocation105_spill] sm:$0xff] %v11217_v12  ;;  %v11247_v63 = vsel %vm1556_vm4, %v1526_v47, %v1527_v19 }
 0x12d   : > { %v1814_v54 = vpack.c.bf16 %v1783_v26, %v1782_v18  ;;  %8796 = vmatmul.mubr.msk.bf16.gmra.mrb[28].mxu0 %vm791_vm3, %v1277_v21  ;;  %v11243_v52 = vsel %vm1556_vm4, %v1527_v19, %v1528_v41  ;;  %v8075_v18 = vld [vmem:[%s14526_s1 + $0x528] sm:$0xff]  ;;  %v8074_v21 = vld [vmem:[%s14526_s1 + $0x520] sm:$0xff]  ;;  %v1529_v26 = vrot.slane %v10521_v0, 1 }
 0x12e   : > { %v11232_v58 = vpop.permute.xlu1 %1639  ;;  %v11234_v30 = vpop.permute.xlu0 %1634 }
 0x12f   : > { %15162 = vst [vmem:[#allocation107_spill] sm:$0xff] %v11232_v58  ;;  %15163 = vst [vmem:[#allocation108_spill] sm:$0xff] %v11234_v30  ;;  %v1785_v2 = vmul.f32 %v11232_v58, %v11217_v12  ;;  %v1784_v10 = vmul.f32 %v11234_v30, %v11221_v40  ;;  %2875 = vperm.xlu1 %9980, %v8073_v51   ;;  %2870 = vperm.xlu0 %9979, %v8072_v60   ;;  %v1530_v51 = vrot.slane %v10551_v15, 1 }
 0x130   : > { %8801 = vmatprep.mubr.msk.bf16.mxu0 %vm791_vm3, %v1814_v54  ;;  %v2368_v30 = vsel %vm840_vm1, %v10992_v34, 0  ;;  %v11273_v15 = vsel %vm1556_vm4, %v1528_v41, %v1529_v26  ;;  %v1532_v34 = vrot.slane %v10583_v28, 1 }
 0x131   : > { %v1815_v60 = vpack.c.bf16 %v1785_v2, %v1784_v10  ;;  %v11269_v0 = vsel %vm1556_vm4, %v1529_v26, %v1530_v51  ;;  %15167 = vst [vmem:[#allocation112_spill] sm:$0xff] %v11273_v15  ;;  %v8077_v2 = vld [vmem:[%s14526_s1 + $0x538] sm:$0xff]  ;;  %v8076_v10 = vld [vmem:[%s14526_s1 + $0x530] sm:$0xff] }
 0x132   : > { %v11257_v54 = vpop.permute.xlu1 %1649  ;;  %v11259_v58 = vpop.permute.xlu0 %1644  ;;  %15166 = vst [vmem:[#allocation111_spill] sm:$0xff] %v11269_v0 }
 0x133   : > { %15164 = vst [vmem:[#allocation109_spill] sm:$0xff] %v11257_v54  ;;  %15165 = vst [vmem:[#allocation110_spill] sm:$0xff] %v11259_v58  ;;  %v1787_v47 = vmul.f32 %v11257_v54, %v11243_v52  ;;  %v1786_v19 = vmul.f32 %v11259_v58, %v11247_v63  ;;  %2885 = vperm.xlu1 %9980, %v8075_v18   ;;  %2880 = vperm.xlu0 %9979, %v8074_v21   ;;  %v1531_v18 = vrot.slane %v10553_v16, 1  ;;  %v11285_v58 = vld [vmem:[%s10180_s22 + $0x10] sm:$0xf] }
 0x135   : > { %v1816_v21 = vpack.c.bf16 %v1787_v47, %v1786_v19  ;;  %8802 = vmatmul.mubr.msk.bf16.vlgmr.msra.gmra.mrb[0].mxu0 %vm791_vm3, %v1815_v60  ;;  %v11298_v16 = vsel %vm1556_vm4, %v1531_v18, %v1532_v34  ;;  %v11302_v28 = vsel %vm1556_vm4, %v1530_v51, %v1531_v18  ;;  %v8078_v60 = vld [vmem:[%s14526_s1 + $0x540] sm:$0xff]  ;;  %v1533_v47 = vrot.slane %v10585_v29, 1 }
 0x136   : > { %8834 = vmatpush3.bf16.msra.mxu0 %v2368_v30  ;;  %v11287_v41 = vpop.permute.xlu1 %1659  ;;  %v11289_v26 = vpop.permute.xlu0 %1654  ;;  %v8079_v30 = vld [vmem:[%s14526_s1 + $0x548] sm:$0xff]  ;;  %v1534_v19 = vrot.slane %v10617_v50, 1 }
 0x137   : > { %15168 = vst [vmem:[#allocation113_spill] sm:$0xff] %v11287_v41  ;;  %15169 = vst [vmem:[#allocation114_spill] sm:$0xff] %v11289_v26  ;;  %v1789_v54 = vmul.f32 %v11287_v41, %v11269_v0  ;;  %v1788_v3 = vmul.f32 %v11289_v26, %v11273_v15  ;;  %2895 = vperm.xlu1 %9980, %v8077_v2   ;;  %2890 = vperm.xlu0 %9979, %v8076_v10  }
 0x138   : > { %8805 = vmatprep.mubr.msk.bf16.mxu0 %vm791_vm3, %v1816_v21  ;;  %9923 = vmatprep.subr.msk.bf16.mxu0 %vm840_vm1, %v11285_v58  ;;  %v11324_v29 = vsel %vm1556_vm4, %v1533_v47, %v1534_v19  ;;  %v11328_v50 = vsel %vm1556_vm4, %v1532_v34, %v1533_v47 }
 0x139   : > { %v1817_v2 = vpack.c.bf16 %v1789_v54, %v1788_v3  ;;  %v8081_v3 = vld [vmem:[%s14526_s1 + $0x558] sm:$0xff]  ;;  %v8080_v54 = vld [vmem:[%s14526_s1 + $0x550] sm:$0xff] }
 0x13a   : > { %v11314_v10 = vpop.permute.xlu1 %1669  ;;  %v11316_v51 = vpop.permute.xlu0 %1664 }
 0x13b   : > { %15170 = vst [vmem:[#allocation115_spill] sm:$0xff] %v11314_v10  ;;  %15171 = vst [vmem:[#allocation116_spill] sm:$0xff] %v11316_v51  ;;  %v1791_v18 = vmul.f32 %v11314_v10, %v11298_v16  ;;  %v1790_v21 = vmul.f32 %v11316_v51, %v11302_v28  ;;  %2905 = vperm.xlu1 %9980, %v8079_v30   ;;  %2900 = vperm.xlu0 %9979, %v8078_v60   ;;  %v1535_v51 = vrot.slane %v10619_v57, 1 }
 0x13c   : > { %v1536_v30 = vrot.slane %v10646_v13, 1 }
 0x13d   : > { %v1818_v60 = vpack.c.bf16 %v1791_v18, %v1790_v21  ;;  %8806 = vmatmul.mubr.msk.bf16.gmra.mrb[4].mxu0 %vm791_vm3, %v1817_v2  ;;  %v11354_v13 = vsel %vm1556_vm4, %v1534_v19, %v1535_v51  ;;  %v8083_v2 = vld [vmem:[%s14526_s1 + $0x568] sm:$0xff]  ;;  %v8082_v18 = vld [vmem:[%s14526_s1 + $0x560] sm:$0xff]  ;;  %v1537_v21 = vrot.slane %v10648_v14, 1 }
 0x13e   : > { %v11339_v10 = vpop.permute.xlu1 %1679  ;;  %v11341_v41 = vpop.permute.xlu0 %1674  ;;  %v11350_v57 = vsel %vm1556_vm4, %v1535_v51, %v1536_v30 }
 0x13f   : > { %15172 = vst [vmem:[#allocation117_spill] sm:$0xff] %v11339_v10  ;;  %15173 = vst [vmem:[#allocation118_spill] sm:$0xff] %v11341_v41  ;;  %v1793_v34 = vmul.f32 %v11339_v10, %v11324_v29  ;;  %v1792_v47 = vmul.f32 %v11341_v41, %v11328_v50  ;;  %2915 = vperm.xlu1 %9980, %v8081_v3   ;;  %2910 = vperm.xlu0 %9979, %v8080_v54   ;;  %v1538_v3 = vrot.slane %v10675_v44, 1  ;;  %v8085_v44 = vld [vmem:[%s14526_s1 + $0x578] sm:$0xff] }
 0x140   : > { %8809 = vmatprep.mubr.msk.bf16.mxu0 %vm791_vm3, %v1818_v60  ;;  %v11378_v14 = vsel %vm1556_vm4, %v1536_v30, %v1537_v21 }
 0x141   : > { %v1819_v54 = vpack.c.bf16 %v1793_v34, %v1792_v47  ;;  %v11374_v41 = vsel %vm1556_vm4, %v1537_v21, %v1538_v3  ;;  %v8084_v34 = vld [vmem:[%s14526_s1 + $0x570] sm:$0xff]  ;;  %v1539_v47 = vrot.slane %v10677_v45, 1 }
 0x142   : > { %v11364_v60 = vpop.permute.xlu1 %1689  ;;  %v11366_v10 = vpop.permute.xlu0 %1684 }
 0x143   : > { %15174 = vst [vmem:[#allocation119_spill] sm:$0xff] %v11364_v60  ;;  %15175 = vst [vmem:[#allocation120_spill] sm:$0xff] %v11366_v10  ;;  %v1795_v19 = vmul.f32 %v11364_v60, %v11350_v57  ;;  %v1794_v51 = vmul.f32 %v11366_v10, %v11354_v13  ;;  %2925 = vperm.xlu1 %9980, %v8083_v2   ;;  %2920 = vperm.xlu0 %9979, %v8082_v18   ;;  %v1540_v2 = vrot.slane %v10704_v27, 1 }
 0x144   : > { %v11404_v27 = vsel %vm1556_vm4, %v1538_v3, %v1539_v47 }
 0x145   : > { %v1820_v18 = vpack.c.bf16 %v1795_v19, %v1794_v51  ;;  %8810 = vmatmul.mubr.msk.bf16.gmra.mrb[8].mxu0 %vm791_vm3, %v1819_v54  ;;  %v11400_v45 = vsel %vm1556_vm4, %v1539_v47, %v1540_v2  ;;  %v8087_v54 = vld [vmem:[%s14526_s1 + $0x588] sm:$0xff]  ;;  %v8086_v19 = vld [vmem:[%s14526_s1 + $0x580] sm:$0xff]  ;;  %v1541_v51 = vrot.slane %v10706_v48, 1 }
 0x146   : > { %v11389_v10 = vpop.permute.xlu1 %1699  ;;  %v11391_v60 = vpop.permute.xlu0 %1694 }
 0x147   : > { %15176 = vst [vmem:[#allocation121_spill] sm:$0xff] %v11389_v10  ;;  %15177 = vst [vmem:[#allocation122_spill] sm:$0xff] %v11391_v60  ;;  %v1797_v30 = vmul.f32 %v11389_v10, %v11374_v41  ;;  %v1796_v21 = vmul.f32 %v11391_v60, %v11378_v14  ;;  %2935 = vperm.xlu1 %9980, %v8085_v44   ;;  %2930 = vperm.xlu0 %9979, %v8084_v34   ;;  %v1542_v44 = vrot.slane %v10733_v11, 1  ;;  %v8089_v11 = vld [vmem:[%s14526_s1 + $0x598] sm:$0xff] }
 0x148   : > { %8813 = vmatprep.mubr.msk.bf16.mxu0 %vm791_vm3, %v1820_v18  ;;  %v11428_v48 = vsel %vm1556_vm4, %v1540_v2, %v1541_v51 }
 0x149   : > { %v1821_v34 = vpack.c.bf16 %v1797_v30, %v1796_v21  ;;  %v11424_v60 = vsel %vm1556_vm4, %v1541_v51, %v1542_v44  ;;  %v8088_v30 = vld [vmem:[%s14526_s1 + $0x590] sm:$0xff]  ;;  %v1543_v21 = vrot.slane %v10735_v46, 1 }
 0x14a   : > { %v11414_v18 = vpop.permute.xlu1 %1709  ;;  %v11416_v10 = vpop.permute.xlu0 %1704 }
 0x14b   : > { %15178 = vst [vmem:[#allocation123_spill] sm:$0xff] %v11414_v18  ;;  %15179 = vst [vmem:[#allocation124_spill] sm:$0xff] %v11416_v10  ;;  %v1799_v3 = vmul.f32 %v11414_v18, %v11400_v45  ;;  %v1798_v47 = vmul.f32 %v11416_v10, %v11404_v27  ;;  %2945 = vperm.xlu1 %9980, %v8087_v54   ;;  %2940 = vperm.xlu0 %9979, %v8086_v19   ;;  %v1544_v54 = vrot.slane %v10762_v31, 1 }
 0x14c   : > { %v11454_v46 = vsel %vm1556_vm4, %v1542_v44, %v1543_v21 }
 0x14d   : > { %v1822_v19 = vpack.c.bf16 %v1799_v3, %v1798_v47  ;;  %8814 = vmatmul.mubr.msk.bf16.gmra.mrb[12].mxu0 %vm791_vm3, %v1821_v34  ;;  %v11450_v31 = vsel %vm1556_vm4, %v1543_v21, %v1544_v54  ;;  %15182 = vst [vmem:[#allocation127_spill] sm:$0xff] %v11454_v46  ;;  %v8091_v34 = vld [vmem:[%s14526_s1 + $0x5a8] sm:$0xff]  ;;  %v8090_v3 = vld [vmem:[%s14526_s1 + $0x5a0] sm:$0xff]  ;;  %v1545_v47 = vrot.slane %v10764_v32, 1 }
 0x14e   : > { %v11439_v10 = vpop.permute.xlu1 %1719  ;;  %v11441_v18 = vpop.permute.xlu0 %1714 }
 0x14f   : > { %15180 = vst [vmem:[#allocation125_spill] sm:$0xff] %v11439_v10  ;;  %15181 = vst [vmem:[#allocation126_spill] sm:$0xff] %v11441_v18  ;;  %v1801_v2 = vmul.f32 %v11439_v10, %v11424_v60  ;;  %v1800_v51 = vmul.f32 %v11441_v18, %v11428_v48  ;;  %2955 = vperm.xlu1 %9980, %v8089_v11   ;;  %2950 = vperm.xlu0 %9979, %v8088_v30   ;;  %v1546_v11 = vrot.slane %v10791_v24, 1  ;;  %v8093_v24 = vld [vmem:[%s14526_s1 + $0x5b8] sm:$0xff] }
 0x150   : > { %8817 = vmatprep.mubr.msk.bf16.mxu0 %vm791_vm3, %v1822_v19  ;;  %v11478_v32 = vsel %vm1556_vm4, %v1544_v54, %v1545_v47 }
 0x151   : > { %v1823_v30 = vpack.c.bf16 %v1801_v2, %v1800_v51  ;;  %v11474_v18 = vsel %vm1556_vm4, %v1545_v47, %v1546_v11  ;;  %15186 = vst [vmem:[#allocation131_spill] sm:$0xff] %v11478_v32  ;;  %v8092_v2 = vld [vmem:[%s14526_s1 + $0x5b0] sm:$0xff]  ;;  %v1547_v51 = vrot.slane %v10793_v17, 1 }
 0x152   : > { %v11464_v19 = vpop.permute.xlu1 %1729  ;;  %v11466_v10 = vpop.permute.xlu0 %1724  ;;  %15185 = vst [vmem:[#allocation130_spill] sm:$0xff] %v11474_v18 }
 0x153   : > { %15183 = vst [vmem:[#allocation128_spill] sm:$0xff] %v11464_v19  ;;  %15184 = vst [vmem:[#allocation129_spill] sm:$0xff] %v11466_v10  ;;  %v1803_v44 = vmul.f32 %v11464_v19, %v11450_v31  ;;  %v1802_v21 = vmul.f32 %v11466_v10, %v11454_v46  ;;  %2965 = vperm.xlu1 %9980, %v8091_v34   ;;  %2960 = vperm.xlu0 %9979, %v8090_v3   ;;  %v1548_v34 = vrot.slane %v10820_v62, 1 }
 0x154   : > { %v11504_v17 = vsel %vm1556_vm4, %v1546_v11, %v1547_v51 }
 0x155   : > { %v1824_v3 = vpack.c.bf16 %v1803_v44, %v1802_v21  ;;  %8818 = vmatmul.mubr.msk.bf16.gmra.mrb[16].mxu0 %vm791_vm3, %v1823_v30  ;;  %v11500_v62 = vsel %vm1556_vm4, %v1547_v51, %v1548_v34  ;;  %15190 = vst [vmem:[#allocation135_spill] sm:$0xff] %v11504_v17  ;;  %v8095_v30 = vld [vmem:[%s14526_s1 + $0x5c8] sm:$0xff]  ;;  %v8094_v44 = vld [vmem:[%s14526_s1 + $0x5c0] sm:$0xff]  ;;  %v1549_v21 = vrot.slane %v10822_v61, 1 }
 0x156   : > { %v11489_v10 = vpop.permute.xlu1 %1739  ;;  %v11491_v19 = vpop.permute.xlu0 %1734  ;;  %15189 = vst [vmem:[#allocation134_spill] sm:$0xff] %v11500_v62 }
 0x157   : > { %15187 = vst [vmem:[#allocation132_spill] sm:$0xff] %v11489_v10  ;;  %15188 = vst [vmem:[#allocation133_spill] sm:$0xff] %v11491_v19  ;;  %v1805_v54 = vmul.f32 %v11489_v10, %v11474_v18  ;;  %v1804_v47 = vmul.f32 %v11491_v19, %v11478_v32  ;;  %2975 = vperm.xlu1 %9980, %v8093_v24   ;;  %2970 = vperm.xlu0 %9979, %v8092_v2   ;;  %v1550_v24 = vrot.slane %v10849_v33, 1  ;;  %v8097_v33 = vld [vmem:[%s14526_s1 + $0x5d8] sm:$0xff] }
 0x158   : > { %8821 = vmatprep.mubr.msk.bf16.mxu0 %vm791_vm3, %v1824_v3  ;;  %v11528_v61 = vsel %vm1556_vm4, %v1548_v34, %v1549_v21 }
 0x159   : > { %v1825_v2 = vpack.c.bf16 %v1805_v54, %v1804_v47  ;;  %v11524_v19 = vsel %vm1556_vm4, %v1549_v21, %v1550_v24  ;;  %15194 = vst [vmem:[#allocation139_spill] sm:$0xff] %v11528_v61  ;;  %v8096_v54 = vld [vmem:[%s14526_s1 + $0x5d0] sm:$0xff]  ;;  %v1551_v47 = vrot.slane %v10851_v53, 1 }
 0x15a   : > { %v11514_v3 = vpop.permute.xlu1 %1749  ;;  %v11516_v10 = vpop.permute.xlu0 %1744  ;;  %15193 = vst [vmem:[#allocation138_spill] sm:$0xff] %v11524_v19 }
 0x15b   : > { %15191 = vst [vmem:[#allocation136_spill] sm:$0xff] %v11514_v3  ;;  %15192 = vst [vmem:[#allocation137_spill] sm:$0xff] %v11516_v10  ;;  %v1807_v11 = vmul.f32 %v11514_v3, %v11500_v62  ;;  %v1806_v51 = vmul.f32 %v11516_v10, %v11504_v17  ;;  %2985 = vperm.xlu1 %9980, %v8095_v30   ;;  %2980 = vperm.xlu0 %9979, %v8094_v44   ;;  %v1552_v30 = vrot.slane %v10878_v1, 1 }
 0x15c   : > { %v11554_v1 = vsel %vm1556_vm4, %v1550_v24, %v1551_v47 }
 0x15d   : > { %v1826_v44 = vpack.c.bf16 %v1807_v11, %v1806_v51  ;;  %8822 = vmatmul.mubr.msk.bf16.gmra.mrb[20].mxu0 %vm791_vm3, %v1825_v2  ;;  %v11550_v53 = vsel %vm1556_vm4, %v1551_v47, %v1552_v30  ;;  %15198 = vst [vmem:[#allocation143_spill] sm:$0xff] %v11554_v1  ;;  %v8099_v2 = vld [vmem:[%s14526_s1 + $0x5e8] sm:$0xff]  ;;  %v8098_v11 = vld [vmem:[%s14526_s1 + $0x5e0] sm:$0xff] }
 0x15e   : > { %v11539_v10 = vpop.permute.xlu1 %1759  ;;  %v11541_v3 = vpop.permute.xlu0 %1754  ;;  %15197 = vst [vmem:[#allocation142_spill] sm:$0xff] %v11550_v53  ;;  %v11562_v51 = vld [vmem:[#allocation2 + $0xe8] sm:$0xff] }
 0x15f   : > { %15195 = vst [vmem:[#allocation140_spill] sm:$0xff] %v11539_v10  ;;  %15196 = vst [vmem:[#allocation141_spill] sm:$0xff] %v11541_v3  ;;  %v1809_v34 = vmul.f32 %v11539_v10, %v11524_v19  ;;  %v1808_v21 = vmul.f32 %v11541_v3, %v11528_v61  ;;  %2995 = vperm.xlu1 %9980, %v8097_v33   ;;  %2990 = vperm.xlu0 %9979, %v8096_v54   ;;  %v1553_v33 = vrot.slane %v11562_v51, 1 }
 0x160   : > { %8825 = vmatprep.mubr.msk.bf16.mxu0 %vm791_vm3, %v1826_v44  ;;  %v15201_v3 = vrot.slane %v10471_v42, 1 }
 0x161   : > { %v1827_v54 = vpack.c.bf16 %v1809_v34, %v1808_v21  ;;  %v11581_v34 = vsel %vm1556_vm4, %v1552_v30, %v1553_v33  ;;  %v8101_v21 = vld [vmem:[%s14526_s1 + $0x5f8] sm:$0xff] }
 0x162   : > { %v11565_v44 = vpop.permute.xlu1 %1769  ;;  %v11567_v10 = vpop.permute.xlu0 %1764  ;;  %v11577_v26 = vsel %vm1556_vm4, %v1553_v33, %v15201_v3  ;;  %15203 = vst [vmem:[#allocation147_spill] sm:$0xff] %v11581_v34  ;;  %v8120_v33 = vld [vmem:[%s14526_s1 + $0x608] sm:$0xff] }
 0x163   : > { %15199 = vst [vmem:[#allocation144_spill] sm:$0xff] %v11565_v44  ;;  %15200 = vst [vmem:[#allocation145_spill] sm:$0xff] %v11567_v10  ;;  %v1811_v24 = vmul.f32 %v11565_v44, %v11550_v53  ;;  %v1810_v47 = vmul.f32 %v11567_v10, %v11554_v1  ;;  %3005 = vperm.xlu1 %9980, %v8099_v2   ;;  %3000 = vperm.xlu0 %9979, %v8098_v11   ;;  %v8100_v10 = vld [vmem:[%s14526_s1 + $0x5f0] sm:$0xff]  ;;  %v8195_v1 = vld [vmem:[%s14526_s1 + $0x7d8] sm:$0xff] }
 0x164   : > { %15202 = vst [vmem:[#allocation146_spill] sm:$0xff] %v11577_v26 }
 0x165   : > { %v1828_v2 = vpack.c.bf16 %v1811_v24, %v1810_v47  ;;  %8826 = vmatmul.mubr.msk.bf16.gmra.mrb[24].mxu0 %vm791_vm3, %v1827_v54  ;;  %v8119_v54 = vld [vmem:[%s14526_s1 + $0x600] sm:$0xff] }
 0x166   : > { %v11590_v42 = vpop.permute.xlu1 %1779  ;;  %v11592_v11 = vpop.permute.xlu0 %1774 }
 0x167   : > { %15204 = vst [vmem:[#allocation148_spill] sm:$0xff] %v11590_v42  ;;  %15205 = vst [vmem:[#allocation149_spill] sm:$0xff] %v11592_v11  ;;  %v1813_v3 = vmul.f32 %v11590_v42, %v11577_v26  ;;  %v1812_v30 = vmul.f32 %v11592_v11, %v11581_v34  ;;  %3015 = vperm.xlu1 %9980, %v8101_v21   ;;  %3010 = vperm.xlu0 %9979, %v8100_v10   ;;  %v8122_v21 = vld [vmem:[%s14526_s1 + $0x618] sm:$0xff] }
 0x168   : > { %8829 = vmatprep.mubr.msk.bf16.mxu0 %vm791_vm3, %v1828_v2  ;;  %v8121_v2 = vld [vmem:[%s14526_s1 + $0x610] sm:$0xff] }
 0x169   : > { %v1829_v24 = vpack.c.bf16 %v1813_v3, %v1812_v30 }
 0x16a   : > { %v11605_v47 = vpop.permute.xlu1 %2116  ;;  %v11607_v44 = vpop.permute.xlu0 %2111 }
 0x16b   : > { %15206 = vst [vmem:[#allocation150_spill] sm:$0xff] %v11605_v47  ;;  %15207 = vst [vmem:[#allocation151_spill] sm:$0xff] %v11607_v44  ;;  %v2270_v42 = vmul.f32 %v11605_v47, %v10499_v56  ;;  %v2269_v10 = vmul.f32 %v11607_v44, %v10495_v55  ;;  %3352 = vperm.xlu1 %9980, %v8120_v33   ;;  %3347 = vperm.xlu0 %9979, %v8119_v54   ;;  %v8123_v54 = vld [vmem:[%s14526_s1 + $0x620] sm:$0xff] }
 0x16d   : > { %v2301_v3 = vpack.c.bf16 %v2270_v42, %v2269_v10  ;;  %8830 = vmatmul.mubr.msk.bf16.gmra.mrb[28].mxu0 %vm791_vm3, %v1829_v24  ;;  %v8124_v42 = vld [vmem:[%s14526_s1 + $0x628] sm:$0xff] }
 0x16e   : > { %v11620_v30 = vpop.permute.xlu1 %2126  ;;  %v11622_v11 = vpop.permute.xlu0 %2121 }
 0x16f   : > { %15208 = vst [vmem:[#allocation152_spill] sm:$0xff] %v11620_v30  ;;  %15209 = vst [vmem:[#allocation153_spill] sm:$0xff] %v11622_v11  ;;  %v2272_v47 = vmul.f32 %v11620_v30, %v10537_v7  ;;  %v2271_v33 = vmul.f32 %v11622_v11, %v10541_v8  ;;  %3362 = vperm.xlu1 %9980, %v8122_v21   ;;  %3357 = vperm.xlu0 %9979, %v8121_v2   ;;  %v8126_v11 = vld [vmem:[%s14526_s1 + $0x638] sm:$0xff] }
 0x170   : > { %8835 = vmatprep.mubr.msk.bf16.mxu0 %vm791_vm3, %v2301_v3  ;;  %v2630_v3 = vsel %vm840_vm1, %v11285_v58, 0 }
 0x171   : > { %v2302_v24 = vpack.c.bf16 %v2272_v47, %v2271_v33  ;;  %v8125_v47 = vld [vmem:[%s14526_s1 + $0x630] sm:$0xff] }
 0x172   : > { %v11635_v10 = vpop.permute.xlu1 %2136  ;;  %v11637_v30 = vpop.permute.xlu0 %2131 }
 0x173   : > { %15210 = vst [vmem:[#allocation154_spill] sm:$0xff] %v11635_v10  ;;  %15211 = vst [vmem:[#allocation155_spill] sm:$0xff] %v11637_v30  ;;  %v2274_v21 = vmul.f32 %v11635_v10, %v10568_v22  ;;  %v2273_v2 = vmul.f32 %v11637_v30, %v10572_v23  ;;  %3372 = vperm.xlu1 %9980, %v8124_v42   ;;  %3367 = vperm.xlu0 %9979, %v8123_v54   ;;  %v11653_v10 = vld [vmem:[%s10180_s22 + $0x14] sm:$0xf]  ;;  %v8187_v23 = vld [vmem:[%s14526_s1 + $0x798] sm:$0xff] }
 0x175   : > { %v2303_v33 = vpack.c.bf16 %v2274_v21, %v2273_v2  ;;  %8836 = vmatmul.mubr.msk.bf16.vlgmr.msra.gmra.mrb[0].mxu0 %vm791_vm3, %v2302_v24  ;;  %v8128_v24 = vld [vmem:[%s14526_s1 + $0x648] sm:$0xff]  ;;  %v8127_v21 = vld [vmem:[%s14526_s1 + $0x640] sm:$0xff] }
 0x176   : > { %8868 = vmatpush3.bf16.msra.mxu0 %v2630_v3  ;;  %v11655_v30 = vpop.permute.xlu1 %2146  ;;  %v11657_v42 = vpop.permute.xlu0 %2141 }
 0x177   : > { %15212 = vst [vmem:[#allocation156_spill] sm:$0xff] %v11655_v30  ;;  %15213 = vst [vmem:[#allocation157_spill] sm:$0xff] %v11657_v42  ;;  %v2276_v58 = vmul.f32 %v11655_v30, %v10601_v35  ;;  %v2275_v54 = vmul.f32 %v11657_v42, %v10605_v36  ;;  %3382 = vperm.xlu1 %9980, %v8126_v11   ;;  %3377 = vperm.xlu0 %9979, %v8125_v47  }
 0x178   : > { %8839 = vmatprep.mubr.msk.bf16.mxu0 %vm791_vm3, %v2303_v33  ;;  %9924 = vmatprep.subr.msk.bf16.mxu0 %vm840_vm1, %v11653_v10  ;;  %v8130_v33 = vld [vmem:[%s14526_s1 + $0x658] sm:$0xff] }
 0x179   : > { %v2304_v2 = vpack.c.bf16 %v2276_v58, %v2275_v54  ;;  %v8129_v58 = vld [vmem:[%s14526_s1 + $0x650] sm:$0xff] }
 0x17a   : > { %v11672_v3 = vpop.permute.xlu1 %2156  ;;  %v11674_v30 = vpop.permute.xlu0 %2151 }
 0x17b   : > { %15214 = vst [vmem:[#allocation158_spill] sm:$0xff] %v11672_v3  ;;  %15215 = vst [vmem:[#allocation159_spill] sm:$0xff] %v11674_v30  ;;  %v2278_v11 = vmul.f32 %v11672_v3, %v10631_v4  ;;  %v2277_v47 = vmul.f32 %v11674_v30, %v10635_v5  ;;  %3392 = vperm.xlu1 %9980, %v8128_v24   ;;  %3387 = vperm.xlu0 %9979, %v8127_v21   ;;  %v8132_v21 = vld [vmem:[%s14526_s1 + $0x668] sm:$0xff]  ;;  %v8183_v5 = vld [vmem:[%s14526_s1 + $0x778] sm:$0xff] }
 0x17d   : > { %v2305_v54 = vpack.c.bf16 %v2278_v11, %v2277_v47  ;;  %8840 = vmatmul.mubr.msk.bf16.gmra.mrb[4].mxu0 %vm791_vm3, %v2304_v2  ;;  %v8131_v2 = vld [vmem:[%s14526_s1 + $0x660] sm:$0xff] }
 0x17e   : > { %v11687_v42 = vpop.permute.xlu1 %2166  ;;  %v11689_v44 = vpop.permute.xlu0 %2161 }
 0x17f   : > { %15216 = vst [vmem:[#allocation160_spill] sm:$0xff] %v11687_v42  ;;  %15217 = vst [vmem:[#allocation161_spill] sm:$0xff] %v11689_v44  ;;  %v2280_v30 = vmul.f32 %v11687_v42, %v10661_v25  ;;  %v2279_v24 = vmul.f32 %v11689_v44, %v10665_v49  ;;  %3402 = vperm.xlu1 %9980, %v8130_v33   ;;  %3397 = vperm.xlu0 %9979, %v8129_v58   ;;  %v8134_v58 = vld [vmem:[%s14526_s1 + $0x678] sm:$0xff] }
 0x180   : > { %8843 = vmatprep.mubr.msk.bf16.mxu0 %vm791_vm3, %v2305_v54 }
 0x181   : > { %v2306_v11 = vpack.c.bf16 %v2280_v30, %v2279_v24  ;;  %v8133_v30 = vld [vmem:[%s14526_s1 + $0x670] sm:$0xff] }
 0x182   : > { %v11702_v47 = vpop.permute.xlu1 %2176  ;;  %v11704_v3 = vpop.permute.xlu0 %2171 }
 0x183   : > { %15218 = vst [vmem:[#allocation162_spill] sm:$0xff] %v11702_v47  ;;  %15219 = vst [vmem:[#allocation163_spill] sm:$0xff] %v11704_v3  ;;  %v2282_v42 = vmul.f32 %v11702_v47, %v10689_v6  ;;  %v2281_v33 = vmul.f32 %v11704_v3, %v10693_v9  ;;  %3412 = vperm.xlu1 %9980, %v8132_v21   ;;  %3407 = vperm.xlu0 %9979, %v8131_v2   ;;  %v15222_v21 = vld [vmem:[#allocation38_spill] sm:$0xff]  ;;  %v8179_v9 = vld [vmem:[%s14526_s1 + $0x758] sm:$0xff] }
 0x185   : > { %v2307_v54 = vpack.c.bf16 %v2282_v42, %v2281_v33  ;;  %8844 = vmatmul.mubr.msk.bf16.gmra.mrb[8].mxu0 %vm791_vm3, %v2306_v11  ;;  %v8136_v42 = vld [vmem:[%s14526_s1 + $0x688] sm:$0xff]  ;;  %v8135_v11 = vld [vmem:[%s14526_s1 + $0x680] sm:$0xff] }
 0x186   : > { %v11717_v24 = vpop.permute.xlu1 %2186  ;;  %v11719_v44 = vpop.permute.xlu0 %2181 }
 0x187   : > { %15220 = vst [vmem:[#allocation164_spill] sm:$0xff] %v11717_v24  ;;  %15221 = vst [vmem:[#allocation165_spill] sm:$0xff] %v11719_v44  ;;  %v2284_v3 = vmul.f32 %v11717_v24, %v10719_v43  ;;  %v2283_v2 = vmul.f32 %v11719_v44, %v15222_v21  ;;  %3422 = vperm.xlu1 %9980, %v8134_v58   ;;  %3417 = vperm.xlu0 %9979, %v8133_v30   ;;  %v15225_v24 = vld [vmem:[#allocation41_spill] sm:$0xff]  ;;  %v15226_v58 = vld [vmem:[#allocation42_spill] sm:$0xff] }
 0x188   : > { %8847 = vmatprep.mubr.msk.bf16.mxu0 %vm791_vm3, %v2307_v54  ;;  %v8138_v54 = vld [vmem:[%s14526_s1 + $0x698] sm:$0xff] }
 0x189   : > { %v2308_v33 = vpack.c.bf16 %v2284_v3, %v2283_v2  ;;  %v8137_v3 = vld [vmem:[%s14526_s1 + $0x690] sm:$0xff] }
 0x18a   : > { %v11732_v47 = vpop.permute.xlu1 %2196  ;;  %v11734_v39 = vpop.permute.xlu0 %2191 }
 0x18b   : > { %15223 = vst [vmem:[#allocation166_spill] sm:$0xff] %v11732_v47  ;;  %15224 = vst [vmem:[#allocation167_spill] sm:$0xff] %v11734_v39  ;;  %v2286_v44 = vmul.f32 %v11732_v47, %v15225_v24  ;;  %v2285_v30 = vmul.f32 %v11734_v39, %v15226_v58  ;;  %3432 = vperm.xlu1 %9980, %v8136_v42   ;;  %3427 = vperm.xlu0 %9979, %v8135_v11   ;;  %v15229_v47 = vld [vmem:[#allocation45_spill] sm:$0xff]  ;;  %v15230_v42 = vld [vmem:[#allocation46_spill] sm:$0xff] }
 0x18d   : > { %v2309_v2 = vpack.c.bf16 %v2286_v44, %v2285_v30  ;;  %8848 = vmatmul.mubr.msk.bf16.gmra.mrb[12].mxu0 %vm791_vm3, %v2308_v33  ;;  %v8140_v44 = vld [vmem:[%s14526_s1 + $0x6a8] sm:$0xff]  ;;  %v8139_v33 = vld [vmem:[%s14526_s1 + $0x6a0] sm:$0xff] }
 0x18e   : > { %v11747_v55 = vpop.permute.xlu1 %2206  ;;  %v11749_v56 = vpop.permute.xlu0 %2201 }
 0x18f   : > { %15227 = vst [vmem:[#allocation168_spill] sm:$0xff] %v11747_v55  ;;  %15228 = vst [vmem:[#allocation169_spill] sm:$0xff] %v11749_v56  ;;  %v2288_v39 = vmul.f32 %v11747_v55, %v15229_v47  ;;  %v2287_v11 = vmul.f32 %v11749_v56, %v15230_v42  ;;  %3442 = vperm.xlu1 %9980, %v8138_v54   ;;  %3437 = vperm.xlu0 %9979, %v8137_v3   ;;  %v15233_v55 = vld [vmem:[#allocation49_spill] sm:$0xff]  ;;  %v15234_v54 = vld [vmem:[#allocation50_spill] sm:$0xff] }
 0x190   : > { %8851 = vmatprep.mubr.msk.bf16.mxu0 %vm791_vm3, %v2309_v2  ;;  %v8142_v2 = vld [vmem:[%s14526_s1 + $0x6b8] sm:$0xff] }
 0x191   : > { %v2310_v30 = vpack.c.bf16 %v2288_v39, %v2287_v11  ;;  %v8141_v39 = vld [vmem:[%s14526_s1 + $0x6b0] sm:$0xff] }
 0x192   : > { %v11762_v58 = vpop.permute.xlu1 %2216  ;;  %v11764_v24 = vpop.permute.xlu0 %2211 }
 0x193   : > { %15231 = vst [vmem:[#allocation170_spill] sm:$0xff] %v11762_v58  ;;  %15232 = vst [vmem:[#allocation171_spill] sm:$0xff] %v11764_v24  ;;  %v2290_v56 = vmul.f32 %v11762_v58, %v15233_v55  ;;  %v2289_v3 = vmul.f32 %v11764_v24, %v15234_v54  ;;  %3452 = vperm.xlu1 %9980, %v8140_v44   ;;  %3447 = vperm.xlu0 %9979, %v8139_v33   ;;  %v15237_v58 = vld [vmem:[#allocation53_spill] sm:$0xff]  ;;  %v15238_v44 = vld [vmem:[#allocation54_spill] sm:$0xff] }
 0x195   : > { %v2311_v11 = vpack.c.bf16 %v2290_v56, %v2289_v3  ;;  %8852 = vmatmul.mubr.msk.bf16.gmra.mrb[16].mxu0 %vm791_vm3, %v2310_v30  ;;  %v8144_v56 = vld [vmem:[%s14526_s1 + $0x6c8] sm:$0xff]  ;;  %v8143_v30 = vld [vmem:[%s14526_s1 + $0x6c0] sm:$0xff] }
 0x196   : > { %v11777_v42 = vpop.permute.xlu1 %2226  ;;  %v11779_v47 = vpop.permute.xlu0 %2221 }
 0x197   : > { %15235 = vst [vmem:[#allocation172_spill] sm:$0xff] %v11777_v42  ;;  %15236 = vst [vmem:[#allocation173_spill] sm:$0xff] %v11779_v47  ;;  %v2292_v24 = vmul.f32 %v11777_v42, %v15237_v58  ;;  %v2291_v33 = vmul.f32 %v11779_v47, %v15238_v44  ;;  %3462 = vperm.xlu1 %9980, %v8142_v2   ;;  %3457 = vperm.xlu0 %9979, %v8141_v39   ;;  %v15241_v42 = vld [vmem:[#allocation57_spill] sm:$0xff]  ;;  %v15242_v2 = vld [vmem:[#allocation58_spill] sm:$0xff] }
 0x198   : > { %8855 = vmatprep.mubr.msk.bf16.mxu0 %vm791_vm3, %v2311_v11  ;;  %v8146_v11 = vld [vmem:[%s14526_s1 + $0x6d8] sm:$0xff] }
 0x199   : > { %v2312_v3 = vpack.c.bf16 %v2292_v24, %v2291_v33  ;;  %v8145_v24 = vld [vmem:[%s14526_s1 + $0x6d0] sm:$0xff] }
 0x19a   : > { %v11792_v54 = vpop.permute.xlu1 %2236  ;;  %v11794_v55 = vpop.permute.xlu0 %2231 }
 0x19b   : > { %15239 = vst [vmem:[#allocation174_spill] sm:$0xff] %v11792_v54  ;;  %15240 = vst [vmem:[#allocation175_spill] sm:$0xff] %v11794_v55  ;;  %v2294_v47 = vmul.f32 %v11792_v54, %v15241_v42  ;;  %v2293_v39 = vmul.f32 %v11794_v55, %v15242_v2  ;;  %3472 = vperm.xlu1 %9980, %v8144_v56   ;;  %3467 = vperm.xlu0 %9979, %v8143_v30   ;;  %v15245_v56 = vld [vmem:[#allocation62_spill] sm:$0xff]  ;;  %v11906_v42 = vld [vmem:[%s10180_s22 + $0x18] sm:$0xf] }
 0x19d   : > { %v2313_v33 = vpack.c.bf16 %v2294_v47, %v2293_v39  ;;  %8856 = vmatmul.mubr.msk.bf16.gmra.mrb[20].mxu0 %vm791_vm3, %v2312_v3  ;;  %v8148_v47 = vld [vmem:[%s14526_s1 + $0x6e8] sm:$0xff]  ;;  %v8147_v3 = vld [vmem:[%s14526_s1 + $0x6e0] sm:$0xff] }
 0x19e   : > { %v11807_v44 = vpop.permute.xlu1 %2246  ;;  %v11809_v58 = vpop.permute.xlu0 %2241 }
 0x19f   : > { %15243 = vst [vmem:[#allocation176_spill] sm:$0xff] %v11807_v44  ;;  %15244 = vst [vmem:[#allocation177_spill] sm:$0xff] %v11809_v58  ;;  %v2296_v55 = vmul.f32 %v11807_v44, %v10891_v20  ;;  %v2295_v30 = vmul.f32 %v11809_v58, %v15245_v56  ;;  %3482 = vperm.xlu1 %9980, %v8146_v11   ;;  %3477 = vperm.xlu0 %9979, %v8145_v24   ;;  %v15248_v11 = vld [vmem:[#allocation66_spill] sm:$0xff]  ;;  %v3117_v20 = vsel %vm840_vm1, %v11653_v10, 0  ;;  %v8177_v10 = vld [vmem:[%s14526_s1 + $0x748] sm:$0xff] }
 0x1a0   : > { %8859 = vmatprep.mubr.msk.bf16.mxu0 %vm791_vm3, %v2313_v33  ;;  %v8150_v33 = vld [vmem:[%s14526_s1 + $0x6f8] sm:$0xff] }
 0x1a1   : > { %v2314_v39 = vpack.c.bf16 %v2296_v55, %v2295_v30  ;;  %v8149_v55 = vld [vmem:[%s14526_s1 + $0x6f0] sm:$0xff] }
 0x1a2   : > { %v11822_v54 = vpop.permute.xlu1 %2256  ;;  %v11824_v2 = vpop.permute.xlu0 %2251 }
 0x1a3   : > { %15246 = vst [vmem:[#allocation178_spill] sm:$0xff] %v11822_v54  ;;  %15247 = vst [vmem:[#allocation179_spill] sm:$0xff] %v11824_v2  ;;  %v2298_v44 = vmul.f32 %v11822_v54, %v10916_v59  ;;  %v2297_v24 = vmul.f32 %v11824_v2, %v15248_v11  ;;  %3492 = vperm.xlu1 %9980, %v8148_v47   ;;  %3487 = vperm.xlu0 %9979, %v8147_v3   ;;  %v15251_v54 = vld [vmem:[#allocation9_spill] sm:$0xff]  ;;  %v15252_v47 = vld [vmem:[#allocation10_spill] sm:$0xff] }
 0x1a5   : > { %v2315_v30 = vpack.c.bf16 %v2298_v44, %v2297_v24  ;;  %8860 = vmatmul.mubr.msk.bf16.gmra.mrb[24].mxu0 %vm791_vm3, %v2314_v39  ;;  %v8169_v44 = vld [vmem:[%s14526_s1 + $0x708] sm:$0xff]  ;;  %v8168_v39 = vld [vmem:[%s14526_s1 + $0x700] sm:$0xff] }
 0x1a6   : > { %v11837_v58 = vpop.permute.xlu1 %2266  ;;  %v11839_v56 = vpop.permute.xlu0 %2261 }
 0x1a7   : > { %15249 = vst [vmem:[#allocation180_spill] sm:$0xff] %v11837_v58  ;;  %15250 = vst [vmem:[#allocation181_spill] sm:$0xff] %v11839_v56  ;;  %v2300_v2 = vmul.f32 %v11837_v58, %v15251_v54  ;;  %v2299_v3 = vmul.f32 %v11839_v56, %v15252_v47  ;;  %3502 = vperm.xlu1 %9980, %v8150_v33   ;;  %3497 = vperm.xlu0 %9979, %v8149_v55   ;;  %v11856_v58 = vld [vmem:[#allocation2] sm:$0xff]  ;;  %v11858_v56 = vld [vmem:[#allocation2 + $0x8] sm:$0xff] }
 0x1a8   : > { %8863 = vmatprep.mubr.msk.bf16.mxu0 %vm791_vm3, %v2315_v30  ;;  %15255 = vst [vmem:[#allocation184_spill] sm:$0xff] %v11856_v58  ;;  %15256 = vst [vmem:[#allocation185_spill] sm:$0xff] %v11858_v56  ;;  %v2563_v33 = vpack.c.bf16 %v11858_v56, %v11856_v58  ;;  %v8171_v55 = vld [vmem:[%s14526_s1 + $0x718] sm:$0xff]  ;;  %v11880_v58 = vld [vmem:[#allocation2 + $0x10] sm:$0xff] }
 0x1a9   : > { %v2316_v24 = vpack.c.bf16 %v2300_v2, %v2299_v3  ;;  %v8170_v2 = vld [vmem:[%s14526_s1 + $0x710] sm:$0xff]  ;;  %15259 = vst [vmem:[#allocation188_spill] sm:$0xff] %v11880_v58 }
 0x1aa   : > { %v11852_v11 = vpop.permute.xlu1 %2865  ;;  %v11854_v59 = vpop.permute.xlu0 %2860 }
 0x1ab   : > { %15253 = vst [vmem:[#allocation182_spill] sm:$0xff] %v11852_v11  ;;  %15254 = vst [vmem:[#allocation183_spill] sm:$0xff] %v11854_v59  ;;  %3839 = vperm.xlu1 %9980, %v8169_v44   ;;  %3834 = vperm.xlu0 %9979, %v8168_v39   ;;  %v8173_v44 = vld [vmem:[%s14526_s1 + $0x728] sm:$0xff]  ;;  %v8172_v39 = vld [vmem:[%s14526_s1 + $0x720] sm:$0xff] }
 0x1ad   : > { %8864 = vmatmul.mubr.msk.bf16.gmra.mrb[28].mxu0 %vm791_vm3, %v2316_v24  ;;  %v11882_v24 = vld [vmem:[#allocation2 + $0x18] sm:$0xff] }
 0x1ae   : > { %v11869_v30 = vpop.permute.xlu1 %2875  ;;  %v11871_v3 = vpop.permute.xlu0 %2870  ;;  %8869 = vmatprep.mubr.msk.bf16.mxu0 %vm791_vm3, %v2563_v33  ;;  %15260 = vst [vmem:[#allocation189_spill] sm:$0xff] %v11882_v24  ;;  %v2564_v56 = vpack.c.bf16 %v11882_v24, %v11880_v58  ;;  %v8175_v58 = vld [vmem:[%s14526_s1 + $0x738] sm:$0xff]  ;;  %v8174_v24 = vld [vmem:[%s14526_s1 + $0x730] sm:$0xff] }
 0x1af   : > { %15257 = vst [vmem:[#allocation186_spill] sm:$0xff] %v11869_v30  ;;  %15258 = vst [vmem:[#allocation187_spill] sm:$0xff] %v11871_v3  ;;  %3849 = vperm.xlu1 %9980, %v8171_v55   ;;  %3844 = vperm.xlu0 %9979, %v8170_v2   ;;  %v11890_v55 = vld [vmem:[#allocation2 + $0x20] sm:$0xff]  ;;  %v11892_v2 = vld [vmem:[#allocation2 + $0x28] sm:$0xff] }
 0x1b0   : > { %15263 = vst [vmem:[#allocation192_spill] sm:$0xff] %v11890_v55  ;;  %15264 = vst [vmem:[#allocation193_spill] sm:$0xff] %v11892_v2  ;;  %v2565_v54 = vpack.c.bf16 %v11892_v2, %v11890_v55  ;;  %v11931_v55 = vld [vmem:[#allocation2 + $0x40] sm:$0xff]  ;;  %v11933_v2 = vld [vmem:[#allocation2 + $0x48] sm:$0xff] }
 0x1b1   : > { %15271 = vst [vmem:[#allocation200_spill] sm:$0xff] %v11931_v55  ;;  %15272 = vst [vmem:[#allocation201_spill] sm:$0xff] %v11933_v2  ;;  %v2567_v43 = vpack.c.bf16 %v11933_v2, %v11931_v55  ;;  %v11955_v55 = vld [vmem:[#allocation2 + $0x50] sm:$0xff]  ;;  %v11957_v2 = vld [vmem:[#allocation2 + $0x58] sm:$0xff] }
 0x1b2   : > { %v11886_v47 = vpop.permute.xlu1 %2885  ;;  %v11888_v33 = vpop.permute.xlu0 %2880  ;;  %15275 = vst [vmem:[#allocation204_spill] sm:$0xff] %v11955_v55  ;;  %15276 = vst [vmem:[#allocation205_spill] sm:$0xff] %v11957_v2 }
 0x1b3   : > { %15261 = vst [vmem:[#allocation190_spill] sm:$0xff] %v11886_v47  ;;  %15262 = vst [vmem:[#allocation191_spill] sm:$0xff] %v11888_v33  ;;  %3859 = vperm.xlu1 %9980, %v8173_v44   ;;  %3854 = vperm.xlu0 %9979, %v8172_v39   ;;  %v8176_v39 = vld [vmem:[%s14526_s1 + $0x740] sm:$0xff] }
 0x1b5   : > { %8870 = vmatmul.mubr.msk.bf16.vlgmr.msra.gmra.mrb[0].mxu0 %vm791_vm3, %v2564_v56  ;;  %v11923_v56 = vld [vmem:[#allocation2 + $0x38] sm:$0xff] }
 0x1b6   : > { %8902 = vmatpush3.bf16.msra.mxu0 %v3117_v20  ;;  %v11908_v21 = vpop.permute.xlu1 %2895  ;;  %v11910_v44 = vpop.permute.xlu0 %2890  ;;  %8873 = vmatprep.mubr.msk.bf16.mxu0 %vm791_vm3, %v2565_v54  ;;  %v11921_v20 = vld [vmem:[#allocation2 + $0x30] sm:$0xff]  ;;  %15268 = vst [vmem:[#allocation197_spill] sm:$0xff] %v11923_v56 }
 0x1b7   : > { %15265 = vst [vmem:[#allocation194_spill] sm:$0xff] %v11908_v21  ;;  %15266 = vst [vmem:[#allocation195_spill] sm:$0xff] %v11910_v44  ;;  %3869 = vperm.xlu1 %9980, %v8175_v58   ;;  %3864 = vperm.xlu0 %9979, %v8174_v24   ;;  %v2566_v54 = vpack.c.bf16 %v11923_v56, %v11921_v20 }
 0x1b8   : > { %9925 = vmatprep.subr.msk.bf16.mxu0 %vm840_vm1, %v11906_v42  ;;  %15267 = vst [vmem:[#allocation196_spill] sm:$0xff] %v11921_v20  ;;  %v8178_v20 = vld [vmem:[%s14526_s1 + $0x750] sm:$0xff] }
 0x1ba   : > { %v11927_v58 = vpop.permute.xlu1 %2905  ;;  %v11929_v24 = vpop.permute.xlu0 %2900 }
 0x1bb   : > { %15269 = vst [vmem:[#allocation198_spill] sm:$0xff] %v11927_v58  ;;  %15270 = vst [vmem:[#allocation199_spill] sm:$0xff] %v11929_v24  ;;  %3879 = vperm.xlu1 %9980, %v8177_v10   ;;  %3874 = vperm.xlu0 %9979, %v8176_v39   ;;  %v8181_v10 = vld [vmem:[%s14526_s1 + $0x768] sm:$0xff]  ;;  %v8180_v39 = vld [vmem:[%s14526_s1 + $0x760] sm:$0xff] }
 0x1bd   : > { %8874 = vmatmul.mubr.msk.bf16.gmra.mrb[4].mxu0 %vm791_vm3, %v2566_v54  ;;  %v2568_v54 = vpack.c.bf16 %v11957_v2, %v11955_v55  ;;  %v8182_v55 = vld [vmem:[%s14526_s1 + $0x770] sm:$0xff] }
 0x1be   : > { %v11944_v56 = vpop.permute.xlu1 %2915  ;;  %v11946_v6 = vpop.permute.xlu0 %2910  ;;  %8877 = vmatprep.mubr.msk.bf16.mxu0 %vm791_vm3, %v2567_v43 }
 0x1bf   : > { %15273 = vst [vmem:[#allocation202_spill] sm:$0xff] %v11944_v56  ;;  %15274 = vst [vmem:[#allocation203_spill] sm:$0xff] %v11946_v6  ;;  %3889 = vperm.xlu1 %9980, %v8179_v9   ;;  %3884 = vperm.xlu0 %9979, %v8178_v20   ;;  %v11965_v9 = vld [vmem:[#allocation2 + $0x60] sm:$0xff]  ;;  %v11967_v20 = vld [vmem:[#allocation2 + $0x68] sm:$0xff] }
 0x1c0   : > { %15279 = vst [vmem:[#allocation208_spill] sm:$0xff] %v11965_v9  ;;  %15280 = vst [vmem:[#allocation209_spill] sm:$0xff] %v11967_v20  ;;  %v2569_v25 = vpack.c.bf16 %v11967_v20, %v11965_v9  ;;  %v11989_v9 = vld [vmem:[#allocation2 + $0x70] sm:$0xff]  ;;  %v11991_v20 = vld [vmem:[#allocation2 + $0x78] sm:$0xff] }
 0x1c1   : > { %15283 = vst [vmem:[#allocation212_spill] sm:$0xff] %v11989_v9  ;;  %15284 = vst [vmem:[#allocation213_spill] sm:$0xff] %v11991_v20 }
 0x1c2   : > { %v11961_v49 = vpop.permute.xlu1 %2925  ;;  %v11963_v43 = vpop.permute.xlu0 %2920 }
 0x1c3   : > { %15277 = vst [vmem:[#allocation206_spill] sm:$0xff] %v11961_v49  ;;  %15278 = vst [vmem:[#allocation207_spill] sm:$0xff] %v11963_v43  ;;  %3899 = vperm.xlu1 %9980, %v8181_v10   ;;  %3894 = vperm.xlu0 %9979, %v8180_v39   ;;  %v8185_v10 = vld [vmem:[%s14526_s1 + $0x788] sm:$0xff]  ;;  %v8184_v39 = vld [vmem:[%s14526_s1 + $0x780] sm:$0xff] }
 0x1c5   : > { %8878 = vmatmul.mubr.msk.bf16.gmra.mrb[8].mxu0 %vm791_vm3, %v2568_v54  ;;  %v2570_v54 = vpack.c.bf16 %v11991_v20, %v11989_v9  ;;  %v8186_v9 = vld [vmem:[%s14526_s1 + $0x790] sm:$0xff] }
 0x1c6   : > { %v11978_v2 = vpop.permute.xlu1 %2935  ;;  %v11980_v4 = vpop.permute.xlu0 %2930  ;;  %8881 = vmatprep.mubr.msk.bf16.mxu0 %vm791_vm3, %v2569_v25 }
 0x1c7   : > { %15281 = vst [vmem:[#allocation210_spill] sm:$0xff] %v11978_v2  ;;  %15282 = vst [vmem:[#allocation211_spill] sm:$0xff] %v11980_v4  ;;  %3909 = vperm.xlu1 %9980, %v8183_v5   ;;  %3904 = vperm.xlu0 %9979, %v8182_v55   ;;  %v11999_v5 = vld [vmem:[#allocation2 + $0x80] sm:$0xff]  ;;  %v12001_v55 = vld [vmem:[#allocation2 + $0x88] sm:$0xff] }
 0x1c8   : > { %15287 = vst [vmem:[#allocation216_spill] sm:$0xff] %v11999_v5  ;;  %15288 = vst [vmem:[#allocation217_spill] sm:$0xff] %v12001_v55  ;;  %v2571_v35 = vpack.c.bf16 %v12001_v55, %v11999_v5  ;;  %v12023_v5 = vld [vmem:[#allocation2 + $0x90] sm:$0xff]  ;;  %v12025_v55 = vld [vmem:[#allocation2 + $0x98] sm:$0xff] }
 0x1c9   : > { %15291 = vst [vmem:[#allocation220_spill] sm:$0xff] %v12023_v5  ;;  %15292 = vst [vmem:[#allocation221_spill] sm:$0xff] %v12025_v55 }
 0x1ca   : > { %v11995_v36 = vpop.permute.xlu1 %2945  ;;  %v11997_v25 = vpop.permute.xlu0 %2940 }
 0x1cb   : > { %15285 = vst [vmem:[#allocation214_spill] sm:$0xff] %v11995_v36  ;;  %15286 = vst [vmem:[#allocation215_spill] sm:$0xff] %v11997_v25  ;;  %3919 = vperm.xlu1 %9980, %v8185_v10   ;;  %3914 = vperm.xlu0 %9979, %v8184_v39   ;;  %v8189_v10 = vld [vmem:[%s14526_s1 + $0x7a8] sm:$0xff]  ;;  %v8188_v39 = vld [vmem:[%s14526_s1 + $0x7a0] sm:$0xff] }
 0x1cd   : > { %8882 = vmatmul.mubr.msk.bf16.gmra.mrb[12].mxu0 %vm791_vm3, %v2570_v54  ;;  %v2572_v54 = vpack.c.bf16 %v12025_v55, %v12023_v5  ;;  %v8190_v5 = vld [vmem:[%s14526_s1 + $0x7b0] sm:$0xff] }
 0x1ce   : > { %v12012_v20 = vpop.permute.xlu1 %2955  ;;  %v12014_v22 = vpop.permute.xlu0 %2950  ;;  %8885 = vmatprep.mubr.msk.bf16.mxu0 %vm791_vm3, %v2571_v35 }
 0x1cf   : > { %15289 = vst [vmem:[#allocation218_spill] sm:$0xff] %v12012_v20  ;;  %15290 = vst [vmem:[#allocation219_spill] sm:$0xff] %v12014_v22  ;;  %3929 = vperm.xlu1 %9980, %v8187_v23   ;;  %3924 = vperm.xlu0 %9979, %v8186_v9   ;;  %v12033_v23 = vld [vmem:[#allocation2 + $0xa0] sm:$0xff]  ;;  %v12035_v9 = vld [vmem:[#allocation2 + $0xa8] sm:$0xff] }
 0x1d0   : > { %15295 = vst [vmem:[#allocation224_spill] sm:$0xff] %v12033_v23  ;;  %15296 = vst [vmem:[#allocation225_spill] sm:$0xff] %v12035_v9  ;;  %v2573_v7 = vpack.c.bf16 %v12035_v9, %v12033_v23  ;;  %v12057_v23 = vld [vmem:[#allocation2 + $0xb0] sm:$0xff]  ;;  %v12059_v9 = vld [vmem:[#allocation2 + $0xb8] sm:$0xff] }
 0x1d1   : > { %15299 = vst [vmem:[#allocation228_spill] sm:$0xff] %v12057_v23  ;;  %15300 = vst [vmem:[#allocation229_spill] sm:$0xff] %v12059_v9 }
 0x1d2   : > { %v12029_v8 = vpop.permute.xlu1 %2965  ;;  %v12031_v35 = vpop.permute.xlu0 %2960 }
 0x1d3   : > { %15293 = vst [vmem:[#allocation222_spill] sm:$0xff] %v12029_v8  ;;  %15294 = vst [vmem:[#allocation223_spill] sm:$0xff] %v12031_v35  ;;  %3939 = vperm.xlu1 %9980, %v8189_v10   ;;  %3934 = vperm.xlu0 %9979, %v8188_v39   ;;  %v8193_v10 = vld [vmem:[%s14526_s1 + $0x7c8] sm:$0xff]  ;;  %v8192_v39 = vld [vmem:[%s14526_s1 + $0x7c0] sm:$0xff] }
 0x1d5   : > { %8886 = vmatmul.mubr.msk.bf16.gmra.mrb[16].mxu0 %vm791_vm3, %v2572_v54  ;;  %v2574_v54 = vpack.c.bf16 %v12059_v9, %v12057_v23  ;;  %v8194_v23 = vld [vmem:[%s14526_s1 + $0x7d0] sm:$0xff] }
 0x1d6   : > { %v12046_v55 = vpop.permute.xlu1 %2975  ;;  %v12048_v37 = vpop.permute.xlu0 %2970  ;;  %8889 = vmatprep.mubr.msk.bf16.mxu0 %vm791_vm3, %v2573_v7 }
 0x1d7   : > { %15297 = vst [vmem:[#allocation226_spill] sm:$0xff] %v12046_v55  ;;  %15298 = vst [vmem:[#allocation227_spill] sm:$0xff] %v12048_v37  ;;  %3949 = vperm.xlu1 %9980, %v8191_v38   ;;  %3944 = vperm.xlu0 %9979, %v8190_v5   ;;  %v12067_v38 = vld [vmem:[#allocation2 + $0xc0] sm:$0xff]  ;;  %v12069_v5 = vld [vmem:[#allocation2 + $0xc8] sm:$0xff] }
 0x1d8   : > { %15303 = vst [vmem:[#allocation232_spill] sm:$0xff] %v12067_v38  ;;  %15304 = vst [vmem:[#allocation233_spill] sm:$0xff] %v12069_v5  ;;  %v2575_v26 = vpack.c.bf16 %v12069_v5, %v12067_v38  ;;  %v12091_v38 = vld [vmem:[#allocation2 + $0xd0] sm:$0xff]  ;;  %v12093_v5 = vld [vmem:[#allocation2 + $0xd8] sm:$0xff] }
 0x1d9   : > { %15307 = vst [vmem:[#allocation236_spill] sm:$0xff] %v12091_v38  ;;  %15308 = vst [vmem:[#allocation237_spill] sm:$0xff] %v12093_v5 }
 0x1da   : > { %v12063_v34 = vpop.permute.xlu1 %2985  ;;  %v12065_v7 = vpop.permute.xlu0 %2980 }
 0x1db   : > { %15301 = vst [vmem:[#allocation230_spill] sm:$0xff] %v12063_v34  ;;  %15302 = vst [vmem:[#allocation231_spill] sm:$0xff] %v12065_v7  ;;  %3959 = vperm.xlu1 %9980, %v8193_v10   ;;  %3954 = vperm.xlu0 %9979, %v8192_v39   ;;  %v8197_v10 = vld [vmem:[%s14526_s1 + $0x7e8] sm:$0xff]  ;;  %v8196_v39 = vld [vmem:[%s14526_s1 + $0x7e0] sm:$0xff] }
 0x1dc   : > { %v8198_v7 = vld [vmem:[%s14526_s1 + $0x7f0] sm:$0xff] }
 0x1dd   : > { %8890 = vmatmul.mubr.msk.bf16.gmra.mrb[20].mxu0 %vm791_vm3, %v2574_v54  ;;  %v2576_v54 = vpack.c.bf16 %v12093_v5, %v12091_v38 }
 0x1de   : > { %v12080_v9 = vpop.permute.xlu1 %2995  ;;  %v12082_v53 = vpop.permute.xlu0 %2990  ;;  %8893 = vmatprep.mubr.msk.bf16.mxu0 %vm791_vm3, %v2575_v26 }
 0x1df   : > { %15305 = vst [vmem:[#allocation234_spill] sm:$0xff] %v12080_v9  ;;  %15306 = vst [vmem:[#allocation235_spill] sm:$0xff] %v12082_v53  ;;  %3969 = vperm.xlu1 %9980, %v8195_v1   ;;  %3964 = vperm.xlu0 %9979, %v8194_v23   ;;  %v12101_v1 = vld [vmem:[#allocation2 + $0xe0] sm:$0xff]  ;;  %v8199_v9 = vld [vmem:[%s14526_s1 + $0x7f8] sm:$0xff] }
 0x1e0   : > { %15311 = vst [vmem:[#allocation240_spill] sm:$0xff] %v12101_v1  ;;  %v2577_v23 = vpack.c.bf16 %v11562_v51, %v12101_v1  ;;  %v3019_v51 = vmul.f32 %v11852_v11, %v11217_v12  ;;  %v12127_v1 = vld [vmem:[#allocation2 + $0xf8] sm:$0xff] }
 0x1e2   : > { %v12097_v53 = vpop.permute.xlu1 %3005  ;;  %v12099_v26 = vpop.permute.xlu0 %3000 }
 0x1e3   : > { %15309 = vst [vmem:[#allocation238_spill] sm:$0xff] %v12097_v53  ;;  %15310 = vst [vmem:[#allocation239_spill] sm:$0xff] %v12099_v26  ;;  %3979 = vperm.xlu1 %9980, %v8197_v10   ;;  %3974 = vperm.xlu0 %9979, %v8196_v39   ;;  %v3018_v10 = vmul.f32 %v11854_v59, %v11221_v40  ;;  %v8218_v39 = vld [vmem:[%s14526_s1 + $0x808] sm:$0xff]  ;;  %v8220_v59 = vld [vmem:[%s14526_s1 + $0x818] sm:$0xff] }
 0x1e4   : > { %v8219_v40 = vld [vmem:[%s14526_s1 + $0x810] sm:$0xff] }
 0x1e5   : > { %8894 = vmatmul.mubr.msk.bf16.gmra.mrb[24].mxu0 %vm791_vm3, %v2576_v54  ;;  %v8217_v54 = vld [vmem:[%s14526_s1 + $0x800] sm:$0xff]  ;;  %v3050_v11 = vpack.c.bf16 %v3019_v51, %v3018_v10  ;;  %v3020_v51 = vmul.f32 %v11871_v3, %v11247_v63  ;;  %v3023_v10 = vmul.f32 %v11886_v47, %v11269_v0  ;;  %v12177_v0 = vld [vmem:[%s10180_s22 + $0x1c] sm:$0xf] }
 0x1e6   : > { %v12112_v38 = vpop.permute.xlu1 %3015  ;;  %v12114_v5 = vpop.permute.xlu0 %3010  ;;  %8897 = vmatprep.mubr.msk.bf16.mxu0 %vm791_vm3, %v2577_v23 }
 0x1e7   : > { %15312 = vst [vmem:[#allocation241_spill] sm:$0xff] %v12112_v38  ;;  %15313 = vst [vmem:[#allocation242_spill] sm:$0xff] %v12114_v5  ;;  %3989 = vperm.xlu1 %9980, %v8199_v9   ;;  %3984 = vperm.xlu0 %9979, %v8198_v7   ;;  %v12129_v5 = vld [vmem:[#allocation2 + $0xf0] sm:$0xff] }
 0x1e8   : > { %15314 = vst [vmem:[#allocation243_spill] sm:$0xff] %v12129_v5  ;;  %v2578_v9 = vpack.c.bf16 %v12127_v1, %v12129_v5 }
 0x1ea   : > { %v12133_v7 = vpop.permute.xlu1 %3352  ;;  %v12135_v23 = vpop.permute.xlu0 %3347 }
 0x1eb   : > { %15315 = vst [vmem:[#allocation244_spill] sm:$0xff] %v12133_v7  ;;  %15316 = vst [vmem:[#allocation245_spill] sm:$0xff] %v12135_v23  ;;  %4326 = vperm.xlu1 %9980, %v8218_v39   ;;  %4321 = vperm.xlu0 %9979, %v8217_v54   ;;  %v3021_v39 = vmul.f32 %v11869_v30, %v11243_v52  ;;  %v3022_v54 = vmul.f32 %v11888_v33, %v11273_v15  ;;  %v8224_v33 = vld [vmem:[%s14526_s1 + $0x838] sm:$0xff]  ;;  %v8223_v15 = vld [vmem:[%s14526_s1 + $0x830] sm:$0xff] }
 0x1ed   : > { %8898 = vmatmul.mubr.msk.bf16.gmra.mrb[28].mxu0 %vm791_vm3, %v2578_v9  ;;  %v8221_v9 = vld [vmem:[%s14526_s1 + $0x820] sm:$0xff]  ;;  %v3052_v47 = vpack.c.bf16 %v3023_v10, %v3022_v54  ;;  %v3024_v10 = vmul.f32 %v11910_v44, %v11302_v28  ;;  %v3027_v54 = vmul.f32 %v11927_v58, %v11324_v29  ;;  %v8228_v58 = vld [vmem:[%s14526_s1 + $0x858] sm:$0xff] }
 0x1ee   : > { %8903 = vmatprep.mubr.msk.bf16.mxu0 %vm791_vm3, %v3050_v11  ;;  %v12145_v12 = vpop.permute.xlu1 %3362  ;;  %v12147_v5 = vpop.permute.xlu0 %3357  ;;  %v8222_v11 = vld [vmem:[%s14526_s1 + $0x828] sm:$0xff] }
 0x1ef   : > { %15317 = vst [vmem:[#allocation246_spill] sm:$0xff] %v12145_v12  ;;  %15318 = vst [vmem:[#allocation247_spill] sm:$0xff] %v12147_v5  ;;  %4336 = vperm.xlu1 %9980, %v8220_v59   ;;  %4331 = vperm.xlu0 %9979, %v8219_v40   ;;  %v3051_v59 = vpack.c.bf16 %v3021_v39, %v3020_v51  ;;  %v3604_v40 = vsel %vm840_vm1, %v11906_v42, 0  ;;  %v3025_v42 = vmul.f32 %v11908_v21, %v11298_v16 }
 0x1f2   : > { %v12163_v30 = vpop.permute.xlu1 %3372  ;;  %v12165_v3 = vpop.permute.xlu0 %3367 }
 0x1f3   : > { %15319 = vst [vmem:[#allocation248_spill] sm:$0xff] %v12163_v30  ;;  %15320 = vst [vmem:[#allocation249_spill] sm:$0xff] %v12165_v3  ;;  %4346 = vperm.xlu1 %9980, %v8222_v11   ;;  %4341 = vperm.xlu0 %9979, %v8221_v9   ;;  %v3026_v11 = vmul.f32 %v11929_v24, %v11328_v50  ;;  %v8225_v9 = vld [vmem:[%s14526_s1 + $0x840] sm:$0xff]  ;;  %v8227_v24 = vld [vmem:[%s14526_s1 + $0x850] sm:$0xff] }
 0x1f5   : > { %8904 = vmatmul.mubr.msk.bf16.vlgmr.msra.gmra.mrb[0].mxu0 %vm791_vm3, %v3051_v59 }
 0x1f6   : > { %8936 = vmatpush3.bf16.msra.mxu0 %v3604_v40  ;;  %8907 = vmatprep.mubr.msk.bf16.mxu0 %vm791_vm3, %v3052_v47  ;;  %v12180_v39 = vpop.permute.xlu1 %3382  ;;  %v12182_v51 = vpop.permute.xlu0 %3377  ;;  %v8226_v47 = vld [vmem:[%s14526_s1 + $0x848] sm:$0xff]  ;;  %v3054_v40 = vpack.c.bf16 %v3027_v54, %v3026_v11  ;;  %v3031_v54 = vmul.f32 %v11961_v49, %v11374_v41  ;;  %v3030_v11 = vmul.f32 %v11963_v43, %v11378_v14  ;;  %v8232_v49 = vld [vmem:[%s14526_s1 + $0x878] sm:$0xff]  ;;  %v8231_v43 = vld [vmem:[%s14526_s1 + $0x870] sm:$0xff] }
 0x1f7   : > { %15321 = vst [vmem:[#allocation250_spill] sm:$0xff] %v12180_v39  ;;  %15322 = vst [vmem:[#allocation251_spill] sm:$0xff] %v12182_v51  ;;  %4356 = vperm.xlu1 %9980, %v8224_v33   ;;  %4351 = vperm.xlu0 %9979, %v8223_v15   ;;  %v3053_v33 = vpack.c.bf16 %v3025_v42, %v3024_v10  ;;  %v3029_v42 = vmul.f32 %v11944_v56, %v11350_v57 }
 0x1f8   : > { %9926 = vmatprep.subr.msk.bf16.mxu0 %vm840_vm1, %v12177_v0  ;;  %v3028_v10 = vmul.f32 %v11946_v6, %v11354_v13 }
 0x1fa   : > { %v12200_v59 = vpop.permute.xlu1 %3392  ;;  %v12202_v15 = vpop.permute.xlu0 %3387 }
 0x1fb   : > { %15323 = vst [vmem:[#allocation252_spill] sm:$0xff] %v12200_v59  ;;  %15324 = vst [vmem:[#allocation253_spill] sm:$0xff] %v12202_v15  ;;  %4366 = vperm.xlu1 %9980, %v8226_v47   ;;  %4361 = vperm.xlu0 %9979, %v8225_v9   ;;  %v8230_v47 = vld [vmem:[%s14526_s1 + $0x868] sm:$0xff]  ;;  %v8229_v9 = vld [vmem:[%s14526_s1 + $0x860] sm:$0xff] }
 0x1fd   : > { %8908 = vmatmul.mubr.msk.bf16.gmra.mrb[4].mxu0 %vm791_vm3, %v3053_v33 }
 0x1fe   : > { %8911 = vmatprep.mubr.msk.bf16.mxu0 %vm791_vm3, %v3054_v40  ;;  %v12212_v21 = vpop.permute.xlu1 %3402  ;;  %v12214_v44 = vpop.permute.xlu0 %3397 }
 0x1ff   : > { %15325 = vst [vmem:[#allocation254_spill] sm:$0xff] %v12212_v21  ;;  %15326 = vst [vmem:[#allocation255_spill] sm:$0xff] %v12214_v44  ;;  %4376 = vperm.xlu1 %9980, %v8228_v58   ;;  %4371 = vperm.xlu0 %9979, %v8227_v24   ;;  %v3055_v58 = vpack.c.bf16 %v3029_v42, %v3028_v10  ;;  %v3056_v24 = vpack.c.bf16 %v3031_v54, %v3030_v11 }
 0x200   : > { %v3033_v42 = vmul.f32 %v11978_v2, %v11400_v45  ;;  %v3032_v10 = vmul.f32 %v11980_v4, %v11404_v27  ;;  %v3035_v54 = vmul.f32 %v11995_v36, %v11424_v60  ;;  %v3034_v11 = vmul.f32 %v11997_v25, %v11428_v48  ;;  %v8236_v36 = vld [vmem:[%s14526_s1 + $0x898] sm:$0xff]  ;;  %v8235_v25 = vld [vmem:[%s14526_s1 + $0x890] sm:$0xff] }
 0x202   : > { %v12230_v33 = vpop.permute.xlu1 %3412  ;;  %v12232_v40 = vpop.permute.xlu0 %3407 }
 0x203   : > { %15327 = vst [vmem:[#allocation256_spill] sm:$0xff] %v12230_v33  ;;  %15328 = vst [vmem:[#allocation257_spill] sm:$0xff] %v12232_v40  ;;  %4386 = vperm.xlu1 %9980, %v8230_v47   ;;  %4381 = vperm.xlu0 %9979, %v8229_v9   ;;  %v8234_v47 = vld [vmem:[%s14526_s1 + $0x888] sm:$0xff]  ;;  %v8233_v9 = vld [vmem:[%s14526_s1 + $0x880] sm:$0xff] }
 0x205   : > { %8912 = vmatmul.mubr.msk.bf16.gmra.mrb[8].mxu0 %vm791_vm3, %v3055_v58 }
 0x206   : > { %8915 = vmatprep.mubr.msk.bf16.mxu0 %vm791_vm3, %v3056_v24  ;;  %v12242_v56 = vpop.permute.xlu1 %3422  ;;  %v12244_v6 = vpop.permute.xlu0 %3417 }
 0x207   : > { %15329 = vst [vmem:[#allocation258_spill] sm:$0xff] %v12242_v56  ;;  %15330 = vst [vmem:[#allocation259_spill] sm:$0xff] %v12244_v6  ;;  %4396 = vperm.xlu1 %9980, %v8232_v49   ;;  %4391 = vperm.xlu0 %9979, %v8231_v43   ;;  %v3057_v49 = vpack.c.bf16 %v3033_v42, %v3032_v10  ;;  %v3058_v43 = vpack.c.bf16 %v3035_v54, %v3034_v11 }
 0x208   : > { %v3037_v42 = vmul.f32 %v12012_v20, %v11450_v31  ;;  %v3036_v10 = vmul.f32 %v12014_v22, %v11454_v46  ;;  %v3039_v54 = vmul.f32 %v12029_v8, %v11474_v18  ;;  %v3038_v11 = vmul.f32 %v12031_v35, %v11478_v32  ;;  %v8240_v8 = vld [vmem:[%s14526_s1 + $0x8b8] sm:$0xff]  ;;  %v8239_v35 = vld [vmem:[%s14526_s1 + $0x8b0] sm:$0xff]  ;;  %v8245_v32 = vld [vmem:[%s14526_s1 + $0x8e0] sm:$0xff] }
 0x20a   : > { %v12260_v58 = vpop.permute.xlu1 %3432  ;;  %v12262_v24 = vpop.permute.xlu0 %3427 }
 0x20b   : > { %15331 = vst [vmem:[#allocation260_spill] sm:$0xff] %v12260_v58  ;;  %15332 = vst [vmem:[#allocation261_spill] sm:$0xff] %v12262_v24  ;;  %4406 = vperm.xlu1 %9980, %v8234_v47   ;;  %4401 = vperm.xlu0 %9979, %v8233_v9   ;;  %v8238_v47 = vld [vmem:[%s14526_s1 + $0x8a8] sm:$0xff]  ;;  %v8237_v9 = vld [vmem:[%s14526_s1 + $0x8a0] sm:$0xff] }
 0x20d   : > { %8916 = vmatmul.mubr.msk.bf16.gmra.mrb[12].mxu0 %vm791_vm3, %v3057_v49 }
 0x20e   : > { %8919 = vmatprep.mubr.msk.bf16.mxu0 %vm791_vm3, %v3058_v43  ;;  %v12272_v2 = vpop.permute.xlu1 %3442  ;;  %v12274_v4 = vpop.permute.xlu0 %3437 }
 0x20f   : > { %15333 = vst [vmem:[#allocation262_spill] sm:$0xff] %v12272_v2  ;;  %15334 = vst [vmem:[#allocation263_spill] sm:$0xff] %v12274_v4  ;;  %4416 = vperm.xlu1 %9980, %v8236_v36   ;;  %4411 = vperm.xlu0 %9979, %v8235_v25   ;;  %v3059_v36 = vpack.c.bf16 %v3037_v42, %v3036_v10  ;;  %v3060_v25 = vpack.c.bf16 %v3039_v54, %v3038_v11  ;;  %v15339_v11 = vld [vmem:[#allocation231_spill] sm:$0xff] }
 0x210   : > { %v3041_v42 = vmul.f32 %v12046_v55, %v11500_v62  ;;  %v3040_v10 = vmul.f32 %v12048_v37, %v11504_v17  ;;  %v3043_v54 = vmul.f32 %v12063_v34, %v11524_v19  ;;  %v8244_v34 = vld [vmem:[%s14526_s1 + $0x8d8] sm:$0xff]  ;;  %v15348_v19 = vld [vmem:[#allocation146_spill] sm:$0xff] }
 0x211   : > { %v3047_v17 = vmul.f32 %v12097_v53, %v15348_v19  ;;  %v15349_v62 = vld [vmem:[#allocation147_spill] sm:$0xff] }
 0x212   : > { %v12290_v49 = vpop.permute.xlu1 %3452  ;;  %v12292_v43 = vpop.permute.xlu0 %3447  ;;  %v8248_v53 = vld [vmem:[%s14526_s1 + $0x8f8] sm:$0xff] }
 0x213   : > { %15335 = vst [vmem:[#allocation264_spill] sm:$0xff] %v12290_v49  ;;  %15336 = vst [vmem:[#allocation265_spill] sm:$0xff] %v12292_v43  ;;  %4426 = vperm.xlu1 %9980, %v8238_v47   ;;  %4421 = vperm.xlu0 %9979, %v8237_v9   ;;  %v3042_v47 = vmul.f32 %v15339_v11, %v11528_v61  ;;  %v8242_v9 = vld [vmem:[%s14526_s1 + $0x8c8] sm:$0xff]  ;;  %v8243_v11 = vld [vmem:[%s14526_s1 + $0x8d0] sm:$0xff] }
 0x215   : > { %8920 = vmatmul.mubr.msk.bf16.gmra.mrb[16].mxu0 %vm791_vm3, %v3059_v36  ;;  %v8241_v36 = vld [vmem:[%s14526_s1 + $0x8c0] sm:$0xff] }
 0x216   : > { %8923 = vmatprep.mubr.msk.bf16.mxu0 %vm791_vm3, %v3060_v25  ;;  %v12302_v20 = vpop.permute.xlu1 %3462  ;;  %v12304_v22 = vpop.permute.xlu0 %3457 }
 0x217   : > { %15337 = vst [vmem:[#allocation266_spill] sm:$0xff] %v12302_v20  ;;  %15338 = vst [vmem:[#allocation267_spill] sm:$0xff] %v12304_v22  ;;  %4436 = vperm.xlu1 %9980, %v8240_v8   ;;  %4431 = vperm.xlu0 %9979, %v8239_v35   ;;  %v3061_v8 = vpack.c.bf16 %v3041_v42, %v3040_v10  ;;  %v3062_v35 = vpack.c.bf16 %v3043_v54, %v3042_v47  ;;  %v15344_v42 = vld [vmem:[#allocation142_spill] sm:$0xff]  ;;  %v15346_v54 = vld [vmem:[#allocation143_spill] sm:$0xff] }
 0x218   : > { %v15345_v10 = vld [vmem:[#allocation234_spill] sm:$0xff]  ;;  %v15347_v47 = vld [vmem:[#allocation235_spill] sm:$0xff] }
 0x21a   : > { %v12320_v25 = vpop.permute.xlu1 %3472  ;;  %v12322_v55 = vpop.permute.xlu0 %3467 }
 0x21b   : > { %15340 = vst [vmem:[#allocation268_spill] sm:$0xff] %v12320_v25  ;;  %15341 = vst [vmem:[#allocation269_spill] sm:$0xff] %v12322_v55  ;;  %4446 = vperm.xlu1 %9980, %v8242_v9   ;;  %4441 = vperm.xlu0 %9979, %v8241_v36   ;;  %v3045_v9 = vmul.f32 %v15345_v10, %v15344_v42  ;;  %v3044_v36 = vmul.f32 %v15347_v47, %v15346_v54  ;;  %v15356_v54 = vld [vmem:[#allocation14_spill] sm:$0xff] }
 0x21d   : > { %8924 = vmatmul.mubr.msk.bf16.gmra.mrb[20].mxu0 %vm791_vm3, %v3061_v8  ;;  %v3046_v8 = vmul.f32 %v12099_v26, %v15349_v62  ;;  %v8247_v26 = vld [vmem:[%s14526_s1 + $0x8f0] sm:$0xff] }
 0x21e   : > { %8927 = vmatprep.mubr.msk.bf16.mxu0 %vm791_vm3, %v3062_v35  ;;  %v12332_v37 = vpop.permute.xlu1 %3482  ;;  %v12334_v61 = vpop.permute.xlu0 %3477  ;;  %v8246_v35 = vld [vmem:[%s14526_s1 + $0x8e8] sm:$0xff] }
 0x21f   : > { %15342 = vst [vmem:[#allocation270_spill] sm:$0xff] %v12332_v37  ;;  %15343 = vst [vmem:[#allocation271_spill] sm:$0xff] %v12334_v61  ;;  %4456 = vperm.xlu1 %9980, %v8244_v34   ;;  %4451 = vperm.xlu0 %9979, %v8243_v11   ;;  %v3063_v34 = vpack.c.bf16 %v3045_v9, %v3044_v36  ;;  %v3064_v11 = vpack.c.bf16 %v3047_v17, %v3046_v8  ;;  %v15352_v9 = vld [vmem:[#allocation101_spill] sm:$0xff]  ;;  %v15353_v17 = vld [vmem:[#allocation102_spill] sm:$0xff] }
 0x220   : > { %v15354_v36 = vld [vmem:[#allocation242_spill] sm:$0xff] }
 0x221   : > { %v3048_v8 = vmul.f32 %v15354_v36, %v15353_v17  ;;  %v15363_v17 = vld [vmem:[#allocation21_spill] sm:$0xff] }
 0x222   : > { %v12350_v10 = vpop.permute.xlu1 %3492  ;;  %v12352_v42 = vpop.permute.xlu0 %3487  ;;  %v3510_v46 = vmul.f32 %v12163_v30, %v15363_v17  ;;  %v15367_v17 = vld [vmem:[#allocation25_spill] sm:$0xff] }
 0x223   : > { %4466 = vperm.xlu1 %9980, %v8246_v35   ;;  %4461 = vperm.xlu0 %9979, %v8245_v32   ;;  %v3049_v32 = vmul.f32 %v12112_v38, %v15352_v9  ;;  %v15355_v35 = vld [vmem:[#allocation13_spill] sm:$0xff] }
 0x224   : > { %v3506_v19 = vmul.f32 %v12133_v7, %v15355_v35  ;;  %v15360_v35 = vld [vmem:[#allocation18_spill] sm:$0xff] }
 0x225   : > { %8928 = vmatmul.mubr.msk.bf16.gmra.mrb[24].mxu0 %vm791_vm3, %v3063_v34  ;;  %v3505_v34 = vmul.f32 %v12135_v23, %v15356_v54  ;;  %v3065_v9 = vpack.c.bf16 %v3049_v32, %v3048_v8  ;;  %v3507_v7 = vmul.f32 %v12147_v5, %v15360_v35  ;;  %v15364_v32 = vld [vmem:[#allocation22_spill] sm:$0xff]  ;;  %v3512_v35 = vmul.f32 %v12180_v39, %v15367_v17  ;;  %v15373_v17 = vld [vmem:[#allocation33_spill] sm:$0xff] }
 0x226   : > { %8931 = vmatprep.mubr.msk.bf16.mxu0 %vm791_vm3, %v3064_v11  ;;  %v12362_v47 = vpop.permute.xlu1 %3502  ;;  %v12364_v62 = vpop.permute.xlu0 %3497  ;;  %v8266_v11 = vld [vmem:[%s359_s19] ss:$0 sm:$0xff] }
 0x227   : > { %15350 = vst [vmem:[#allocation272_spill] sm:$0xff] %v12362_v47  ;;  %15351 = vst [vmem:[#allocation273_spill] sm:$0xff] %v12364_v62  ;;  %4476 = vperm.xlu1 %9980, %v8248_v53   ;;  %4471 = vperm.xlu0 %9979, %v8247_v26   ;;  %v3537_v53 = vpack.c.bf16 %v3506_v19, %v3505_v34  ;;  %v15359_v26 = vld [vmem:[#allocation17_spill] sm:$0xff]  ;;  %v3509_v19 = vmul.f32 %v12165_v3, %v15364_v32  ;;  %v15368_v32 = vld [vmem:[#allocation26_spill] sm:$0xff] }
 0x228   : > { %v3508_v54 = vmul.f32 %v12145_v12, %v15359_v26 }
 0x229   : > { %v3539_v34 = vpack.c.bf16 %v3510_v46, %v3509_v19 }
 0x22a   : > { %v12379_v18 = vpop.permute.xlu1 %3839  ;;  %v12381_v38 = vpop.permute.xlu0 %3834  ;;  %v3538_v8 = vpack.c.bf16 %v3508_v54, %v3507_v7  ;;  %v3511_v7 = vmul.f32 %v12182_v51, %v15368_v32  ;;  %v15370_v54 = vld [vmem:[#allocation30_spill] sm:$0xff]  ;;  %v3516_v32 = vmul.f32 %v12212_v21, %v15373_v17 }
 0x22b   : > { %15357 = vst [vmem:[#allocation13_spill] sm:$0xff] %v12379_v18  ;;  %15358 = vst [vmem:[#allocation14_spill] sm:$0xff] %v12381_v38  ;;  %4812 = vperm.xlu0 %9979, %v8266_v11   ;;  %v12400_v11 = vld [vmem:[%s10180_s22 + $0x20] sm:$0xf]  ;;  %v3513_v19 = vmul.f32 %v12202_v15, %v15370_v54  ;;  %v15374_v51 = vld [vmem:[#allocation34_spill] sm:$0xff] }
 0x22c   : > { %v3540_v5 = vpack.c.bf16 %v3512_v35, %v3511_v7  ;;  %v3515_v39 = vmul.f32 %v12214_v44, %v15374_v51  ;;  %v15376_v54 = vld [vmem:[#allocation38_spill] sm:$0xff] }
 0x22d   : > { %8932 = vmatmul.mubr.msk.bf16.gmra.mrb[28].mxu0 %vm791_vm3, %v3065_v9  ;;  %v4091_v9 = vsel %vm840_vm1, %v12177_v0, 0  ;;  %v15369_v0 = vld [vmem:[#allocation29_spill] sm:$0xff]  ;;  %v3517_v35 = vmul.f32 %v12232_v40, %v15376_v54  ;;  %v15380_v51 = vld [vmem:[#allocation42_spill] sm:$0xff] }
 0x22e   : > { %8937 = vmatprep.mubr.msk.bf16.mxu0 %vm791_vm3, %v3537_v53  ;;  %v12389_v23 = vpop.permute.xlu1 %3849  ;;  %v12391_v36 = vpop.permute.xlu0 %3844  ;;  %v3514_v46 = vmul.f32 %v12200_v59, %v15369_v0  ;;  %v15375_v0 = vld [vmem:[#allocation37_spill] sm:$0xff]  ;;  %v3519_v17 = vmul.f32 %v12244_v6, %v15380_v51  ;;  %v15384_v40 = vld [vmem:[#allocation46_spill] sm:$0xff] }
 0x22f   : > { %15361 = vst [vmem:[#allocation17_spill] sm:$0xff] %v12389_v23  ;;  %15362 = vst [vmem:[#allocation18_spill] sm:$0xff] %v12391_v36  ;;  %v3518_v59 = vmul.f32 %v12230_v33, %v15375_v0  ;;  %v15383_v54 = vld [vmem:[#allocation45_spill] sm:$0xff]  ;;  %v15388_v51 = vld [vmem:[#allocation50_spill] sm:$0xff] }
 0x230   : > { %v3522_v33 = vmul.f32 %v12260_v58, %v15383_v54  ;;  %v3523_v6 = vmul.f32 %v12274_v4, %v15388_v51  ;;  %v15389_v54 = vld [vmem:[#allocation53_spill] sm:$0xff]  ;;  %v15394_v51 = vld [vmem:[#allocation58_spill] sm:$0xff] }
 0x231   : > { %v3526_v58 = vmul.f32 %v12290_v49, %v15389_v54  ;;  %v3527_v4 = vmul.f32 %v12304_v22, %v15394_v51  ;;  %v15395_v54 = vld [vmem:[#allocation61_spill] sm:$0xff] }
 0x232   : > { %v12402_v53 = vpop.permute.xlu1 %3859  ;;  %v12404_v26 = vpop.permute.xlu0 %3854  ;;  %v3530_v49 = vmul.f32 %v12320_v25, %v15395_v54 }
 0x233   : > { %15365 = vst [vmem:[#allocation21_spill] sm:$0xff] %v12402_v53  ;;  %15366 = vst [vmem:[#allocation22_spill] sm:$0xff] %v12404_v26 }
 0x235   : > { %8938 = vmatmul.mubr.msk.bf16.vlgmr.msra.gmra.mrb[0].mxu0 %vm791_vm3, %v3538_v8 }
 0x236   : > { %8970 = vmatpush3.bf16.msra.mxu0 %v4091_v9  ;;  %8941 = vmatprep.mubr.msk.bf16.mxu0 %vm791_vm3, %v3539_v34  ;;  %v12418_v8 = vpop.permute.xlu1 %3869  ;;  %v12420_v9 = vpop.permute.xlu0 %3864  ;;  %v3541_v34 = vpack.c.bf16 %v3514_v46, %v3513_v19  ;;  %v3542_v46 = vpack.c.bf16 %v3516_v32, %v3515_v39  ;;  %v15379_v19 = vld [vmem:[#allocation41_spill] sm:$0xff]  ;;  %v3521_v39 = vmul.f32 %v12262_v24, %v15384_v40  ;;  %v15390_v40 = vld [vmem:[#allocation54_spill] sm:$0xff] }
 0x237   : > { %9927 = vmatprep.subr.msk.bf16.mxu0 %vm840_vm1, %v12400_v11  ;;  %15371 = vst [vmem:[#allocation25_spill] sm:$0xff] %v12418_v8  ;;  %15372 = vst [vmem:[#allocation26_spill] sm:$0xff] %v12420_v9 }
 0x238   : > { %v3545_v32 = vpack.c.bf16 %v3522_v33, %v3521_v39  ;;  %v3525_v33 = vmul.f32 %v12292_v43, %v15390_v40  ;;  %v15396_v40 = vld [vmem:[#allocation62_spill] sm:$0xff] }
 0x23a   : > { %v12432_v7 = vpop.permute.xlu1 %3879  ;;  %v12434_v15 = vpop.permute.xlu0 %3874 }
 0x23b   : > { %15377 = vst [vmem:[#allocation29_spill] sm:$0xff] %v12432_v7  ;;  %15378 = vst [vmem:[#allocation30_spill] sm:$0xff] %v12434_v15 }
 0x23d   : > { %8942 = vmatmul.mubr.msk.bf16.gmra.mrb[4].mxu0 %vm791_vm3, %v3540_v5  ;;  %v3543_v5 = vpack.c.bf16 %v3518_v59, %v3517_v35 }
 0x23e   : > { %8945 = vmatprep.mubr.msk.bf16.mxu0 %vm791_vm3, %v3541_v34  ;;  %v3520_v34 = vmul.f32 %v12242_v56, %v15379_v19  ;;  %v12442_v0 = vpop.permute.xlu1 %3889  ;;  %v12444_v44 = vpop.permute.xlu0 %3884 }
 0x23f   : > { %15381 = vst [vmem:[#allocation33_spill] sm:$0xff] %v12442_v0  ;;  %15382 = vst [vmem:[#allocation34_spill] sm:$0xff] %v12444_v44 }
 0x240   : > { %v3544_v59 = vpack.c.bf16 %v3520_v34, %v3519_v17 }
 0x242   : > { %v12450_v35 = vpop.permute.xlu1 %3899 }
 0x243   : > { %15385 = vst [vmem:[#allocation37_spill] sm:$0xff] %v12450_v35 }
 0x245   : > { %8946 = vmatmul.mubr.msk.bf16.gmra.mrb[8].mxu0 %vm791_vm3, %v3542_v46  ;;  %v12452_v46 = vpop.permute.xlu0 %3894 }
 0x246   : > { %8949 = vmatprep.mubr.msk.bf16.mxu0 %vm791_vm3, %v3543_v5  ;;  %15386 = vst [vmem:[#allocation38_spill] sm:$0xff] %v12452_v46  ;;  %v15387_v5 = vld [vmem:[#allocation49_spill] sm:$0xff]  ;;  %v12464_v17 = vpop.permute.xlu1 %3909 }
 0x247   : > { %v3524_v19 = vmul.f32 %v12272_v2, %v15387_v5  ;;  %15391 = vst [vmem:[#allocation41_spill] sm:$0xff] %v12464_v17 }
 0x249   : > { %v3546_v34 = vpack.c.bf16 %v3524_v19, %v3523_v6  ;;  %v12466_v39 = vpop.permute.xlu0 %3904  ;;  %v3529_v6 = vmul.f32 %v12322_v55, %v15396_v40  ;;  %v15403_v40 = vld [vmem:[#allocation9_spill] sm:$0xff]  ;;  %v15404_v55 = vld [vmem:[#allocation10_spill] sm:$0xff] }
 0x24a   : > { %15392 = vst [vmem:[#allocation42_spill] sm:$0xff] %v12466_v39  ;;  %v12478_v19 = vpop.permute.xlu1 %3919  ;;  %v3534_v25 = vmul.f32 %v12350_v10, %v15403_v40  ;;  %v15409_v40 = vld [vmem:[#allocation189_spill] sm:$0xff] }
 0x24b   : > { %15397 = vst [vmem:[#allocation45_spill] sm:$0xff] %v12478_v19 }
 0x24d   : > { %8950 = vmatmul.mubr.msk.bf16.gmra.mrb[12].mxu0 %vm791_vm3, %v3544_v59  ;;  %v3547_v59 = vpack.c.bf16 %v3526_v58, %v3525_v33  ;;  %v12480_v43 = vpop.permute.xlu0 %3914  ;;  %v3549_v33 = vpack.c.bf16 %v3530_v49, %v3529_v6 }
 0x24e   : > { %8953 = vmatprep.mubr.msk.bf16.mxu0 %vm791_vm3, %v3545_v32  ;;  %v15393_v32 = vld [vmem:[#allocation57_spill] sm:$0xff]  ;;  %15398 = vst [vmem:[#allocation46_spill] sm:$0xff] %v12480_v43  ;;  %v12488_v54 = vpop.permute.xlu1 %3929 }
 0x24f   : > { %v3528_v5 = vmul.f32 %v12302_v20, %v15393_v32  ;;  %v15400_v32 = vld [vmem:[#allocation66_spill] sm:$0xff]  ;;  %15401 = vst [vmem:[#allocation49_spill] sm:$0xff] %v12488_v54 }
 0x250   : > { %v3531_v51 = vmul.f32 %v12334_v61, %v15400_v32  ;;  %v15408_v32 = vld [vmem:[#allocation7_spill] sm:$0xff] }
 0x251   : > { %v3548_v58 = vpack.c.bf16 %v3528_v5, %v3527_v4  ;;  %v12490_v22 = vpop.permute.xlu0 %3924  ;;  %v3533_v4 = vmul.f32 %v12352_v42, %v15404_v55  ;;  %v3535_v61 = vmul.f32 %v12364_v62, %v15408_v32  ;;  %v15410_v55 = vld [vmem:[#allocation188_spill] sm:$0xff] }
 0x252   : > { %15402 = vst [vmem:[#allocation50_spill] sm:$0xff] %v12490_v22  ;;  %v12496_v6 = vpop.permute.xlu1 %3939  ;;  %v15414_v32 = vld [vmem:[#allocation192_spill] sm:$0xff] }
 0x253   : > { %v3551_v5 = vpack.c.bf16 %v3534_v25, %v3533_v4  ;;  %15405 = vst [vmem:[#allocation53_spill] sm:$0xff] %v12496_v6  ;;  %v3992_v25 = vmul.f32 %v15410_v55, %v12381_v38 }
 0x255   : > { %8954 = vmatmul.mubr.msk.bf16.gmra.mrb[16].mxu0 %vm791_vm3, %v3546_v34  ;;  %v15399_v34 = vld [vmem:[#allocation65_spill] sm:$0xff] }
 0x256   : > { %8957 = vmatprep.mubr.msk.bf16.mxu0 %vm791_vm3, %v3547_v59  ;;  %v3532_v59 = vmul.f32 %v12332_v37, %v15399_v34  ;;  %v3993_v37 = vmul.f32 %v15409_v40, %v12379_v18  ;;  %v15415_v40 = vld [vmem:[#allocation197_spill] sm:$0xff] }
 0x257   : > { %v3997_v18 = vmul.f32 %v15415_v40, %v12402_v53 }
 0x258   : > { %v3550_v49 = vpack.c.bf16 %v3532_v59, %v3531_v51  ;;  %v12510_v51 = vpop.permute.xlu1 %3949 }
 0x259   : > { %15411 = vst [vmem:[#allocation57_spill] sm:$0xff] %v12510_v51 }
 0x25c   : > { %v12524_v55 = vpop.permute.xlu1 %3959 }
 0x25d   : > { %8958 = vmatmul.mubr.msk.bf16.gmra.mrb[20].mxu0 %vm791_vm3, %v3548_v58  ;;  %v12498_v58 = vpop.permute.xlu0 %3934  ;;  %15417 = vst [vmem:[#allocation61_spill] sm:$0xff] %v12524_v55 }
 0x25e   : > { %8961 = vmatprep.mubr.msk.bf16.mxu0 %vm791_vm3, %v3549_v33  ;;  %15406 = vst [vmem:[#allocation54_spill] sm:$0xff] %v12498_v58  ;;  %v15407_v33 = vld [vmem:[#allocation8_spill] sm:$0xff] }
 0x25f   : > { %v3536_v34 = vmul.f32 %v12362_v47, %v15407_v33  ;;  %v3994_v47 = vmul.f32 %v15414_v32, %v12391_v36  ;;  %v15420_v32 = vld [vmem:[#allocation200_spill] sm:$0xff] }
 0x260   : > { %v3998_v40 = vmul.f32 %v15420_v32, %v12420_v9  ;;  %v15428_v9 = vld [vmem:[#allocation208_spill] sm:$0xff] }
 0x261   : > { %v3552_v59 = vpack.c.bf16 %v3536_v34, %v3535_v61  ;;  %v12512_v4 = vpop.permute.xlu0 %3944  ;;  %v15416_v61 = vld [vmem:[#allocation196_spill] sm:$0xff] }
 0x262   : > { %15412 = vst [vmem:[#allocation58_spill] sm:$0xff] %v12512_v4  ;;  %v3996_v34 = vmul.f32 %v15416_v61, %v12404_v26  ;;  %v12536_v61 = vpop.permute.xlu1 %3969 }
 0x263   : > { %15421 = vst [vmem:[#allocation65_spill] sm:$0xff] %v12536_v61 }
 0x265   : > { %8962 = vmatmul.mubr.msk.bf16.gmra.mrb[24].mxu0 %vm791_vm3, %v3550_v49  ;;  %v4024_v49 = vpack.c.bf16 %v3993_v37, %v3992_v25  ;;  %v12526_v38 = vpop.permute.xlu0 %3954  ;;  %v4578_v25 = vsel %vm840_vm1, %v12400_v11, 0 }
 0x266   : > { %8965 = vmatprep.mubr.msk.bf16.mxu0 %vm791_vm3, %v3551_v5  ;;  %v15413_v5 = vld [vmem:[#allocation193_spill] sm:$0xff]  ;;  %15418 = vst [vmem:[#allocation62_spill] sm:$0xff] %v12526_v38 }
 0x267   : > { %v3995_v33 = vmul.f32 %v15413_v5, %v12389_v23 }
 0x269   : > { %v4025_v37 = vpack.c.bf16 %v3995_v33, %v3994_v47  ;;  %v12538_v26 = vpop.permute.xlu0 %3964  ;;  %v15423_v47 = vld [vmem:[#allocation205_spill] sm:$0xff] }
 0x26a   : > { %15422 = vst [vmem:[#allocation66_spill] sm:$0xff] %v12538_v26  ;;  %v4001_v33 = vmul.f32 %v15423_v47, %v12432_v7  ;;  %v15429_v47 = vld [vmem:[#allocation213_spill] sm:$0xff] }
 0x26b   : > { %v4005_v7 = vmul.f32 %v15429_v47, %v12450_v35  ;;  %v15435_v47 = vld [vmem:[#allocation221_spill] sm:$0xff] }
 0x26c   : > { %v4009_v35 = vmul.f32 %v15435_v47, %v12478_v19 }
 0x26d   : > { %8966 = vmatmul.mubr.msk.bf16.gmra.mrb[28].mxu0 %vm791_vm3, %v3552_v59  ;;  %v4026_v59 = vpack.c.bf16 %v3997_v18, %v3996_v34  ;;  %v15424_v18 = vld [vmem:[#allocation204_spill] sm:$0xff] }
 0x26e   : > { %8971 = vmatprep.mubr.msk.bf16.mxu0 %vm791_vm3, %v4024_v49  ;;  %v15419_v49 = vld [vmem:[#allocation201_spill] sm:$0xff]  ;;  %v4000_v11 = vmul.f32 %v15424_v18, %v12434_v15 }
 0x26f   : > { %v3999_v5 = vmul.f32 %v15419_v49, %v12418_v8  ;;  %v15427_v49 = vld [vmem:[#allocation209_spill] sm:$0xff]  ;;  %v4002_v8 = vmul.f32 %v15428_v9, %v12444_v44  ;;  %v15434_v9 = vld [vmem:[#allocation216_spill] sm:$0xff] }
 0x270   : > { %v4003_v32 = vmul.f32 %v15427_v49, %v12442_v0  ;;  %v4006_v44 = vmul.f32 %v15434_v9, %v12466_v39 }
 0x271   : > { %v4027_v34 = vpack.c.bf16 %v3999_v5, %v3998_v40  ;;  %v15430_v5 = vld [vmem:[#allocation212_spill] sm:$0xff] }
 0x272   : > { %v4004_v40 = vmul.f32 %v15430_v5, %v12452_v46 }
 0x275   : > { %8972 = vmatmul.mubr.msk.bf16.vlgmr.msra.gmra.mrb[0].mxu0 %vm791_vm3, %v4025_v37  ;;  %v4028_v37 = vpack.c.bf16 %v4001_v33, %v4000_v11  ;;  %v4029_v33 = vpack.c.bf16 %v4003_v32, %v4002_v8  ;;  %v15436_v8 = vld [vmem:[#allocation220_spill] sm:$0xff] }
 0x276   : > { %9004 = vmatpush3.bf16.msra.mxu0 %v4578_v25  ;;  %8975 = vmatprep.mubr.msk.bf16.mxu0 %vm791_vm3, %v4026_v59  ;;  %v12544_v25 = vpop.permute.xlu1 %3979  ;;  %v12546_v59 = vpop.permute.xlu0 %3974  ;;  %v4008_v32 = vmul.f32 %v15436_v8, %v12480_v43  ;;  %v15441_v8 = vld [vmem:[#allocation229_spill] sm:$0xff] }
 0x277   : > { %15425 = vst [vmem:[#allocation9_spill] sm:$0xff] %v12544_v25  ;;  %15426 = vst [vmem:[#allocation10_spill] sm:$0xff] %v12546_v59  ;;  %v4013_v43 = vmul.f32 %v15441_v8, %v12496_v6  ;;  %v15447_v8 = vld [vmem:[#allocation237_spill] sm:$0xff] }
 0x278   : > { %v4017_v6 = vmul.f32 %v15447_v8, %v12524_v55  ;;  %v4021_v8 = vmul.f32 %v12127_v1, %v12544_v25 }
 0x27a   : > { %v12558_v18 = vpop.permute.xlu1 %3989  ;;  %v12560_v11 = vpop.permute.xlu0 %3984 }
 0x27b   : > { %15431 = vst [vmem:[#allocation8_spill] sm:$0xff] %v12558_v18  ;;  %15432 = vst [vmem:[#allocation7_spill] sm:$0xff] %v12560_v11 }
 0x27d   : > { %8976 = vmatmul.mubr.msk.bf16.gmra.mrb[4].mxu0 %vm791_vm3, %v4027_v34  ;;  %v4030_v34 = vpack.c.bf16 %v4005_v7, %v4004_v40  ;;  %v4032_v40 = vpack.c.bf16 %v4009_v35, %v4008_v32 }
 0x27e   : > { %8979 = vmatprep.mubr.msk.bf16.mxu0 %vm791_vm3, %v4028_v37  ;;  %v15433_v37 = vld [vmem:[#allocation217_spill] sm:$0xff]  ;;  %v12572_v5 = vpop.permute.xlu1 %4326  ;;  %v12574_v46 = vpop.permute.xlu0 %4321 }
 0x27f   : > { %v4007_v49 = vmul.f32 %v15433_v37, %v12464_v17  ;;  %15437 = vst [vmem:[#allocation189_spill] sm:$0xff] %v12572_v5  ;;  %15438 = vst [vmem:[#allocation188_spill] sm:$0xff] %v12574_v46  ;;  %v15440_v37 = vld [vmem:[#allocation224_spill] sm:$0xff] }
 0x280   : > { %v4010_v9 = vmul.f32 %v15440_v37, %v12490_v22  ;;  %v15446_v22 = vld [vmem:[#allocation232_spill] sm:$0xff] }
 0x281   : > { %v4031_v7 = vpack.c.bf16 %v4007_v49, %v4006_v44  ;;  %v15442_v44 = vld [vmem:[#allocation228_spill] sm:$0xff] }
 0x282   : > { %v12582_v47 = vpop.permute.xlu1 %4336  ;;  %v12584_v39 = vpop.permute.xlu0 %4331  ;;  %v4012_v35 = vmul.f32 %v15442_v44, %v12498_v58  ;;  %v12787_v17 = vld [vmem:[%s15496_s21] ss:$0 sm:$0xff] }
 0x284   : > { %v4034_v32 = vpack.c.bf16 %v4013_v43, %v4012_v35 }
 0x285   : > { %8980 = vmatmul.mubr.msk.bf16.gmra.mrb[8].mxu0 %vm791_vm3, %v4029_v33  ;;  %v15439_v33 = vld [vmem:[#allocation225_spill] sm:$0xff] }
 0x286   : > { %8983 = vmatprep.mubr.msk.bf16.mxu0 %vm791_vm3, %v4030_v34  ;;  %v4011_v34 = vmul.f32 %v15439_v33, %v12488_v54  ;;  %v15445_v33 = vld [vmem:[#allocation233_spill] sm:$0xff]  ;;  %v4014_v54 = vmul.f32 %v15446_v22, %v12512_v4  ;;  %v15451_v22 = vld [vmem:[#allocation240_spill] sm:$0xff] }
 0x287   : > { %v4015_v37 = vmul.f32 %v15445_v33, %v12510_v51  ;;  %v4018_v4 = vmul.f32 %v15451_v22, %v12538_v26 }
 0x288   : > { %v4033_v49 = vpack.c.bf16 %v4011_v34, %v4010_v9  ;;  %v15448_v34 = vld [vmem:[#allocation236_spill] sm:$0xff] }
 0x289   : > { %v4016_v43 = vmul.f32 %v15448_v34, %v12526_v38  ;;  %v4035_v9 = vpack.c.bf16 %v4015_v37, %v4014_v54  ;;  %v15452_v54 = vld [vmem:[#allocation243_spill] sm:$0xff] }
 0x28a   : > { %v4020_v37 = vmul.f32 %v15452_v54, %v12546_v59  ;;  %v4480_v54 = vmul.f32 %v12572_v5, %v11243_v52  ;;  %v15485_v5 = vld [vmem:[#allocation143_spill] sm:$0xff] }
 0x28d   : > { %8984 = vmatmul.mubr.msk.bf16.gmra.mrb[12].mxu0 %vm791_vm3, %v4031_v7  ;;  %v12590_v7 = vpop.permute.xlu1 %4346 }
 0x28e   : > { %8987 = vmatprep.mubr.msk.bf16.mxu0 %vm791_vm3, %v4032_v40  ;;  %15443 = vst [vmem:[#allocation193_spill] sm:$0xff] %v12590_v7  ;;  %v12592_v40 = vpop.permute.xlu0 %4341  ;;  %v4484_v52 = vmul.f32 %v12590_v7, %v11298_v16 }
 0x28f   : > { %15444 = vst [vmem:[#allocation192_spill] sm:$0xff] %v12592_v40 }
 0x291   : > { %v12604_v44 = vpop.permute.xlu1 %4356 }
 0x292   : > { %15449 = vst [vmem:[#allocation197_spill] sm:$0xff] %v12604_v44  ;;  %v12606_v35 = vpop.permute.xlu0 %4351 }
 0x293   : > { %15450 = vst [vmem:[#allocation196_spill] sm:$0xff] %v12606_v35 }
 0x295   : > { %8988 = vmatmul.mubr.msk.bf16.gmra.mrb[16].mxu0 %vm791_vm3, %v4033_v49  ;;  %v4036_v49 = vpack.c.bf16 %v4017_v6, %v4016_v43  ;;  %v12617_v34 = vpop.permute.xlu1 %4366  ;;  %v4038_v43 = vpack.c.bf16 %v4021_v8, %v4020_v37 }
 0x296   : > { %8991 = vmatprep.mubr.msk.bf16.mxu0 %vm791_vm3, %v4034_v32  ;;  %v10013_v32 = vld [vmem:[#allocation2 + $0xe8] sm:$0xff]  ;;  %15453 = vst [vmem:[#allocation201_spill] sm:$0xff] %v12617_v34  ;;  %v12619_v38 = vpop.permute.xlu0 %4361  ;;  %v4488_v16 = vmul.f32 %v12617_v34, %v11350_v57 }
 0x297   : > { %v4019_v33 = vmul.f32 %v10013_v32, %v12536_v61  ;;  %15454 = vst [vmem:[#allocation200_spill] sm:$0xff] %v12619_v38  ;;  %v15456_v32 = vld [vmem:[#allocation184_spill] sm:$0xff] }
 0x298   : > { %v4022_v22 = vmul.f32 %v15456_v32, %v12560_v11  ;;  %v15462_v32 = vld [vmem:[#allocation112_spill] sm:$0xff] }
 0x299   : > { %v4037_v6 = vpack.c.bf16 %v4019_v33, %v4018_v4  ;;  %v12627_v1 = vpop.permute.xlu1 %4376  ;;  %v4479_v4 = vmul.f32 %v12574_v46, %v11247_v63  ;;  %v4481_v11 = vmul.f32 %v12584_v39, %v15462_v32  ;;  %v4483_v63 = vmul.f32 %v12592_v40, %v11302_v28  ;;  %v15540_v40 = vld [vmem:[#allocation28_spill] sm:$0xff] }
 0x29a   : > { %15457 = vst [vmem:[#allocation205_spill] sm:$0xff] %v12627_v1  ;;  %v12629_v26 = vpop.permute.xlu0 %4371  ;;  %v4487_v28 = vmul.f32 %v12619_v38, %v11354_v13 }
 0x29b   : > { %15458 = vst [vmem:[#allocation204_spill] sm:$0xff] %v12629_v26  ;;  %v4511_v8 = vpack.c.bf16 %v4480_v54, %v4479_v4  ;;  %v4513_v4 = vpack.c.bf16 %v4484_v52, %v4483_v63 }
 0x29c   : > { %v4515_v32 = vpack.c.bf16 %v4488_v16, %v4487_v28 }
 0x29d   : > { %8992 = vmatmul.mubr.msk.bf16.gmra.mrb[20].mxu0 %vm791_vm3, %v4035_v9  ;;  %v15455_v9 = vld [vmem:[#allocation185_spill] sm:$0xff]  ;;  %v12635_v37 = vpop.permute.xlu1 %4386 }
 0x29e   : > { %8995 = vmatprep.mubr.msk.bf16.mxu0 %vm791_vm3, %v4036_v49  ;;  %v4023_v49 = vmul.f32 %v15455_v9, %v12558_v18  ;;  %15459 = vst [vmem:[#allocation209_spill] sm:$0xff] %v12635_v37  ;;  %v4492_v13 = vmul.f32 %v12635_v37, %v11400_v45  ;;  %v15490_v18 = vld [vmem:[#allocation101_spill] sm:$0xff] }
 0x2a0   : > { %v4039_v33 = vpack.c.bf16 %v4023_v49, %v4022_v22 }
 0x2a1   : > { %v12649_v22 = vpop.permute.xlu1 %4396 }
 0x2a2   : > { %15463 = vst [vmem:[#allocation213_spill] sm:$0xff] %v12649_v22 }
 0x2a5   : > { %8996 = vmatmul.mubr.msk.bf16.gmra.mrb[24].mxu0 %vm791_vm3, %v4037_v6  ;;  %v12637_v6 = vpop.permute.xlu0 %4381 }
 0x2a6   : > { %8999 = vmatprep.mubr.msk.bf16.mxu0 %vm791_vm3, %v4038_v43  ;;  %15460 = vst [vmem:[#allocation208_spill] sm:$0xff] %v12637_v6  ;;  %v15461_v43 = vld [vmem:[#allocation111_spill] sm:$0xff]  ;;  %v4491_v63 = vmul.f32 %v12637_v6, %v11404_v27 }
 0x2a7   : > { %v4482_v9 = vmul.f32 %v12582_v47, %v15461_v43  ;;  %v15471_v27 = vld [vmem:[#allocation127_spill] sm:$0xff] }
 0x2a9   : > { %v4512_v49 = vpack.c.bf16 %v4482_v9, %v4481_v11  ;;  %v12651_v54 = vpop.permute.xlu0 %4391  ;;  %v12663_v11 = vpop.permute.xlu1 %4406 }
 0x2aa   : > { %15464 = vst [vmem:[#allocation212_spill] sm:$0xff] %v12651_v54  ;;  %15465 = vst [vmem:[#allocation217_spill] sm:$0xff] %v12663_v11  ;;  %v4496_v45 = vmul.f32 %v12663_v11, %v11450_v31  ;;  %v15476_v31 = vld [vmem:[#allocation134_spill] sm:$0xff] }
 0x2ad   : > { %9000 = vmatmul.mubr.msk.bf16.gmra.mrb[28].mxu0 %vm791_vm3, %v4039_v33  ;;  %v4486_v33 = vmul.f32 %v12604_v44, %v11324_v29  ;;  %v12665_v43 = vpop.permute.xlu0 %4401  ;;  %v4490_v29 = vmul.f32 %v12627_v1, %v11374_v41  ;;  %v12673_v57 = vpop.permute.xlu1 %4416  ;;  %v4494_v41 = vmul.f32 %v12649_v22, %v11424_v60  ;;  %v15474_v60 = vld [vmem:[#allocation130_spill] sm:$0xff] }
 0x2ae   : > { %9005 = vmatprep.mubr.msk.bf16.mxu0 %vm791_vm3, %v4511_v8  ;;  %v4485_v8 = vmul.f32 %v12606_v35, %v11328_v50  ;;  %15466 = vst [vmem:[#allocation216_spill] sm:$0xff] %v12665_v43  ;;  %v4489_v50 = vmul.f32 %v12629_v26, %v11378_v14  ;;  %15467 = vst [vmem:[#allocation221_spill] sm:$0xff] %v12673_v57  ;;  %v4493_v14 = vmul.f32 %v12651_v54, %v11428_v48  ;;  %v15475_v48 = vld [vmem:[#allocation131_spill] sm:$0xff]  ;;  %v15510_v26 = vld [vmem:[#allocation12_spill] sm:$0xff] }
 0x2af   : > { %v4495_v16 = vmul.f32 %v12665_v43, %v15471_v27  ;;  %v15504_v54 = vld [vmem:[#allocation11_spill] sm:$0xff] }
 0x2b0   : > { %v4514_v9 = vpack.c.bf16 %v4486_v33, %v4485_v8  ;;  %v4518_v28 = vpack.c.bf16 %v4494_v41, %v4493_v14 }
 0x2b1   : > { %v12675_v52 = vpop.permute.xlu0 %4411  ;;  %v12681_v33 = vpop.permute.xlu1 %4426 }
 0x2b2   : > { %15468 = vst [vmem:[#allocation220_spill] sm:$0xff] %v12675_v52  ;;  %15469 = vst [vmem:[#allocation225_spill] sm:$0xff] %v12681_v33 }
 0x2b5   : > { %9006 = vmatmul.mubr.msk.bf16.vlgmr.msra.gmra.mrb[0].mxu0 %vm791_vm3, %v4512_v49  ;;  %v4516_v49 = vpack.c.bf16 %v4490_v29, %v4489_v50  ;;  %v12683_v8 = vpop.permute.xlu0 %4421  ;;  %v4519_v29 = vpack.c.bf16 %v4496_v45, %v4495_v16  ;;  %v4498_v50 = vmul.f32 %v12673_v57, %v15474_v60  ;;  %v15480_v16 = vld [vmem:[#allocation138_spill] sm:$0xff] }
 0x2b6   : > { %9009 = vmatprep.mubr.msk.bf16.mxu0 %vm791_vm3, %v4513_v4  ;;  %v4517_v4 = vpack.c.bf16 %v4492_v13, %v4491_v63  ;;  %15470 = vst [vmem:[#allocation224_spill] sm:$0xff] %v12683_v8  ;;  %v4497_v13 = vmul.f32 %v12675_v52, %v15475_v48  ;;  %v4500_v63 = vmul.f32 %v12681_v33, %v15476_v31 }
 0x2b8   : > { %v4520_v45 = vpack.c.bf16 %v4498_v50, %v4497_v13 }
 0x2bd   : > { %9010 = vmatmul.mubr.msk.bf16.gmra.mrb[4].mxu0 %vm791_vm3, %v4514_v9  ;;  %v12695_v9 = vpop.permute.xlu1 %4436 }
 0x2be   : > { %9013 = vmatprep.mubr.msk.bf16.mxu0 %vm791_vm3, %v4515_v32  ;;  %15472 = vst [vmem:[#allocation229_spill] sm:$0xff] %v12695_v9  ;;  %v12697_v32 = vpop.permute.xlu0 %4431 }
 0x2bf   : > { %15473 = vst [vmem:[#allocation228_spill] sm:$0xff] %v12697_v32 }
 0x2c1   : > { %v12709_v41 = vpop.permute.xlu1 %4446 }
 0x2c2   : > { %15478 = vst [vmem:[#allocation233_spill] sm:$0xff] %v12709_v41  ;;  %v12711_v14 = vpop.permute.xlu0 %4441 }
 0x2c3   : > { %15479 = vst [vmem:[#allocation232_spill] sm:$0xff] %v12711_v14  ;;  %v4503_v50 = vmul.f32 %v12711_v14, %v15485_v5 }
 0x2c5   : > { %9014 = vmatmul.mubr.msk.bf16.gmra.mrb[8].mxu0 %vm791_vm3, %v4516_v49  ;;  %v15477_v49 = vld [vmem:[#allocation135_spill] sm:$0xff]  ;;  %v12719_v48 = vpop.permute.xlu1 %4456 }
 0x2c6   : > { %9017 = vmatprep.mubr.msk.bf16.mxu0 %vm791_vm3, %v4517_v4  ;;  %v4499_v4 = vmul.f32 %v12683_v8, %v15477_v49  ;;  %15482 = vst [vmem:[#allocation237_spill] sm:$0xff] %v12719_v48  ;;  %v12721_v31 = vpop.permute.xlu0 %4451  ;;  %v15484_v49 = vld [vmem:[#allocation142_spill] sm:$0xff] }
 0x2c7   : > { %15483 = vst [vmem:[#allocation236_spill] sm:$0xff] %v12721_v31  ;;  %v4504_v46 = vmul.f32 %v12709_v41, %v15484_v49 }
 0x2c8   : > { %v4521_v27 = vpack.c.bf16 %v4500_v63, %v4499_v4 }
 0x2c9   : > { %v4523_v63 = vpack.c.bf16 %v4504_v46, %v4503_v50  ;;  %v12727_v4 = vpop.permute.xlu1 %4466 }
 0x2ca   : > { %15486 = vst [vmem:[#allocation240_spill] sm:$0xff] %v12727_v4  ;;  %v4508_v5 = vmul.f32 %v12727_v4, %v15490_v18 }
 0x2cd   : > { %9018 = vmatmul.mubr.msk.bf16.gmra.mrb[12].mxu0 %vm791_vm3, %v4518_v28  ;;  %v4502_v28 = vmul.f32 %v12695_v9, %v15480_v16  ;;  %v12741_v59 = vpop.permute.xlu1 %4476 }
 0x2ce   : > { %9021 = vmatprep.mubr.msk.bf16.mxu0 %vm791_vm3, %v4519_v29  ;;  %v15481_v29 = vld [vmem:[#allocation139_spill] sm:$0xff]  ;;  %15492 = vst [vmem:[#allocation185_spill] sm:$0xff] %v12741_v59 }
 0x2cf   : > { %v4501_v60 = vmul.f32 %v12697_v32, %v15481_v29  ;;  %v15489_v29 = vld [vmem:[#allocation147_spill] sm:$0xff] }
 0x2d0   : > { %v4505_v49 = vmul.f32 %v12721_v31, %v15489_v29  ;;  %v15495_v29 = vld [vmem:[#allocation106_spill] sm:$0xff] }
 0x2d1   : > { %v4522_v13 = vpack.c.bf16 %v4502_v28, %v4501_v60  ;;  %v15491_v28 = vld [vmem:[#allocation102_spill] sm:$0xff] }
 0x2d5   : > { %9022 = vmatmul.mubr.msk.bf16.gmra.mrb[16].mxu0 %vm791_vm3, %v4520_v45  ;;  %v12729_v45 = vpop.permute.xlu0 %4461 }
 0x2d6   : > { %9025 = vmatprep.mubr.msk.bf16.mxu0 %vm791_vm3, %v4521_v27  ;;  %15487 = vst [vmem:[#allocation243_spill] sm:$0xff] %v12729_v45  ;;  %v15488_v27 = vld [vmem:[#allocation146_spill] sm:$0xff]  ;;  %v4507_v46 = vmul.f32 %v12729_v45, %v15491_v28  ;;  %v4999_v28 = vld [vmem:[%s10185_s10] sm:$0xf] }
 0x2d7   : > { %v4506_v16 = vmul.f32 %v12719_v48, %v15488_v27  ;;  %9928 = vmatprep.subr.msk.bf16.mxu1 %vm840_vm1, %v4999_v28 }
 0x2d8   : > { %v4525_v50 = vpack.c.bf16 %v4508_v5, %v4507_v46 }
 0x2d9   : > { %v4524_v60 = vpack.c.bf16 %v4506_v16, %v4505_v49  ;;  %v5049_v16 = vsel %vm840_vm1, %v4999_v28, 0  ;;  %v12756_v49 = vld [vmem:[%s10185_s10 + $0x4] sm:$0xf] }
 0x2da   : > { %9038 = vmatpush3.bf16.msra.mxu1 %v5049_v16 }
 0x2db   : > { %9929 = vmatprep.subr.msk.bf16.mxu1 %vm840_vm1, %v12756_v49 }
 0x2dd   : > { %9026 = vmatmul.mubr.msk.bf16.gmra.mrb[20].mxu0 %vm791_vm3, %v4522_v13  ;;  %v12743_v13 = vpop.permute.xlu0 %4471 }
 0x2de   : > { %9029 = vmatprep.mubr.msk.bf16.mxu0 %vm791_vm3, %v4523_v63  ;;  %15493 = vst [vmem:[#allocation184_spill] sm:$0xff] %v12743_v13  ;;  %v15494_v63 = vld [vmem:[#allocation105_spill] sm:$0xff]  ;;  %v4509_v18 = vmul.f32 %v12743_v13, %v15495_v29 }
 0x2df   : > { %v4510_v27 = vmul.f32 %v12741_v59, %v15494_v63 }
 0x2e1   : > { %v4526_v4 = vpack.c.bf16 %v4510_v27, %v4509_v18  ;;  %v12801_v24 = vpop.permute.xlu0 %4812 }
 0x2e5   : > { %9030 = vmatmul.mubr.msk.bf16.gmra.mrb[24].mxu0 %vm791_vm3, %v4524_v60 }
 0x2e6   : > { %9033 = vmatprep.mubr.msk.bf16.mxu0 %vm791_vm3, %v4525_v50 }
 0x2ed   : > { %9034 = vmatmul.mubr.msk.bf16.gmra.mrb[28].mxu0 %vm791_vm3, %v4526_v4 }
 0x388   : > { %v9007_v5 = vpop.f32.mrb[0].mxu0 }
 0x389   : > { %v4614_v46 = vpop.f32.mrb[1].mxu0  ;;  %v9343_v23 = vadd.f32 %v9007_v5, %v12787_v17 }
 0x38a   : > { %v9008_v60 = vpop.f32.mrb[2].mxu0  ;;  %v9344_v2 = vadd.f32 %v12787_v17, %v4614_v46 }
 0x38b   : > { %v4617_v50 = vpop.f32.mrb[3].mxu0  ;;  %v9345_v62 = vadd.f32 %v9008_v60, %v12787_v17  ;;  %v4817_v21 = vmul.f32 %v9343_v23, %v12801_v24  ;;  %vm4775_vm6 = vcmp.ge.f32.partialorder %v9343_v23, 0.0 }
 0x38c   : > { %v9346_v36 = vadd.f32 %v12787_v17, %v4617_v50  ;;  %v4815_v5 = vmul.f32 %v9344_v2, %v12801_v24  ;;  %vm4773_vm8 = vcmp.ge.f32.partialorder %v9344_v2, 0.0 }
 0x38d   : > { %v4818_v30 = vmul.f32 %v9345_v62, %v12801_v24  ;;  %vm4776_vm7 = vcmp.ge.f32.partialorder %v9345_v62, 0.0  ;;  %v12817_v31 = vsel %vm4775_vm6, %v9343_v23, %v4817_v21 }
 0x38e   : > { %v4816_v56 = vmul.f32 %v9346_v36, %v12801_v24  ;;  %vm4774_vm5 = vcmp.ge.f32.partialorder %v9346_v36, 0.0 }
 0x38f   : > { %v12819_v41 = vsel %vm4776_vm7, %v9345_v62, %v4818_v30  ;;  %v4889_v62 = vrot.slane %v12817_v31, 7 }
 0x390   : > { %v9011_v63 = vpop.f32.mrb[4].mxu0  ;;  %v12813_v12 = vsel %vm4774_vm5, %v9346_v36, %v4816_v56 }
 0x391   : > { %v4630_v27 = vpop.f32.mrb[5].mxu0  ;;  %v9347_v50 = vadd.f32 %v9011_v63, %v12787_v17  ;;  %15497 = vst [vmem:[#allocation111_spill] sm:$0xff] %v12813_v12  ;;  %v4888_v36 = vrot.slane %v12813_v12, 7 }
 0x392   : > { %v9012_v29 = vpop.f32.mrb[6].mxu0  ;;  %v9348_v60 = vadd.f32 %v12787_v17, %v4630_v27  ;;  %v12825_v27 = vsel %vm4773_vm8, %v9344_v2, %v4815_v5 }
 0x393   : > { %v4633_v4 = vpop.f32.mrb[7].mxu0  ;;  %v4821_v63 = vmul.f32 %v9347_v50, %v12801_v24  ;;  %v9349_v14 = vadd.f32 %v9012_v29, %v12787_v17  ;;  %15498 = vst [vmem:[#allocation112_spill] sm:$0xff] %v12825_v27  ;;  %vm4779_vm9 = vcmp.ge.f32.partialorder %v9347_v50, 0.0  ;;  %v4887_v30 = vrot.slane %v12825_v27, 7 }
 0x394   : > { %v4819_v32 = vmul.f32 %v9348_v60, %v12801_v24  ;;  %v9350_v56 = vadd.f32 %v12787_v17, %v4633_v4  ;;  %vm4777_vm10 = vcmp.ge.f32.partialorder %v9348_v60, 0.0  ;;  %v12841_v4 = vsel %vm840_vm1, %v12756_v49, 0 }
 0x395   : > { %v12833_v23 = vsel %vm4779_vm9, %v9347_v50, %v4821_v63  ;;  %v4822_v29 = vmul.f32 %v9349_v14, %v12801_v24  ;;  %vm4780_vm11 = vcmp.ge.f32.partialorder %v9349_v14, 0.0  ;;  %v12849_v63 = vsel %vm517_vm2, %v4887_v30, %v4888_v36  ;;  %v15650_v50 = vld [vmem:[#allocation210_spill] sm:$0xff] }
 0x396   : > { %v12836_v2 = vsel %vm4777_vm10, %v9348_v60, %v4819_v32  ;;  %v4820_v5 = vmul.f32 %v9350_v56, %v12801_v24  ;;  %15500 = vst [vmem:[#allocation127_spill] sm:$0xff] %v12849_v63  ;;  %v12853_v32 = vsel %vm517_vm2, %v4888_v36, %v4889_v62  ;;  %vm4778_vm12 = vcmp.ge.f32.partialorder %v9350_v56, 0.0 }
 0x397   : > { %15501 = vst [vmem:[#allocation130_spill] sm:$0xff] %v12853_v32  ;;  %v4891_v11 = vrot.slane %v12836_v2, 7  ;;  %v12866_v22 = vsel %vm4780_vm11, %v9349_v14, %v4822_v29  ;;  %v12873_v37 = vmul.f32 %v12849_v63, %v15504_v54 }
 0x398   : > { %v9015_v18 = vpop.f32.mrb[8].mxu0  ;;  %v12879_v6 = vsel %vm4778_vm12, %v9350_v56, %v4820_v5 }
 0x399   : > { %v12760_v59 = vpop.f32.mrb[9].mxu0  ;;  %v9351_v21 = vadd.f32 %v9015_v18, %v12787_v17  ;;  %v15502_v18 = vrot.slane %v12819_v41, 7  ;;  %v4892_v5 = vrot.slane %v12879_v6, 7 }
 0x39a   : > { %v12762_v13 = vpop.f32.mrb[10].mxu0  ;;  %v9352_v36 = vadd.f32 %v12787_v17, %v12760_v59 }
 0x39b   : > { %v12764_v28 = vpop.f32.mrb[11].mxu0  ;;  %v4825_v14 = vmul.f32 %v9351_v21, %v12801_v24  ;;  %vm4783_vm14 = vcmp.ge.f32.partialorder %v9351_v21, 0.0  ;;  %v9353_v54 = vadd.f32 %v12762_v13, %v12787_v17 }
 0x39c   : > { %vm4781_vm5 = vcmp.ge.f32.partialorder %v9352_v36, 0.0  ;;  %v4823_v13 = vmul.f32 %v9352_v36, %v12801_v24 }
 0x39d   : > { %v12896_v1 = vsel %vm4783_vm14, %v9351_v21, %v4825_v14  ;;  %vm4784_vm6 = vcmp.ge.f32.partialorder %v9353_v54, 0.0  ;;  %v4826_v63 = vmul.f32 %v9353_v54, %v12801_v24 }
 0x39e   : > { %v12933_v35 = vsel %vm4781_vm5, %v9352_v36, %v4823_v13 }
 0x3a0   : > { %v12766_v16 = vpop.f32.mrb[12].mxu0 }
 0x3a1   : > { %v12768_v45 = vpop.f32.mrb[13].mxu0  ;;  %v9355_v21 = vadd.f32 %v12766_v16, %v12787_v17 }
 0x3a2   : > { %v12770_v25 = vpop.f32.mrb[14].mxu0 }
 0x3a3   : > { %v12772_v61 = vpop.f32.mrb[15].mxu0  ;;  %vm4787_vm8 = vcmp.ge.f32.partialorder %v9355_v21, 0.0  ;;  %v9357_v13 = vadd.f32 %v12770_v25, %v12787_v17 }
 0x3a5   : > { %vm4788_vm10 = vcmp.ge.f32.partialorder %v9357_v13, 0.0 }
 0x3a8   : > { %v12774_v55 = vpop.f32.mrb[16].mxu0 }
 0x3a9   : > { %v12776_v51 = vpop.f32.mrb[17].mxu0 }
 0x3aa   : > { %v12778_v58 = vpop.f32.mrb[18].mxu0 }
 0x3ab   : > { %v12780_v19 = vpop.f32.mrb[19].mxu0 }
 0x3b0   : > { %v12789_v0 = vpop.f32.mrb[20].mxu0 }
 0x3b1   : > { %v12791_v15 = vpop.f32.mrb[21].mxu0 }
 0x3b2   : > { %v12794_v53 = vpop.f32.mrb[22].mxu0 }
 0x3b3   : > { %v12798_v20 = vpop.f32.mrb[23].mxu0 }
 0x3b8   : > { %v12809_v3 = vpop.f32.mrb[24].mxu0 }
 0x3b9   : > { %v12811_v46 = vpop.f32.mrb[25].mxu0 }
 0x3ba   : > { %v12815_v48 = vpop.f32.mrb[26].mxu0 }
 0x3bb   : > { %v12823_v9 = vpop.f32.mrb[27].mxu0 }
 0x3c0   : > { %v9035_v33 = vpop.f32.mrb[28].mxu0 }
 0x3c1   : > { %v9371_v8 = vadd.f32 %v9035_v33, %v12787_v17  ;;  %v12845_v57 = vpop.f32.mrb[29].mxu0  ;;  %v12861_v33 = vsel %vm517_vm2, %v4889_v62, %v15502_v18  ;;  %v15505_v62 = vld [vmem:[#allocation16_spill] sm:$0xff] }
 0x3c2   : > { %v9036_v49 = vpop.f32.mrb[30].mxu0  ;;  %15503 = vst [vmem:[#allocation131_spill] sm:$0xff] %v12861_v33  ;;  %v12877_v18 = vmul.f32 %v12853_v32, %v15505_v62  ;;  %v9354_v62 = vadd.f32 %v12787_v17, %v12764_v28 }
 0x3c3   : > { %v4729_v60 = vpop.f32.mrb[31].mxu0  ;;  %vm4803_vm13 = vcmp.ge.f32.partialorder %v9371_v8, 0.0  ;;  %v4845_v52 = vmul.f32 %v9371_v8, %v12801_v24  ;;  %v9373_v29 = vadd.f32 %v9036_v49, %v12787_v17 }
 0x3c4   : > { %v9374_v59 = vadd.f32 %v12787_v17, %v4729_v60  ;;  %v4824_v60 = vmul.f32 %v9354_v62, %v12801_v24  ;;  %vm4782_vm7 = vcmp.ge.f32.partialorder %v9354_v62, 0.0 }
 0x3c5   : > { %v12890_v32 = vsel %vm4803_vm13, %v9371_v8, %v4845_v52  ;;  %vm4804_vm15 = vcmp.ge.f32.partialorder %v9373_v29, 0.0  ;;  %v4846_v56 = vmul.f32 %v9373_v29, %v12801_v24 }
 0x3c6   : > { %15506 = vst [vmem:[#allocation134_spill] sm:$0xff] %v12890_v32  ;;  %vm4802_vm0 = vcmp.ge.f32.partialorder %v9374_v59, 0.0  ;;  %v4844_v49 = vmul.f32 %v9374_v59, %v12801_v24  ;;  %v4917_v8 = vrot.slane %v12890_v32, 7 }
 0x3c7   : > { %v12899_v43 = vsel %vm4804_vm15, %v9373_v29, %v4846_v56  ;;  %v9356_v29 = vadd.f32 %v12787_v17, %v12768_v45  ;;  %v15511_v45 = vld [vmem:[#allocation15_spill] sm:$0xff] }
 0x3c8   : > { %15507 = vst [vmem:[#allocation135_spill] sm:$0xff] %v12899_v43  ;;  %v12901_v52 = vsel %vm4802_vm0, %v9374_v59, %v4844_v49  ;;  %v4918_v28 = vrot.slane %v12899_v43, 7  ;;  %v4956_v38 = vmul.f32 %v12861_v33, %v15511_v45  ;;  %v15513_v49 = vld [vmem:[#allocation5_spill] sm:$0xff]  ;;  %v12947_v45 = vsel %vm517_vm2, %v4891_v11, %v4892_v5 }
 0x3c9   : > { %15508 = vst [vmem:[#allocation138_spill] sm:$0xff] %v12901_v52  ;;  %v14892_v14 = vrot.slane %v12901_v52, 7  ;;  %15514 = vst [vmem:[#allocation142_spill] sm:$0xff] %v12947_v45  ;;  %v4827_v36 = vmul.f32 %v9356_v29, %v12801_v24  ;;  %vm4785_vm9 = vcmp.ge.f32.partialorder %v9356_v29, 0.0 }
 0x3ca   : > { %v12914_v59 = vsel %vm517_vm2, %v4917_v8, %v4918_v28  ;;  %v12918_v56 = vsel %vm517_vm2, %v4918_v28, %v4887_v30  ;;  %v15512_v30 = vld [vmem:[#allocation6_spill] sm:$0xff]  ;;  %v4985_v25 = vpack.c.bf16 %v4956_v38, %v12877_v18 }
 0x3cb   : > { %15509 = vst [vmem:[#allocation139_spill] sm:$0xff] %v12918_v56  ;;  %v12925_v16 = vsel %vm517_vm2, %v14892_v14, %v4917_v8  ;;  %v4952_v34 = vmul.f32 %v12914_v59, %v15510_v26  ;;  %v4953_v7 = vmul.f32 %v12918_v56, %v15513_v49  ;;  %v12940_v8 = vsel %vm4784_vm6, %v9353_v54, %v4826_v63  ;;  %v15537_v56 = vld [vmem:[#allocation31_spill] sm:$0xff] }
 0x3cc   : > { %v4951_v28 = vmul.f32 %v12925_v16, %v15512_v30  ;;  %v12942_v14 = vsel %vm4782_vm7, %v9354_v62, %v4824_v60  ;;  %v4829_v26 = vmul.f32 %v9355_v21, %v12801_v24  ;;  %v9358_v63 = vadd.f32 %v12787_v17, %v12772_v61 }
 0x3cd   : > { %v4984_v54 = vpack.c.bf16 %v12873_v37, %v4953_v7  ;;  %v15515_v62 = vrot.slane %v12819_v41, 7  ;;  %v4895_v49 = vrot.slane %v12933_v35, 7  ;;  %v4896_v61 = vrot.slane %v12942_v14, 7 }
 0x3ce   : > { %v4983_v30 = vpack.c.bf16 %v4952_v34, %v4951_v28  ;;  %v12967_v34 = vld [vmem:[%s10185_s10 + $0x8] sm:$0xf]  ;;  %v12970_v7 = vsel %vm4787_vm8, %v9355_v21, %v4829_v26  ;;  %v15517_v37 = vrot.slane %v12866_v22, 7  ;;  %v12987_v18 = vsel %vm4785_vm9, %v9356_v29, %v4827_v36  ;;  %v15522_v21 = vld [vmem:[#allocation20_spill] sm:$0xff] }
 0x3cf   : > { %v12959_v60 = vsel %vm517_vm2, %v15515_v62, %v4891_v11  ;;  %v15518_v11 = vrot.slane %v12833_v23, 7  ;;  %vm4786_vm11 = vcmp.ge.f32.partialorder %v9358_v63, 0.0  ;;  %v9362_v29 = vadd.f32 %v12787_v17, %v12780_v19  ;;  %v15524_v36 = vld [vmem:[#allocation24_spill] sm:$0xff] }
 0x3d0   : > { %15516 = vst [vmem:[#allocation143_spill] sm:$0xff] %v12959_v60  ;;  %9039 = vmatprep.mubr.msk.bf16.mxu1 %vm791_vm3, %v4983_v30  ;;  %v4957_v26 = vmul.f32 %v12959_v60, %v15522_v21  ;;  %v4899_v60 = vrot.slane %v12987_v18, 7  ;;  %v9361_v19 = vadd.f32 %v12778_v58, %v12787_v17  ;;  %v9364_v58 = vadd.f32 %v12787_v17, %v12791_v15 }
 0x3d1   : > { %9040 = vmatmul.mubr.msk.bf16.vlgmr.msra.gmra.mrb[0].mxu1 %vm791_vm3, %v4984_v54  ;;  %v12979_v28 = vsel %vm517_vm2, %v15518_v11, %v15517_v37  ;;  %v15520_v30 = vmov %v15518_v11  ;;  %v15523_v54 = vld [vmem:[#allocation19_spill] sm:$0xff]  ;;  %v4830_v37 = vmul.f32 %v9357_v13, %v12801_v24  ;;  %v4828_v11 = vmul.f32 %v9358_v63, %v12801_v24 }
 0x3d2   : > { %15519 = vst [vmem:[#allocation146_spill] sm:$0xff] %v12979_v28  ;;  %v12985_v38 = vsel %vm517_vm2, %v4892_v5, %v15520_v30  ;;  %9072 = vmatpush3.bf16.msra.mxu1 %v12841_v4  ;;  %9043 = vmatprep.mubr.msk.bf16.mxu1 %vm791_vm3, %v4985_v25  ;;  %v4958_v62 = vmul.f32 %v12947_v45, %v15523_v54  ;;  %v15525_v30 = vld [vmem:[#allocation23_spill] sm:$0xff]  ;;  %vm4790_vm13 = vcmp.ge.f32.partialorder %v9362_v29, 0.0  ;;  %vm4792_vm15 = vcmp.ge.f32.partialorder %v9361_v19, 0.0 }
 0x3d3   : > { %15521 = vst [vmem:[#allocation147_spill] sm:$0xff] %v12985_v38  ;;  %v9359_v5 = vadd.f32 %v12774_v55, %v12787_v17  ;;  %9930 = vmatprep.subr.msk.bf16.mxu1 %vm840_vm1, %v12967_v34  ;;  %v9360_v4 = vadd.f32 %v12787_v17, %v12776_v51  ;;  %v4959_v25 = vmul.f32 %v12985_v38, %v15524_v36  ;;  %v4901_v55 = vrot.slane %v12970_v7, 7 }
 0x3d4   : > { %v4960_v21 = vmul.f32 %v12979_v28, %v15525_v30  ;;  %v4986_v45 = vpack.c.bf16 %v4958_v62, %v4957_v26  ;;  %v13018_v36 = vsel %vm4788_vm10, %v9357_v13, %v4830_v37  ;;  %v13021_v30 = vsel %vm4786_vm11, %v9358_v63, %v4828_v11 }
 0x3d5   : > { %vm4791_vm12 = vcmp.ge.f32.partialorder %v9359_v5, 0.0  ;;  %v4833_v54 = vmul.f32 %v9359_v5, %v12801_v24  ;;  %v4831_v44 = vmul.f32 %v9360_v4, %v12801_v24  ;;  %v4832_v33 = vmul.f32 %v9362_v29, %v12801_v24 }
 0x3d6   : > { %v4987_v28 = vpack.c.bf16 %v4960_v21, %v4959_v25  ;;  %v13028_v51 = vsel %vm517_vm2, %v4895_v49, %v4896_v61  ;;  %v15527_v13 = vrot.slane %v12940_v8, 7  ;;  %v15528_v63 = vrot.slane %v12896_v1, 7 }
 0x3d7   : > { %15526 = vst [vmem:[#allocation101_spill] sm:$0xff] %v13028_v51  ;;  %vm4789_vm14 = vcmp.ge.f32.partialorder %v9360_v4, 0.0  ;;  %v4834_v11 = vmul.f32 %v9361_v19, %v12801_v24  ;;  %v9363_v15 = vadd.f32 %v12789_v0, %v12787_v17  ;;  %v13063_v0 = vsel %vm4790_vm13, %v9362_v29, %v4832_v33 }
 0x3d8   : > { %v13039_v26 = vsel %vm517_vm2, %v15528_v63, %v15527_v13  ;;  %v15530_v62 = vmov %v15528_v63  ;;  %v15534_v13 = vld [vmem:[#allocation27_spill] sm:$0xff]  ;;  %15535 = vst [vmem:[#allocation11_spill] sm:$0xff] %v13063_v0  ;;  %v13072_v21 = vsel %vm4789_vm14, %v9360_v4, %v4831_v44  ;;  %vm4793_vm5 = vcmp.ge.f32.partialorder %v9364_v58, 0.0 }
 0x3d9   : > { %9044 = vmatmul.mubr.msk.bf16.gmra.mrb[4].mxu1 %vm791_vm3, %v4986_v45  ;;  %15529 = vst [vmem:[#allocation102_spill] sm:$0xff] %v13039_v26  ;;  %v13045_v37 = vsel %vm517_vm2, %v4896_v61, %v15530_v62  ;;  %v15532_v45 = vrot.slane %v12866_v22, 7  ;;  %v9365_v61 = vadd.f32 %v12794_v53, %v12787_v17  ;;  %v4962_v63 = vmul.f32 %v13028_v51, %v15534_v13 }
 0x3da   : > { %15531 = vst [vmem:[#allocation105_spill] sm:$0xff] %v13045_v37  ;;  %9047 = vmatprep.mubr.msk.bf16.mxu1 %vm791_vm3, %v4987_v28  ;;  %v4900_v62 = vrot.slane %v13021_v30, 7  ;;  %v15536_v28 = vld [vmem:[#allocation32_spill] sm:$0xff]  ;;  %15539 = vst [vmem:[#allocation12_spill] sm:$0xff] %v13072_v21  ;;  %v4835_v53 = vmul.f32 %v9364_v58, %v12801_v24  ;;  %v13077_v51 = vsel %vm4792_vm15, %v9361_v19, %v4834_v11  ;;  %vm4795_vm0 = vcmp.ge.f32.partialorder %v9363_v15, 0.0 }
 0x3db   : > { %v13055_v25 = vsel %vm517_vm2, %v15532_v45, %v4895_v49  ;;  %v4963_v38 = vmul.f32 %v13045_v37, %v15536_v28  ;;  %v4964_v49 = vmul.f32 %v13039_v26, %v15537_v56  ;;  %v13070_v45 = vsel %vm4791_vm12, %v9359_v5, %v4833_v54  ;;  %15541 = vst [vmem:[#allocation15_spill] sm:$0xff] %v13077_v51 }
 0x3dc   : > { %15533 = vst [vmem:[#allocation106_spill] sm:$0xff] %v13055_v25  ;;  %15538 = vst [vmem:[#allocation16_spill] sm:$0xff] %v13070_v45  ;;  %v4961_v13 = vmul.f32 %v13055_v25, %v15540_v40  ;;  %v9366_v33 = vadd.f32 %v12787_v17, %v12798_v20  ;;  %v4904_v29 = vrot.slane %v13063_v0, 7  ;;  %v4837_v56 = vmul.f32 %v9363_v15, %v12801_v24  ;;  %v15574_v25 = vld [vmem:[#allocation44_spill] sm:$0xff] }
 0x3dd   : > { %v4838_v5 = vmul.f32 %v9365_v61, %v12801_v24  ;;  %vm4796_vm6 = vcmp.ge.f32.partialorder %v9365_v61, 0.0  ;;  %v4989_v4 = vpack.c.bf16 %v4964_v49, %v4963_v38  ;;  %v13086_v54 = vsel %vm517_vm2, %v4899_v60, %v4900_v62 }
 0x3de   : > { %v4988_v44 = vpack.c.bf16 %v4962_v63, %v4961_v13  ;;  %15542 = vst [vmem:[#allocation6_spill] sm:$0xff] %v13086_v54  ;;  %v15543_v40 = vrot.slane %v12833_v23, 1  ;;  %v15544_v19 = vrot.slane %v12879_v6, 1  ;;  %v13096_v11 = vsel %vm4793_vm5, %v9364_v58, %v4835_v53 }
 0x3df   : > { %15546 = vst [vmem:[#allocation20_spill] sm:$0xff] %v13096_v11  ;;  %v15547_v63 = vrot.slane %v13018_v36, 7  ;;  %v13107_v28 = vsel %vm517_vm2, %v4900_v62, %v4901_v55  ;;  %v15551_v13 = vrot.slane %v12836_v2, 1  ;;  %vm4794_vm7 = vcmp.ge.f32.partialorder %v9366_v33, 0.0 }
 0x3e0   : > { %v13094_v20 = vsel %vm1556_vm4, %v15544_v19, %v15543_v40  ;;  %15549 = vst [vmem:[#allocation24_spill] sm:$0xff] %v13107_v28  ;;  %v15550_v49 = vmov %v15544_v19  ;;  %v15553_v53 = vrot.slane %v12940_v8, 7  ;;  %v13132_v40 = vsel %vm4796_vm6, %v9365_v61, %v4838_v5 }
 0x3e1   : > { %15545 = vst [vmem:[#allocation5_spill] sm:$0xff] %v13094_v20  ;;  %9048 = vmatmul.mubr.msk.bf16.gmra.mrb[8].mxu1 %vm791_vm3, %v4988_v44  ;;  %v13103_v38 = vsel %vm517_vm2, %v4901_v55, %v15547_v63  ;;  %v13115_v58 = vsel %vm1556_vm4, %v15551_v13, %v15550_v49  ;;  %v13130_v62 = vmul.f32 %v13094_v20, %v12582_v47  ;;  %15557 = vst [vmem:[#allocation28_spill] sm:$0xff] %v13132_v40  ;;  %v15558_v63 = vld [vmem:[#allocation35_spill] sm:$0xff]  ;;  %v15559_v13 = vld [vmem:[#allocation40_spill] sm:$0xff] }
 0x3e2   : > { %15548 = vst [vmem:[#allocation19_spill] sm:$0xff] %v13103_v38  ;;  %15552 = vst [vmem:[#allocation23_spill] sm:$0xff] %v13115_v58  ;;  %9051 = vmatprep.mubr.msk.bf16.mxu1 %vm791_vm3, %v4989_v4  ;;  %v13122_v44 = vsel %vm517_vm2, %v15553_v53, %v4899_v60  ;;  %v13126_v55 = vmul.f32 %v13115_v58, %v12584_v39  ;;  %v4836_v19 = vmul.f32 %v9366_v33, %v12801_v24  ;;  %v15560_v53 = vld [vmem:[#allocation39_spill] sm:$0xff] }
 0x3e3   : > { %15554 = vst [vmem:[#allocation27_spill] sm:$0xff] %v13122_v44  ;;  %15556 = vst [vmem:[#allocation31_spill] sm:$0xff] %v13130_v62  ;;  %v9367_v4 = vadd.f32 %v12809_v3, %v12787_v17  ;;  %v4966_v49 = vmul.f32 %v13086_v54, %v15558_v63  ;;  %v9370_v60 = vadd.f32 %v12787_v17, %v12823_v9  ;;  %v4905_v5 = vrot.slane %v13070_v45, 7  ;;  %v15561_v63 = vld [vmem:[#allocation36_spill] sm:$0xff] }
 0x3e4   : > { %15555 = vst [vmem:[#allocation32_spill] sm:$0xff] %v13126_v55  ;;  %v4967_v39 = vmul.f32 %v13107_v28, %v15559_v13  ;;  %v4968_v47 = vmul.f32 %v13103_v38, %v15560_v53  ;;  %v4906_v26 = vrot.slane %v13077_v51, 7  ;;  %v9369_v3 = vadd.f32 %v12815_v48, %v12787_v17  ;;  %v15572_v55 = vld [vmem:[#allocation47_spill] sm:$0xff] }
 0x3e5   : > { %v4965_v54 = vmul.f32 %v13122_v44, %v15561_v63  ;;  %v4903_v9 = vrot.slane %v13072_v21, 7  ;;  %v13155_v13 = vsel %vm4795_vm0, %v9363_v15, %v4837_v56  ;;  %v4907_v53 = vrot.slane %v13096_v11, 7 }
 0x3e6   : > { %15562 = vst [vmem:[#allocation35_spill] sm:$0xff] %v13155_v13  ;;  %v9368_v61 = vadd.f32 %v12787_v17, %v12811_v46  ;;  %v13162_v62 = vsel %vm4794_vm7, %v9366_v33, %v4836_v19  ;;  %v9372_v48 = vadd.f32 %v12787_v17, %v12845_v57  ;;  %vm4799_vm8 = vcmp.ge.f32.partialorder %v9367_v4, 0.0 }
 0x3e7   : > { %15563 = vst [vmem:[#allocation40_spill] sm:$0xff] %v13162_v62  ;;  %v4990_v38 = vpack.c.bf16 %v4966_v49, %v4965_v54  ;;  %v4840_v63 = vmul.f32 %v9370_v60, %v12801_v24  ;;  %v4991_v28 = vpack.c.bf16 %v4968_v47, %v4967_v39  ;;  %v13169_v15 = vsel %vm517_vm2, %v4903_v9, %v4904_v29 }
 0x3e8   : > { %15564 = vst [vmem:[#allocation39_spill] sm:$0xff] %v13169_v15  ;;  %v4842_v56 = vmul.f32 %v9369_v3, %v12801_v24  ;;  %vm4798_vm9 = vcmp.ge.f32.partialorder %v9370_v60, 0.0  ;;  %v13175_v46 = vsel %vm517_vm2, %v4905_v5, %v4906_v26  ;;  %v13179_v17 = vsel %vm517_vm2, %v4904_v29, %v4905_v5  ;;  %v15569_v29 = vld [vmem:[#allocation43_spill] sm:$0xff]  ;;  %v15571_v5 = vld [vmem:[#allocation48_spill] sm:$0xff] }
 0x3e9   : > { %9052 = vmatmul.mubr.msk.bf16.gmra.mrb[12].mxu1 %vm791_vm3, %v4990_v38  ;;  %15565 = vst [vmem:[#allocation36_spill] sm:$0xff] %v13175_v46  ;;  %15566 = vst [vmem:[#allocation274_spill] sm:$0xff] %v13179_v17  ;;  %v4841_v57 = vmul.f32 %v9367_v4, %v12801_v24  ;;  %v4839_v33 = vmul.f32 %v9368_v61, %v12801_v24  ;;  %vm4800_vm10 = vcmp.ge.f32.partialorder %v9369_v3, 0.0  ;;  %v15567_v54 = vrot.slane %v13018_v36, 7 }
 0x3ea   : > { %9055 = vmatprep.mubr.msk.bf16.mxu1 %vm791_vm3, %v4991_v28  ;;  %v4908_v19 = vrot.slane %v13162_v62, 7  ;;  %vm4797_vm11 = vcmp.ge.f32.partialorder %v9368_v61, 0.0  ;;  %v4843_v49 = vmul.f32 %v9372_v48, %v12801_v24  ;;  %v4970_v39 = vmul.f32 %v13169_v15, %v15569_v29 }
 0x3eb   : > { %v13188_v38 = vsel %vm517_vm2, %v15567_v54, %v4903_v9  ;;  %v13194_v47 = vsel %vm4798_vm9, %v9370_v60, %v4840_v63  ;;  %vm4801_vm12 = vcmp.ge.f32.partialorder %v9372_v48, 0.0  ;;  %v4971_v28 = vmul.f32 %v13179_v17, %v15571_v5  ;;  %v15585_v54 = vld [vmem:[#allocation55_spill] sm:$0xff]  ;;  %v15587_v17 = vld [vmem:[#allocation56_spill] sm:$0xff] }
 0x3ec   : > { %15568 = vst [vmem:[#allocation275_spill] sm:$0xff] %v13188_v38  ;;  %15570 = vst [vmem:[#allocation43_spill] sm:$0xff] %v13194_v47  ;;  %v4972_v44 = vmul.f32 %v13175_v46, %v15572_v55  ;;  %v13202_v37 = vsel %vm4800_vm10, %v9369_v3, %v4842_v56  ;;  %v4969_v24 = vmul.f32 %v13188_v38, %v15574_v25  ;;  %v4909_v60 = vrot.slane %v13155_v13, 7 }
 0x3ed   : > { %15573 = vst [vmem:[#allocation48_spill] sm:$0xff] %v13202_v37  ;;  %v13209_v63 = vsel %vm4799_vm8, %v9367_v4, %v4841_v57  ;;  %v13211_v5 = vsel %vm4797_vm11, %v9368_v61, %v4839_v33  ;;  %v4912_v55 = vrot.slane %v13194_v47, 7  ;;  %v13214_v46 = vsel %vm4801_vm12, %v9372_v48, %v4843_v49 }
 0x3ee   : > { %15575 = vst [vmem:[#allocation47_spill] sm:$0xff] %v13209_v63  ;;  %15576 = vst [vmem:[#allocation44_spill] sm:$0xff] %v13211_v5  ;;  %v4992_v9 = vpack.c.bf16 %v4970_v39, %v4969_v24  ;;  %v13218_v3 = vsel %vm517_vm2, %v4907_v53, %v4908_v19  ;;  %v4914_v25 = vrot.slane %v13202_v37, 7  ;;  %v4993_v56 = vpack.c.bf16 %v4972_v44, %v4971_v28  ;;  %v15583_v39 = vld [vmem:[#allocation51_spill] sm:$0xff] }
 0x3ef   : > { %15577 = vst [vmem:[#allocation276_spill] sm:$0xff] %v13214_v46  ;;  %15578 = vst [vmem:[#allocation277_spill] sm:$0xff] %v13218_v3  ;;  %v13223_v29 = vsel %vm517_vm2, %v4906_v26, %v4907_v53  ;;  %v15580_v4 = vrot.slane %v13132_v40, 7  ;;  %v5554_v48 = vrot.slane %v13072_v21, 1  ;;  %v5557_v57 = vrot.slane %v13077_v51, 1  ;;  %v15646_v51 = vld [vmem:[#allocation206_spill] sm:$0xff] }
 0x3f0   : > { %15579 = vst [vmem:[#allocation278_spill] sm:$0xff] %v13223_v29  ;;  %v4911_v33 = vrot.slane %v13211_v5, 7  ;;  %v13237_v44 = vsel %vm517_vm2, %v4908_v19, %v4909_v60  ;;  %v5555_v26 = vrot.slane %v13063_v0, 1  ;;  %v4913_v53 = vrot.slane %v13209_v63, 7 }
 0x3f1   : > { %v13229_v61 = vsel %vm517_vm2, %v4909_v60, %v15580_v4  ;;  %9056 = vmatmul.mubr.msk.bf16.gmra.mrb[16].mxu1 %vm791_vm3, %v4992_v9  ;;  %15582 = vst [vmem:[#allocation280_spill] sm:$0xff] %v13237_v44  ;;  %v4915_v49 = vrot.slane %v13214_v46, 7  ;;  %v4974_v28 = vmul.f32 %v13218_v3, %v15583_v39  ;;  %v5560_v24 = vrot.slane %v13155_v13, 1  ;;  %v15584_v4 = vld [vmem:[#allocation52_spill] sm:$0xff] }
 0x3f2   : > { %15581 = vst [vmem:[#allocation279_spill] sm:$0xff] %v13229_v61  ;;  %9059 = vmatprep.mubr.msk.bf16.mxu1 %vm791_vm3, %v4993_v56  ;;  %v4973_v9 = vmul.f32 %v13223_v29, %v15584_v4  ;;  %v4976_v19 = vmul.f32 %v13229_v61, %v15585_v54  ;;  %v13252_v60 = vsel %vm517_vm2, %v4911_v33, %v4912_v55  ;;  %v15590_v4 = vrot.slane %v12901_v52, 7 }
 0x3f3   : > { %15586 = vst [vmem:[#allocation51_spill] sm:$0xff] %v13252_v60  ;;  %v4975_v38 = vmul.f32 %v13237_v44, %v15587_v17  ;;  %v13258_v56 = vsel %vm517_vm2, %v4913_v53, %v4914_v25  ;;  %v13262_v39 = vsel %vm517_vm2, %v4912_v55, %v4913_v53  ;;  %v5558_v61 = vrot.slane %v13096_v11, 1  ;;  %v15594_v53 = vld [vmem:[#allocation59_spill] sm:$0xff]  ;;  %v15596_v11 = vld [vmem:[#allocation64_spill] sm:$0xff] }
 0x3f4   : > { %15588 = vst [vmem:[#allocation52_spill] sm:$0xff] %v13258_v56  ;;  %15589 = vst [vmem:[#allocation55_spill] sm:$0xff] %v13262_v39  ;;  %v13268_v54 = vsel %vm517_vm2, %v4915_v49, %v15590_v4  ;;  %v5561_v29 = vrot.slane %v13132_v40, 1  ;;  %v5559_v17 = vrot.slane %v13162_v62, 1  ;;  %v5564_v44 = vrot.slane %v13209_v63, 1  ;;  %v15597_v62 = vld [vmem:[#allocation63_spill] sm:$0xff] }
 0x3f5   : > { %15591 = vst [vmem:[#allocation56_spill] sm:$0xff] %v13268_v54  ;;  %v4994_v3 = vpack.c.bf16 %v4974_v28, %v4973_v9  ;;  %v15592_v15 = vrot.slane %v13132_v40, 7  ;;  %v4978_v13 = vmul.f32 %v13252_v60, %v15594_v53  ;;  %v13284_v4 = vsel %vm517_vm2, %v4914_v25, %v4915_v49  ;;  %v15598_v28 = vld [vmem:[#allocation67_spill] sm:$0xff]  ;;  %v15599_v40 = vld [vmem:[#allocation69_spill] sm:$0xff]  ;;  %v15602_v49 = vld [vmem:[#allocation180_spill] sm:$0xff] }
 0x3f6   : > { %15595 = vst [vmem:[#allocation59_spill] sm:$0xff] %v13284_v4  ;;  %v4979_v21 = vmul.f32 %v13262_v39, %v15596_v11  ;;  %v4980_v63 = vmul.f32 %v13258_v56, %v15597_v62  ;;  %v13292_v9 = vmul.f32 %v13268_v54, %v15598_v28  ;;  %v15600_v53 = vld [vmem:[#allocation181_spill] sm:$0xff]  ;;  %v13305_v11 = vmul.f32 %v12914_v59, %v15602_v49  ;;  %v15604_v28 = vld [vmem:[#allocation60_spill] sm:$0xff]  ;;  %v15606_v60 = vld [vmem:[#allocation70_spill] sm:$0xff] }
 0x3f7   : > { %v13278_v55 = vsel %vm517_vm2, %v15592_v15, %v4911_v33  ;;  %v13296_v15 = vmul.f32 %v12899_v43, %v15599_v40  ;;  %v5562_v33 = vrot.slane %v13211_v5, 1  ;;  %v13301_v25 = vmul.f32 %v12925_v16, %v15600_v53  ;;  %v15605_v40 = vld [vmem:[#allocation68_spill] sm:$0xff] }
 0x3f8   : > { %15593 = vst [vmem:[#allocation281_spill] sm:$0xff] %v13278_v55  ;;  %15603 = vst [vmem:[#allocation63_spill] sm:$0xff] %v13305_v11  ;;  %v4995_v39 = vpack.c.bf16 %v4976_v19, %v4975_v38  ;;  %v5565_v62 = vrot.slane %v13202_v37, 1  ;;  %v4977_v54 = vmul.f32 %v13278_v55, %v15604_v28  ;;  %v13313_v56 = vmul.f32 %v13284_v4, %v15605_v40 }
 0x3f9   : > { %15601 = vst [vmem:[#allocation64_spill] sm:$0xff] %v13301_v25  ;;  %9060 = vmatmul.mubr.msk.bf16.gmra.mrb[20].mxu1 %vm791_vm3, %v4994_v3  ;;  %v13317_v53 = vmul.f32 %v12890_v32, %v15606_v60  ;;  %v5563_v5 = vrot.slane %v13194_v47, 1  ;;  %v5566_v38 = vrot.slane %v13214_v46, 1  ;;  %v5567_v19 = vrot.slane %v12901_v52, 1  ;;  %v15632_v47 = vld [vmem:[#allocation195_spill] sm:$0xff] }
 0x3fa   : > { %9063 = vmatprep.mubr.msk.bf16.mxu1 %vm791_vm3, %v4995_v39  ;;  %v4996_v3 = vpack.c.bf16 %v4978_v13, %v4977_v54  ;;  %v4997_v28 = vpack.c.bf16 %v4980_v63, %v4979_v21  ;;  %v4998_v40 = vpack.c.bf16 %v13292_v9, %v13313_v56  ;;  %v15607_v60 = vrot.slane %v12933_v35, 1 }
 0x3fb   : > { %v5276_v4 = vpack.c.bf16 %v13296_v15, %v13317_v53  ;;  %v15608_v55 = vrot.slane %v12866_v22, 1  ;;  %v15610_v39 = vrot.slane %v12833_v23, 1  ;;  %v15611_v13 = vrot.slane %v12896_v1, 1 }
 0x3fc   : > { %v15612_v63 = vrot.slane %v12942_v14, 1  ;;  %v15614_v9 = vmov %v15607_v60  ;;  %v15616_v53 = vrot.slane %v12940_v8, 1  ;;  %v15619_v54 = vrot.slane %v12970_v7, 1 }
 0x3fd   : > { %v13334_v49 = vsel %vm1556_vm4, %v15608_v55, %v15607_v60  ;;  %v15609_v46 = vmov %v15608_v55  ;;  %v15622_v11 = vrot.slane %v13018_v36, 1 }
 0x3fe   : > { %v13342_v21 = vsel %vm1556_vm4, %v15610_v39, %v15609_v46  ;;  %v13350_v56 = vsel %vm1556_vm4, %v15612_v63, %v15611_v13  ;;  %v15613_v55 = vmov %v15612_v63  ;;  %v15615_v46 = vrot.slane %v12987_v18, 1 }
 0x3ff   : > { %v13360_v15 = vsel %vm1556_vm4, %v15614_v9, %v15613_v55  ;;  %v15617_v39 = vmov %v15616_v53  ;;  %v15620_v55 = vrot.slane %v13021_v30, 1  ;;  %v15624_v52 = vmov %v15619_v54 }
 0x400   : > { %v13368_v60 = vsel %vm1556_vm4, %v15616_v53, %v15615_v46  ;;  %v13376_v63 = vsel %vm1556_vm4, %v15611_v13, %v15617_v39  ;;  %v13398_v39 = vsel %vm1556_vm4, %v15622_v11, %v5554_v48  ;;  %v15623_v13 = vmov %v15622_v11 }
 0x401   : > { %15618 = vst [vmem:[#allocation67_spill] sm:$0xff] %v13376_v63  ;;  %v13384_v9 = vsel %vm1556_vm4, %v15620_v55, %v15619_v54  ;;  %v15621_v25 = vmov %v15620_v55  ;;  %v13406_v54 = vsel %vm1556_vm4, %v15624_v52, %v15623_v13  ;;  %v15625_v55 = vrot.slane %v13070_v45, 1  ;;  %9064 = vmatmul.mubr.msk.bf16.gmra.mrb[24].mxu1 %vm791_vm3, %v4996_v3  ;;  %v15628_v3 = vld [vmem:[#allocation191_spill] sm:$0xff] }
 0x402   : > { %v13392_v53 = vsel %vm1556_vm4, %v15615_v46, %v15621_v25  ;;  %v13416_v46 = vsel %vm1556_vm4, %v5554_v48, %v5555_v26  ;;  %v13420_v11 = vsel %vm1556_vm4, %v5557_v57, %v5558_v61  ;;  %v13430_v13 = vsel %vm1556_vm4, %v5559_v17, %v5560_v24  ;;  %9067 = vmatprep.mubr.msk.bf16.mxu1 %vm791_vm3, %v4997_v28  ;;  %v15636_v28 = vld [vmem:[#allocation199_spill] sm:$0xff] }
 0x403   : > { %v13412_v25 = vsel %vm1556_vm4, %v5555_v26, %v15625_v55  ;;  %v15626_v43 = vmov %v15625_v55  ;;  %v13434_v55 = vsel %vm1556_vm4, %v5558_v61, %v5559_v17  ;;  %v13438_v48 = vsel %vm1556_vm4, %v5561_v29, %v5562_v33 }
 0x404   : > { %v13426_v52 = vsel %vm1556_vm4, %v15626_v43, %v5557_v57  ;;  %v13442_v26 = vsel %vm1556_vm4, %v5560_v24, %v5561_v29  ;;  %v13446_v43 = vsel %vm1556_vm4, %v5563_v5, %v5564_v44  ;;  %v13451_v57 = vsel %vm1556_vm4, %v5562_v33, %v5563_v5  ;;  %v15630_v33 = vld [vmem:[#allocation190_spill] sm:$0xff] }
 0x405   : > { %v13455_v61 = vsel %vm1556_vm4, %v5565_v62, %v5566_v38  ;;  %v13459_v17 = vsel %vm1556_vm4, %v5564_v44, %v5565_v62  ;;  %v15627_v29 = vrot.slane %v12890_v32, 1  ;;  %v13470_v5 = vmul.f32 %v13115_v58, %v15628_v3  ;;  %v15634_v62 = vld [vmem:[#allocation194_spill] sm:$0xff] }
 0x406   : > { %v13474_v37 = vmul.f32 %v13094_v20, %v15630_v33  ;;  %v13478_v44 = vmul.f32 %v13342_v21, %v15632_v47  ;;  %v13482_v32 = vmul.f32 %v13334_v49, %v15634_v62  ;;  %v13490_v3 = vmul.f32 %v13360_v15, %v15636_v28  ;;  %v15638_v58 = vld [vmem:[#allocation198_spill] sm:$0xff]  ;;  %v15640_v20 = vld [vmem:[#allocation203_spill] sm:$0xff] }
 0x407   : > { %v13465_v24 = vsel %vm1556_vm4, %v5567_v19, %v15627_v29  ;;  %15629 = vst [vmem:[#allocation69_spill] sm:$0xff] %v13470_v5  ;;  %v13486_v29 = vsel %vm1556_vm4, %v5566_v38, %v5567_v19  ;;  %v13494_v33 = vmul.f32 %v13350_v56, %v15638_v58  ;;  %v13498_v47 = vmul.f32 %v13376_v63, %v15640_v20  ;;  %v15642_v38 = vld [vmem:[#allocation202_spill] sm:$0xff]  ;;  %v15644_v28 = vld [vmem:[#allocation207_spill] sm:$0xff] }
 0x408   : > { %15631 = vst [vmem:[#allocation181_spill] sm:$0xff] %v13474_v37  ;;  %15633 = vst [vmem:[#allocation180_spill] sm:$0xff] %v13478_v44  ;;  %v13506_v19 = vmul.f32 %v13368_v60, %v15642_v38  ;;  %v13510_v45 = vmul.f32 %v13392_v53, %v15644_v28  ;;  %v13516_v20 = vmul.f32 %v13384_v9, %v15646_v51  ;;  %v15648_v63 = vld [vmem:[#allocation211_spill] sm:$0xff]  ;;  %v15654_v58 = vld [vmem:[#allocation214_spill] sm:$0xff] }
 0x409   : > { %15635 = vst [vmem:[#allocation60_spill] sm:$0xff] %v13482_v32  ;;  %15637 = vst [vmem:[#allocation68_spill] sm:$0xff] %v13490_v3  ;;  %v13520_v62 = vmul.f32 %v13406_v54, %v15648_v63  ;;  %v13524_v44 = vmul.f32 %v13398_v39, %v15650_v50  ;;  %v15652_v28 = vld [vmem:[#allocation215_spill] sm:$0xff]  ;;  %v13534_v3 = vmul.f32 %v13412_v25, %v15654_v58  ;;  %v15658_v5 = vld [vmem:[#allocation218_spill] sm:$0xff]  ;;  %9068 = vmatmul.mubr.msk.bf16.gmra.mrb[28].mxu1 %vm791_vm3, %v4998_v40 }
 0x40a   : > { %15639 = vst [vmem:[#allocation70_spill] sm:$0xff] %v13494_v33  ;;  %15641 = vst [vmem:[#allocation191_spill] sm:$0xff] %v13498_v47  ;;  %v13530_v32 = vmul.f32 %v13416_v46, %v15652_v28  ;;  %v15656_v51 = vld [vmem:[#allocation219_spill] sm:$0xff]  ;;  %v13546_v38 = vmul.f32 %v13420_v11, %v15658_v5  ;;  %v15666_v50 = vld [vmem:[#allocation226_spill] sm:$0xff]  ;;  %9073 = vmatprep.mubr.msk.bf16.mxu1 %vm791_vm3, %v5276_v4 }
 0x40b   : > { %15643 = vst [vmem:[#allocation190_spill] sm:$0xff] %v13506_v19  ;;  %15645 = vst [vmem:[#allocation195_spill] sm:$0xff] %v13510_v45  ;;  %v13538_v33 = vmul.f32 %v13426_v52, %v15656_v51  ;;  %v15660_v28 = vld [vmem:[#allocation223_spill] sm:$0xff]  ;;  %v15662_v19 = vld [vmem:[#allocation222_spill] sm:$0xff] }
 0x40c   : > { %15647 = vst [vmem:[#allocation194_spill] sm:$0xff] %v13516_v20  ;;  %15649 = vst [vmem:[#allocation199_spill] sm:$0xff] %v13520_v62  ;;  %v13550_v47 = vmul.f32 %v13434_v55, %v15660_v28  ;;  %v13556_v51 = vmul.f32 %v13430_v13, %v15662_v19  ;;  %v15664_v37 = vld [vmem:[#allocation227_spill] sm:$0xff]  ;;  %v13564_v62 = vmul.f32 %v13438_v48, %v15666_v50  ;;  %v15674_v5 = vld [vmem:[#allocation234_spill] sm:$0xff] }
 0x40d   : > { %15651 = vst [vmem:[#allocation198_spill] sm:$0xff] %v13524_v44  ;;  %15653 = vst [vmem:[#allocation203_spill] sm:$0xff] %v13530_v32  ;;  %v13560_v63 = vmul.f32 %v13442_v26, %v15664_v37  ;;  %v15668_v28 = vld [vmem:[#allocation231_spill] sm:$0xff]  ;;  %v15670_v32 = vld [vmem:[#allocation230_spill] sm:$0xff] }
 0x40e   : > { %15655 = vst [vmem:[#allocation202_spill] sm:$0xff] %v13534_v3  ;;  %15657 = vst [vmem:[#allocation207_spill] sm:$0xff] %v13538_v33  ;;  %v13571_v58 = vmul.f32 %v13451_v57, %v15668_v28  ;;  %v13575_v19 = vmul.f32 %v13446_v43, %v15670_v32  ;;  %v15672_v3 = vld [vmem:[#allocation235_spill] sm:$0xff]  ;;  %v13588_v28 = vmul.f32 %v13455_v61, %v15674_v5  ;;  %v15679_v44 = vld [vmem:[#allocation238_spill] sm:$0xff] }
 0x40f   : > { %15659 = vst [vmem:[#allocation206_spill] sm:$0xff] %v13546_v38  ;;  %15661 = vst [vmem:[#allocation211_spill] sm:$0xff] %v13550_v47  ;;  %v13579_v37 = vmul.f32 %v13459_v17, %v15672_v3  ;;  %v15676_v33 = vld [vmem:[#allocation239_spill] sm:$0xff]  ;;  %v13600_v40 = vmul.f32 %v13465_v24, %v15679_v44  ;;  %v15681_v47 = vld [vmem:[#allocation73_spill] sm:$0xff]  ;;  %v5701_v44 = vsel %vm840_vm1, %v12967_v34, 0 }
 0x410   : > { %15663 = vst [vmem:[#allocation210_spill] sm:$0xff] %v13556_v51  ;;  %15665 = vst [vmem:[#allocation215_spill] sm:$0xff] %v13560_v63  ;;  %v13592_v32 = vmul.f32 %v13486_v29, %v15676_v33  ;;  %v15678_v38 = vld [vmem:[#allocation71_spill] sm:$0xff]  ;;  %v5249_v50 = vmul.f32 %v12819_v41, %v15681_v47  ;;  %v15682_v63 = vld [vmem:[#allocation72_spill] sm:$0xff]  ;;  %v13620_v47 = vmul.f32 %v12925_v16, %v12352_v42 }
 0x411   : > { %15667 = vst [vmem:[#allocation214_spill] sm:$0xff] %v13564_v62  ;;  %15669 = vst [vmem:[#allocation219_spill] sm:$0xff] %v13571_v58  ;;  %v5247_v3 = vmul.f32 %v12813_v12, %v15678_v38  ;;  %v5246_v33 = vmul.f32 %v12825_v27, %v15682_v63  ;;  %v15683_v38 = vld [vmem:[#allocation74_spill] sm:$0xff]  ;;  %v13624_v63 = vmul.f32 %v12914_v59, %v12350_v10  ;;  %v15687_v34 = vld [vmem:[#allocation77_spill] sm:$0xff] }
 0x412   : > { %15671 = vst [vmem:[#allocation218_spill] sm:$0xff] %v13575_v19  ;;  %15673 = vst [vmem:[#allocation223_spill] sm:$0xff] %v13579_v37  ;;  %v5248_v51 = vmul.f32 %v12817_v31, %v15683_v38  ;;  %v13615_v19 = vld [vmem:[%s10185_s10 + $0xc] sm:$0xf]  ;;  %v15689_v16 = vld [vmem:[#allocation78_spill] sm:$0xff] }
 0x413   : > { %15675 = vst [vmem:[#allocation222_spill] sm:$0xff] %v13588_v28  ;;  %15677 = vst [vmem:[#allocation227_spill] sm:$0xff] %v13592_v32  ;;  %v5277_v4 = vpack.c.bf16 %v5247_v3, %v5246_v33  ;;  %v15686_v3 = vld [vmem:[#allocation75_spill] sm:$0xff]  ;;  %v15692_v62 = vld [vmem:[#allocation80_spill] sm:$0xff] }
 0x414   : > { %15680 = vst [vmem:[#allocation226_spill] sm:$0xff] %v13600_v40  ;;  %v5278_v58 = vpack.c.bf16 %v5249_v50, %v5248_v51  ;;  %15684 = vst [vmem:[#allocation231_spill] sm:$0xff] %v13620_v47  ;;  %v5251_v33 = vmul.f32 %v12879_v6, %v15686_v3  ;;  %v5253_v51 = vmul.f32 %v12866_v22, %v15687_v34  ;;  %v15688_v50 = vld [vmem:[#allocation76_spill] sm:$0xff]  ;;  %v15690_v38 = vld [vmem:[#allocation79_spill] sm:$0xff] }
 0x415   : > { %9074 = vmatmul.mubr.msk.bf16.vlgmr.msra.gmra.mrb[0].mxu1 %vm791_vm3, %v5277_v4  ;;  %15685 = vst [vmem:[#allocation230_spill] sm:$0xff] %v13624_v63  ;;  %v5250_v42 = vmul.f32 %v12836_v2, %v15688_v50  ;;  %v5252_v4 = vmul.f32 %v12833_v23, %v15689_v16  ;;  %v15691_v3 = vld [vmem:[#allocation81_spill] sm:$0xff]  ;;  %v5254_v50 = vmul.f32 %v12933_v35, %v15692_v62  ;;  %v15693_v5 = vld [vmem:[#allocation82_spill] sm:$0xff]  ;;  %v15694_v10 = vld [vmem:[#allocation83_spill] sm:$0xff] }
 0x416   : > { %9106 = vmatpush3.bf16.msra.mxu1 %v5701_v44  ;;  %9077 = vmatprep.mubr.msk.bf16.mxu1 %vm791_vm3, %v5278_v58  ;;  %v5255_v44 = vmul.f32 %v12942_v14, %v15690_v38  ;;  %v5257_v34 = vmul.f32 %v12940_v8, %v15691_v3  ;;  %v5256_v16 = vmul.f32 %v12896_v1, %v15693_v5  ;;  %v15697_v38 = vld [vmem:[#allocation86_spill] sm:$0xff]  ;;  %v15698_v5 = vld [vmem:[#allocation192_spill] sm:$0xff]  ;;  %v15726_v37 = vld [vmem:[#allocation217_spill] sm:$0xff] }
 0x417   : > { %9931 = vmatprep.subr.msk.bf16.mxu1 %vm840_vm1, %v13615_v19  ;;  %v5279_v59 = vpack.c.bf16 %v5251_v33, %v5250_v42  ;;  %v5280_v58 = vpack.c.bf16 %v5253_v51, %v5252_v4  ;;  %v5259_v33 = vmul.f32 %v13021_v30, %v15694_v10  ;;  %v15695_v42 = vld [vmem:[#allocation85_spill] sm:$0xff]  ;;  %v5260_v62 = vmul.f32 %v12970_v7, %v15697_v38 }
 0x418   : > { %v5281_v32 = vpack.c.bf16 %v5255_v44, %v5254_v50  ;;  %v5282_v51 = vpack.c.bf16 %v5257_v34, %v5256_v16  ;;  %v5261_v4 = vmul.f32 %v13018_v36, %v15695_v42  ;;  %v13661_v44 = vmul.f32 %v13342_v21, %v15698_v5  ;;  %v15700_v10 = vld [vmem:[#allocation193_spill] sm:$0xff]  ;;  %v15702_v16 = vld [vmem:[#allocation87_spill] sm:$0xff]  ;;  %v15703_v42 = vld [vmem:[#allocation196_spill] sm:$0xff] }
 0x419   : > { %v13665_v34 = vmul.f32 %v13334_v49, %v15700_v10  ;;  %v15708_v5 = vld [vmem:[#allocation67_spill] sm:$0xff]  ;;  %v15710_v10 = vld [vmem:[#allocation201_spill] sm:$0xff] }
 0x41a   : > { %15699 = vst [vmem:[#allocation235_spill] sm:$0xff] %v13661_v44  ;;  %v5284_v50 = vpack.c.bf16 %v5261_v4, %v5260_v62  ;;  %v13685_v4 = vmul.f32 %v13368_v60, %v15710_v10  ;;  %v15712_v62 = vld [vmem:[#allocation204_spill] sm:$0xff]  ;;  %v13725_v10 = vmul.f32 %v13420_v11, %v15726_v37 }
 0x41b   : > { %15701 = vst [vmem:[#allocation234_spill] sm:$0xff] %v13665_v34 }
 0x41c   : > { %15711 = vst [vmem:[#allocation73_spill] sm:$0xff] %v13685_v4  ;;  %15727 = vst [vmem:[#allocation81_spill] sm:$0xff] %v13725_v10  ;;  %v15747_v10 = vld [vmem:[#allocation15_spill] sm:$0xff] }
 0x41d   : > { %9078 = vmatmul.mubr.msk.bf16.gmra.mrb[4].mxu1 %vm791_vm3, %v5279_v59  ;;  %v15696_v59 = vld [vmem:[#allocation84_spill] sm:$0xff] }
 0x41e   : > { %9081 = vmatprep.mubr.msk.bf16.mxu1 %vm791_vm3, %v5280_v58  ;;  %v5258_v58 = vmul.f32 %v12987_v18, %v15696_v59  ;;  %v13671_v59 = vmul.f32 %v13360_v15, %v15703_v42  ;;  %v15722_v42 = vld [vmem:[#allocation213_spill] sm:$0xff] }
 0x420   : > { %v5283_v3 = vpack.c.bf16 %v5259_v33, %v5258_v58  ;;  %15704 = vst [vmem:[#allocation239_spill] sm:$0xff] %v13671_v59  ;;  %v15707_v58 = vld [vmem:[#allocation200_spill] sm:$0xff]  ;;  %v13713_v59 = vmul.f32 %v13412_v25, %v15722_v42 }
 0x421   : > { %v13681_v47 = vmul.f32 %v15708_v5, %v15707_v58  ;;  %v15716_v33 = vld [vmem:[#allocation208_spill] sm:$0xff]  ;;  %v15718_v58 = vld [vmem:[#allocation209_spill] sm:$0xff] }
 0x422   : > { %v13699_v44 = vmul.f32 %v13406_v54, %v15716_v33  ;;  %v13703_v34 = vmul.f32 %v13398_v39, %v15718_v58  ;;  %15723 = vst [vmem:[#allocation78_spill] sm:$0xff] %v13713_v59  ;;  %v15732_v33 = vld [vmem:[#allocation224_spill] sm:$0xff] }
 0x423   : > { %15709 = vst [vmem:[#allocation238_spill] sm:$0xff] %v13681_v47  ;;  %v13740_v58 = vmul.f32 %v13442_v26, %v15732_v33  ;;  %v15740_v59 = vld [vmem:[#allocation232_spill] sm:$0xff] }
 0x424   : > { %15717 = vst [vmem:[#allocation75_spill] sm:$0xff] %v13699_v44  ;;  %15719 = vst [vmem:[#allocation77_spill] sm:$0xff] %v13703_v34  ;;  %v15734_v44 = vld [vmem:[#allocation225_spill] sm:$0xff]  ;;  %v13759_v33 = vmul.f32 %v13459_v17, %v15740_v59  ;;  %v15755_v59 = vld [vmem:[#allocation40_spill] sm:$0xff] }
 0x425   : > { %9082 = vmatmul.mubr.msk.bf16.gmra.mrb[8].mxu1 %vm791_vm3, %v5281_v32  ;;  %v5263_v32 = vmul.f32 %v13063_v0, %v15702_v16  ;;  %v13689_v16 = vmul.f32 %v13392_v53, %v15712_v62  ;;  %v15720_v62 = vld [vmem:[#allocation212_spill] sm:$0xff]  ;;  %15733 = vst [vmem:[#allocation83_spill] sm:$0xff] %v13740_v58  ;;  %v13744_v37 = vmul.f32 %v13438_v48, %v15734_v44  ;;  %v15742_v34 = vld [vmem:[#allocation233_spill] sm:$0xff] }
 0x426   : > { %9085 = vmatprep.mubr.msk.bf16.mxu1 %vm791_vm3, %v5282_v51  ;;  %v15705_v51 = vld [vmem:[#allocation197_spill] sm:$0xff]  ;;  %v13709_v40 = vmul.f32 %v13416_v46, %v15720_v62  ;;  %v15728_v62 = vld [vmem:[#allocation220_spill] sm:$0xff]  ;;  %15741 = vst [vmem:[#allocation192_spill] sm:$0xff] %v13759_v33 }
 0x427   : > { %v13675_v38 = vmul.f32 %v13350_v56, %v15705_v51  ;;  %15713 = vst [vmem:[#allocation72_spill] sm:$0xff] %v13689_v16  ;;  %v15714_v51 = vld [vmem:[#allocation205_spill] sm:$0xff]  ;;  %v13729_v47 = vmul.f32 %v13434_v55, %v15728_v62  ;;  %15735 = vst [vmem:[#allocation85_spill] sm:$0xff] %v13744_v37  ;;  %v15736_v62 = vld [vmem:[#allocation228_spill] sm:$0xff] }
 0x428   : > { %v13695_v63 = vmul.f32 %v13384_v9, %v15714_v51  ;;  %15721 = vst [vmem:[#allocation76_spill] sm:$0xff] %v13709_v40  ;;  %v15724_v51 = vld [vmem:[#allocation216_spill] sm:$0xff]  ;;  %v13751_v42 = vmul.f32 %v13451_v57, %v15736_v62  ;;  %v15738_v40 = vld [vmem:[#allocation229_spill] sm:$0xff]  ;;  %v15752_v37 = vld [vmem:[#allocation90_spill] sm:$0xff] }
 0x429   : > { %15706 = vst [vmem:[#allocation71_spill] sm:$0xff] %v13675_v38  ;;  %v13717_v38 = vmul.f32 %v13426_v52, %v15724_v51  ;;  %15729 = vst [vmem:[#allocation80_spill] sm:$0xff] %v13729_v47  ;;  %v15730_v51 = vld [vmem:[#allocation221_spill] sm:$0xff]  ;;  %v15744_v62 = vld [vmem:[#allocation236_spill] sm:$0xff] }
 0x42a   : > { %15715 = vst [vmem:[#allocation74_spill] sm:$0xff] %v13695_v63  ;;  %v13736_v4 = vmul.f32 %v13430_v13, %v15730_v51  ;;  %15737 = vst [vmem:[#allocation84_spill] sm:$0xff] %v13751_v42  ;;  %v13755_v51 = vmul.f32 %v13446_v43, %v15738_v40  ;;  %v15746_v40 = vld [vmem:[#allocation89_spill] sm:$0xff]  ;;  %v15750_v47 = vld [vmem:[#allocation88_spill] sm:$0xff] }
 0x42b   : > { %15725 = vst [vmem:[#allocation79_spill] sm:$0xff] %v13717_v38  ;;  %v13771_v38 = vmul.f32 %v13486_v29, %v15744_v62  ;;  %v5265_v16 = vmul.f32 %v15747_v10, %v15746_v40  ;;  %v15748_v63 = vld [vmem:[#allocation237_spill] sm:$0xff]  ;;  %v15758_v10 = vld [vmem:[#allocation92_spill] sm:$0xff] }
 0x42c   : > { %15731 = vst [vmem:[#allocation82_spill] sm:$0xff] %v13736_v4  ;;  %15739 = vst [vmem:[#allocation86_spill] sm:$0xff] %v13755_v51  ;;  %v13779_v44 = vmul.f32 %v13465_v24, %v15748_v63  ;;  %v15753_v4 = vld [vmem:[#allocation16_spill] sm:$0xff]  ;;  %v15754_v63 = vld [vmem:[#allocation91_spill] sm:$0xff] }
 0x42d   : > { %9086 = vmatmul.mubr.msk.bf16.gmra.mrb[12].mxu1 %vm791_vm3, %v5283_v3  ;;  %v13767_v3 = vmul.f32 %v13455_v61, %v15742_v34  ;;  %15745 = vst [vmem:[#allocation87_spill] sm:$0xff] %v13771_v38  ;;  %v5264_v62 = vmul.f32 %v15753_v4, %v15752_v37  ;;  %v5267_v42 = vmul.f32 %v15755_v59, %v15754_v63  ;;  %v15756_v51 = vld [vmem:[#allocation93_spill] sm:$0xff]  ;;  %v15759_v34 = vld [vmem:[#allocation20_spill] sm:$0xff]  ;;  %v15761_v37 = vld [vmem:[#allocation35_spill] sm:$0xff] }
 0x42e   : > { %9089 = vmatprep.mubr.msk.bf16.mxu1 %vm791_vm3, %v5284_v50  ;;  %15749 = vst [vmem:[#allocation196_spill] sm:$0xff] %v13779_v44  ;;  %v15751_v50 = vld [vmem:[#allocation12_spill] sm:$0xff]  ;;  %v5266_v33 = vmul.f32 %v15759_v34, %v15758_v10  ;;  %v15766_v63 = vld [vmem:[#allocation135_spill] sm:$0xff] }
 0x42f   : > { %15743 = vst [vmem:[#allocation193_spill] sm:$0xff] %v13767_v3  ;;  %v5262_v58 = vmul.f32 %v15751_v50, %v15750_v47  ;;  %v5286_v45 = vpack.c.bf16 %v5265_v16, %v5264_v62  ;;  %v15757_v47 = vld [vmem:[#allocation28_spill] sm:$0xff]  ;;  %v15760_v3 = vld [vmem:[#allocation94_spill] sm:$0xff]  ;;  %v15770_v59 = vld [vmem:[#allocation47_spill] sm:$0xff] }
 0x430   : > { %v5269_v20 = vmul.f32 %v15757_v47, %v15756_v51  ;;  %v5268_v4 = vmul.f32 %v15761_v37, %v15760_v3  ;;  %v5287_v0 = vpack.c.bf16 %v5267_v42, %v5266_v33  ;;  %v15765_v62 = vld [vmem:[#allocation48_spill] sm:$0xff]  ;;  %v5569_v51 = vrot.slane %v15766_v63, 1  ;;  %v15769_v47 = vld [vmem:[#allocation98_spill] sm:$0xff]  ;;  %v15792_v33 = vld [vmem:[#allocation23_spill] sm:$0xff] }
 0x431   : > { %v5285_v40 = vpack.c.bf16 %v5263_v32, %v5262_v58  ;;  %v15762_v32 = vld [vmem:[#allocation95_spill] sm:$0xff]  ;;  %v15764_v58 = vld [vmem:[#allocation97_spill] sm:$0xff]  ;;  %v15767_v38 = vld [vmem:[#allocation96_spill] sm:$0xff]  ;;  %v5272_v3 = vmul.f32 %v15770_v59, %v15769_v47  ;;  %v5540_v59 = vrot.slane %v12817_v31, 1 }
 0x432   : > { %v5288_v28 = vpack.c.bf16 %v5269_v20, %v5268_v4  ;;  %v15768_v44 = vld [vmem:[#allocation44_spill] sm:$0xff]  ;;  %v5538_v20 = vrot.slane %v12825_v27, 1  ;;  %v15777_v47 = vld [vmem:[#allocation138_spill] sm:$0xff] }
 0x433   : > { %v5270_v10 = vmul.f32 %v15768_v44, %v15767_v38  ;;  %v15776_v38 = vld [vmem:[#allocation99_spill] sm:$0xff] }
 0x434   : > { %v5275_v63 = vmul.f32 %v15777_v47, %v15776_v38 }
 0x435   : > { %9090 = vmatmul.mubr.msk.bf16.gmra.mrb[16].mxu1 %vm791_vm3, %v5285_v40  ;;  %v5273_v40 = vmul.f32 %v15765_v62, %v15764_v58  ;;  %v13820_v58 = vsel %vm1556_vm4, %v5569_v51, %v5538_v20 }
 0x436   : > { %9093 = vmatprep.mubr.msk.bf16.mxu1 %vm791_vm3, %v5286_v45  ;;  %v15763_v45 = vld [vmem:[#allocation43_spill] sm:$0xff]  ;;  %15775 = vst [vmem:[#allocation200_spill] sm:$0xff] %v13820_v58 }
 0x437   : > { %v5271_v16 = vmul.f32 %v15763_v45, %v15762_v32  ;;  %v13865_v45 = vld [vmem:[%s10185_s10 + $0x10] sm:$0xf] }
 0x439   : > { %v5289_v4 = vpack.c.bf16 %v5271_v16, %v5270_v10  ;;  %v5539_v16 = vrot.slane %v12813_v12, 1 }
 0x43b   : > { %v13836_v38 = vsel %vm1556_vm4, %v5539_v16, %v5540_v59  ;;  %v13840_v47 = vsel %vm1556_vm4, %v5538_v20, %v5539_v16  ;;  %v15789_v16 = vld [vmem:[#allocation109_spill] sm:$0xff] }
 0x43c   : > { %15782 = vst [vmem:[#allocation67_spill] sm:$0xff] %v13836_v38  ;;  %15783 = vst [vmem:[#allocation201_spill] sm:$0xff] %v13840_v47 }
 0x43d   : > { %9094 = vmatmul.mubr.msk.bf16.gmra.mrb[20].mxu1 %vm791_vm3, %v5287_v0  ;;  %v5290_v0 = vpack.c.bf16 %v5273_v40, %v5272_v3  ;;  %v15778_v40 = vld [vmem:[#allocation104_spill] sm:$0xff]  ;;  %v15779_v3 = vld [vmem:[#allocation103_spill] sm:$0xff] }
 0x43e   : > { %9097 = vmatprep.mubr.msk.bf16.mxu1 %vm791_vm3, %v5288_v28  ;;  %v15771_v28 = vld [vmem:[#allocation134_spill] sm:$0xff] }
 0x43f   : > { %v15772_v42 = vrot.slane %v15771_v28, 1  ;;  %v15780_v28 = vld [vmem:[#allocation100_spill] sm:$0xff] }
 0x441   : > { %v13816_v32 = vsel %vm1556_vm4, %v15772_v42, %v5569_v51  ;;  %v15781_v42 = vld [vmem:[#allocation276_spill] sm:$0xff]  ;;  %v5541_v51 = vrot.slane %v12819_v41, 1 }
 0x442   : > { %15774 = vst [vmem:[#allocation197_spill] sm:$0xff] %v13816_v32  ;;  %v5602_v10 = vmul.f32 %v13816_v32, %v15778_v40  ;;  %v5274_v62 = vmul.f32 %v15781_v42, %v15780_v28 }
 0x443   : > { %v13856_v20 = vsel %vm1556_vm4, %v5540_v59, %v5541_v51  ;;  %v15791_v59 = vld [vmem:[#allocation114_spill] sm:$0xff] }
 0x444   : > { %15788 = vst [vmem:[#allocation205_spill] sm:$0xff] %v13856_v20 }
 0x445   : > { %9098 = vmatmul.mubr.msk.bf16.gmra.mrb[24].mxu1 %vm791_vm3, %v5289_v4  ;;  %v5603_v4 = vmul.f32 %v13820_v58, %v15779_v3  ;;  %v15784_v3 = vrot.slane %v12836_v2, 1  ;;  %v15787_v58 = vld [vmem:[#allocation107_spill] sm:$0xff] }
 0x446   : > { %9101 = vmatprep.mubr.msk.bf16.mxu1 %vm791_vm3, %v5290_v0  ;;  %v5291_v0 = vpack.c.bf16 %v5275_v63, %v5274_v62  ;;  %v15786_v62 = vld [vmem:[#allocation108_spill] sm:$0xff]  ;;  %v5605_v32 = vmul.f32 %v13836_v38, %v15787_v58  ;;  %v5608_v58 = vmul.f32 %v15792_v33, %v15791_v59  ;;  %v15799_v33 = vld [vmem:[#allocation119_spill] sm:$0xff] }
 0x447   : > { %v5634_v40 = vpack.c.bf16 %v5603_v4, %v5602_v10  ;;  %v13847_v28 = vsel %vm1556_vm4, %v5541_v51, %v15784_v3  ;;  %v5604_v63 = vmul.f32 %v13840_v47, %v15786_v62  ;;  %v15790_v4 = vld [vmem:[#allocation110_spill] sm:$0xff]  ;;  %v15793_v51 = vld [vmem:[#allocation113_spill] sm:$0xff] }
 0x448   : > { %15785 = vst [vmem:[#allocation204_spill] sm:$0xff] %v13847_v28  ;;  %v5607_v10 = vmul.f32 %v13847_v28, %v15789_v16  ;;  %v15794_v62 = vld [vmem:[#allocation5_spill] sm:$0xff] }
 0x449   : > { %v5635_v3 = vpack.c.bf16 %v5605_v32, %v5604_v63  ;;  %v5609_v16 = vmul.f32 %v15794_v62, %v15793_v51  ;;  %v15795_v32 = vld [vmem:[#allocation115_spill] sm:$0xff]  ;;  %v15796_v63 = vld [vmem:[#allocation116_spill] sm:$0xff]  ;;  %v5615_v51 = vmul.f32 %v13368_v60, %v15799_v33 }
 0x44a   : > { %v15800_v62 = vld [vmem:[#allocation120_spill] sm:$0xff] }
 0x44d   : > { %9102 = vmatmul.mubr.msk.bf16.gmra.mrb[28].mxu1 %vm791_vm3, %v5291_v0  ;;  %v5606_v0 = vmul.f32 %v13856_v20, %v15790_v4  ;;  %v5637_v4 = vpack.c.bf16 %v5609_v16, %v5608_v58  ;;  %v15801_v58 = vld [vmem:[#allocation122_spill] sm:$0xff] }
 0x44e   : > { %9107 = vmatprep.mubr.msk.bf16.mxu1 %vm791_vm3, %v5634_v40  ;;  %v5995_v40 = vsel %vm840_vm1, %v13615_v19, 0  ;;  %v5611_v19 = vmul.f32 %v13334_v49, %v15795_v32  ;;  %v5614_v49 = vmul.f32 %v15708_v5, %v15800_v62  ;;  %v5616_v16 = vmul.f32 %v13392_v53, %v15801_v58 }
 0x44f   : > { %v5636_v42 = vpack.c.bf16 %v5607_v10, %v5606_v0  ;;  %v5610_v10 = vmul.f32 %v13342_v21, %v15796_v63  ;;  %v15803_v63 = vld [vmem:[#allocation123_spill] sm:$0xff] }
 0x450   : > { %v5640_v21 = vpack.c.bf16 %v5615_v51, %v5614_v49  ;;  %v15809_v51 = vld [vmem:[#allocation133_spill] sm:$0xff]  ;;  %v15810_v49 = vld [vmem:[#allocation132_spill] sm:$0xff] }
 0x451   : > { %v5638_v0 = vpack.c.bf16 %v5611_v19, %v5610_v10  ;;  %v15802_v19 = vld [vmem:[#allocation121_spill] sm:$0xff]  ;;  %v15804_v10 = vld [vmem:[#allocation124_spill] sm:$0xff]  ;;  %v5624_v62 = vmul.f32 %v13434_v55, %v15809_v51  ;;  %v15827_v51 = vld [vmem:[#allocation154_spill] sm:$0xff] }
 0x452   : > { %v5618_v60 = vmul.f32 %v13406_v54, %v15804_v10 }
 0x455   : > { %9108 = vmatmul.mubr.msk.bf16.vlgmr.msra.gmra.mrb[0].mxu1 %vm791_vm3, %v5635_v3 }
 0x456   : > { %9140 = vmatpush3.bf16.msra.mxu1 %v5995_v40  ;;  %9111 = vmatprep.mubr.msk.bf16.mxu1 %vm791_vm3, %v5636_v42  ;;  %v15797_v42 = vld [vmem:[#allocation118_spill] sm:$0xff]  ;;  %v15798_v40 = vld [vmem:[#allocation117_spill] sm:$0xff] }
 0x457   : > { %9932 = vmatprep.subr.msk.bf16.mxu1 %vm840_vm1, %v13865_v45  ;;  %v5612_v3 = vmul.f32 %v13360_v15, %v15797_v42  ;;  %v5613_v59 = vmul.f32 %v13350_v56, %v15798_v40  ;;  %v5617_v15 = vmul.f32 %v13384_v9, %v15802_v19  ;;  %v5619_v56 = vmul.f32 %v13398_v39, %v15803_v63  ;;  %v15807_v40 = vld [vmem:[#allocation128_spill] sm:$0xff] }
 0x458   : > { %v5623_v9 = vmul.f32 %v13420_v11, %v15807_v40  ;;  %v15815_v63 = vld [vmem:[#allocation144_spill] sm:$0xff] }
 0x459   : > { %v5639_v32 = vpack.c.bf16 %v5613_v59, %v5612_v3  ;;  %v5642_v5 = vpack.c.bf16 %v5619_v56, %v5618_v60  ;;  %v15806_v3 = vld [vmem:[#allocation125_spill] sm:$0xff] }
 0x45a   : > { %v5621_v53 = vmul.f32 %v13412_v25, %v15806_v3  ;;  %v15808_v59 = vld [vmem:[#allocation129_spill] sm:$0xff]  ;;  %v15822_v3 = vld [vmem:[#allocation127_spill] sm:$0xff] }
 0x45b   : > { %v5622_v39 = vmul.f32 %v13426_v52, %v15808_v59  ;;  %v15816_v56 = vld [vmem:[#allocation145_spill] sm:$0xff]  ;;  %v15824_v59 = vld [vmem:[#allocation130_spill] sm:$0xff] }
 0x45c   : > { %v15817_v60 = vld [vmem:[#allocation149_spill] sm:$0xff] }
 0x45d   : > { %9112 = vmatmul.mubr.msk.bf16.gmra.mrb[4].mxu1 %vm791_vm3, %v5637_v4  ;;  %v5641_v4 = vpack.c.bf16 %v5617_v15, %v5616_v16  ;;  %v5644_v54 = vpack.c.bf16 %v5623_v9, %v5622_v39  ;;  %v15813_v16 = vld [vmem:[#allocation141_spill] sm:$0xff]  ;;  %v15814_v15 = vld [vmem:[#allocation140_spill] sm:$0xff] }
 0x45e   : > { %9115 = vmatprep.mubr.msk.bf16.mxu1 %vm791_vm3, %v5638_v0  ;;  %v15805_v0 = vld [vmem:[#allocation126_spill] sm:$0xff]  ;;  %v5628_v19 = vmul.f32 %v13451_v57, %v15813_v16  ;;  %v5629_v55 = vmul.f32 %v13446_v43, %v15814_v15  ;;  %v15818_v57 = vld [vmem:[#allocation148_spill] sm:$0xff]  ;;  %v15819_v43 = vld [vmem:[#allocation151_spill] sm:$0xff] }
 0x45f   : > { %v5620_v42 = vmul.f32 %v13416_v46, %v15805_v0  ;;  %v5625_v46 = vmul.f32 %v13430_v13, %v15810_v49  ;;  %v5631_v13 = vmul.f32 %v13455_v61, %v15815_v63  ;;  %v15820_v0 = vld [vmem:[#allocation139_spill] sm:$0xff]  ;;  %v15821_v61 = vld [vmem:[#allocation150_spill] sm:$0xff]  ;;  %v15823_v9 = vld [vmem:[#allocation153_spill] sm:$0xff] }
 0x460   : > { %v5647_v10 = vpack.c.bf16 %v5629_v55, %v5628_v19  ;;  %v5898_v39 = vmul.f32 %v15824_v59, %v15823_v9  ;;  %v15829_v49 = vld [vmem:[#allocation155_spill] sm:$0xff]  ;;  %v15833_v15 = vld [vmem:[#allocation156_spill] sm:$0xff]  ;;  %v15834_v55 = vld [vmem:[#allocation146_spill] sm:$0xff] }
 0x461   : > { %v5643_v33 = vpack.c.bf16 %v5621_v53, %v5620_v42  ;;  %v5645_v58 = vpack.c.bf16 %v5625_v46, %v5624_v62  ;;  %v5896_v42 = vmul.f32 %v15820_v0, %v15819_v43  ;;  %v5897_v53 = vmul.f32 %v15822_v3, %v15821_v61  ;;  %v15830_v46 = vld [vmem:[#allocation143_spill] sm:$0xff]  ;;  %v15842_v61 = vld [vmem:[#allocation102_spill] sm:$0xff] }
 0x462   : > { %v15832_v16 = vld [vmem:[#allocation147_spill] sm:$0xff]  ;;  %v5903_v63 = vmul.f32 %v15834_v55, %v15833_v15 }
 0x463   : > { %v5928_v40 = vpack.c.bf16 %v5897_v53, %v5896_v42  ;;  %v15841_v42 = vld [vmem:[#allocation160_spill] sm:$0xff]  ;;  %v15852_v15 = vld [vmem:[#allocation39_spill] sm:$0xff] }
 0x464   : > { %v5907_v53 = vmul.f32 %v15842_v61, %v15841_v42  ;;  %v15857_v42 = vld [vmem:[#allocation168_spill] sm:$0xff]  ;;  %v15869_v3 = vld [vmem:[#allocation175_spill] sm:$0xff] }
 0x465   : > { %9116 = vmatmul.mubr.msk.bf16.gmra.mrb[8].mxu1 %vm791_vm3, %v5639_v32  ;;  %v15811_v32 = vld [vmem:[#allocation136_spill] sm:$0xff] }
 0x466   : > { %9119 = vmatprep.mubr.msk.bf16.mxu1 %vm791_vm3, %v5640_v21  ;;  %v5627_v25 = vmul.f32 %v13438_v48, %v15811_v32  ;;  %v15812_v21 = vld [vmem:[#allocation137_spill] sm:$0xff]  ;;  %v5630_v48 = vmul.f32 %v13459_v17, %v15816_v56  ;;  %v5900_v32 = vmul.f32 %v15830_v46, %v15829_v49 }
 0x467   : > { %v5626_v11 = vmul.f32 %v13442_v26, %v15812_v21  ;;  %v6257_v21 = vsel %vm840_vm1, %v13865_v45, 0  ;;  %v15836_v56 = vld [vmem:[#allocation101_spill] sm:$0xff]  ;;  %v15838_v45 = vld [vmem:[#allocation106_spill] sm:$0xff] }
 0x468   : > { %v5648_v26 = vpack.c.bf16 %v5631_v13, %v5630_v48  ;;  %v15835_v13 = vld [vmem:[#allocation158_spill] sm:$0xff]  ;;  %v15847_v49 = vld [vmem:[#allocation165_spill] sm:$0xff] }
 0x469   : > { %v5646_v52 = vpack.c.bf16 %v5627_v25, %v5626_v11  ;;  %v5905_v48 = vmul.f32 %v15836_v56, %v15835_v13  ;;  %v15853_v13 = vld [vmem:[#allocation167_spill] sm:$0xff] }
 0x46d   : > { %9120 = vmatmul.mubr.msk.bf16.gmra.mrb[12].mxu1 %vm791_vm3, %v5641_v4  ;;  %v5632_v4 = vmul.f32 %v13486_v29, %v15817_v60  ;;  %v15826_v29 = vld [vmem:[#allocation131_spill] sm:$0xff] }
 0x46e   : > { %9123 = vmatprep.mubr.msk.bf16.mxu1 %vm791_vm3, %v5642_v5  ;;  %v5633_v5 = vmul.f32 %v13465_v24, %v15818_v57  ;;  %v15828_v24 = vld [vmem:[#allocation142_spill] sm:$0xff]  ;;  %v15839_v57 = vld [vmem:[#allocation161_spill] sm:$0xff] }
 0x46f   : > { %v5901_v62 = vmul.f32 %v15828_v24, %v15827_v51 }
 0x470   : > { %v5649_v17 = vpack.c.bf16 %v5633_v5, %v5632_v4  ;;  %v15840_v5 = vld [vmem:[#allocation105_spill] sm:$0xff] }
 0x471   : > { %v5930_v11 = vpack.c.bf16 %v5901_v62, %v5900_v32  ;;  %v5906_v43 = vmul.f32 %v15840_v5, %v15839_v57  ;;  %v15848_v32 = vld [vmem:[#allocation24_spill] sm:$0xff]  ;;  %v15856_v57 = vld [vmem:[#allocation274_spill] sm:$0xff] }
 0x473   : > { %v5933_v51 = vpack.c.bf16 %v5907_v53, %v5906_v43  ;;  %v15858_v53 = vld [vmem:[#allocation36_spill] sm:$0xff] }
 0x475   : > { %9124 = vmatmul.mubr.msk.bf16.gmra.mrb[16].mxu1 %vm791_vm3, %v5643_v33  ;;  %v15825_v33 = vld [vmem:[#allocation152_spill] sm:$0xff] }
 0x476   : > { %9127 = vmatprep.mubr.msk.bf16.mxu1 %vm791_vm3, %v5644_v54  ;;  %v5899_v54 = vmul.f32 %v15826_v29, %v15825_v33  ;;  %v15846_v33 = vld [vmem:[#allocation27_spill] sm:$0xff] }
 0x478   : > { %v5929_v25 = vpack.c.bf16 %v5899_v54, %v5898_v39  ;;  %v15845_v39 = vld [vmem:[#allocation163_spill] sm:$0xff] }
 0x479   : > { %v5908_v54 = vmul.f32 %v15846_v33, %v15845_v39  ;;  %v15860_v39 = vld [vmem:[#allocation277_spill] sm:$0xff] }
 0x47d   : > { %9128 = vmatmul.mubr.msk.bf16.gmra.mrb[20].mxu1 %vm791_vm3, %v5645_v58  ;;  %v8352_v58 = vld [vmem:[%s10185_s10 + $0x14] sm:$0xf] }
 0x47e   : > { %9131 = vmatprep.mubr.msk.bf16.mxu1 %vm791_vm3, %v5646_v52  ;;  %v15831_v52 = vld [vmem:[#allocation157_spill] sm:$0xff] }
 0x47f   : > { %v5902_v19 = vmul.f32 %v15832_v16, %v15831_v52 }
 0x481   : > { %v5931_v60 = vpack.c.bf16 %v5903_v63, %v5902_v19  ;;  %v15851_v19 = vld [vmem:[#allocation166_spill] sm:$0xff] }
 0x482   : > { %v5913_v63 = vmul.f32 %v15852_v15, %v15851_v19 }
 0x485   : > { %9132 = vmatmul.mubr.msk.bf16.gmra.mrb[24].mxu1 %vm791_vm3, %v5647_v10  ;;  %v15837_v10 = vld [vmem:[#allocation159_spill] sm:$0xff] }
 0x486   : > { %9135 = vmatprep.mubr.msk.bf16.mxu1 %vm791_vm3, %v5648_v26  ;;  %v5904_v26 = vmul.f32 %v15838_v45, %v15837_v10 }
 0x488   : > { %v5932_v4 = vpack.c.bf16 %v5905_v48, %v5904_v26  ;;  %v15854_v48 = vld [vmem:[#allocation275_spill] sm:$0xff] }
 0x489   : > { %v5912_v10 = vmul.f32 %v15854_v48, %v15853_v13  ;;  %v15865_v13 = vld [vmem:[#allocation172_spill] sm:$0xff] }
 0x48d   : > { %9136 = vmatmul.mubr.msk.bf16.gmra.mrb[28].mxu1 %vm791_vm3, %v5649_v17  ;;  %v15843_v17 = vld [vmem:[#allocation162_spill] sm:$0xff] }
 0x48e   : > { %9141 = vmatprep.mubr.msk.bf16.mxu1 %vm791_vm3, %v5928_v40  ;;  %v15844_v40 = vld [vmem:[#allocation6_spill] sm:$0xff] }
 0x48f   : > { %v5909_v9 = vmul.f32 %v15844_v40, %v15843_v17  ;;  %v5915_v17 = vmul.f32 %v15858_v53, %v15857_v42 }
 0x491   : > { %v5934_v62 = vpack.c.bf16 %v5909_v9, %v5908_v54  ;;  %v15859_v9 = vld [vmem:[#allocation170_spill] sm:$0xff] }
 0x492   : > { %v5917_v54 = vmul.f32 %v15860_v39, %v15859_v9  ;;  %v15870_v9 = vld [vmem:[#allocation281_spill] sm:$0xff] }
 0x493   : > { %v5920_v0 = vmul.f32 %v15870_v9, %v15869_v3 }
 0x495   : > { %9142 = vmatmul.mubr.msk.bf16.vlgmr.msra.gmra.mrb[0].mxu1 %vm791_vm3, %v5929_v25  ;;  %v5910_v25 = vmul.f32 %v15848_v32, %v15847_v49 }
 0x496   : > { %9174 = vmatpush3.bf16.msra.mxu1 %v6257_v21  ;;  %9145 = vmatprep.mubr.msk.bf16.mxu1 %vm791_vm3, %v5930_v11  ;;  %v15849_v21 = vld [vmem:[#allocation164_spill] sm:$0xff]  ;;  %v15850_v11 = vld [vmem:[#allocation19_spill] sm:$0xff] }
 0x497   : > { %9933 = vmatprep.subr.msk.bf16.mxu1 %vm840_vm1, %v8352_v58  ;;  %v5911_v52 = vmul.f32 %v15850_v11, %v15849_v21 }
 0x499   : > { %v5935_v26 = vpack.c.bf16 %v5911_v52, %v5910_v25  ;;  %v15863_v25 = vld [vmem:[#allocation173_spill] sm:$0xff]  ;;  %v15864_v52 = vld [vmem:[#allocation280_spill] sm:$0xff] }
 0x49d   : > { %9146 = vmatmul.mubr.msk.bf16.gmra.mrb[4].mxu1 %vm791_vm3, %v5931_v60  ;;  %v5936_v60 = vpack.c.bf16 %v5913_v63, %v5912_v10  ;;  %v5918_v63 = vmul.f32 %v15864_v52, %v15863_v25  ;;  %v15866_v10 = vld [vmem:[#allocation279_spill] sm:$0xff]  ;;  %v15875_v25 = vld [vmem:[#allocation178_spill] sm:$0xff] }
 0x49e   : > { %9149 = vmatprep.mubr.msk.bf16.mxu1 %vm791_vm3, %v5932_v4  ;;  %v15855_v4 = vld [vmem:[#allocation169_spill] sm:$0xff] }
 0x49f   : > { %v5914_v43 = vmul.f32 %v15856_v57, %v15855_v4  ;;  %v15868_v4 = vld [vmem:[#allocation51_spill] sm:$0xff] }
 0x4a1   : > { %v5937_v21 = vpack.c.bf16 %v5915_v17, %v5914_v43  ;;  %v15871_v43 = vld [vmem:[#allocation177_spill] sm:$0xff]  ;;  %v15872_v17 = vld [vmem:[#allocation55_spill] sm:$0xff] }
 0x4a5   : > { %9150 = vmatmul.mubr.msk.bf16.gmra.mrb[8].mxu1 %vm791_vm3, %v5933_v51  ;;  %v15861_v51 = vld [vmem:[#allocation171_spill] sm:$0xff] }
 0x4a6   : > { %9153 = vmatprep.mubr.msk.bf16.mxu1 %vm791_vm3, %v5934_v62  ;;  %v15862_v62 = vld [vmem:[#allocation278_spill] sm:$0xff] }
 0x4a7   : > { %v5916_v49 = vmul.f32 %v15862_v62, %v15861_v51 }
 0x4a9   : > { %v5938_v19 = vpack.c.bf16 %v5917_v54, %v5916_v49  ;;  %v5922_v54 = vmul.f32 %v15872_v17, %v15871_v43  ;;  %v15873_v49 = vld [vmem:[#allocation176_spill] sm:$0xff]  ;;  %v6551_v43 = vsel %vm840_vm1, %v8352_v58, 0  ;;  %v6195_v58 = vpack.c.bf16 %v12940_v8, %v12896_v1 }
 0x4ad   : > { %9154 = vmatmul.mubr.msk.bf16.gmra.mrb[12].mxu1 %vm791_vm3, %v5935_v26  ;;  %v5919_v26 = vmul.f32 %v15866_v10, %v15865_v13  ;;  %v15876_v13 = vld [vmem:[#allocation56_spill] sm:$0xff] }
 0x4ae   : > { %9157 = vmatprep.mubr.msk.bf16.mxu1 %vm791_vm3, %v5936_v60  ;;  %v15867_v60 = vld [vmem:[#allocation174_spill] sm:$0xff]  ;;  %v5925_v62 = vmul.f32 %v15876_v13, %v15875_v25  ;;  %v6197_v25 = vpack.c.bf16 %v13018_v36, %v12970_v7 }
 0x4af   : > { %v5921_v42 = vmul.f32 %v15868_v4, %v15867_v60  ;;  %v5939_v39 = vpack.c.bf16 %v5919_v26, %v5918_v63  ;;  %v15877_v60 = vld [vmem:[#allocation179_spill] sm:$0xff]  ;;  %v15880_v26 = vld [vmem:[#allocation64_spill] sm:$0xff] }
 0x4b0   : > { %v15878_v4 = vld [vmem:[#allocation59_spill] sm:$0xff] }
 0x4b1   : > { %v5940_v51 = vpack.c.bf16 %v5921_v42, %v5920_v0  ;;  %v5924_v10 = vmul.f32 %v15878_v4, %v15877_v60  ;;  %v6190_v0 = vpack.c.bf16 %v12813_v12, %v12825_v27  ;;  %v15882_v60 = vld [vmem:[#allocation11_spill] sm:$0xff]  ;;  %v15893_v12 = vld [vmem:[#allocation182_spill] sm:$0xff] }
 0x4b3   : > { %v5942_v63 = vpack.c.bf16 %v5925_v62, %v5924_v10  ;;  %v6192_v62 = vpack.c.bf16 %v12879_v6, %v12836_v2  ;;  %v8369_v10 = vld [vmem:[%s10185_s10 + $0x18] sm:$0xf] }
 0x4b5   : > { %9158 = vmatmul.mubr.msk.bf16.gmra.mrb[16].mxu1 %vm791_vm3, %v5937_v21  ;;  %v15874_v21 = vld [vmem:[#allocation52_spill] sm:$0xff] }
 0x4b6   : > { %9161 = vmatprep.mubr.msk.bf16.mxu1 %vm791_vm3, %v5938_v19  ;;  %v5923_v19 = vmul.f32 %v15874_v21, %v15873_v49  ;;  %v6194_v49 = vpack.c.bf16 %v12942_v14, %v12933_v35 }
 0x4b8   : > { %v5941_v3 = vpack.c.bf16 %v5923_v19, %v5922_v54  ;;  %v6193_v54 = vpack.c.bf16 %v12866_v22, %v12833_v23  ;;  %v6196_v19 = vpack.c.bf16 %v13021_v30, %v12987_v18 }
 0x4bd   : > { %9162 = vmatmul.mubr.msk.bf16.gmra.mrb[20].mxu1 %vm791_vm3, %v5939_v39  ;;  %v15879_v39 = vld [vmem:[#allocation63_spill] sm:$0xff] }
 0x4be   : > { %9165 = vmatprep.mubr.msk.bf16.mxu1 %vm791_vm3, %v5940_v51  ;;  %v15881_v42 = vpack.c.bf16 %v15879_v39, %v15880_v26  ;;  %v6191_v51 = vpack.c.bf16 %v12819_v41, %v12817_v31  ;;  %v15885_v26 = vld [vmem:[#allocation40_spill] sm:$0xff] }
 0x4c5   : > { %9166 = vmatmul.mubr.msk.bf16.gmra.mrb[24].mxu1 %vm791_vm3, %v5941_v3  ;;  %v6198_v3 = vpack.c.bf16 %v15882_v60, %v15751_v50 }
 0x4c6   : > { %9169 = vmatprep.mubr.msk.bf16.mxu1 %vm791_vm3, %v5942_v63  ;;  %v15883_v63 = vld [vmem:[#allocation16_spill] sm:$0xff] }
 0x4cd   : > { %9170 = vmatmul.mubr.msk.bf16.gmra.mrb[28].mxu1 %vm791_vm3, %v15881_v42  ;;  %v6200_v42 = vpack.c.bf16 %v15885_v26, %v15759_v34 }
 0x4ce   : > { %9175 = vmatprep.mubr.msk.bf16.mxu1 %vm791_vm3, %v6190_v0  ;;  %v15884_v0 = vld [vmem:[#allocation15_spill] sm:$0xff] }
 0x4cf   : > { %v6199_v39 = vpack.c.bf16 %v15884_v0, %v15883_v63 }
 0x4d5   : > { %9176 = vmatmul.mubr.msk.bf16.vlgmr.msra.gmra.mrb[0].mxu1 %vm791_vm3, %v6191_v51  ;;  %v15886_v51 = vld [vmem:[#allocation28_spill] sm:$0xff] }
 0x4d6   : > { %9208 = vmatpush3.bf16.msra.mxu1 %v6551_v43  ;;  %9179 = vmatprep.mubr.msk.bf16.mxu1 %vm791_vm3, %v6192_v62  ;;  %v6201_v43 = vpack.c.bf16 %v15886_v51, %v15761_v37  ;;  %v15887_v62 = vld [vmem:[#allocation43_spill] sm:$0xff] }
 0x4d7   : > { %9934 = vmatprep.subr.msk.bf16.mxu1 %vm840_vm1, %v8369_v10 }
 0x4dd   : > { %9180 = vmatmul.mubr.msk.bf16.gmra.mrb[4].mxu1 %vm791_vm3, %v6193_v54  ;;  %v6202_v54 = vpack.c.bf16 %v15887_v62, %v15768_v44  ;;  %v6453_v44 = vmul.f32 %v13836_v38, %v15893_v12  ;;  %v15895_v62 = vld [vmem:[#allocation135_spill] sm:$0xff]  ;;  %v15898_v12 = vld [vmem:[#allocation181_spill] sm:$0xff] }
 0x4de   : > { %9183 = vmatprep.mubr.msk.bf16.mxu1 %vm791_vm3, %v6194_v49  ;;  %v15888_v49 = vld [vmem:[#allocation47_spill] sm:$0xff]  ;;  %v15899_v38 = vld [vmem:[#allocation69_spill] sm:$0xff] }
 0x4e5   : > { %9184 = vmatmul.mubr.msk.bf16.gmra.mrb[8].mxu1 %vm791_vm3, %v6195_v58  ;;  %v15889_v58 = vld [vmem:[#allocation48_spill] sm:$0xff] }
 0x4e6   : > { %9187 = vmatprep.mubr.msk.bf16.mxu1 %vm791_vm3, %v6196_v19  ;;  %v6203_v19 = vpack.c.bf16 %v15889_v58, %v15888_v49  ;;  %v15896_v49 = vld [vmem:[#allocation186_spill] sm:$0xff] }
 0x4ed   : > { %9188 = vmatmul.mubr.msk.bf16.gmra.mrb[12].mxu1 %vm791_vm3, %v6197_v25  ;;  %v15890_v25 = vld [vmem:[#allocation276_spill] sm:$0xff] }
 0x4ee   : > { %9191 = vmatprep.mubr.msk.bf16.mxu1 %vm791_vm3, %v6198_v3  ;;  %v15891_v3 = vld [vmem:[#allocation138_spill] sm:$0xff] }
 0x4ef   : > { %v6204_v27 = vpack.c.bf16 %v15891_v3, %v15890_v25  ;;  %v6455_v25 = vmul.f32 %v13847_v28, %v15896_v49 }
 0x4f5   : > { %9192 = vmatmul.mubr.msk.bf16.gmra.mrb[16].mxu1 %vm791_vm3, %v6199_v39  ;;  %v15892_v39 = vld [vmem:[#allocation183_spill] sm:$0xff] }
 0x4f6   : > { %9195 = vmatprep.mubr.msk.bf16.mxu1 %vm791_vm3, %v6200_v42  ;;  %v6452_v42 = vmul.f32 %v13840_v47, %v15892_v39  ;;  %v6845_v39 = vsel %vm840_vm1, %v8369_v10, 0  ;;  %v8386_v47 = vld [vmem:[%s10185_s10 + $0x1c] sm:$0xf]  ;;  %v15907_v10 = vld [vmem:[#allocation190_spill] sm:$0xff] }
 0x4fd   : > { %9196 = vmatmul.mubr.msk.bf16.gmra.mrb[20].mxu1 %vm791_vm3, %v6201_v43  ;;  %v15894_v43 = vld [vmem:[#allocation134_spill] sm:$0xff] }
 0x4fe   : > { %9199 = vmatprep.mubr.msk.bf16.mxu1 %vm791_vm3, %v6202_v54  ;;  %v6205_v37 = vpack.c.bf16 %v15895_v62, %v15894_v43  ;;  %v6484_v54 = vpack.c.bf16 %v6453_v44, %v6452_v42  ;;  %v15900_v44 = vpack.c.bf16 %v15898_v12, %v15899_v38  ;;  %v15902_v42 = vld [vmem:[#allocation180_spill] sm:$0xff]  ;;  %v15910_v38 = vld [vmem:[#allocation194_spill] sm:$0xff] }
 0x505   : > { %9200 = vmatmul.mubr.msk.bf16.gmra.mrb[24].mxu1 %vm791_vm3, %v6203_v19  ;;  %v15897_v19 = vld [vmem:[#allocation187_spill] sm:$0xff] }
 0x506   : > { %9203 = vmatprep.mubr.msk.bf16.mxu1 %vm791_vm3, %v6204_v27  ;;  %v6454_v27 = vmul.f32 %v13856_v20, %v15897_v19  ;;  %v15914_v20 = vld [vmem:[#allocation199_spill] sm:$0xff] }
 0x508   : > { %v6485_v3 = vpack.c.bf16 %v6455_v25, %v6454_v27  ;;  %v15905_v25 = vld [vmem:[#allocation68_spill] sm:$0xff] }
 0x50d   : > { %9204 = vmatmul.mubr.msk.bf16.gmra.mrb[28].mxu1 %vm791_vm3, %v6205_v37  ;;  %v15901_v37 = vld [vmem:[#allocation60_spill] sm:$0xff] }
 0x50e   : > { %9209 = vmatprep.mubr.msk.bf16.mxu1 %vm791_vm3, %v6484_v54  ;;  %v15903_v49 = vpack.c.bf16 %v15901_v37, %v15902_v42  ;;  %v15904_v54 = vld [vmem:[#allocation70_spill] sm:$0xff] }
 0x50f   : > { %v15906_v19 = vpack.c.bf16 %v15904_v54, %v15905_v25  ;;  %v15916_v42 = vld [vmem:[#allocation202_spill] sm:$0xff] }
 0x510   : > { %v15919_v25 = vld [vmem:[#allocation206_spill] sm:$0xff] }
 0x515   : > { %9210 = vmatmul.mubr.msk.bf16.vlgmr.msra.gmra.mrb[0].mxu1 %vm791_vm3, %v6485_v3  ;;  %v15908_v3 = vld [vmem:[#allocation191_spill] sm:$0xff] }
 0x516   : > { %9242 = vmatpush3.bf16.msra.mxu1 %v6845_v39  ;;  %9213 = vmatprep.mubr.msk.bf16.mxu1 %vm791_vm3, %v15900_v44  ;;  %v15909_v27 = vpack.c.bf16 %v15907_v10, %v15908_v3  ;;  %v15911_v39 = vld [vmem:[#allocation195_spill] sm:$0xff]  ;;  %v15913_v44 = vld [vmem:[#allocation198_spill] sm:$0xff] }
 0x517   : > { %9935 = vmatprep.subr.msk.bf16.mxu1 %vm840_vm1, %v8386_v47  ;;  %v15912_v12 = vpack.c.bf16 %v15910_v38, %v15911_v39  ;;  %v15915_v37 = vpack.c.bf16 %v15913_v44, %v15914_v20  ;;  %v15922_v3 = vld [vmem:[#allocation210_spill] sm:$0xff] }
 0x518   : > { %v15925_v39 = vld [vmem:[#allocation214_spill] sm:$0xff] }
 0x519   : > { %v15928_v44 = vld [vmem:[#allocation218_spill] sm:$0xff] }
 0x51d   : > { %9214 = vmatmul.mubr.msk.bf16.gmra.mrb[4].mxu1 %vm791_vm3, %v15903_v49  ;;  %v15917_v49 = vld [vmem:[#allocation203_spill] sm:$0xff] }
 0x51e   : > { %9217 = vmatprep.mubr.msk.bf16.mxu1 %vm791_vm3, %v15906_v19  ;;  %v15918_v54 = vpack.c.bf16 %v15916_v42, %v15917_v49  ;;  %v15920_v19 = vld [vmem:[#allocation207_spill] sm:$0xff]  ;;  %v15931_v49 = vld [vmem:[#allocation222_spill] sm:$0xff] }
 0x51f   : > { %v15921_v10 = vpack.c.bf16 %v15919_v25, %v15920_v19  ;;  %v15934_v19 = vld [vmem:[#allocation226_spill] sm:$0xff] }
 0x525   : > { %9218 = vmatmul.mubr.msk.bf16.gmra.mrb[8].mxu1 %vm791_vm3, %v15909_v27  ;;  %v15923_v27 = vld [vmem:[#allocation211_spill] sm:$0xff] }
 0x526   : > { %9221 = vmatprep.mubr.msk.bf16.mxu1 %vm791_vm3, %v15912_v12  ;;  %v15924_v38 = vpack.c.bf16 %v15922_v3, %v15923_v27  ;;  %v15926_v12 = vld [vmem:[#allocation215_spill] sm:$0xff]  ;;  %v15937_v27 = vld [vmem:[#allocation242_spill] sm:$0xff] }
 0x527   : > { %v15927_v20 = vpack.c.bf16 %v15925_v39, %v15926_v12  ;;  %v15939_v12 = vld [vmem:[#allocation241_spill] sm:$0xff] }
 0x52d   : > { %9222 = vmatmul.mubr.msk.bf16.gmra.mrb[12].mxu1 %vm791_vm3, %v15915_v37  ;;  %v15929_v37 = vld [vmem:[#allocation219_spill] sm:$0xff] }
 0x52e   : > { %9225 = vmatprep.mubr.msk.bf16.mxu1 %vm791_vm3, %v15918_v54  ;;  %v15930_v42 = vpack.c.bf16 %v15928_v44, %v15929_v37  ;;  %v15932_v54 = vld [vmem:[#allocation223_spill] sm:$0xff]  ;;  %v15941_v44 = vld [vmem:[#allocation245_spill] sm:$0xff] }
 0x52f   : > { %v15933_v25 = vpack.c.bf16 %v15931_v49, %v15932_v54  ;;  %v6746_v37 = vmul.f32 %v15824_v59, %v15941_v44 }
 0x535   : > { %9226 = vmatmul.mubr.msk.bf16.gmra.mrb[16].mxu1 %vm791_vm3, %v15921_v10  ;;  %v15935_v10 = vld [vmem:[#allocation227_spill] sm:$0xff] }
 0x536   : > { %9229 = vmatprep.mubr.msk.bf16.mxu1 %vm791_vm3, %v15924_v38  ;;  %v15936_v3 = vpack.c.bf16 %v15934_v19, %v15935_v10  ;;  %v15938_v38 = vld [vmem:[#allocation197_spill] sm:$0xff]  ;;  %v15943_v19 = vld [vmem:[#allocation246_spill] sm:$0xff] }
 0x537   : > { %v6482_v39 = vmul.f32 %v15938_v38, %v15937_v27  ;;  %v6749_v10 = vmul.f32 %v15828_v24, %v15943_v19  ;;  %v15945_v38 = vld [vmem:[#allocation248_spill] sm:$0xff]  ;;  %v15947_v24 = vld [vmem:[#allocation250_spill] sm:$0xff] }
 0x53d   : > { %9230 = vmatmul.mubr.msk.bf16.gmra.mrb[20].mxu1 %vm791_vm3, %v15927_v20  ;;  %v15940_v20 = vld [vmem:[#allocation200_spill] sm:$0xff] }
 0x53e   : > { %9233 = vmatprep.mubr.msk.bf16.mxu1 %vm791_vm3, %v15930_v42  ;;  %v6483_v28 = vmul.f32 %v15940_v20, %v15939_v12  ;;  %v15942_v42 = vld [vmem:[#allocation244_spill] sm:$0xff]  ;;  %v6751_v12 = vmul.f32 %v15834_v55, %v15945_v38  ;;  %v15946_v20 = vld [vmem:[#allocation247_spill] sm:$0xff]  ;;  %v15948_v55 = vld [vmem:[#allocation253_spill] sm:$0xff] }
 0x53f   : > { %v6747_v49 = vmul.f32 %v15826_v29, %v15942_v42  ;;  %v6748_v59 = vmul.f32 %v15830_v46, %v15946_v20  ;;  %v6754_v46 = vmul.f32 %v15840_v5, %v15948_v55  ;;  %v15949_v38 = vld [vmem:[#allocation252_spill] sm:$0xff]  ;;  %v15950_v20 = vld [vmem:[#allocation251_spill] sm:$0xff]  ;;  %v15960_v55 = vld [vmem:[#allocation277_spill] sm:$0xff] }
 0x540   : > { %v6499_v54 = vpack.c.bf16 %v6483_v28, %v6482_v39  ;;  %v7139_v28 = vsel %vm840_vm1, %v8386_v47, 0  ;;  %v14155_v39 = vld [vmem:[%s10185_s10 + $0x20] sm:$0xf]  ;;  %v6755_v47 = vmul.f32 %v15842_v61, %v15949_v38  ;;  %v15961_v38 = vld [vmem:[#allocation265_spill] sm:$0xff] }
 0x541   : > { %v6779_v44 = vpack.c.bf16 %v6749_v10, %v6748_v59  ;;  %v15953_v10 = vld [vmem:[#allocation256_spill] sm:$0xff] }
 0x542   : > { %v6759_v5 = vmul.f32 %v15850_v11, %v15953_v10 }
 0x545   : > { %9234 = vmatmul.mubr.msk.bf16.gmra.mrb[24].mxu1 %vm791_vm3, %v15933_v25  ;;  %v6778_v25 = vpack.c.bf16 %v6747_v49, %v6746_v37  ;;  %v6752_v37 = vmul.f32 %v15838_v45, %v15950_v20  ;;  %v6782_v49 = vpack.c.bf16 %v6755_v47, %v6754_v46  ;;  %v15962_v47 = vld [vmem:[#allocation264_spill] sm:$0xff] }
 0x546   : > { %9237 = vmatprep.mubr.msk.bf16.mxu1 %vm791_vm3, %v15936_v3  ;;  %v15944_v3 = vld [vmem:[#allocation249_spill] sm:$0xff] }
 0x547   : > { %v6750_v27 = vmul.f32 %v15832_v16, %v15944_v3  ;;  %v6753_v16 = vmul.f32 %v15836_v56, %v15947_v24  ;;  %v15954_v3 = vld [vmem:[#allocation255_spill] sm:$0xff] }
 0x548   : > { %v6756_v61 = vmul.f32 %v15846_v33, %v15954_v3  ;;  %v15970_v3 = vld [vmem:[#allocation267_spill] sm:$0xff] }
 0x549   : > { %v6780_v29 = vpack.c.bf16 %v6751_v12, %v6750_v27  ;;  %v6781_v42 = vpack.c.bf16 %v6753_v16, %v6752_v37  ;;  %v15955_v12 = vld [vmem:[#allocation258_spill] sm:$0xff]  ;;  %v15964_v37 = vld [vmem:[#allocation263_spill] sm:$0xff] }
 0x54a   : > { %v6761_v59 = vmul.f32 %v15852_v15, %v15955_v12  ;;  %v15959_v16 = vld [vmem:[#allocation262_spill] sm:$0xff]  ;;  %v6766_v15 = vmul.f32 %v15864_v52, %v15961_v38 }
 0x54b   : > { %v6765_v46 = vmul.f32 %v15960_v55, %v15959_v16  ;;  %v15971_v12 = vld [vmem:[#allocation270_spill] sm:$0xff]  ;;  %v15979_v16 = vld [vmem:[#allocation272_spill] sm:$0xff]  ;;  %v15980_v55 = vld [vmem:[#allocation127_spill] sm:$0xff] }
 0x54d   : > { %9238 = vmatmul.mubr.msk.bf16.gmra.mrb[28].mxu1 %vm791_vm3, %v6499_v54  ;;  %v15951_v54 = vld [vmem:[#allocation254_spill] sm:$0xff] }
 0x54e   : > { %9243 = vmatprep.mubr.msk.bf16.mxu1 %vm791_vm3, %v6778_v25  ;;  %v6757_v56 = vmul.f32 %v15844_v40, %v15951_v54  ;;  %v15952_v25 = vld [vmem:[#allocation257_spill] sm:$0xff]  ;;  %v15966_v54 = vld [vmem:[#allocation266_spill] sm:$0xff] }
 0x54f   : > { %v6758_v19 = vmul.f32 %v15848_v32, %v15952_v25 }
 0x550   : > { %v6783_v27 = vpack.c.bf16 %v6757_v56, %v6756_v61  ;;  %v15967_v56 = vld [vmem:[#allocation51_spill] sm:$0xff]  ;;  %v6768_v61 = vmul.f32 %v15870_v9, %v15970_v3  ;;  %v15976_v9 = vld [vmem:[#allocation273_spill] sm:$0xff] }
 0x551   : > { %v6784_v45 = vpack.c.bf16 %v6759_v5, %v6758_v19  ;;  %v6769_v25 = vmul.f32 %v15967_v56, %v15966_v54  ;;  %v15968_v19 = vld [vmem:[#allocation269_spill] sm:$0xff]  ;;  %v15969_v5 = vld [vmem:[#allocation268_spill] sm:$0xff] }
 0x552   : > { %v6770_v10 = vmul.f32 %v15872_v17, %v15968_v19  ;;  %v6771_v52 = vmul.f32 %v15874_v21, %v15969_v5  ;;  %v15973_v17 = vld [vmem:[#allocation230_spill] sm:$0xff]  ;;  %v15974_v21 = vld [vmem:[#allocation231_spill] sm:$0xff] }
 0x555   : > { %9244 = vmatmul.mubr.msk.bf16.vlgmr.msra.gmra.mrb[0].mxu1 %vm791_vm3, %v6779_v44  ;;  %v15956_v44 = vld [vmem:[#allocation261_spill] sm:$0xff] }
 0x556   : > { %9276 = vmatpush3.bf16.msra.mxu1 %v7139_v28  ;;  %9247 = vmatprep.mubr.msk.bf16.mxu1 %vm791_vm3, %v6780_v29  ;;  %v6762_v40 = vmul.f32 %v15856_v57, %v15956_v44  ;;  %v15957_v28 = vld [vmem:[#allocation260_spill] sm:$0xff]  ;;  %v15958_v29 = vld [vmem:[#allocation259_spill] sm:$0xff] }
 0x557   : > { %9936 = vmatprep.subr.msk.bf16.mxu1 %vm840_vm1, %v14155_v39  ;;  %v6763_v32 = vmul.f32 %v15858_v53, %v15957_v28  ;;  %v6760_v11 = vmul.f32 %v15854_v48, %v15958_v29  ;;  %v15963_v57 = vld [vmem:[#allocation279_spill] sm:$0xff]  ;;  %v15965_v53 = vld [vmem:[#allocation278_spill] sm:$0xff] }
 0x558   : > { %v6767_v20 = vmul.f32 %v15963_v57, %v15962_v47  ;;  %v15972_v44 = vld [vmem:[#allocation271_spill] sm:$0xff]  ;;  %v15982_v47 = vld [vmem:[#allocation17_spill] sm:$0xff] }
 0x559   : > { %v6785_v24 = vpack.c.bf16 %v6761_v59, %v6760_v11  ;;  %v6786_v33 = vpack.c.bf16 %v6763_v32, %v6762_v40  ;;  %v6773_v59 = vmul.f32 %v15876_v13, %v15971_v12  ;;  %v6772_v40 = vmul.f32 %v15878_v4, %v15972_v44  ;;  %v15977_v29 = vld [vmem:[#allocation139_spill] sm:$0xff] }
 0x55a   : > { %v6788_v48 = vpack.c.bf16 %v6767_v20, %v6766_v15  ;;  %v15975_v32 = vpack.c.bf16 %v15973_v17, %v15974_v21  ;;  %v6776_v11 = vmul.f32 %v15977_v29, %v15976_v9  ;;  %v6777_v13 = vmul.f32 %v15980_v55, %v15979_v16  ;;  %v15983_v20 = vld [vmem:[#allocation21_spill] sm:$0xff]  ;;  %v15997_v17 = vld [vmem:[#allocation46_spill] sm:$0xff] }
 0x55b   : > { %v6791_v28 = vpack.c.bf16 %v6773_v59, %v6772_v40  ;;  %v7043_v57 = vmul.f32 %v12879_v6, %v15982_v47  ;;  %v15986_v6 = vld [vmem:[#allocation25_spill] sm:$0xff]  ;;  %v16008_v47 = vld [vmem:[#allocation62_spill] sm:$0xff] }
 0x55c   : > { %v6793_v38 = vpack.c.bf16 %v6777_v13, %v6776_v11  ;;  %v7047_v56 = vmul.f32 %v12942_v14, %v15986_v6  ;;  %v15994_v59 = vld [vmem:[#allocation41_spill] sm:$0xff]  ;;  %v16000_v11 = vld [vmem:[#allocation50_spill] sm:$0xff]  ;;  %v16004_v13 = vld [vmem:[#allocation43_spill] sm:$0xff] }
 0x55d   : > { %9248 = vmatmul.mubr.msk.bf16.gmra.mrb[4].mxu1 %vm791_vm3, %v6781_v42  ;;  %v6764_v42 = vmul.f32 %v15965_v53, %v15964_v37  ;;  %v7045_v37 = vmul.f32 %v12866_v22, %v15983_v20  ;;  %v15984_v53 = vld [vmem:[#allocation18_spill] sm:$0xff]  ;;  %v15987_v22 = vld [vmem:[#allocation29_spill] sm:$0xff]  ;;  %v7055_v44 = vmul.f32 %v15882_v60, %v15994_v59  ;;  %v16028_v59 = vld [vmem:[#allocation235_spill] sm:$0xff] }
 0x55e   : > { %9251 = vmatprep.mubr.msk.bf16.mxu1 %vm791_vm3, %v6782_v49  ;;  %v15995_v40 = vld [vmem:[#allocation45_spill] sm:$0xff]  ;;  %v16015_v6 = vld [vmem:[#allocation10_spill] sm:$0xff] }
 0x55f   : > { %v6787_v49 = vpack.c.bf16 %v6765_v46, %v6764_v42  ;;  %v15981_v46 = vld [vmem:[#allocation14_spill] sm:$0xff]  ;;  %v15999_v29 = vld [vmem:[#allocation53_spill] sm:$0xff] }
 0x560   : > { %v7040_v4 = vmul.f32 %v12817_v31, %v15981_v46  ;;  %v15985_v42 = vld [vmem:[#allocation22_spill] sm:$0xff]  ;;  %v7433_v31 = vsel %vm840_vm1, %v14155_v39, 0  ;;  %v7061_v60 = vmul.f32 %v15886_v51, %v15999_v29  ;;  %v16003_v55 = vld [vmem:[#allocation57_spill] sm:$0xff]  ;;  %v16007_v51 = vld [vmem:[#allocation44_spill] sm:$0xff] }
 0x561   : > { %v7063_v46 = vmul.f32 %v16004_v13, %v16003_v55  ;;  %v16040_v29 = vld [vmem:[#allocation75_spill] sm:$0xff]  ;;  %v16049_v55 = vld [vmem:[#allocation80_spill] sm:$0xff] }
 0x565   : > { %9252 = vmatmul.mubr.msk.bf16.gmra.mrb[8].mxu1 %vm791_vm3, %v6783_v27  ;;  %v6789_v27 = vpack.c.bf16 %v6769_v25, %v6768_v61  ;;  %v7049_v25 = vmul.f32 %v12940_v8, %v15987_v22  ;;  %v15991_v61 = vld [vmem:[#allocation37_spill] sm:$0xff] }
 0x566   : > { %9255 = vmatprep.mubr.msk.bf16.mxu1 %vm791_vm3, %v6784_v45  ;;  %v6790_v45 = vpack.c.bf16 %v6771_v52, %v6770_v10  ;;  %v15990_v52 = vld [vmem:[#allocation33_spill] sm:$0xff]  ;;  %v7053_v14 = vmul.f32 %v13018_v36, %v15991_v61  ;;  %v16022_v61 = vld [vmem:[#allocation188_spill] sm:$0xff] }
 0x567   : > { %v7051_v3 = vmul.f32 %v13021_v30, %v15990_v52  ;;  %v7057_v30 = vmul.f32 %v15884_v0, %v15995_v40  ;;  %v7058_v0 = vmul.f32 %v15759_v34, %v16000_v11  ;;  %v16009_v34 = vld [vmem:[#allocation47_spill] sm:$0xff]  ;;  %v16042_v11 = vld [vmem:[#allocation78_spill] sm:$0xff] }
 0x568   : > { %v16020_v52 = vld [vmem:[#allocation7_spill] sm:$0xff] }
 0x569   : > { %v16030_v40 = vld [vmem:[#allocation71_spill] sm:$0xff] }
 0x56d   : > { %9256 = vmatmul.mubr.msk.bf16.gmra.mrb[12].mxu1 %vm791_vm3, %v6785_v24  ;;  %v15978_v24 = vld [vmem:[#allocation13_spill] sm:$0xff] }
 0x56e   : > { %9259 = vmatprep.mubr.msk.bf16.mxu1 %vm791_vm3, %v6786_v33  ;;  %v7041_v33 = vmul.f32 %v12819_v41, %v15978_v24  ;;  %v7042_v41 = vmul.f32 %v12836_v2, %v15984_v53  ;;  %v15988_v2 = vld [vmem:[#allocation26_spill] sm:$0xff]  ;;  %v16010_v53 = vld [vmem:[#allocation65_spill] sm:$0xff] }
 0x56f   : > { %v7046_v19 = vmul.f32 %v12933_v35, %v15988_v2  ;;  %v16001_v24 = vld [vmem:[#allocation54_spill] sm:$0xff]  ;;  %v16016_v2 = vld [vmem:[#allocation8_spill] sm:$0xff] }
 0x570   : > { %v7072_v15 = vpack.c.bf16 %v7041_v33, %v7040_v4  ;;  %v16005_v4 = vld [vmem:[#allocation61_spill] sm:$0xff] }
 0x571   : > { %v7075_v5 = vpack.c.bf16 %v7047_v56, %v7046_v19  ;;  %v7068_v56 = vmul.f32 %v15894_v43, %v16015_v6  ;;  %v16017_v19 = vld [vmem:[#allocation111_spill] sm:$0xff]  ;;  %v16067_v6 = vld [vmem:[#allocation184_spill] sm:$0xff] }
 0x575   : > { %9260 = vmatmul.mubr.msk.bf16.gmra.mrb[16].mxu1 %vm791_vm3, %v6787_v49  ;;  %v7044_v49 = vmul.f32 %v12833_v23, %v15985_v42  ;;  %v15989_v23 = vld [vmem:[#allocation30_spill] sm:$0xff] }
 0x576   : > { %9263 = vmatprep.mubr.msk.bf16.mxu1 %vm791_vm3, %v6788_v48  ;;  %v7073_v48 = vpack.c.bf16 %v7043_v57, %v7042_v41  ;;  %v7048_v10 = vmul.f32 %v12896_v1, %v15989_v23  ;;  %v7064_v57 = vmul.f32 %v16009_v34, %v16008_v47  ;;  %v16011_v41 = vld [vmem:[#allocation138_spill] sm:$0xff]  ;;  %v7071_v23 = vmul.f32 %v16017_v19, %v16016_v2  ;;  %v16057_v47 = vld [vmem:[#allocation193_spill] sm:$0xff]  ;;  %v16058_v34 = vld [vmem:[#allocation192_spill] sm:$0xff] }
 0x577   : > { %v7074_v54 = vpack.c.bf16 %v7045_v37, %v7044_v49  ;;  %v7067_v42 = vmul.f32 %v16011_v41, %v16010_v53  ;;  %v16012_v49 = vld [vmem:[#allocation9_spill] sm:$0xff]  ;;  %v16062_v41 = vld [vmem:[#allocation240_spill] sm:$0xff]  ;;  %v16070_v2 = vld [vmem:[#allocation67_spill] sm:$0xff] }
 0x578   : > { %v7076_v39 = vpack.c.bf16 %v7049_v25, %v7048_v10  ;;  %v16018_v10 = vld [vmem:[#allocation189_spill] sm:$0xff] }
 0x57d   : > { %9264 = vmatmul.mubr.msk.bf16.gmra.mrb[20].mxu1 %vm791_vm3, %v6789_v27  ;;  %v15992_v27 = vld [vmem:[#allocation34_spill] sm:$0xff] }
 0x57e   : > { %9267 = vmatprep.mubr.msk.bf16.mxu1 %vm791_vm3, %v6790_v45  ;;  %v7050_v8 = vmul.f32 %v12987_v18, %v15992_v27  ;;  %v15993_v45 = vld [vmem:[#allocation38_spill] sm:$0xff]  ;;  %v7056_v18 = vmul.f32 %v15883_v63, %v15997_v17 }
 0x57f   : > { %v7052_v35 = vmul.f32 %v12970_v7, %v15993_v45  ;;  %v16024_v45 = vld [vmem:[#allocation31_spill] sm:$0xff]  ;;  %v16034_v17 = vld [vmem:[#allocation238_spill] sm:$0xff] }
 0x580   : > { %v7077_v12 = vpack.c.bf16 %v7051_v3, %v7050_v8  ;;  %v7080_v7 = vpack.c.bf16 %v7057_v30, %v7056_v18  ;;  %v16031_v30 = vld [vmem:[#allocation239_spill] sm:$0xff] }
 0x581   : > { %v7078_v1 = vpack.c.bf16 %v7053_v14, %v7052_v35  ;;  %v16023_v14 = vld [vmem:[#allocation205_spill] sm:$0xff]  ;;  %v16025_v35 = vld [vmem:[#allocation32_spill] sm:$0xff] }
 0x582   : > { %v7334_v27 = vmul.f32 %v16023_v14, %v16022_v61  ;;  %v10014_v61 = vld [vmem:[#allocation2 + $0x10] sm:$0xff] }
 0x585   : > { %9268 = vmatmul.mubr.msk.bf16.gmra.mrb[24].mxu1 %vm791_vm3, %v6791_v28  ;;  %v15996_v28 = vld [vmem:[#allocation42_spill] sm:$0xff] }
 0x586   : > { %9271 = vmatprep.mubr.msk.bf16.mxu1 %vm791_vm3, %v15975_v32  ;;  %v7054_v36 = vmul.f32 %v15751_v50, %v15996_v28  ;;  %v15998_v32 = vld [vmem:[#allocation49_spill] sm:$0xff]  ;;  %v16002_v50 = vld [vmem:[#allocation35_spill] sm:$0xff]  ;;  %v16032_v28 = vpack.c.bf16 %v16030_v40, %v16031_v30 }
 0x587   : > { %v7059_v9 = vmul.f32 %v15885_v26, %v15998_v32  ;;  %v7060_v33 = vmul.f32 %v16002_v50, %v16001_v24  ;;  %v7065_v26 = vmul.f32 %v15889_v58, %v16005_v4  ;;  %v16014_v58 = vld [vmem:[#allocation276_spill] sm:$0xff]  ;;  %v16045_v50 = vld [vmem:[#allocation81_spill] sm:$0xff]  ;;  %v16052_v4 = vld [vmem:[#allocation83_spill] sm:$0xff] }
 0x588   : > { %v7079_v21 = vpack.c.bf16 %v7055_v44, %v7054_v36  ;;  %v16033_v36 = vld [vmem:[#allocation73_spill] sm:$0xff] }
 0x589   : > { %v7081_v16 = vpack.c.bf16 %v7059_v9, %v7058_v0  ;;  %v7082_v63 = vpack.c.bf16 %v7061_v60, %v7060_v33  ;;  %v7084_v37 = vpack.c.bf16 %v7065_v26, %v7064_v57  ;;  %v16035_v18 = vpack.c.bf16 %v16033_v36, %v16034_v17  ;;  %v16039_v9 = vld [vmem:[#allocation77_spill] sm:$0xff]  ;;  %v16043_v0 = vld [vmem:[#allocation76_spill] sm:$0xff]  ;;  %v16046_v33 = vld [vmem:[#allocation79_spill] sm:$0xff] }
 0x58a   : > { %v16041_v60 = vpack.c.bf16 %v16039_v9, %v16040_v29  ;;  %v16044_v24 = vpack.c.bf16 %v16042_v11, %v16043_v0  ;;  %v16059_v57 = vpack.c.bf16 %v16057_v47, %v16058_v34  ;;  %v10019_v9 = vld [vmem:[#allocation2 + $0x20] sm:$0xff]  ;;  %v10020_v11 = vld [vmem:[#allocation2 + $0x38] sm:$0xff] }
 0x58b   : > { %v10024_v34 = vld [vmem:[#allocation2 + $0x58] sm:$0xff] }
 0x58d   : > { %9272 = vmatmul.mubr.msk.bf16.gmra.mrb[28].mxu1 %vm791_vm3, %v6793_v38  ;;  %v16006_v38 = vld [vmem:[#allocation58_spill] sm:$0xff] }
 0x58e   : > { %9277 = vmatprep.mubr.msk.bf16.mxu1 %vm791_vm3, %v7072_v15  ;;  %v7062_v15 = vmul.f32 %v16007_v51, %v16006_v38  ;;  %v16054_v38 = vld [vmem:[#allocation86_spill] sm:$0xff]  ;;  %v16055_v51 = vld [vmem:[#allocation84_spill] sm:$0xff] }
 0x590   : > { %v7083_v20 = vpack.c.bf16 %v7063_v46, %v7062_v15  ;;  %v16051_v46 = vld [vmem:[#allocation85_spill] sm:$0xff]  ;;  %v16056_v15 = vpack.c.bf16 %v16054_v38, %v16055_v51  ;;  %v10023_v51 = vld [vmem:[#allocation2 + $0x40] sm:$0xff] }
 0x591   : > { %v16053_v26 = vpack.c.bf16 %v16051_v46, %v16052_v4  ;;  %v10022_v46 = vld [vmem:[#allocation2 + $0x50] sm:$0xff] }
 0x595   : > { %9278 = vmatmul.mubr.msk.bf16.vlgmr.msra.gmra.mrb[0].mxu1 %vm791_vm3, %v7073_v48  ;;  %v7069_v48 = vmul.f32 %v15895_v62, %v16012_v49  ;;  %v16021_v62 = vld [vmem:[#allocation112_spill] sm:$0xff] }
 0x596   : > { %9310 = vmatpush3.bf16.msra.mxu1 %v7433_v31  ;;  %9281 = vmatprep.mubr.msk.bf16.mxu1 %vm791_vm3, %v7074_v54  ;;  %v16013_v31 = vld [vmem:[#allocation66_spill] sm:$0xff]  ;;  %v7070_v3 = vmul.f32 %v16021_v62, %v16020_v52 }
 0x597   : > { %v7066_v54 = vmul.f32 %v16014_v58, %v16013_v31  ;;  %v7086_v25 = vpack.c.bf16 %v7069_v48, %v7068_v56  ;;  %v16064_v31 = vld [vmem:[#allocation196_spill] sm:$0xff]  ;;  %v16065_v58 = vld [vmem:[#allocation87_spill] sm:$0xff]  ;;  %v16068_v56 = vld [vmem:[#allocation201_spill] sm:$0xff] }
 0x598   : > { %v7087_v8 = vpack.c.bf16 %v7071_v23, %v7070_v3 }
 0x599   : > { %v7085_v22 = vpack.c.bf16 %v7067_v42, %v7066_v54  ;;  %v16063_v42 = vld [vmem:[#allocation200_spill] sm:$0xff]  ;;  %v16066_v54 = vpack.c.bf16 %v16064_v31, %v16065_v58  ;;  %v10026_v31 = vld [vmem:[#allocation2 + $0x70] sm:$0xff] }
 0x59a   : > { %v7363_v49 = vmul.f32 %v16063_v42, %v16062_v41 }
 0x59d   : > { %9282 = vmatmul.mubr.msk.bf16.gmra.mrb[4].mxu1 %vm791_vm3, %v7075_v5  ;;  %v16019_v5 = vld [vmem:[#allocation204_spill] sm:$0xff] }
 0x59e   : > { %9285 = vmatprep.mubr.msk.bf16.mxu1 %vm791_vm3, %v7076_v39  ;;  %v7335_v39 = vmul.f32 %v16019_v5, %v16018_v10  ;;  %v14379_v10 = vld [vmem:[%s367_s30] ss:$0 sm:$0xff] }
 0x5a0   : > { %v7366_v43 = vpack.c.bf16 %v7335_v39, %v7334_v27 }
 0x5a5   : > { %9286 = vmatmul.mubr.msk.bf16.gmra.mrb[8].mxu1 %vm791_vm3, %v7077_v12  ;;  %v16026_v12 = vpack.c.bf16 %v16024_v45, %v16025_v35 }
 0x5a6   : > { %9289 = vmatprep.mubr.msk.bf16.mxu1 %vm791_vm3, %v7078_v1  ;;  %v16027_v1 = vld [vmem:[#allocation234_spill] sm:$0xff] }
 0x5a7   : > { %v16029_v44 = vpack.c.bf16 %v16027_v1, %v16028_v59  ;;  %v10017_v59 = vld [vmem:[#allocation2 + $0x8] sm:$0xff] }
 0x5ad   : > { %9290 = vmatmul.mubr.msk.bf16.gmra.mrb[12].mxu1 %vm791_vm3, %v7079_v21  ;;  %v16036_v21 = vld [vmem:[#allocation74_spill] sm:$0xff] }
 0x5ae   : > { %9293 = vmatprep.mubr.msk.bf16.mxu1 %vm791_vm3, %v7080_v7  ;;  %v16037_v7 = vld [vmem:[#allocation72_spill] sm:$0xff] }
 0x5af   : > { %v16038_v32 = vpack.c.bf16 %v16036_v21, %v16037_v7 }
 0x5b5   : > { %9294 = vmatmul.mubr.msk.bf16.gmra.mrb[16].mxu1 %vm791_vm3, %v7081_v16  ;;  %v16047_v16 = vpack.c.bf16 %v16045_v50, %v16046_v33 }
 0x5b6   : > { %9297 = vmatprep.mubr.msk.bf16.mxu1 %vm791_vm3, %v7082_v63  ;;  %v16048_v63 = vld [vmem:[#allocation82_spill] sm:$0xff] }
 0x5b7   : > { %v16050_v13 = vpack.c.bf16 %v16048_v63, %v16049_v55 }
 0x5bd   : > { %9298 = vmatmul.mubr.msk.bf16.gmra.mrb[20].mxu1 %vm791_vm3, %v7083_v20  ;;  %v16060_v20 = vld [vmem:[#allocation243_spill] sm:$0xff] }
 0x5be   : > { %9301 = vmatprep.mubr.msk.bf16.mxu1 %vm791_vm3, %v7084_v37  ;;  %v16061_v37 = vld [vmem:[#allocation197_spill] sm:$0xff] }
 0x5bf   : > { %v7362_v53 = vmul.f32 %v16061_v37, %v16060_v20  ;;  %v10025_v20 = vld [vmem:[#allocation2 + $0x48] sm:$0xff] }
 0x5c1   : > { %v7380_v48 = vpack.c.bf16 %v7363_v49, %v7362_v53 }
 0x5c5   : > { %9302 = vmatmul.mubr.msk.bf16.gmra.mrb[24].mxu1 %vm791_vm3, %v7085_v22  ;;  %v7364_v22 = vmul.f32 %v16068_v56, %v16067_v6  ;;  %v10027_v56 = vld [vmem:[#allocation2 + $0x60] sm:$0xff] }
 0x5c6   : > { %9305 = vmatprep.mubr.msk.bf16.mxu1 %vm791_vm3, %v7086_v25  ;;  %v16069_v25 = vld [vmem:[#allocation185_spill] sm:$0xff] }
 0x5c7   : > { %v7365_v19 = vmul.f32 %v16070_v2, %v16069_v25  ;;  %v10028_v2 = vld [vmem:[#allocation2 + $0x78] sm:$0xff] }
 0x5c9   : > { %v7381_v23 = vpack.c.bf16 %v7365_v19, %v7364_v22 }
 0x5cd   : > { %9306 = vmatmul.mubr.msk.bf16.gmra.mrb[28].mxu1 %vm791_vm3, %v7087_v8 }
 0x5ce   : > { %9311 = vmatprep.mubr.msk.bf16.mxu1 %vm791_vm3, %v7366_v43  ;;  %v10015_v43 = vld [vmem:[#allocation2] sm:$0xff] }
 0x5d5   : > { %9312 = vmatmul.mubr.msk.bf16.vlgmr.msra.gmra.mrb[0].mxu1 %vm791_vm3, %v16026_v12  ;;  %v10016_v12 = vld [vmem:[#allocation2 + $0x18] sm:$0xff] }
 0x5d6   : > { %9315 = vmatprep.mubr.msk.bf16.mxu1 %vm791_vm3, %v16029_v44 }
 0x5dd   : > { %9316 = vmatmul.mubr.msk.bf16.gmra.mrb[4].mxu1 %vm791_vm3, %v16032_v28 }
 0x5de   : > { %9319 = vmatprep.mubr.msk.bf16.mxu1 %vm791_vm3, %v16035_v18  ;;  %v10018_v18 = vld [vmem:[#allocation2 + $0x30] sm:$0xff] }
 0x5e5   : > { %9320 = vmatmul.mubr.msk.bf16.gmra.mrb[8].mxu1 %vm791_vm3, %v16038_v32 }
 0x5e6   : > { %9323 = vmatprep.mubr.msk.bf16.mxu1 %vm791_vm3, %v16041_v60 }
 0x5ed   : > { %9324 = vmatmul.mubr.msk.bf16.gmra.mrb[12].mxu1 %vm791_vm3, %v16044_v24  ;;  %v10021_v24 = vld [vmem:[#allocation2 + $0x28] sm:$0xff] }
 0x5ee   : > { %9327 = vmatprep.mubr.msk.bf16.mxu1 %vm791_vm3, %v16047_v16 }
 0x5f5   : > { %9328 = vmatmul.mubr.msk.bf16.gmra.mrb[16].mxu1 %vm791_vm3, %v16050_v13 }
 0x5f6   : > { %9331 = vmatprep.mubr.msk.bf16.mxu1 %vm791_vm3, %v16053_v26 }
 0x5fd   : > { %9332 = vmatmul.mubr.msk.bf16.gmra.mrb[20].mxu1 %vm791_vm3, %v16056_v15 }
 0x5fe   : > { %9335 = vmatprep.mubr.msk.bf16.mxu1 %vm791_vm3, %v16059_v57 }
 0x605   : > { %9336 = vmatmul.mubr.msk.bf16.gmra.mrb[24].mxu1 %vm791_vm3, %v16066_v54 }
 0x606   : > { %9339 = vmatprep.mubr.msk.bf16.mxu1 %vm791_vm3, %v7380_v48 }
 0x60d   : > { %9340 = vmatmul.mubr.msk.bf16.gmra.mrb[28].mxu1 %vm791_vm3, %v7381_v23  ;;  %v10029_v23 = vld [vmem:[#allocation2 + $0x68] sm:$0xff] }
 0x6a8   : > { %v9313_v5 = vpop.f32.mrb[0].mxu1 }
 0x6a9   : > { %v9375_v39 = vadd.f32 %v9313_v5, %v14379_v10  ;;  %v7469_v52 = vpop.f32.mrb[1].mxu1 }
 0x6aa   : > { %v9376_v62 = vadd.f32 %v14379_v10, %v7469_v52  ;;  %v9314_v3 = vpop.f32.mrb[2].mxu1 }
 0x6ab   : > { %v7630_v14 = vadd.f32 %v10014_v61, %v9375_v39  ;;  %v9377_v27 = vadd.f32 %v9314_v3, %v14379_v10  ;;  %v7472_v8 = vpop.f32.mrb[3].mxu1 }
 0x6ac   : > { %v7628_v45 = vadd.f32 %v10015_v43, %v9376_v62  ;;  %v9378_v35 = vadd.f32 %v14379_v10, %v7472_v8 }
 0x6ad   : > { %7662 = vst.msk [vmem:[#allocation2 + $0x10] sm:$0xff] %vm791_vm3, %v7630_v14  ;;  %v7631_v1 = vadd.f32 %v10016_v12, %v9377_v27  ;;  %v10030_v14 = vld [vmem:[#allocation2 + $0x90] sm:$0xff] }
 0x6ae   : > { %7660 = vst.msk [vmem:[#allocation2] sm:$0xff] %vm791_vm3, %v7628_v45  ;;  %v7629_v44 = vadd.f32 %v10017_v59, %v9378_v35  ;;  %v10031_v45 = vld [vmem:[#allocation2 + $0x80] sm:$0xff] }
 0x6af   : > { %7663 = vst.msk [vmem:[#allocation2 + $0x18] sm:$0xff] %vm791_vm3, %v7631_v1  ;;  %v10032_v1 = vld [vmem:[#allocation2 + $0x98] sm:$0xff] }
 0x6b0   : > { %7661 = vst.msk [vmem:[#allocation2 + $0x8] sm:$0xff] %vm791_vm3, %v7629_v44  ;;  %v9317_v40 = vpop.f32.mrb[4].mxu1  ;;  %v10033_v44 = vld [vmem:[#allocation2 + $0x88] sm:$0xff] }
 0x6b1   : > { %v9379_v30 = vadd.f32 %v9317_v40, %v14379_v10  ;;  %v7485_v28 = vpop.f32.mrb[5].mxu1 }
 0x6b2   : > { %v9380_v36 = vadd.f32 %v14379_v10, %v7485_v28  ;;  %v9318_v17 = vpop.f32.mrb[6].mxu1 }
 0x6b3   : > { %v7634_v21 = vadd.f32 %v10018_v18, %v9379_v30  ;;  %v9381_v7 = vadd.f32 %v9318_v17, %v14379_v10  ;;  %v7488_v32 = vpop.f32.mrb[7].mxu1 }
 0x6b4   : > { %v7632_v29 = vadd.f32 %v10019_v9, %v9380_v36  ;;  %v9382_v60 = vadd.f32 %v14379_v10, %v7488_v32 }
 0x6b5   : > { %7666 = vst.msk [vmem:[#allocation2 + $0x30] sm:$0xff] %vm791_vm3, %v7634_v21  ;;  %v7635_v0 = vadd.f32 %v10020_v11, %v9381_v7  ;;  %v10034_v21 = vld [vmem:[#allocation2 + $0xb0] sm:$0xff] }
 0x6b6   : > { %7664 = vst.msk [vmem:[#allocation2 + $0x20] sm:$0xff] %vm791_vm3, %v7632_v29  ;;  %v7633_v50 = vadd.f32 %v10021_v24, %v9382_v60  ;;  %v10035_v29 = vld [vmem:[#allocation2 + $0xa0] sm:$0xff] }
 0x6b7   : > { %7667 = vst.msk [vmem:[#allocation2 + $0x38] sm:$0xff] %vm791_vm3, %v7635_v0  ;;  %v10036_v0 = vld [vmem:[#allocation2 + $0xb8] sm:$0xff] }
 0x6b8   : > { %7665 = vst.msk [vmem:[#allocation2 + $0x28] sm:$0xff] %vm791_vm3, %v7633_v50  ;;  %v9321_v33 = vpop.f32.mrb[8].mxu1  ;;  %v10037_v50 = vld [vmem:[#allocation2 + $0xa8] sm:$0xff] }
 0x6b9   : > { %v9383_v16 = vadd.f32 %v9321_v33, %v14379_v10  ;;  %v7501_v63 = vpop.f32.mrb[9].mxu1 }
 0x6ba   : > { %v9384_v55 = vadd.f32 %v14379_v10, %v7501_v63  ;;  %v9322_v13 = vpop.f32.mrb[10].mxu1 }
 0x6bb   : > { %v7638_v4 = vadd.f32 %v10022_v46, %v9383_v16  ;;  %v9385_v26 = vadd.f32 %v9322_v13, %v14379_v10  ;;  %v7504_v38 = vpop.f32.mrb[11].mxu1 }
 0x6bc   : > { %v7636_v15 = vadd.f32 %v10023_v51, %v9384_v55  ;;  %v9386_v47 = vadd.f32 %v14379_v10, %v7504_v38 }
 0x6bd   : > { %7670 = vst.msk [vmem:[#allocation2 + $0x50] sm:$0xff] %vm791_vm3, %v7638_v4  ;;  %v7639_v57 = vadd.f32 %v10024_v34, %v9385_v26  ;;  %v10038_v4 = vld [vmem:[#allocation2 + $0xd0] sm:$0xff] }
 0x6be   : > { %7668 = vst.msk [vmem:[#allocation2 + $0x40] sm:$0xff] %vm791_vm3, %v7636_v15  ;;  %v7637_v37 = vadd.f32 %v10025_v20, %v9386_v47  ;;  %v10039_v15 = vld [vmem:[#allocation2 + $0xc0] sm:$0xff] }
 0x6bf   : > { %7671 = vst.msk [vmem:[#allocation2 + $0x58] sm:$0xff] %vm791_vm3, %v7639_v57  ;;  %v10040_v57 = vld [vmem:[#allocation2 + $0xd8] sm:$0xff] }
 0x6c0   : > { %7669 = vst.msk [vmem:[#allocation2 + $0x48] sm:$0xff] %vm791_vm3, %v7637_v37  ;;  %v9325_v53 = vpop.f32.mrb[12].mxu1  ;;  %v10041_v37 = vld [vmem:[#allocation2 + $0xc8] sm:$0xff] }
 0x6c1   : > { %v9387_v41 = vadd.f32 %v9325_v53, %v14379_v10  ;;  %v7517_v42 = vpop.f32.mrb[13].mxu1 }
 0x6c2   : > { %v9388_v49 = vadd.f32 %v14379_v10, %v7517_v42  ;;  %v9326_v48 = vpop.f32.mrb[14].mxu1 }
 0x6c3   : > { %v7642_v58 = vadd.f32 %v10026_v31, %v9387_v41  ;;  %v9389_v54 = vadd.f32 %v9326_v48, %v14379_v10  ;;  %v7520_v6 = vpop.f32.mrb[15].mxu1 }
 0x6c4   : > { %v7640_v22 = vadd.f32 %v10027_v56, %v9388_v49  ;;  %v9390_v25 = vadd.f32 %v14379_v10, %v7520_v6 }
 0x6c5   : > { %7674 = vst.msk [vmem:[#allocation2 + $0x70] sm:$0xff] %vm791_vm3, %v7642_v58  ;;  %v7643_v19 = vadd.f32 %v10028_v2, %v9389_v54  ;;  %v10042_v58 = vld [vmem:[#allocation2 + $0xf0] sm:$0xff] }
 0x6c6   : > { %7672 = vst.msk [vmem:[#allocation2 + $0x60] sm:$0xff] %vm791_vm3, %v7640_v22  ;;  %v7641_v5 = vadd.f32 %v10029_v23, %v9390_v25  ;;  %v10043_v22 = vld [vmem:[#allocation2 + $0xe0] sm:$0xff] }
 0x6c7   : > { %7675 = vst.msk [vmem:[#allocation2 + $0x78] sm:$0xff] %vm791_vm3, %v7643_v19  ;;  %v10044_v19 = vld [vmem:[#allocation2 + $0xf8] sm:$0xff] }
 0x6c8   : > { %7673 = vst.msk [vmem:[#allocation2 + $0x68] sm:$0xff] %vm791_vm3, %v7641_v5  ;;  %v9329_v39 = vpop.f32.mrb[16].mxu1  ;;  %v10045_v5 = vld [vmem:[#allocation2 + $0xe8] sm:$0xff] }
 0x6c9   : > { %v9391_v52 = vadd.f32 %v9329_v39, %v14379_v10  ;;  %v7533_v62 = vpop.f32.mrb[17].mxu1 }
 0x6ca   : > { %v9392_v3 = vadd.f32 %v14379_v10, %v7533_v62  ;;  %v9330_v61 = vpop.f32.mrb[18].mxu1  ;;  %v7698_v62 = vld [vmem:[#allocation2 + $0x10] sm:$0xff] (!%p8420_p8) }
 0x6cb   : > { %v7646_v27 = vadd.f32 %v10030_v14, %v9391_v52  ;;  %v9393_v8 = vadd.f32 %v9330_v61, %v14379_v10  ;;  %v7536_v43 = vpop.f32.mrb[19].mxu1  ;;  %v7696_v52 = vld [vmem:[#allocation2] sm:$0xff] (!%p8420_p8)  ;;  %7730 = vst.msk [vmem:[%s10194_s16 + $0x10] sm:$0xff] (!%p8420_p8), %vm791_vm3, %v7698_v62  ;;  %v7701_v14 = vld [vmem:[#allocation2 + $0x28] sm:$0xff] (!%p8420_p8) }
 0x6cc   : > { %v7644_v35 = vadd.f32 %v10031_v45, %v9392_v3  ;;  %v9394_v12 = vadd.f32 %v14379_v10, %v7536_v43  ;;  %7728 = vst.msk [vmem:[%s10194_s16] sm:$0xff] (!%p8420_p8), %vm791_vm3, %v7696_v52  ;;  %v7699_v3 = vld [vmem:[#allocation2 + $0x18] sm:$0xff] (!%p8420_p8)  ;;  %v7700_v61 = vld [vmem:[#allocation2 + $0x20] sm:$0xff] (!%p8420_p8)  ;;  %7733 = vst.msk [vmem:[%s10194_s16 + $0x28] sm:$0xff] (!%p8420_p8), %vm791_vm3, %v7701_v14 }
 0x6cd   : > { %7678 = vst.msk [vmem:[#allocation2 + $0x90] sm:$0xff] %vm791_vm3, %v7646_v27  ;;  %v7647_v59 = vadd.f32 %v10032_v1, %v9393_v8  ;;  %7731 = vst.msk [vmem:[%s10194_s16 + $0x18] sm:$0xff] (!%p8420_p8), %vm791_vm3, %v7699_v3  ;;  %v7702_v27 = vld [vmem:[#allocation2 + $0x30] sm:$0xff] (!%p8420_p8)  ;;  %v7703_v8 = vld [vmem:[#allocation2 + $0x38] sm:$0xff] (!%p8420_p8) }
 0x6ce   : > { %7676 = vst.msk [vmem:[#allocation2 + $0x80] sm:$0xff] %vm791_vm3, %v7644_v35  ;;  %v7645_v40 = vadd.f32 %v10033_v44, %v9394_v12  ;;  %7732 = vst.msk [vmem:[%s10194_s16 + $0x20] sm:$0xff] (!%p8420_p8), %vm791_vm3, %v7700_v61  ;;  %v7704_v43 = vld [vmem:[#allocation2 + $0x40] sm:$0xff] (!%p8420_p8)  ;;  %v7705_v45 = vld [vmem:[#allocation2 + $0x48] sm:$0xff] (!%p8420_p8) }
 0x6cf   : > { %7679 = vst.msk [vmem:[#allocation2 + $0x98] sm:$0xff] %vm791_vm3, %v7647_v59  ;;  %7734 = vst.msk [vmem:[%s10194_s16 + $0x30] sm:$0xff] (!%p8420_p8), %vm791_vm3, %v7702_v27  ;;  %v7706_v35 = vld [vmem:[#allocation2 + $0x50] sm:$0xff] (!%p8420_p8)  ;;  %v7707_v12 = vld [vmem:[#allocation2 + $0x58] sm:$0xff] (!%p8420_p8) }
 0x6d0   : > { %7677 = vst.msk [vmem:[#allocation2 + $0x88] sm:$0xff] %vm791_vm3, %v7645_v40  ;;  %v9333_v30 = vpop.f32.mrb[20].mxu1  ;;  %7735 = vst.msk [vmem:[%s10194_s16 + $0x38] sm:$0xff] (!%p8420_p8), %vm791_vm3, %v7703_v8  ;;  %v7708_v1 = vld [vmem:[#allocation2 + $0x60] sm:$0xff] (!%p8420_p8)  ;;  %v7709_v59 = vld [vmem:[#allocation2 + $0x68] sm:$0xff] (!%p8420_p8) }
 0x6d1   : > { %v9395_v28 = vadd.f32 %v9333_v30, %v14379_v10  ;;  %v7549_v36 = vpop.f32.mrb[21].mxu1  ;;  %7736 = vst.msk [vmem:[%s10194_s16 + $0x40] sm:$0xff] (!%p8420_p8), %vm791_vm3, %v7704_v43  ;;  %7737 = vst.msk [vmem:[%s10194_s16 + $0x48] sm:$0xff] (!%p8420_p8), %vm791_vm3, %v7705_v45  ;;  %v7710_v44 = vld [vmem:[#allocation2 + $0x70] sm:$0xff] (!%p8420_p8)  ;;  %v7711_v40 = vld [vmem:[#allocation2 + $0x78] sm:$0xff] (!%p8420_p8) }
 0x6d2   : > { %v9396_v17 = vadd.f32 %v14379_v10, %v7549_v36  ;;  %v9334_v18 = vpop.f32.mrb[22].mxu1  ;;  %7738 = vst.msk [vmem:[%s10194_s16 + $0x50] sm:$0xff] (!%p8420_p8), %vm791_vm3, %v7706_v35  ;;  %7739 = vst.msk [vmem:[%s10194_s16 + $0x58] sm:$0xff] (!%p8420_p8), %vm791_vm3, %v7707_v12 }
 0x6d3   : > { %v7650_v7 = vadd.f32 %v10034_v21, %v9395_v28  ;;  %v9397_v32 = vadd.f32 %v9334_v18, %v14379_v10  ;;  %v7552_v9 = vpop.f32.mrb[23].mxu1  ;;  %7740 = vst.msk [vmem:[%s10194_s16 + $0x60] sm:$0xff] (!%p8420_p8), %vm791_vm3, %v7708_v1  ;;  %7741 = vst.msk [vmem:[%s10194_s16 + $0x68] sm:$0xff] (!%p8420_p8), %vm791_vm3, %v7709_v59 }
 0x6d4   : > { %v7648_v60 = vadd.f32 %v10035_v29, %v9396_v17  ;;  %v9398_v11 = vadd.f32 %v14379_v10, %v7552_v9  ;;  %7742 = vst.msk [vmem:[%s10194_s16 + $0x70] sm:$0xff] (!%p8420_p8), %vm791_vm3, %v7710_v44  ;;  %7743 = vst.msk [vmem:[%s10194_s16 + $0x78] sm:$0xff] (!%p8420_p8), %vm791_vm3, %v7711_v40  ;;  %v7714_v36 = vld [vmem:[#allocation2 + $0x90] sm:$0xff] (!%p8420_p8) }
 0x6d5   : > { %7682 = vst.msk [vmem:[#allocation2 + $0xb0] sm:$0xff] %vm791_vm3, %v7650_v7  ;;  %v7651_v24 = vadd.f32 %v10036_v0, %v9397_v32  ;;  %v7712_v30 = vld [vmem:[#allocation2 + $0x80] sm:$0xff] (!%p8420_p8)  ;;  %7746 = vst.msk [vmem:[%s10194_s16 + $0x90] sm:$0xff] (!%p8420_p8), %vm791_vm3, %v7714_v36 }
 0x6d6   : > { %7680 = vst.msk [vmem:[#allocation2 + $0xa0] sm:$0xff] %vm791_vm3, %v7648_v60  ;;  %v7649_v33 = vadd.f32 %v10037_v50, %v9398_v11  ;;  %7744 = vst.msk [vmem:[%s10194_s16 + $0x80] sm:$0xff] (!%p8420_p8), %vm791_vm3, %v7712_v30  ;;  %v7715_v17 = vld [vmem:[#allocation2 + $0x98] sm:$0xff] (!%p8420_p8) }
 0x6d7   : > { %7683 = vst.msk [vmem:[#allocation2 + $0xb8] sm:$0xff] %vm791_vm3, %v7651_v24  ;;  %v7713_v28 = vld [vmem:[#allocation2 + $0x88] sm:$0xff] (!%p8420_p8)  ;;  %7747 = vst.msk [vmem:[%s10194_s16 + $0x98] sm:$0xff] (!%p8420_p8), %vm791_vm3, %v7715_v17 }
 0x6d8   : > { %7681 = vst.msk [vmem:[#allocation2 + $0xa8] sm:$0xff] %vm791_vm3, %v7649_v33  ;;  %v9337_v16 = vpop.f32.mrb[24].mxu1  ;;  %7745 = vst.msk [vmem:[%s10194_s16 + $0x88] sm:$0xff] (!%p8420_p8), %vm791_vm3, %v7713_v28 }
 0x6d9   : > { %v9399_v63 = vadd.f32 %v9337_v16, %v14379_v10  ;;  %v7565_v55 = vpop.f32.mrb[25].mxu1 }
 0x6da   : > { %v9400_v13 = vadd.f32 %v14379_v10, %v7565_v55  ;;  %v9338_v46 = vpop.f32.mrb[26].mxu1 }
 0x6db   : > { %v7654_v26 = vadd.f32 %v10038_v4, %v9399_v63  ;;  %v9401_v38 = vadd.f32 %v9338_v46, %v14379_v10  ;;  %v7568_v51 = vpop.f32.mrb[27].mxu1 }
 0x6dc   : > { %v7652_v47 = vadd.f32 %v10039_v15, %v9400_v13  ;;  %v9402_v34 = vadd.f32 %v14379_v10, %v7568_v51  ;;  %v7718_v7 = vld [vmem:[#allocation2 + $0xb0] sm:$0xff] (!%p8420_p8) }
 0x6dd   : > { %7686 = vst.msk [vmem:[#allocation2 + $0xd0] sm:$0xff] %vm791_vm3, %v7654_v26  ;;  %v7655_v20 = vadd.f32 %v10040_v57, %v9401_v38  ;;  %v7716_v18 = vld [vmem:[#allocation2 + $0xa0] sm:$0xff] (!%p8420_p8)  ;;  %7750 = vst.msk [vmem:[%s10194_s16 + $0xb0] sm:$0xff] (!%p8420_p8), %vm791_vm3, %v7718_v7 }
 0x6de   : > { %7684 = vst.msk [vmem:[#allocation2 + $0xc0] sm:$0xff] %vm791_vm3, %v7652_v47  ;;  %v7653_v53 = vadd.f32 %v10041_v37, %v9402_v34  ;;  %7748 = vst.msk [vmem:[%s10194_s16 + $0xa0] sm:$0xff] (!%p8420_p8), %vm791_vm3, %v7716_v18  ;;  %v7719_v32 = vld [vmem:[#allocation2 + $0xb8] sm:$0xff] (!%p8420_p8) }
 0x6df   : > { %7687 = vst.msk [vmem:[#allocation2 + $0xd8] sm:$0xff] %vm791_vm3, %v7655_v20  ;;  %v7717_v21 = vld [vmem:[#allocation2 + $0xa8] sm:$0xff] (!%p8420_p8)  ;;  %7751 = vst.msk [vmem:[%s10194_s16 + $0xb8] sm:$0xff] (!%p8420_p8), %vm791_vm3, %v7719_v32 }
 0x6e0   : > { %7685 = vst.msk [vmem:[#allocation2 + $0xc8] sm:$0xff] %vm791_vm3, %v7653_v53  ;;  %v9341_v41 = vpop.f32.mrb[28].mxu1  ;;  %7749 = vst.msk [vmem:[%s10194_s16 + $0xa8] sm:$0xff] (!%p8420_p8), %vm791_vm3, %v7717_v21 }
 0x6e1   : > { %v9403_v42 = vadd.f32 %v9341_v41, %v14379_v10  ;;  %v7581_v49 = vpop.f32.mrb[29].mxu1 }
 0x6e2   : > { %v9404_v48 = vadd.f32 %v14379_v10, %v7581_v49  ;;  %v9342_v31 = vpop.f32.mrb[30].mxu1  ;;  %7695 = sbr.rel (%p8420_p8) target bundleno = 1777 (0x6f1), region = 56 }
 0x6e3   : > { %v7658_v54 = vadd.f32 %v10042_v58, %v9403_v42  ;;  %v9405_v6 = vadd.f32 %v9342_v31, %v14379_v10  ;;  %v7584_v56 = vpop.f32.mrb[31].mxu1 }
 0x6e4   : > { %v7656_v25 = vadd.f32 %v10043_v22, %v9404_v48  ;;  %v9406_v2 = vadd.f32 %v14379_v10, %v7584_v56  ;;  %v7697_v10 = vld [vmem:[#allocation2 + $0x8] sm:$0xff] (!%p8420_p8)  ;;  %v7722_v60 = vld [vmem:[#allocation2 + $0xd0] sm:$0xff] (!%p8420_p8) }
 0x6e5   : > { %7690 = vst.msk [vmem:[#allocation2 + $0xf0] sm:$0xff] %vm791_vm3, %v7658_v54  ;;  %v7659_v23 = vadd.f32 %v10044_v19, %v9405_v6  ;;  %7729 = vst.msk [vmem:[%s10194_s16 + $0x8] sm:$0xff] (!%p8420_p8), %vm791_vm3, %v7697_v10  ;;  %v7720_v9 = vld [vmem:[#allocation2 + $0xc0] sm:$0xff] (!%p8420_p8) }
 0x6e6   : > { %7688 = vst.msk [vmem:[#allocation2 + $0xe0] sm:$0xff] %vm791_vm3, %v7656_v25  ;;  %v7657_v39 = vadd.f32 %v10045_v5, %v9406_v2  ;;  %7752 = vst.msk [vmem:[%s10194_s16 + $0xc0] sm:$0xff] (!%p8420_p8), %vm791_vm3, %v7720_v9  ;;  %v7723_v11 = vld [vmem:[#allocation2 + $0xd8] sm:$0xff] (!%p8420_p8) }
 0x6e7   : > { %7691 = vst.msk [vmem:[#allocation2 + $0xf8] sm:$0xff] %vm791_vm3, %v7659_v23  ;;  %v7721_v29 = vld [vmem:[#allocation2 + $0xc8] sm:$0xff] (!%p8420_p8)  ;;  %7754 = vst.msk [vmem:[%s10194_s16 + $0xd0] sm:$0xff] (!%p8420_p8), %vm791_vm3, %v7722_v60 }
 0x6e8   : > { %7689 = vst.msk [vmem:[#allocation2 + $0xe8] sm:$0xff] %vm791_vm3, %v7657_v39  ;;  %7753 = vst.msk [vmem:[%s10194_s16 + $0xc8] sm:$0xff] (!%p8420_p8), %vm791_vm3, %v7721_v29 }
 0x6e9   : > { %7755 = vst.msk [vmem:[%s10194_s16 + $0xd8] sm:$0xff] %vm791_vm3, %v7723_v11 }
 0x6ec   : > { %v7726_v50 = vld [vmem:[#allocation2 + $0xf0] sm:$0xff] }
 0x6ed   : > { %v7724_v0 = vld [vmem:[#allocation2 + $0xe0] sm:$0xff]  ;;  %7758 = vst.msk [vmem:[%s10194_s16 + $0xf0] sm:$0xff] %vm791_vm3, %v7726_v50 }
 0x6ee   : > { %7756 = vst.msk [vmem:[%s10194_s16 + $0xe0] sm:$0xff] %vm791_vm3, %v7724_v0  ;;  %v7727_v33 = vld [vmem:[#allocation2 + $0xf8] sm:$0xff] }
 0x6ef   : > { %v7725_v24 = vld [vmem:[#allocation2 + $0xe8] sm:$0xff]  ;;  %7759 = vst.msk [vmem:[%s10194_s16 + $0xf8] sm:$0xff] %vm791_vm3, %v7727_v33 }
 0x6f0   : > { %7757 = vst.msk [vmem:[%s10194_s16 + $0xe8] sm:$0xff] %vm791_vm3, %v7725_v24 }
 0x6f1 PF: > { %s17_s28 = sadd.s32 1, %s10084_s28   ;;  %s16071_s30 = sld [smem:[#allocation3_spill]] }
 0x6f2   : > { %p14_p9 = scmp.ge.s32.totalorder %s17_s28, 8   ;;  %s16072_s24 = smov %s10076_s26 }
 0x6f3   : > { %s16073_s25 = smov %s10080_s27  ;;  %s16074_s26 = smov %s16077_s29 }
 0x6f4   :  { %16 = sbr.rel (!%p14_p9) target bundleno = 3 (0x3), region = 124 }
 0x6f7   : > { %s16075_s27 = smov %s16071_s30 }

</bundles_post_ra>
